<compile_context>
chip_gen: v5e
topology: v5e:2x2
jax: 0.10.0
libtpu: 0.0.40
codegen_flags: <defaults>
</compile_context>

<pallas_src>
import math
import numpy as np

import jax
import jax.numpy as jnp
from jax.experimental import pallas as pl
from jax.experimental.pallas import tpu as pltpu

EPS = 1e-5  # nn.InstanceNorm2d default eps


# ----------------------------------------------------------------------------
# Static selection tables: S_all[p, t*tap_pad + o] = 1 iff output pixel o reads
# input pixel p through tap t (zero padding + stride handled here).
# ----------------------------------------------------------------------------
def _make_selection_T(h, w, k, stride, pad):
    ho = (h + 2 * pad - k) // stride + 1
    wo = (w + 2 * pad - k) // stride + 1
    tap_pad = max(128, ((ho * wo + 127) // 128) * 128)   # lane-aligned tap blocks
    s = np.zeros((h * w, k * k * tap_pad), np.float32)
    for di in range(k):
        for dj in range(k):
            t = di * k + dj
            for oi in range(ho):
                ii = oi * stride + di - pad
                if ii < 0 or ii >= h:
                    continue
                for oj in range(wo):
                    jj = oj * stride + dj - pad
                    if 0 <= jj < w:
                        s[ii * w + jj, t * tap_pad + oi * wo + oj] = 1.0
    return s, ho, wo, tap_pad


# ----------------------------------------------------------------------------
# Kernel body
# ----------------------------------------------------------------------------
def _sigmoid(x):
    # Single EUP op instead of exp + reciprocal.
    return 0.5 * (1.0 + jnp.tanh(0.5 * x))


def _instance_norm_silu(y):
    # y: (cout, hw) f32.  InstanceNorm2d (affine=False, biased var) over the
    # spatial (lane) axis, then SiLU.  Stats stay in f32.
    mean = jnp.mean(y, axis=1, keepdims=True)
    c = y - mean
    var = jnp.mean(c * c, axis=1, keepdims=True)
    yn = c * jax.lax.rsqrt(var + EPS)
    return yn * _sigmoid(yn)


def _conv_block(aT, s_ref, w_ref, cin, cout, hw_out, tap_pad):
    """One ConvBlock (3x3 conv -> InstanceNorm -> SiLU), channels-first layout.

    aT : (cin, hw_in) f32   ->   (cout, hw_out) f32
    """
    # Stage 1: all 9 shifted-tap gathers fused into ONE matmul.
    p_all = jnp.dot(aT.astype(jnp.bfloat16), s_ref[...],
                    preferred_element_type=jnp.float32)        # (cin, 9*tap_pad)
    y = jnp.zeros((cout, hw_out), jnp.float32)
    for t in range(9):
        # tap_pad is a multiple of 128 -> lane-aligned slice (free sub-reg pick)
        p_t = p_all[:, t * tap_pad:t * tap_pad + hw_out]       # (cin, hw_out) f32
        if cin == 1:
            # K=1 taps: f32 VPU outer-product MAC (no bf16 elementwise, no K=1 dots)
            y = y + w_ref[t] * p_t                             # (cout,1)*(1,hw_out)
        else:
            y = y + jnp.dot(w_ref[t], p_t.astype(jnp.bfloat16),
                            preferred_element_type=jnp.float32)  # (cout,cin)@(cin,hw_out)
    return _instance_norm_silu(y)


def _make_kernel(layer_dims):
    # layer_dims: tuple of (cin, cout, hw_out, tap_pad) for the four ConvBlocks.
    def kernel(x_ref, s1, w1, s2, w2, s3, w3, s4, w4, wl_ref, bl_ref, o_ref):
        s_refs = (s1, s2, s3, s4)
        w_refs = (w1, w2, w3, w4)
        a = x_ref[0]                                           # (Cin, H*W) f32
        for (cin, cout, hw_out, tap_pad), s_r, w_r in zip(layer_dims, s_refs, w_refs):
            a = _conv_block(a, s_r, w_r, cin, cout, hw_out, tap_pad)
        # Final 1x1 conv (channel reduction) + bias + sigmoid, lane-dense row out.
        z = jnp.dot(wl_ref[...], a, preferred_element_type=jnp.float32) + bl_ref[...]
        o_ref[0] = _sigmoid(z)                                 # (1, hw_last)
    return kernel


def _const_spec(arr):
    nd = arr.ndim
    return pl.BlockSpec(arr.shape, lambda n, _nd=nd: (0,) * _nd)


# ----------------------------------------------------------------------------
# Parameters & forward
# ----------------------------------------------------------------------------
def init_discriminator_params(key, in_channels=1, features=32):
    ks = jax.random.split(key, 6)

    def conv_w(k, cin, cout):
        fan_in = 9 * cin
        # (kh*kw, cout, cin), tap index t = kh*3 + kw.
        return jax.random.normal(k, (9, cout, cin), jnp.float32) / math.sqrt(fan_in)

    F = features
    return {
        # Conv biases omitted: exactly cancelled by InstanceNorm mean subtraction.
        "l1": conv_w(ks[0], in_channels, F),
        "l2": conv_w(ks[1], F, 2 * F),
        "l3": conv_w(ks[2], 2 * F, 4 * F),
        "l4": conv_w(ks[3], 4 * F, 4 * F),
        "last_w": jax.random.normal(ks[4], (1, 4 * F), jnp.float32) / math.sqrt(4 * F),
        "last_b": jax.random.normal(ks[5], (1, 1), jnp.float32) * 0.1,
    }


def discriminator_forward(x_nchw, params):
    """Matches Discriminator.forward.  Input/output NCHW (PyTorch convention)."""
    N, Cin, H, W = x_nchw.shape
    F = params["l1"].shape[1]

    # NCHW -> (N, Cin, H*W): pure reshape (channels-first kernel layout).
    x = x_nchw.astype(jnp.float32).reshape(N, Cin, H * W)

    layer_cfg = [
        ("l1", Cin,   F,     2),
        ("l2", F,     2 * F, 2),
        ("l3", 2 * F, 4 * F, 2),
        ("l4", 4 * F, 4 * F, 1),
    ]
    sel_tables, weights, layer_dims = [], [], []
    h, w = H, W
    for name, cin, cout, stride in layer_cfg:
        s_np, h, w, tap_pad = _make_selection_T(h, w, 3, stride, 1)
        sel_tables.append(jnp.asarray(s_np, jnp.bfloat16))      # 0/1, exact in bf16
        wdt = jnp.float32 if cin == 1 else jnp.bfloat16         # f32 for the VPU MAC path
        weights.append(params[name].astype(wdt))
        layer_dims.append((cin, cout, h * w, tap_pad))
    hw_last = h * w

    wl = params["last_w"].astype(jnp.float32)                   # (1, 4F)
    bl = params["last_b"].astype(jnp.float32)                   # (1, 1)

    inputs = [x]
    in_specs = [pl.BlockSpec((1, Cin, H * W), lambda n: (n, 0, 0))]
    for s_t, w_t in zip(sel_tables, weights):
        inputs += [s_t, w_t]
        in_specs += [_const_spec(s_t), _const_spec(w_t)]
    inputs += [wl, bl]
    in_specs += [_const_spec(wl), _const_spec(bl)]

    out = pl.pallas_call(
        _make_kernel(tuple(layer_dims)),
        out_shape=jax.ShapeDtypeStruct((N, 1, hw_last), jnp.float32),
        grid=(N,),
        in_specs=in_specs,
        out_specs=pl.BlockSpec((1, 1, hw_last), lambda n: (n, 0, 0)),
        compiler_params=pltpu.CompilerParams(
            dimension_semantics=("parallel",),
            vmem_limit_bytes=32 * 1024 * 1024),
    )(*inputs)

    # (N, 1, hw_last) -> (N, 1, h, w): pure reshape, already NCHW.
    return out.reshape(N, 1, h, w)


# ----------------------------------------------------------------------------
# Pure-JAX reference (same semantics as the PyTorch module) for validation.
# ----------------------------------------------------------------------------
def _reference_forward(x_nchw, params):
    hi = jax.lax.Precision.HIGHEST

    def conv(a, w9, stride):
        cout, cin = w9.shape[1], w9.shape[2]
        k = w9.reshape(3, 3, cout, cin).transpose(2, 3, 0, 1)    # (cout, cin, 3, 3)
        return jax.lax.conv_general_dilated(
            a, k, (stride, stride), ((1, 1), (1, 1)),
            dimension_numbers=("NCHW", "OIHW", "NCHW"), precision=hi)

    def in_silu(y):
        m = y.mean(axis=(2, 3), keepdims=True)
        v = jnp.mean((y - m) ** 2, axis=(2, 3), keepdims=True)
        yn = (y - m) * jax.lax.rsqrt(v + EPS)
        return yn * jax.nn.sigmoid(yn)

    a = x_nchw.astype(jnp.float32)
    for name, stride in (("l1", 2), ("l2", 2), ("l3", 2), ("l4", 1)):
        a = in_silu(conv(a, params[name], stride))
    z = jnp.einsum("nchw,c->nhw", a, params["last_w"][0], precision=hi)[:, None]
    return jax.nn.sigmoid(z + params["last_b"][0, 0])


# ----------------------------------------------------------------------------
if __name__ == "__main__":
    key = jax.random.PRNGKey(0)
    k_in, k_par = jax.random.split(key)

    N, C_in, H, W = 2, 1, 16, 16
    x = jax.random.normal(k_in, (N, C_in, H, W), jnp.float32)

    params = init_discriminator_params(k_par, in_channels=C_in, features=32)

    out = jax.jit(discriminator_forward)(x, params)
    out = jax.block_until_ready(out)

    # 16 -> 8 -> 4 -> 2 -> 2 (stride-1) -> 2 ; channels end at 1
    assert out.shape == (N, 1, 2, 2), out.shape
    assert bool(jnp.all(jnp.isfinite(out)))
    assert bool(jnp.all((out >= 0.0) & (out <= 1.0)))   # sigmoid output range

    # Numerical check vs. an f32 reference; bf16 matmul operands in the kernel
    # bound the expected error well below this tolerance.
    ref = jax.block_until_ready(jax.jit(_reference_forward)(x, params))
    err = float(jnp.max(jnp.abs(out - ref)))
    assert err < 5e-2, f"max |pallas - reference| = {err}"

    print("KERNEL_OK")
</pallas_src>

<mosaic_0001>
module attributes {stable_mosaic.version = 11 : i64} {
  func.func @kernel(%arg0: i32, %arg1: memref<1x1x256xf32, #tpu.memory_space<vmem>>, %arg2: memref<256x1152xbf16, #tpu.memory_space<vmem>>, %arg3: memref<9x32x1xf32, #tpu.memory_space<vmem>>, %arg4: memref<64x1152xbf16, #tpu.memory_space<vmem>>, %arg5: memref<9x64x32xbf16, #tpu.memory_space<vmem>>, %arg6: memref<16x1152xbf16, #tpu.memory_space<vmem>>, %arg7: memref<9x128x64xbf16, #tpu.memory_space<vmem>>, %arg8: memref<4x1152xbf16, #tpu.memory_space<vmem>>, %arg9: memref<9x128x128xbf16, #tpu.memory_space<vmem>>, %arg10: memref<1x128xf32, #tpu.memory_space<vmem>>, %arg11: memref<1x1xf32, #tpu.memory_space<vmem>>, %arg12: memref<1x1x4xf32, #tpu.memory_space<vmem>>) attributes {dimension_semantics = [#tpu.dimension_semantics<parallel>], iteration_bounds = array<i64: 2>, scalar_prefetch = 0 : i64, scratch_operands = 0 : i64, tpu.core_type = #tpu.core_type<tc>, window_params = [{transform_indices = @transform_0, window_bounds = array<i64: 1, 1, 256>}, {pipeline_mode = #tpu.pipeline_mode<synchronous>, transform_indices = @transform_1, window_bounds = array<i64: 256, 1152>}, {pipeline_mode = #tpu.pipeline_mode<synchronous>, transform_indices = @transform_2, window_bounds = array<i64: 9, 32, 1>}, {pipeline_mode = #tpu.pipeline_mode<synchronous>, transform_indices = @transform_3, window_bounds = array<i64: 64, 1152>}, {pipeline_mode = #tpu.pipeline_mode<synchronous>, transform_indices = @transform_4, window_bounds = array<i64: 9, 64, 32>}, {pipeline_mode = #tpu.pipeline_mode<synchronous>, transform_indices = @transform_5, window_bounds = array<i64: 16, 1152>}, {pipeline_mode = #tpu.pipeline_mode<synchronous>, transform_indices = @transform_6, window_bounds = array<i64: 9, 128, 64>}, {pipeline_mode = #tpu.pipeline_mode<synchronous>, transform_indices = @transform_7, window_bounds = array<i64: 4, 1152>}, {pipeline_mode = #tpu.pipeline_mode<synchronous>, transform_indices = @transform_8, window_bounds = array<i64: 9, 128, 128>}, {pipeline_mode = #tpu.pipeline_mode<synchronous>, transform_indices = @transform_9, window_bounds = array<i64: 1, 128>}, {pipeline_mode = #tpu.pipeline_mode<synchronous>, transform_indices = @transform_10, window_bounds = array<i64: 1, 1>}, {transform_indices = @transform_11, window_bounds = array<i64: 1, 1, 4>}]} {
    %c0 = arith.constant 0 : index
    %c0_0 = arith.constant 0 : index
    %c0_1 = arith.constant 0 : index
    %0 = vector.load %arg1[%c0, %c0_0, %c0_1] : memref<1x1x256xf32, #tpu.memory_space<vmem>>, vector<1x1x256xf32>
    %1 = vector.shape_cast %0 : vector<1x1x256xf32> to vector<1x256xf32>
    %2 = arith.truncf %1 : vector<1x256xf32> to vector<1x256xbf16>
    %c0_2 = arith.constant 0 : index
    %c0_3 = arith.constant 0 : index
    %3 = vector.load %arg2[%c0_2, %c0_3] : memref<256x1152xbf16, #tpu.memory_space<vmem>>, vector<256x1152xbf16>
    %cst = arith.constant dense<0.000000e+00> : vector<1x1152xf32>
    %4 = tpu.matmul %2, %3, %cst {dimension_numbers = #tpu.dot_dimension_numbers<[1], [0], [0], [1], [0, 0, 1, 1], [], []>} : vector<1x256xbf16>, vector<256x1152xbf16>, vector<1x1152xf32> -> vector<1x1152xf32>
    %cst_4 = arith.constant 0.000000e+00 : f32
    %5 = vector.broadcast %cst_4 : f32 to vector<32x64xf32>
    %6 = vector.extract_strided_slice %4 {offsets = [0, 0], sizes = [1, 64], strides = [1, 1]} : vector<1x1152xf32> to vector<1x64xf32>
    %c0_5 = arith.constant 0 : index
    %c0_6 = arith.constant 0 : index
    %c0_7 = arith.constant 0 : index
    %7 = vector.load %arg3[%c0_5, %c0_6, %c0_7] : memref<9x32x1xf32, #tpu.memory_space<vmem>>, vector<1x32x1xf32>
    %8 = vector.shape_cast %7 : vector<1x32x1xf32> to vector<32x1xf32>
    %9 = vector.broadcast %8 : vector<32x1xf32> to vector<32x64xf32>
    %10 = vector.broadcast %6 : vector<1x64xf32> to vector<32x64xf32>
    %11 = arith.mulf %9, %10 : vector<32x64xf32>
    %12 = arith.addf %5, %11 : vector<32x64xf32>
    %13 = vector.extract_strided_slice %4 {offsets = [0, 128], sizes = [1, 64], strides = [1, 1]} : vector<1x1152xf32> to vector<1x64xf32>
    %c1 = arith.constant 1 : index
    %c0_8 = arith.constant 0 : index
    %c0_9 = arith.constant 0 : index
    %14 = vector.load %arg3[%c1, %c0_8, %c0_9] : memref<9x32x1xf32, #tpu.memory_space<vmem>>, vector<1x32x1xf32>
    %15 = vector.shape_cast %14 : vector<1x32x1xf32> to vector<32x1xf32>
    %16 = vector.broadcast %15 : vector<32x1xf32> to vector<32x64xf32>
    %17 = vector.broadcast %13 : vector<1x64xf32> to vector<32x64xf32>
    %18 = arith.mulf %16, %17 : vector<32x64xf32>
    %19 = arith.addf %12, %18 : vector<32x64xf32>
    %20 = vector.extract_strided_slice %4 {offsets = [0, 256], sizes = [1, 64], strides = [1, 1]} : vector<1x1152xf32> to vector<1x64xf32>
    %c2 = arith.constant 2 : index
    %c0_10 = arith.constant 0 : index
    %c0_11 = arith.constant 0 : index
    %21 = vector.load %arg3[%c2, %c0_10, %c0_11] : memref<9x32x1xf32, #tpu.memory_space<vmem>>, vector<1x32x1xf32>
    %22 = vector.shape_cast %21 : vector<1x32x1xf32> to vector<32x1xf32>
    %23 = vector.broadcast %22 : vector<32x1xf32> to vector<32x64xf32>
    %24 = vector.broadcast %20 : vector<1x64xf32> to vector<32x64xf32>
    %25 = arith.mulf %23, %24 : vector<32x64xf32>
    %26 = arith.addf %19, %25 : vector<32x64xf32>
    %27 = vector.extract_strided_slice %4 {offsets = [0, 384], sizes = [1, 64], strides = [1, 1]} : vector<1x1152xf32> to vector<1x64xf32>
    %c3 = arith.constant 3 : index
    %c0_12 = arith.constant 0 : index
    %c0_13 = arith.constant 0 : index
    %28 = vector.load %arg3[%c3, %c0_12, %c0_13] : memref<9x32x1xf32, #tpu.memory_space<vmem>>, vector<1x32x1xf32>
    %29 = vector.shape_cast %28 : vector<1x32x1xf32> to vector<32x1xf32>
    %30 = vector.broadcast %29 : vector<32x1xf32> to vector<32x64xf32>
    %31 = vector.broadcast %27 : vector<1x64xf32> to vector<32x64xf32>
    %32 = arith.mulf %30, %31 : vector<32x64xf32>
    %33 = arith.addf %26, %32 : vector<32x64xf32>
    %34 = vector.extract_strided_slice %4 {offsets = [0, 512], sizes = [1, 64], strides = [1, 1]} : vector<1x1152xf32> to vector<1x64xf32>
    %c4 = arith.constant 4 : index
    %c0_14 = arith.constant 0 : index
    %c0_15 = arith.constant 0 : index
    %35 = vector.load %arg3[%c4, %c0_14, %c0_15] : memref<9x32x1xf32, #tpu.memory_space<vmem>>, vector<1x32x1xf32>
    %36 = vector.shape_cast %35 : vector<1x32x1xf32> to vector<32x1xf32>
    %37 = vector.broadcast %36 : vector<32x1xf32> to vector<32x64xf32>
    %38 = vector.broadcast %34 : vector<1x64xf32> to vector<32x64xf32>
    %39 = arith.mulf %37, %38 : vector<32x64xf32>
    %40 = arith.addf %33, %39 : vector<32x64xf32>
    %41 = vector.extract_strided_slice %4 {offsets = [0, 640], sizes = [1, 64], strides = [1, 1]} : vector<1x1152xf32> to vector<1x64xf32>
    %c5 = arith.constant 5 : index
    %c0_16 = arith.constant 0 : index
    %c0_17 = arith.constant 0 : index
    %42 = vector.load %arg3[%c5, %c0_16, %c0_17] : memref<9x32x1xf32, #tpu.memory_space<vmem>>, vector<1x32x1xf32>
    %43 = vector.shape_cast %42 : vector<1x32x1xf32> to vector<32x1xf32>
    %44 = vector.broadcast %43 : vector<32x1xf32> to vector<32x64xf32>
    %45 = vector.broadcast %41 : vector<1x64xf32> to vector<32x64xf32>
    %46 = arith.mulf %44, %45 : vector<32x64xf32>
    %47 = arith.addf %40, %46 : vector<32x64xf32>
    %48 = vector.extract_strided_slice %4 {offsets = [0, 768], sizes = [1, 64], strides = [1, 1]} : vector<1x1152xf32> to vector<1x64xf32>
    %c6 = arith.constant 6 : index
    %c0_18 = arith.constant 0 : index
    %c0_19 = arith.constant 0 : index
    %49 = vector.load %arg3[%c6, %c0_18, %c0_19] : memref<9x32x1xf32, #tpu.memory_space<vmem>>, vector<1x32x1xf32>
    %50 = vector.shape_cast %49 : vector<1x32x1xf32> to vector<32x1xf32>
    %51 = vector.broadcast %50 : vector<32x1xf32> to vector<32x64xf32>
    %52 = vector.broadcast %48 : vector<1x64xf32> to vector<32x64xf32>
    %53 = arith.mulf %51, %52 : vector<32x64xf32>
    %54 = arith.addf %47, %53 : vector<32x64xf32>
    %55 = vector.extract_strided_slice %4 {offsets = [0, 896], sizes = [1, 64], strides = [1, 1]} : vector<1x1152xf32> to vector<1x64xf32>
    %c7 = arith.constant 7 : index
    %c0_20 = arith.constant 0 : index
    %c0_21 = arith.constant 0 : index
    %56 = vector.load %arg3[%c7, %c0_20, %c0_21] : memref<9x32x1xf32, #tpu.memory_space<vmem>>, vector<1x32x1xf32>
    %57 = vector.shape_cast %56 : vector<1x32x1xf32> to vector<32x1xf32>
    %58 = vector.broadcast %57 : vector<32x1xf32> to vector<32x64xf32>
    %59 = vector.broadcast %55 : vector<1x64xf32> to vector<32x64xf32>
    %60 = arith.mulf %58, %59 : vector<32x64xf32>
    %61 = arith.addf %54, %60 : vector<32x64xf32>
    %62 = vector.extract_strided_slice %4 {offsets = [0, 1024], sizes = [1, 64], strides = [1, 1]} : vector<1x1152xf32> to vector<1x64xf32>
    %c8 = arith.constant 8 : index
    %c0_22 = arith.constant 0 : index
    %c0_23 = arith.constant 0 : index
    %63 = vector.load %arg3[%c8, %c0_22, %c0_23] : memref<9x32x1xf32, #tpu.memory_space<vmem>>, vector<1x32x1xf32>
    %64 = vector.shape_cast %63 : vector<1x32x1xf32> to vector<32x1xf32>
    %65 = vector.broadcast %64 : vector<32x1xf32> to vector<32x64xf32>
    %66 = vector.broadcast %62 : vector<1x64xf32> to vector<32x64xf32>
    %67 = arith.mulf %65, %66 : vector<32x64xf32>
    %68 = arith.addf %61, %67 : vector<32x64xf32>
    %cst_24 = arith.constant dense<0.000000e+00> : vector<32xf32>
    %69 = vector.multi_reduction <add>, %68, %cst_24 [1] : vector<32x64xf32> to vector<32xf32>
    %70 = vector.shape_cast %69 : vector<32xf32> to vector<32x1xf32>
    %cst_25 = arith.constant 6.400000e+01 : f32
    %71 = vector.broadcast %cst_25 : f32 to vector<32x1xf32>
    %72 = arith.divf %70, %71 : vector<32x1xf32>
    %73 = vector.broadcast %72 : vector<32x1xf32> to vector<32x64xf32>
    %74 = arith.subf %68, %73 : vector<32x64xf32>
    %75 = arith.mulf %74, %74 : vector<32x64xf32>
    %cst_26 = arith.constant dense<0.000000e+00> : vector<32xf32>
    %76 = vector.multi_reduction <add>, %75, %cst_26 [1] : vector<32x64xf32> to vector<32xf32>
    %77 = vector.shape_cast %76 : vector<32xf32> to vector<32x1xf32>
    %cst_27 = arith.constant 6.400000e+01 : f32
    %78 = vector.broadcast %cst_27 : f32 to vector<32x1xf32>
    %79 = arith.divf %77, %78 : vector<32x1xf32>
    %cst_28 = arith.constant 9.99999974E-6 : f32
    %80 = vector.broadcast %cst_28 : f32 to vector<32x1xf32>
    %81 = arith.addf %79, %80 : vector<32x1xf32>
    %82 = math.rsqrt %81 : vector<32x1xf32>
    %83 = vector.broadcast %82 : vector<32x1xf32> to vector<32x64xf32>
    %84 = arith.mulf %74, %83 : vector<32x64xf32>
    %cst_29 = arith.constant 5.000000e-01 : f32
    %85 = vector.broadcast %cst_29 : f32 to vector<32x64xf32>
    %86 = arith.mulf %85, %84 : vector<32x64xf32>
    %87 = math.tanh %86 : vector<32x64xf32>
    %cst_30 = arith.constant 1.000000e+00 : f32
    %88 = vector.broadcast %cst_30 : f32 to vector<32x64xf32>
    %89 = arith.addf %88, %87 : vector<32x64xf32>
    %cst_31 = arith.constant 5.000000e-01 : f32
    %90 = vector.broadcast %cst_31 : f32 to vector<32x64xf32>
    %91 = arith.mulf %90, %89 : vector<32x64xf32>
    %92 = arith.mulf %84, %91 : vector<32x64xf32>
    %93 = arith.truncf %92 : vector<32x64xf32> to vector<32x64xbf16>
    %c0_32 = arith.constant 0 : index
    %c0_33 = arith.constant 0 : index
    %94 = vector.load %arg4[%c0_32, %c0_33] : memref<64x1152xbf16, #tpu.memory_space<vmem>>, vector<64x1152xbf16>
    %cst_34 = arith.constant dense<0.000000e+00> : vector<32x1152xf32>
    %95 = tpu.matmul %93, %94, %cst_34 {dimension_numbers = #tpu.dot_dimension_numbers<[1], [0], [0], [1], [0, 0, 1, 1], [], []>} : vector<32x64xbf16>, vector<64x1152xbf16>, vector<32x1152xf32> -> vector<32x1152xf32>
    %cst_35 = arith.constant 0.000000e+00 : f32
    %96 = vector.broadcast %cst_35 : f32 to vector<64x16xf32>
    %97 = vector.extract_strided_slice %95 {offsets = [0, 0], sizes = [32, 16], strides = [1, 1]} : vector<32x1152xf32> to vector<32x16xf32>
    %c0_36 = arith.constant 0 : index
    %c0_37 = arith.constant 0 : index
    %c0_38 = arith.constant 0 : index
    %98 = vector.load %arg5[%c0_36, %c0_37, %c0_38] : memref<9x64x32xbf16, #tpu.memory_space<vmem>>, vector<1x64x32xbf16>
    %99 = vector.shape_cast %98 : vector<1x64x32xbf16> to vector<64x32xbf16>
    %100 = arith.truncf %97 : vector<32x16xf32> to vector<32x16xbf16>
    %cst_39 = arith.constant dense<0.000000e+00> : vector<64x16xf32>
    %101 = tpu.matmul %99, %100, %cst_39 {dimension_numbers = #tpu.dot_dimension_numbers<[1], [0], [0], [1], [0, 0, 1, 1], [], []>} : vector<64x32xbf16>, vector<32x16xbf16>, vector<64x16xf32> -> vector<64x16xf32>
    %102 = arith.addf %96, %101 : vector<64x16xf32>
    %103 = vector.extract_strided_slice %95 {offsets = [0, 128], sizes = [32, 16], strides = [1, 1]} : vector<32x1152xf32> to vector<32x16xf32>
    %c1_40 = arith.constant 1 : index
    %c0_41 = arith.constant 0 : index
    %c0_42 = arith.constant 0 : index
    %104 = vector.load %arg5[%c1_40, %c0_41, %c0_42] : memref<9x64x32xbf16, #tpu.memory_space<vmem>>, vector<1x64x32xbf16>
    %105 = vector.shape_cast %104 : vector<1x64x32xbf16> to vector<64x32xbf16>
    %106 = arith.truncf %103 : vector<32x16xf32> to vector<32x16xbf16>
    %cst_43 = arith.constant dense<0.000000e+00> : vector<64x16xf32>
    %107 = tpu.matmul %105, %106, %cst_43 {dimension_numbers = #tpu.dot_dimension_numbers<[1], [0], [0], [1], [0, 0, 1, 1], [], []>} : vector<64x32xbf16>, vector<32x16xbf16>, vector<64x16xf32> -> vector<64x16xf32>
    %108 = arith.addf %102, %107 : vector<64x16xf32>
    %109 = vector.extract_strided_slice %95 {offsets = [0, 256], sizes = [32, 16], strides = [1, 1]} : vector<32x1152xf32> to vector<32x16xf32>
    %c2_44 = arith.constant 2 : index
    %c0_45 = arith.constant 0 : index
    %c0_46 = arith.constant 0 : index
    %110 = vector.load %arg5[%c2_44, %c0_45, %c0_46] : memref<9x64x32xbf16, #tpu.memory_space<vmem>>, vector<1x64x32xbf16>
    %111 = vector.shape_cast %110 : vector<1x64x32xbf16> to vector<64x32xbf16>
    %112 = arith.truncf %109 : vector<32x16xf32> to vector<32x16xbf16>
    %cst_47 = arith.constant dense<0.000000e+00> : vector<64x16xf32>
    %113 = tpu.matmul %111, %112, %cst_47 {dimension_numbers = #tpu.dot_dimension_numbers<[1], [0], [0], [1], [0, 0, 1, 1], [], []>} : vector<64x32xbf16>, vector<32x16xbf16>, vector<64x16xf32> -> vector<64x16xf32>
    %114 = arith.addf %108, %113 : vector<64x16xf32>
    %115 = vector.extract_strided_slice %95 {offsets = [0, 384], sizes = [32, 16], strides = [1, 1]} : vector<32x1152xf32> to vector<32x16xf32>
    %c3_48 = arith.constant 3 : index
    %c0_49 = arith.constant 0 : index
    %c0_50 = arith.constant 0 : index
    %116 = vector.load %arg5[%c3_48, %c0_49, %c0_50] : memref<9x64x32xbf16, #tpu.memory_space<vmem>>, vector<1x64x32xbf16>
    %117 = vector.shape_cast %116 : vector<1x64x32xbf16> to vector<64x32xbf16>
    %118 = arith.truncf %115 : vector<32x16xf32> to vector<32x16xbf16>
    %cst_51 = arith.constant dense<0.000000e+00> : vector<64x16xf32>
    %119 = tpu.matmul %117, %118, %cst_51 {dimension_numbers = #tpu.dot_dimension_numbers<[1], [0], [0], [1], [0, 0, 1, 1], [], []>} : vector<64x32xbf16>, vector<32x16xbf16>, vector<64x16xf32> -> vector<64x16xf32>
    %120 = arith.addf %114, %119 : vector<64x16xf32>
    %121 = vector.extract_strided_slice %95 {offsets = [0, 512], sizes = [32, 16], strides = [1, 1]} : vector<32x1152xf32> to vector<32x16xf32>
    %c4_52 = arith.constant 4 : index
    %c0_53 = arith.constant 0 : index
    %c0_54 = arith.constant 0 : index
    %122 = vector.load %arg5[%c4_52, %c0_53, %c0_54] : memref<9x64x32xbf16, #tpu.memory_space<vmem>>, vector<1x64x32xbf16>
    %123 = vector.shape_cast %122 : vector<1x64x32xbf16> to vector<64x32xbf16>
    %124 = arith.truncf %121 : vector<32x16xf32> to vector<32x16xbf16>
    %cst_55 = arith.constant dense<0.000000e+00> : vector<64x16xf32>
    %125 = tpu.matmul %123, %124, %cst_55 {dimension_numbers = #tpu.dot_dimension_numbers<[1], [0], [0], [1], [0, 0, 1, 1], [], []>} : vector<64x32xbf16>, vector<32x16xbf16>, vector<64x16xf32> -> vector<64x16xf32>
    %126 = arith.addf %120, %125 : vector<64x16xf32>
    %127 = vector.extract_strided_slice %95 {offsets = [0, 640], sizes = [32, 16], strides = [1, 1]} : vector<32x1152xf32> to vector<32x16xf32>
    %c5_56 = arith.constant 5 : index
    %c0_57 = arith.constant 0 : index
    %c0_58 = arith.constant 0 : index
    %128 = vector.load %arg5[%c5_56, %c0_57, %c0_58] : memref<9x64x32xbf16, #tpu.memory_space<vmem>>, vector<1x64x32xbf16>
    %129 = vector.shape_cast %128 : vector<1x64x32xbf16> to vector<64x32xbf16>
    %130 = arith.truncf %127 : vector<32x16xf32> to vector<32x16xbf16>
    %cst_59 = arith.constant dense<0.000000e+00> : vector<64x16xf32>
    %131 = tpu.matmul %129, %130, %cst_59 {dimension_numbers = #tpu.dot_dimension_numbers<[1], [0], [0], [1], [0, 0, 1, 1], [], []>} : vector<64x32xbf16>, vector<32x16xbf16>, vector<64x16xf32> -> vector<64x16xf32>
    %132 = arith.addf %126, %131 : vector<64x16xf32>
    %133 = vector.extract_strided_slice %95 {offsets = [0, 768], sizes = [32, 16], strides = [1, 1]} : vector<32x1152xf32> to vector<32x16xf32>
    %c6_60 = arith.constant 6 : index
    %c0_61 = arith.constant 0 : index
    %c0_62 = arith.constant 0 : index
    %134 = vector.load %arg5[%c6_60, %c0_61, %c0_62] : memref<9x64x32xbf16, #tpu.memory_space<vmem>>, vector<1x64x32xbf16>
    %135 = vector.shape_cast %134 : vector<1x64x32xbf16> to vector<64x32xbf16>
    %136 = arith.truncf %133 : vector<32x16xf32> to vector<32x16xbf16>
    %cst_63 = arith.constant dense<0.000000e+00> : vector<64x16xf32>
    %137 = tpu.matmul %135, %136, %cst_63 {dimension_numbers = #tpu.dot_dimension_numbers<[1], [0], [0], [1], [0, 0, 1, 1], [], []>} : vector<64x32xbf16>, vector<32x16xbf16>, vector<64x16xf32> -> vector<64x16xf32>
    %138 = arith.addf %132, %137 : vector<64x16xf32>
    %139 = vector.extract_strided_slice %95 {offsets = [0, 896], sizes = [32, 16], strides = [1, 1]} : vector<32x1152xf32> to vector<32x16xf32>
    %c7_64 = arith.constant 7 : index
    %c0_65 = arith.constant 0 : index
    %c0_66 = arith.constant 0 : index
    %140 = vector.load %arg5[%c7_64, %c0_65, %c0_66] : memref<9x64x32xbf16, #tpu.memory_space<vmem>>, vector<1x64x32xbf16>
    %141 = vector.shape_cast %140 : vector<1x64x32xbf16> to vector<64x32xbf16>
    %142 = arith.truncf %139 : vector<32x16xf32> to vector<32x16xbf16>
    %cst_67 = arith.constant dense<0.000000e+00> : vector<64x16xf32>
    %143 = tpu.matmul %141, %142, %cst_67 {dimension_numbers = #tpu.dot_dimension_numbers<[1], [0], [0], [1], [0, 0, 1, 1], [], []>} : vector<64x32xbf16>, vector<32x16xbf16>, vector<64x16xf32> -> vector<64x16xf32>
    %144 = arith.addf %138, %143 : vector<64x16xf32>
    %145 = vector.extract_strided_slice %95 {offsets = [0, 1024], sizes = [32, 16], strides = [1, 1]} : vector<32x1152xf32> to vector<32x16xf32>
    %c8_68 = arith.constant 8 : index
    %c0_69 = arith.constant 0 : index
    %c0_70 = arith.constant 0 : index
    %146 = vector.load %arg5[%c8_68, %c0_69, %c0_70] : memref<9x64x32xbf16, #tpu.memory_space<vmem>>, vector<1x64x32xbf16>
    %147 = vector.shape_cast %146 : vector<1x64x32xbf16> to vector<64x32xbf16>
    %148 = arith.truncf %145 : vector<32x16xf32> to vector<32x16xbf16>
    %cst_71 = arith.constant dense<0.000000e+00> : vector<64x16xf32>
    %149 = tpu.matmul %147, %148, %cst_71 {dimension_numbers = #tpu.dot_dimension_numbers<[1], [0], [0], [1], [0, 0, 1, 1], [], []>} : vector<64x32xbf16>, vector<32x16xbf16>, vector<64x16xf32> -> vector<64x16xf32>
    %150 = arith.addf %144, %149 : vector<64x16xf32>
    %cst_72 = arith.constant dense<0.000000e+00> : vector<64xf32>
    %151 = vector.multi_reduction <add>, %150, %cst_72 [1] : vector<64x16xf32> to vector<64xf32>
    %152 = vector.shape_cast %151 : vector<64xf32> to vector<64x1xf32>
    %cst_73 = arith.constant 1.600000e+01 : f32
    %153 = vector.broadcast %cst_73 : f32 to vector<64x1xf32>
    %154 = arith.divf %152, %153 : vector<64x1xf32>
    %155 = vector.broadcast %154 : vector<64x1xf32> to vector<64x16xf32>
    %156 = arith.subf %150, %155 : vector<64x16xf32>
    %157 = arith.mulf %156, %156 : vector<64x16xf32>
    %cst_74 = arith.constant dense<0.000000e+00> : vector<64xf32>
    %158 = vector.multi_reduction <add>, %157, %cst_74 [1] : vector<64x16xf32> to vector<64xf32>
    %159 = vector.shape_cast %158 : vector<64xf32> to vector<64x1xf32>
    %cst_75 = arith.constant 1.600000e+01 : f32
    %160 = vector.broadcast %cst_75 : f32 to vector<64x1xf32>
    %161 = arith.divf %159, %160 : vector<64x1xf32>
    %cst_76 = arith.constant 9.99999974E-6 : f32
    %162 = vector.broadcast %cst_76 : f32 to vector<64x1xf32>
    %163 = arith.addf %161, %162 : vector<64x1xf32>
    %164 = math.rsqrt %163 : vector<64x1xf32>
    %165 = vector.broadcast %164 : vector<64x1xf32> to vector<64x16xf32>
    %166 = arith.mulf %156, %165 : vector<64x16xf32>
    %cst_77 = arith.constant 5.000000e-01 : f32
    %167 = vector.broadcast %cst_77 : f32 to vector<64x16xf32>
    %168 = arith.mulf %167, %166 : vector<64x16xf32>
    %169 = math.tanh %168 : vector<64x16xf32>
    %cst_78 = arith.constant 1.000000e+00 : f32
    %170 = vector.broadcast %cst_78 : f32 to vector<64x16xf32>
    %171 = arith.addf %170, %169 : vector<64x16xf32>
    %cst_79 = arith.constant 5.000000e-01 : f32
    %172 = vector.broadcast %cst_79 : f32 to vector<64x16xf32>
    %173 = arith.mulf %172, %171 : vector<64x16xf32>
    %174 = arith.mulf %166, %173 : vector<64x16xf32>
    %175 = arith.truncf %174 : vector<64x16xf32> to vector<64x16xbf16>
    %c0_80 = arith.constant 0 : index
    %c0_81 = arith.constant 0 : index
    %176 = vector.load %arg6[%c0_80, %c0_81] : memref<16x1152xbf16, #tpu.memory_space<vmem>>, vector<16x1152xbf16>
    %cst_82 = arith.constant dense<0.000000e+00> : vector<64x1152xf32>
    %177 = tpu.matmul %175, %176, %cst_82 {dimension_numbers = #tpu.dot_dimension_numbers<[1], [0], [0], [1], [0, 0, 1, 1], [], []>} : vector<64x16xbf16>, vector<16x1152xbf16>, vector<64x1152xf32> -> vector<64x1152xf32>
    %cst_83 = arith.constant 0.000000e+00 : f32
    %178 = vector.broadcast %cst_83 : f32 to vector<128x4xf32>
    %179 = vector.extract_strided_slice %177 {offsets = [0, 0], sizes = [64, 4], strides = [1, 1]} : vector<64x1152xf32> to vector<64x4xf32>
    %c0_84 = arith.constant 0 : index
    %c0_85 = arith.constant 0 : index
    %c0_86 = arith.constant 0 : index
    %180 = vector.load %arg7[%c0_84, %c0_85, %c0_86] : memref<9x128x64xbf16, #tpu.memory_space<vmem>>, vector<1x128x64xbf16>
    %181 = vector.shape_cast %180 : vector<1x128x64xbf16> to vector<128x64xbf16>
    %182 = arith.truncf %179 : vector<64x4xf32> to vector<64x4xbf16>
    %cst_87 = arith.constant dense<0.000000e+00> : vector<128x4xf32>
    %183 = tpu.matmul %181, %182, %cst_87 {dimension_numbers = #tpu.dot_dimension_numbers<[1], [0], [0], [1], [0, 0, 1, 1], [], []>} : vector<128x64xbf16>, vector<64x4xbf16>, vector<128x4xf32> -> vector<128x4xf32>
    %184 = arith.addf %178, %183 : vector<128x4xf32>
    %185 = vector.extract_strided_slice %177 {offsets = [0, 128], sizes = [64, 4], strides = [1, 1]} : vector<64x1152xf32> to vector<64x4xf32>
    %c1_88 = arith.constant 1 : index
    %c0_89 = arith.constant 0 : index
    %c0_90 = arith.constant 0 : index
    %186 = vector.load %arg7[%c1_88, %c0_89, %c0_90] : memref<9x128x64xbf16, #tpu.memory_space<vmem>>, vector<1x128x64xbf16>
    %187 = vector.shape_cast %186 : vector<1x128x64xbf16> to vector<128x64xbf16>
    %188 = arith.truncf %185 : vector<64x4xf32> to vector<64x4xbf16>
    %cst_91 = arith.constant dense<0.000000e+00> : vector<128x4xf32>
    %189 = tpu.matmul %187, %188, %cst_91 {dimension_numbers = #tpu.dot_dimension_numbers<[1], [0], [0], [1], [0, 0, 1, 1], [], []>} : vector<128x64xbf16>, vector<64x4xbf16>, vector<128x4xf32> -> vector<128x4xf32>
    %190 = arith.addf %184, %189 : vector<128x4xf32>
    %191 = vector.extract_strided_slice %177 {offsets = [0, 256], sizes = [64, 4], strides = [1, 1]} : vector<64x1152xf32> to vector<64x4xf32>
    %c2_92 = arith.constant 2 : index
    %c0_93 = arith.constant 0 : index
    %c0_94 = arith.constant 0 : index
    %192 = vector.load %arg7[%c2_92, %c0_93, %c0_94] : memref<9x128x64xbf16, #tpu.memory_space<vmem>>, vector<1x128x64xbf16>
    %193 = vector.shape_cast %192 : vector<1x128x64xbf16> to vector<128x64xbf16>
    %194 = arith.truncf %191 : vector<64x4xf32> to vector<64x4xbf16>
    %cst_95 = arith.constant dense<0.000000e+00> : vector<128x4xf32>
    %195 = tpu.matmul %193, %194, %cst_95 {dimension_numbers = #tpu.dot_dimension_numbers<[1], [0], [0], [1], [0, 0, 1, 1], [], []>} : vector<128x64xbf16>, vector<64x4xbf16>, vector<128x4xf32> -> vector<128x4xf32>
    %196 = arith.addf %190, %195 : vector<128x4xf32>
    %197 = vector.extract_strided_slice %177 {offsets = [0, 384], sizes = [64, 4], strides = [1, 1]} : vector<64x1152xf32> to vector<64x4xf32>
    %c3_96 = arith.constant 3 : index
    %c0_97 = arith.constant 0 : index
    %c0_98 = arith.constant 0 : index
    %198 = vector.load %arg7[%c3_96, %c0_97, %c0_98] : memref<9x128x64xbf16, #tpu.memory_space<vmem>>, vector<1x128x64xbf16>
    %199 = vector.shape_cast %198 : vector<1x128x64xbf16> to vector<128x64xbf16>
    %200 = arith.truncf %197 : vector<64x4xf32> to vector<64x4xbf16>
    %cst_99 = arith.constant dense<0.000000e+00> : vector<128x4xf32>
    %201 = tpu.matmul %199, %200, %cst_99 {dimension_numbers = #tpu.dot_dimension_numbers<[1], [0], [0], [1], [0, 0, 1, 1], [], []>} : vector<128x64xbf16>, vector<64x4xbf16>, vector<128x4xf32> -> vector<128x4xf32>
    %202 = arith.addf %196, %201 : vector<128x4xf32>
    %203 = vector.extract_strided_slice %177 {offsets = [0, 512], sizes = [64, 4], strides = [1, 1]} : vector<64x1152xf32> to vector<64x4xf32>
    %c4_100 = arith.constant 4 : index
    %c0_101 = arith.constant 0 : index
    %c0_102 = arith.constant 0 : index
    %204 = vector.load %arg7[%c4_100, %c0_101, %c0_102] : memref<9x128x64xbf16, #tpu.memory_space<vmem>>, vector<1x128x64xbf16>
    %205 = vector.shape_cast %204 : vector<1x128x64xbf16> to vector<128x64xbf16>
    %206 = arith.truncf %203 : vector<64x4xf32> to vector<64x4xbf16>
    %cst_103 = arith.constant dense<0.000000e+00> : vector<128x4xf32>
    %207 = tpu.matmul %205, %206, %cst_103 {dimension_numbers = #tpu.dot_dimension_numbers<[1], [0], [0], [1], [0, 0, 1, 1], [], []>} : vector<128x64xbf16>, vector<64x4xbf16>, vector<128x4xf32> -> vector<128x4xf32>
    %208 = arith.addf %202, %207 : vector<128x4xf32>
    %209 = vector.extract_strided_slice %177 {offsets = [0, 640], sizes = [64, 4], strides = [1, 1]} : vector<64x1152xf32> to vector<64x4xf32>
    %c5_104 = arith.constant 5 : index
    %c0_105 = arith.constant 0 : index
    %c0_106 = arith.constant 0 : index
    %210 = vector.load %arg7[%c5_104, %c0_105, %c0_106] : memref<9x128x64xbf16, #tpu.memory_space<vmem>>, vector<1x128x64xbf16>
    %211 = vector.shape_cast %210 : vector<1x128x64xbf16> to vector<128x64xbf16>
    %212 = arith.truncf %209 : vector<64x4xf32> to vector<64x4xbf16>
    %cst_107 = arith.constant dense<0.000000e+00> : vector<128x4xf32>
    %213 = tpu.matmul %211, %212, %cst_107 {dimension_numbers = #tpu.dot_dimension_numbers<[1], [0], [0], [1], [0, 0, 1, 1], [], []>} : vector<128x64xbf16>, vector<64x4xbf16>, vector<128x4xf32> -> vector<128x4xf32>
    %214 = arith.addf %208, %213 : vector<128x4xf32>
    %215 = vector.extract_strided_slice %177 {offsets = [0, 768], sizes = [64, 4], strides = [1, 1]} : vector<64x1152xf32> to vector<64x4xf32>
    %c6_108 = arith.constant 6 : index
    %c0_109 = arith.constant 0 : index
    %c0_110 = arith.constant 0 : index
    %216 = vector.load %arg7[%c6_108, %c0_109, %c0_110] : memref<9x128x64xbf16, #tpu.memory_space<vmem>>, vector<1x128x64xbf16>
    %217 = vector.shape_cast %216 : vector<1x128x64xbf16> to vector<128x64xbf16>
    %218 = arith.truncf %215 : vector<64x4xf32> to vector<64x4xbf16>
    %cst_111 = arith.constant dense<0.000000e+00> : vector<128x4xf32>
    %219 = tpu.matmul %217, %218, %cst_111 {dimension_numbers = #tpu.dot_dimension_numbers<[1], [0], [0], [1], [0, 0, 1, 1], [], []>} : vector<128x64xbf16>, vector<64x4xbf16>, vector<128x4xf32> -> vector<128x4xf32>
    %220 = arith.addf %214, %219 : vector<128x4xf32>
    %221 = vector.extract_strided_slice %177 {offsets = [0, 896], sizes = [64, 4], strides = [1, 1]} : vector<64x1152xf32> to vector<64x4xf32>
    %c7_112 = arith.constant 7 : index
    %c0_113 = arith.constant 0 : index
    %c0_114 = arith.constant 0 : index
    %222 = vector.load %arg7[%c7_112, %c0_113, %c0_114] : memref<9x128x64xbf16, #tpu.memory_space<vmem>>, vector<1x128x64xbf16>
    %223 = vector.shape_cast %222 : vector<1x128x64xbf16> to vector<128x64xbf16>
    %224 = arith.truncf %221 : vector<64x4xf32> to vector<64x4xbf16>
    %cst_115 = arith.constant dense<0.000000e+00> : vector<128x4xf32>
    %225 = tpu.matmul %223, %224, %cst_115 {dimension_numbers = #tpu.dot_dimension_numbers<[1], [0], [0], [1], [0, 0, 1, 1], [], []>} : vector<128x64xbf16>, vector<64x4xbf16>, vector<128x4xf32> -> vector<128x4xf32>
    %226 = arith.addf %220, %225 : vector<128x4xf32>
    %227 = vector.extract_strided_slice %177 {offsets = [0, 1024], sizes = [64, 4], strides = [1, 1]} : vector<64x1152xf32> to vector<64x4xf32>
    %c8_116 = arith.constant 8 : index
    %c0_117 = arith.constant 0 : index
    %c0_118 = arith.constant 0 : index
    %228 = vector.load %arg7[%c8_116, %c0_117, %c0_118] : memref<9x128x64xbf16, #tpu.memory_space<vmem>>, vector<1x128x64xbf16>
    %229 = vector.shape_cast %228 : vector<1x128x64xbf16> to vector<128x64xbf16>
    %230 = arith.truncf %227 : vector<64x4xf32> to vector<64x4xbf16>
    %cst_119 = arith.constant dense<0.000000e+00> : vector<128x4xf32>
    %231 = tpu.matmul %229, %230, %cst_119 {dimension_numbers = #tpu.dot_dimension_numbers<[1], [0], [0], [1], [0, 0, 1, 1], [], []>} : vector<128x64xbf16>, vector<64x4xbf16>, vector<128x4xf32> -> vector<128x4xf32>
    %232 = arith.addf %226, %231 : vector<128x4xf32>
    %cst_120 = arith.constant dense<0.000000e+00> : vector<128xf32>
    %233 = vector.multi_reduction <add>, %232, %cst_120 [1] : vector<128x4xf32> to vector<128xf32>
    %234 = vector.shape_cast %233 : vector<128xf32> to vector<128x1xf32>
    %cst_121 = arith.constant 4.000000e+00 : f32
    %235 = vector.broadcast %cst_121 : f32 to vector<128x1xf32>
    %236 = arith.divf %234, %235 : vector<128x1xf32>
    %237 = vector.broadcast %236 : vector<128x1xf32> to vector<128x4xf32>
    %238 = arith.subf %232, %237 : vector<128x4xf32>
    %239 = arith.mulf %238, %238 : vector<128x4xf32>
    %cst_122 = arith.constant dense<0.000000e+00> : vector<128xf32>
    %240 = vector.multi_reduction <add>, %239, %cst_122 [1] : vector<128x4xf32> to vector<128xf32>
    %241 = vector.shape_cast %240 : vector<128xf32> to vector<128x1xf32>
    %cst_123 = arith.constant 4.000000e+00 : f32
    %242 = vector.broadcast %cst_123 : f32 to vector<128x1xf32>
    %243 = arith.divf %241, %242 : vector<128x1xf32>
    %cst_124 = arith.constant 9.99999974E-6 : f32
    %244 = vector.broadcast %cst_124 : f32 to vector<128x1xf32>
    %245 = arith.addf %243, %244 : vector<128x1xf32>
    %246 = math.rsqrt %245 : vector<128x1xf32>
    %247 = vector.broadcast %246 : vector<128x1xf32> to vector<128x4xf32>
    %248 = arith.mulf %238, %247 : vector<128x4xf32>
    %cst_125 = arith.constant 5.000000e-01 : f32
    %249 = vector.broadcast %cst_125 : f32 to vector<128x4xf32>
    %250 = arith.mulf %249, %248 : vector<128x4xf32>
    %251 = math.tanh %250 : vector<128x4xf32>
    %cst_126 = arith.constant 1.000000e+00 : f32
    %252 = vector.broadcast %cst_126 : f32 to vector<128x4xf32>
    %253 = arith.addf %252, %251 : vector<128x4xf32>
    %cst_127 = arith.constant 5.000000e-01 : f32
    %254 = vector.broadcast %cst_127 : f32 to vector<128x4xf32>
    %255 = arith.mulf %254, %253 : vector<128x4xf32>
    %256 = arith.mulf %248, %255 : vector<128x4xf32>
    %257 = arith.truncf %256 : vector<128x4xf32> to vector<128x4xbf16>
    %c0_128 = arith.constant 0 : index
    %c0_129 = arith.constant 0 : index
    %258 = vector.load %arg8[%c0_128, %c0_129] : memref<4x1152xbf16, #tpu.memory_space<vmem>>, vector<4x1152xbf16>
    %cst_130 = arith.constant dense<0.000000e+00> : vector<128x1152xf32>
    %259 = tpu.matmul %257, %258, %cst_130 {dimension_numbers = #tpu.dot_dimension_numbers<[1], [0], [0], [1], [0, 0, 1, 1], [], []>} : vector<128x4xbf16>, vector<4x1152xbf16>, vector<128x1152xf32> -> vector<128x1152xf32>
    %cst_131 = arith.constant 0.000000e+00 : f32
    %260 = vector.broadcast %cst_131 : f32 to vector<128x4xf32>
    %261 = vector.extract_strided_slice %259 {offsets = [0, 0], sizes = [128, 4], strides = [1, 1]} : vector<128x1152xf32> to vector<128x4xf32>
    %c0_132 = arith.constant 0 : index
    %c0_133 = arith.constant 0 : index
    %c0_134 = arith.constant 0 : index
    %262 = vector.load %arg9[%c0_132, %c0_133, %c0_134] : memref<9x128x128xbf16, #tpu.memory_space<vmem>>, vector<1x128x128xbf16>
    %263 = vector.shape_cast %262 : vector<1x128x128xbf16> to vector<128x128xbf16>
    %264 = arith.truncf %261 : vector<128x4xf32> to vector<128x4xbf16>
    %cst_135 = arith.constant dense<0.000000e+00> : vector<128x4xf32>
    %265 = tpu.matmul %263, %264, %cst_135 {dimension_numbers = #tpu.dot_dimension_numbers<[1], [0], [0], [1], [0, 0, 1, 1], [], []>} : vector<128x128xbf16>, vector<128x4xbf16>, vector<128x4xf32> -> vector<128x4xf32>
    %266 = arith.addf %260, %265 : vector<128x4xf32>
    %267 = vector.extract_strided_slice %259 {offsets = [0, 128], sizes = [128, 4], strides = [1, 1]} : vector<128x1152xf32> to vector<128x4xf32>
    %c1_136 = arith.constant 1 : index
    %c0_137 = arith.constant 0 : index
    %c0_138 = arith.constant 0 : index
    %268 = vector.load %arg9[%c1_136, %c0_137, %c0_138] : memref<9x128x128xbf16, #tpu.memory_space<vmem>>, vector<1x128x128xbf16>
    %269 = vector.shape_cast %268 : vector<1x128x128xbf16> to vector<128x128xbf16>
    %270 = arith.truncf %267 : vector<128x4xf32> to vector<128x4xbf16>
    %cst_139 = arith.constant dense<0.000000e+00> : vector<128x4xf32>
    %271 = tpu.matmul %269, %270, %cst_139 {dimension_numbers = #tpu.dot_dimension_numbers<[1], [0], [0], [1], [0, 0, 1, 1], [], []>} : vector<128x128xbf16>, vector<128x4xbf16>, vector<128x4xf32> -> vector<128x4xf32>
    %272 = arith.addf %266, %271 : vector<128x4xf32>
    %273 = vector.extract_strided_slice %259 {offsets = [0, 256], sizes = [128, 4], strides = [1, 1]} : vector<128x1152xf32> to vector<128x4xf32>
    %c2_140 = arith.constant 2 : index
    %c0_141 = arith.constant 0 : index
    %c0_142 = arith.constant 0 : index
    %274 = vector.load %arg9[%c2_140, %c0_141, %c0_142] : memref<9x128x128xbf16, #tpu.memory_space<vmem>>, vector<1x128x128xbf16>
    %275 = vector.shape_cast %274 : vector<1x128x128xbf16> to vector<128x128xbf16>
    %276 = arith.truncf %273 : vector<128x4xf32> to vector<128x4xbf16>
    %cst_143 = arith.constant dense<0.000000e+00> : vector<128x4xf32>
    %277 = tpu.matmul %275, %276, %cst_143 {dimension_numbers = #tpu.dot_dimension_numbers<[1], [0], [0], [1], [0, 0, 1, 1], [], []>} : vector<128x128xbf16>, vector<128x4xbf16>, vector<128x4xf32> -> vector<128x4xf32>
    %278 = arith.addf %272, %277 : vector<128x4xf32>
    %279 = vector.extract_strided_slice %259 {offsets = [0, 384], sizes = [128, 4], strides = [1, 1]} : vector<128x1152xf32> to vector<128x4xf32>
    %c3_144 = arith.constant 3 : index
    %c0_145 = arith.constant 0 : index
    %c0_146 = arith.constant 0 : index
    %280 = vector.load %arg9[%c3_144, %c0_145, %c0_146] : memref<9x128x128xbf16, #tpu.memory_space<vmem>>, vector<1x128x128xbf16>
    %281 = vector.shape_cast %280 : vector<1x128x128xbf16> to vector<128x128xbf16>
    %282 = arith.truncf %279 : vector<128x4xf32> to vector<128x4xbf16>
    %cst_147 = arith.constant dense<0.000000e+00> : vector<128x4xf32>
    %283 = tpu.matmul %281, %282, %cst_147 {dimension_numbers = #tpu.dot_dimension_numbers<[1], [0], [0], [1], [0, 0, 1, 1], [], []>} : vector<128x128xbf16>, vector<128x4xbf16>, vector<128x4xf32> -> vector<128x4xf32>
    %284 = arith.addf %278, %283 : vector<128x4xf32>
    %285 = vector.extract_strided_slice %259 {offsets = [0, 512], sizes = [128, 4], strides = [1, 1]} : vector<128x1152xf32> to vector<128x4xf32>
    %c4_148 = arith.constant 4 : index
    %c0_149 = arith.constant 0 : index
    %c0_150 = arith.constant 0 : index
    %286 = vector.load %arg9[%c4_148, %c0_149, %c0_150] : memref<9x128x128xbf16, #tpu.memory_space<vmem>>, vector<1x128x128xbf16>
    %287 = vector.shape_cast %286 : vector<1x128x128xbf16> to vector<128x128xbf16>
    %288 = arith.truncf %285 : vector<128x4xf32> to vector<128x4xbf16>
    %cst_151 = arith.constant dense<0.000000e+00> : vector<128x4xf32>
    %289 = tpu.matmul %287, %288, %cst_151 {dimension_numbers = #tpu.dot_dimension_numbers<[1], [0], [0], [1], [0, 0, 1, 1], [], []>} : vector<128x128xbf16>, vector<128x4xbf16>, vector<128x4xf32> -> vector<128x4xf32>
    %290 = arith.addf %284, %289 : vector<128x4xf32>
    %291 = vector.extract_strided_slice %259 {offsets = [0, 640], sizes = [128, 4], strides = [1, 1]} : vector<128x1152xf32> to vector<128x4xf32>
    %c5_152 = arith.constant 5 : index
    %c0_153 = arith.constant 0 : index
    %c0_154 = arith.constant 0 : index
    %292 = vector.load %arg9[%c5_152, %c0_153, %c0_154] : memref<9x128x128xbf16, #tpu.memory_space<vmem>>, vector<1x128x128xbf16>
    %293 = vector.shape_cast %292 : vector<1x128x128xbf16> to vector<128x128xbf16>
    %294 = arith.truncf %291 : vector<128x4xf32> to vector<128x4xbf16>
    %cst_155 = arith.constant dense<0.000000e+00> : vector<128x4xf32>
    %295 = tpu.matmul %293, %294, %cst_155 {dimension_numbers = #tpu.dot_dimension_numbers<[1], [0], [0], [1], [0, 0, 1, 1], [], []>} : vector<128x128xbf16>, vector<128x4xbf16>, vector<128x4xf32> -> vector<128x4xf32>
    %296 = arith.addf %290, %295 : vector<128x4xf32>
    %297 = vector.extract_strided_slice %259 {offsets = [0, 768], sizes = [128, 4], strides = [1, 1]} : vector<128x1152xf32> to vector<128x4xf32>
    %c6_156 = arith.constant 6 : index
    %c0_157 = arith.constant 0 : index
    %c0_158 = arith.constant 0 : index
    %298 = vector.load %arg9[%c6_156, %c0_157, %c0_158] : memref<9x128x128xbf16, #tpu.memory_space<vmem>>, vector<1x128x128xbf16>
    %299 = vector.shape_cast %298 : vector<1x128x128xbf16> to vector<128x128xbf16>
    %300 = arith.truncf %297 : vector<128x4xf32> to vector<128x4xbf16>
    %cst_159 = arith.constant dense<0.000000e+00> : vector<128x4xf32>
    %301 = tpu.matmul %299, %300, %cst_159 {dimension_numbers = #tpu.dot_dimension_numbers<[1], [0], [0], [1], [0, 0, 1, 1], [], []>} : vector<128x128xbf16>, vector<128x4xbf16>, vector<128x4xf32> -> vector<128x4xf32>
    %302 = arith.addf %296, %301 : vector<128x4xf32>
    %303 = vector.extract_strided_slice %259 {offsets = [0, 896], sizes = [128, 4], strides = [1, 1]} : vector<128x1152xf32> to vector<128x4xf32>
    %c7_160 = arith.constant 7 : index
    %c0_161 = arith.constant 0 : index
    %c0_162 = arith.constant 0 : index
    %304 = vector.load %arg9[%c7_160, %c0_161, %c0_162] : memref<9x128x128xbf16, #tpu.memory_space<vmem>>, vector<1x128x128xbf16>
    %305 = vector.shape_cast %304 : vector<1x128x128xbf16> to vector<128x128xbf16>
    %306 = arith.truncf %303 : vector<128x4xf32> to vector<128x4xbf16>
    %cst_163 = arith.constant dense<0.000000e+00> : vector<128x4xf32>
    %307 = tpu.matmul %305, %306, %cst_163 {dimension_numbers = #tpu.dot_dimension_numbers<[1], [0], [0], [1], [0, 0, 1, 1], [], []>} : vector<128x128xbf16>, vector<128x4xbf16>, vector<128x4xf32> -> vector<128x4xf32>
    %308 = arith.addf %302, %307 : vector<128x4xf32>
    %309 = vector.extract_strided_slice %259 {offsets = [0, 1024], sizes = [128, 4], strides = [1, 1]} : vector<128x1152xf32> to vector<128x4xf32>
    %c8_164 = arith.constant 8 : index
    %c0_165 = arith.constant 0 : index
    %c0_166 = arith.constant 0 : index
    %310 = vector.load %arg9[%c8_164, %c0_165, %c0_166] : memref<9x128x128xbf16, #tpu.memory_space<vmem>>, vector<1x128x128xbf16>
    %311 = vector.shape_cast %310 : vector<1x128x128xbf16> to vector<128x128xbf16>
    %312 = arith.truncf %309 : vector<128x4xf32> to vector<128x4xbf16>
    %cst_167 = arith.constant dense<0.000000e+00> : vector<128x4xf32>
    %313 = tpu.matmul %311, %312, %cst_167 {dimension_numbers = #tpu.dot_dimension_numbers<[1], [0], [0], [1], [0, 0, 1, 1], [], []>} : vector<128x128xbf16>, vector<128x4xbf16>, vector<128x4xf32> -> vector<128x4xf32>
    %314 = arith.addf %308, %313 : vector<128x4xf32>
    %cst_168 = arith.constant dense<0.000000e+00> : vector<128xf32>
    %315 = vector.multi_reduction <add>, %314, %cst_168 [1] : vector<128x4xf32> to vector<128xf32>
    %316 = vector.shape_cast %315 : vector<128xf32> to vector<128x1xf32>
    %cst_169 = arith.constant 4.000000e+00 : f32
    %317 = vector.broadcast %cst_169 : f32 to vector<128x1xf32>
    %318 = arith.divf %316, %317 : vector<128x1xf32>
    %319 = vector.broadcast %318 : vector<128x1xf32> to vector<128x4xf32>
    %320 = arith.subf %314, %319 : vector<128x4xf32>
    %321 = arith.mulf %320, %320 : vector<128x4xf32>
    %cst_170 = arith.constant dense<0.000000e+00> : vector<128xf32>
    %322 = vector.multi_reduction <add>, %321, %cst_170 [1] : vector<128x4xf32> to vector<128xf32>
    %323 = vector.shape_cast %322 : vector<128xf32> to vector<128x1xf32>
    %cst_171 = arith.constant 4.000000e+00 : f32
    %324 = vector.broadcast %cst_171 : f32 to vector<128x1xf32>
    %325 = arith.divf %323, %324 : vector<128x1xf32>
    %cst_172 = arith.constant 9.99999974E-6 : f32
    %326 = vector.broadcast %cst_172 : f32 to vector<128x1xf32>
    %327 = arith.addf %325, %326 : vector<128x1xf32>
    %328 = math.rsqrt %327 : vector<128x1xf32>
    %329 = vector.broadcast %328 : vector<128x1xf32> to vector<128x4xf32>
    %330 = arith.mulf %320, %329 : vector<128x4xf32>
    %cst_173 = arith.constant 5.000000e-01 : f32
    %331 = vector.broadcast %cst_173 : f32 to vector<128x4xf32>
    %332 = arith.mulf %331, %330 : vector<128x4xf32>
    %333 = math.tanh %332 : vector<128x4xf32>
    %cst_174 = arith.constant 1.000000e+00 : f32
    %334 = vector.broadcast %cst_174 : f32 to vector<128x4xf32>
    %335 = arith.addf %334, %333 : vector<128x4xf32>
    %cst_175 = arith.constant 5.000000e-01 : f32
    %336 = vector.broadcast %cst_175 : f32 to vector<128x4xf32>
    %337 = arith.mulf %336, %335 : vector<128x4xf32>
    %338 = arith.mulf %330, %337 : vector<128x4xf32>
    %c0_176 = arith.constant 0 : index
    %c0_177 = arith.constant 0 : index
    %339 = vector.load %arg10[%c0_176, %c0_177] : memref<1x128xf32, #tpu.memory_space<vmem>>, vector<1x128xf32>
    %cst_178 = arith.constant dense<0.000000e+00> : vector<1x4xf32>
    %340 = tpu.matmul %339, %338, %cst_178 {dimension_numbers = #tpu.dot_dimension_numbers<[1], [0], [0], [1], [0, 0, 1, 1], [], []>} : vector<1x128xf32>, vector<128x4xf32>, vector<1x4xf32> -> vector<1x4xf32>
    %c0_179 = arith.constant 0 : index
    %c0_180 = arith.constant 0 : index
    %341 = vector.load %arg11[%c0_179, %c0_180] : memref<1x1xf32, #tpu.memory_space<vmem>>, vector<1x1xf32>
    %342 = vector.broadcast %341 : vector<1x1xf32> to vector<1x4xf32>
    %343 = arith.addf %340, %342 : vector<1x4xf32>
    %cst_181 = arith.constant 5.000000e-01 : f32
    %344 = vector.broadcast %cst_181 : f32 to vector<1x4xf32>
    %345 = arith.mulf %344, %343 : vector<1x4xf32>
    %346 = math.tanh %345 : vector<1x4xf32>
    %cst_182 = arith.constant 1.000000e+00 : f32
    %347 = vector.broadcast %cst_182 : f32 to vector<1x4xf32>
    %348 = arith.addf %347, %346 : vector<1x4xf32>
    %cst_183 = arith.constant 5.000000e-01 : f32
    %349 = vector.broadcast %cst_183 : f32 to vector<1x4xf32>
    %350 = arith.mulf %349, %348 : vector<1x4xf32>
    %c0_184 = arith.constant 0 : index
    %c0_185 = arith.constant 0 : index
    %c0_186 = arith.constant 0 : index
    %351 = vector.load %arg12[%c0_184, %c0_185, %c0_186] : memref<1x1x4xf32, #tpu.memory_space<vmem>>, vector<1x1x4xf32>
    %352 = vector.shape_cast %351 : vector<1x1x4xf32> to vector<1x4xf32>
    %353 = vector.shape_cast %350 : vector<1x4xf32> to vector<1x1x4xf32>
    tpu.vector_store %arg12[%c0_184, %c0_185, %c0_186], %353 {strides = array<i32>} : memref<1x1x4xf32, #tpu.memory_space<vmem>>, vector<1x1x4xf32>,
    return
  }
  func.func @transform_0(%arg0: i32) -> (i32, i32, i32) {
    %c0_i32 = arith.constant 0 : i32
    %c0_i32_0 = arith.constant 0 : i32
    %c0_i32_1 = arith.constant 0 : i32
    return %arg0, %c0_i32, %c0_i32_0 : i32, i32, i32
  }
  func.func @transform_1(%arg0: i32) -> (i32, i32) {
    %c0_i32 = arith.constant 0 : i32
    %c0_i32_0 = arith.constant 0 : i32
    %c0_i32_1 = arith.constant 0 : i32
    return %c0_i32, %c0_i32_0 : i32, i32
  }
  func.func @transform_2(%arg0: i32) -> (i32, i32, i32) {
    %c0_i32 = arith.constant 0 : i32
    %c0_i32_0 = arith.constant 0 : i32
    %c0_i32_1 = arith.constant 0 : i32
    %c0_i32_2 = arith.constant 0 : i32
    return %c0_i32, %c0_i32_0, %c0_i32_1 : i32, i32, i32
  }
  func.func @transform_3(%arg0: i32) -> (i32, i32) {
    %c0_i32 = arith.constant 0 : i32
    %c0_i32_0 = arith.constant 0 : i32
    %c0_i32_1 = arith.constant 0 : i32
    return %c0_i32, %c0_i32_0 : i32, i32
  }
  func.func @transform_4(%arg0: i32) -> (i32, i32, i32) {
    %c0_i32 = arith.constant 0 : i32
    %c0_i32_0 = arith.constant 0 : i32
    %c0_i32_1 = arith.constant 0 : i32
    %c0_i32_2 = arith.constant 0 : i32
    return %c0_i32, %c0_i32_0, %c0_i32_1 : i32, i32, i32
  }
  func.func @transform_5(%arg0: i32) -> (i32, i32) {
    %c0_i32 = arith.constant 0 : i32
    %c0_i32_0 = arith.constant 0 : i32
    %c0_i32_1 = arith.constant 0 : i32
    return %c0_i32, %c0_i32_0 : i32, i32
  }
  func.func @transform_6(%arg0: i32) -> (i32, i32, i32) {
    %c0_i32 = arith.constant 0 : i32
    %c0_i32_0 = arith.constant 0 : i32
    %c0_i32_1 = arith.constant 0 : i32
    %c0_i32_2 = arith.constant 0 : i32
    return %c0_i32, %c0_i32_0, %c0_i32_1 : i32, i32, i32
  }
  func.func @transform_7(%arg0: i32) -> (i32, i32) {
    %c0_i32 = arith.constant 0 : i32
    %c0_i32_0 = arith.constant 0 : i32
    %c0_i32_1 = arith.constant 0 : i32
    return %c0_i32, %c0_i32_0 : i32, i32
  }
  func.func @transform_8(%arg0: i32) -> (i32, i32, i32) {
    %c0_i32 = arith.constant 0 : i32
    %c0_i32_0 = arith.constant 0 : i32
    %c0_i32_1 = arith.constant 0 : i32
    %c0_i32_2 = arith.constant 0 : i32
    return %c0_i32, %c0_i32_0, %c0_i32_1 : i32, i32, i32
  }
  func.func @transform_9(%arg0: i32) -> (i32, i32) {
    %c0_i32 = arith.constant 0 : i32
    %c0_i32_0 = arith.constant 0 : i32
    %c0_i32_1 = arith.constant 0 : i32
    return %c0_i32, %c0_i32_0 : i32, i32
  }
  func.func @transform_10(%arg0: i32) -> (i32, i32) {
    %c0_i32 = arith.constant 0 : i32
    %c0_i32_0 = arith.constant 0 : i32
    %c0_i32_1 = arith.constant 0 : i32
    return %c0_i32, %c0_i32_0 : i32, i32
  }
  func.func @transform_11(%arg0: i32) -> (i32, i32, i32) {
    %c0_i32 = arith.constant 0 : i32
    %c0_i32_0 = arith.constant 0 : i32
    %c0_i32_1 = arith.constant 0 : i32
    return %arg0, %c0_i32, %c0_i32_0 : i32, i32, i32
  }
}

</mosaic_0001>

<bundles_post_ra>
// kernel: discriminator_forward.1
= control target key start
LH: loop header
LB: loop body
LE: loop exit
PB: predicated region body
PF: predicated region fallthrough
CT: control target
= control target key end

     0   :  { %s10311_s19 = smov 0   ;;  %s14179_s0 = inlined_call_operand.vmem [shape: f32[2,1,256], index: 0, kind: input, shape index: {}]   ;;  %s14180_s1 = inlined_call_operand.vmem [shape: bf16[256,1152], index: 1, kind: input, shape index: {}]   ;;  %s14181_s2 = inlined_call_operand.vmem [shape: f32[9,32,1], index: 2, kind: input, shape index: {}]   ;;  %s14182_s3 = inlined_call_operand.vmem [shape: bf16[64,1152], index: 3, kind: input, shape index: {}]   ;;  %s14183_s4 = inlined_call_operand.vmem [shape: bf16[9,64,32], index: 4, kind: input, shape index: {}]   ;;  %s14184_s5 = inlined_call_operand.vmem [shape: bf16[16,1152], index: 5, kind: input, shape index: {}]   ;;  %s14185_s6 = inlined_call_operand.vmem [shape: bf16[9,128,64], index: 6, kind: input, shape index: {}]   ;;  %s14186_s7 = inlined_call_operand.vmem [shape: bf16[4,1152], index: 7, kind: input, shape index: {}]   ;;  %s14187_s8 = inlined_call_operand.vmem [shape: bf16[9,128,128], index: 8, kind: input, shape index: {}]   ;;  %s14188_s9 = inlined_call_operand.vmem [shape: f32[1,128], index: 9, kind: input, shape index: {}]   ;;  %s14189_s10 = inlined_call_operand.<no memory space> [shape: f32[1,1], index: 10, kind: input, shape index: {}]   ;;  %s14190_s11 = inlined_call_operand.vmem [shape: f32[2,1,4], index: 11, kind: output, shape index: {}]  }
   0x1   :  { %v16_v0 = vstv %s14189_s10 }
   0x2   :  { %17 = vst [vmem:[#allocation2] sm:$0x1] %v16_v0 }
   0x3 LB: > { %s7596_s20 = sadd.s32 4294967295, %s10242_s19   ;;  %p7600_p0 = scmp.ge.s32.totalorder %s10242_s19, 1  ;;  %s10242_s19 = sphi %s10311_s19, %s23_s19  }
   0x4   : > { %p338_p1 = scmp.lt.s32.totalorder %s10242_s19, 3 }
   0x6   : > { %p339_p2 = pnand %p7600_p0, %p338_p1 }
   0x8   : > { %342 = sbr.rel (%p339_p2) target bundleno = 3642 (0xe3a), region = 64 }
   0xd   : > { %v8178_v1 = vld [vmem:[%s14181_s2 + $0x20] sm:$0xff]  ;;  %v7856_v3 = vld [vmem:[%s14180_s1 + $0x1f8] sm:$0xf]  ;;  %v10244_v4 = vmov 0   ;;  %v9733_v5 = vld [vmem:[%s14180_s1 + $0x218] sm:$0xf0] }
   0xe   : > { %v1521_v2 = vld [vmem:[%s14181_s2] sm:$0xff]  ;;  %10050 = vset.pattern.permute.xlu1 %v10244_v4  ;;  %10049 = vset.pattern.permute.xlu0 %v10244_v4  ;;  %v8144_v6 = vld [vmem:[%s14180_s1 + $0x438] sm:$0xf]  ;;  %v9805_v7 = vld [vmem:[%s14180_s1 + $0x458] sm:$0xf0]  ;;  %v7857_v8 = vor.u32 %v9733_v5, %v7856_v3  ;;  %p10462_p3 = scmp.lt.s32.totalorder %s7596_s20, 1 }
   0xf   : > { %1561 = vperm.xlu1 %10050, %v8178_v1   ;;  %1527 = vperm.xlu0 %10049, %v1521_v2   ;;  %v8145_v9 = vor.u32 %v9805_v7, %v8144_v6  ;;  %v9729_v10 = vld [vmem:[%s14180_s1 + $0x1fc] sm:$0xf]  ;;  %v7858_v11 = vld [vmem:[%s14180_s1 + $0x21c] sm:$0xf0]  ;;  %v7820_v15 = vld [vmem:[%s14180_s1 + $0x1b0] sm:$0xf] }
  0x10   : > { %v9801_v12 = vld [vmem:[%s14180_s1 + $0x43c] sm:$0xf]  ;;  %v7861_v13 = vor.u32 %v9729_v10, %v7858_v11  ;;  %v8146_v14 = vld [vmem:[%s14180_s1 + $0x45c] sm:$0xf0]  ;;  %v9724_v16 = vld [vmem:[%s14180_s1 + $0x1d0] sm:$0xf0]  ;;  %10051 = vset.pattern.permute.xlu2 %v10244_v4  ;;  %1287 = vmatpush.bf16.msra.mxu0 %v7857_v8 }
  0x11   : > { %1300 = vmatpush.bf16.msra.mxu1 %v8145_v9  ;;  %v8149_v17 = vor.u32 %v9801_v12, %v8146_v14  ;;  %v7821_v18 = vor.u32 %v9724_v16, %v7820_v15  ;;  %v8108_v19 = vld [vmem:[%s14180_s1 + $0x3f0] sm:$0xf]  ;;  %v9796_v20 = vld [vmem:[%s14180_s1 + $0x410] sm:$0xf0]  ;;  %v7822_v23 = vld [vmem:[%s14180_s1 + $0x1d4] sm:$0xf0] }
  0x12   : > { %v9720_v21 = vld [vmem:[%s14180_s1 + $0x1b4] sm:$0xf]  ;;  %1313 = vmatpush.bf16.msra.mxu2 %v7861_v13  ;;  %v8109_v22 = vor.u32 %v9796_v20, %v8108_v19  ;;  %v8110_v25 = vld [vmem:[%s14180_s1 + $0x414] sm:$0xf0]  ;;  %v8179_v28 = vld [vmem:[%s14181_s2 + $0x28] sm:$0xff]  ;;  %s14286_s20 = smov (!%p10462_p3, %s7596_s20), 1 }
  0x13   : > { %v9792_v24 = vld [vmem:[%s14180_s1 + $0x3f4] sm:$0xf]  ;;  %1326 = vmatpush.bf16.msra.mxu3 %v8149_v17  ;;  %v7825_v26 = vor.u32 %v9720_v21, %v7822_v23  ;;  %v1522_v29 = vld [vmem:[%s14181_s2 + $0x8] sm:$0xff]  ;;  %v7786_v37 = vld [vmem:[%s14180_s1 + $0x18c] sm:$0xf0]  ;;  %s7601_s28 = sshll.u32 %s14286_s20, 1 }
  0x14   : > { %v8113_v27 = vor.u32 %v9792_v24, %v8110_v25  ;;  %v7784_v30 = vld [vmem:[%s14180_s1 + $0x168] sm:$0xf]  ;;  %v9715_v31 = vld [vmem:[%s14180_s1 + $0x188] sm:$0xf0]  ;;  %1288 = vmatpush.bf16.msra.mxu0 %v7821_v18  ;;  %v8074_v40 = vld [vmem:[%s14180_s1 + $0x3cc] sm:$0xf0]  ;;  %s378_s16 = scalar_lea.vmem %s14179_s0, %s7601_s28 }
  0x15   : > { %v8072_v32 = vld [vmem:[%s14180_s1 + $0x3a8] sm:$0xf]  ;;  %v9787_v33 = vld [vmem:[%s14180_s1 + $0x3c8] sm:$0xf0]  ;;  %1301 = vmatpush.bf16.msra.mxu1 %v8109_v22  ;;  %v7785_v34 = vor.u32 %v9715_v31, %v7784_v30  ;;  %v7748_v41 = vld [vmem:[%s14180_s1 + $0x120] sm:$0xf] }
  0x16   : > { %v8073_v35 = vor.u32 %v9787_v33, %v8072_v32  ;;  %v9711_v36 = vld [vmem:[%s14180_s1 + $0x16c] sm:$0xf]  ;;  %1314 = vmatpush.bf16.msra.mxu2 %v7825_v26  ;;  %v9706_v42 = vld [vmem:[%s14180_s1 + $0x140] sm:$0xf0]  ;;  %v8036_v44 = vld [vmem:[%s14180_s1 + $0x360] sm:$0xf] }
  0x17   : > { %v9783_v38 = vld [vmem:[%s14180_s1 + $0x3ac] sm:$0xf]  ;;  %v7789_v39 = vor.u32 %v9711_v36, %v7786_v37  ;;  %1327 = vmatpush.bf16.msra.mxu3 %v8113_v27  ;;  %1566 = vperm.xlu1 %10050, %v8179_v28   ;;  %v9778_v45 = vld [vmem:[%s14180_s1 + $0x380] sm:$0xf0]  ;;  %v7750_v47 = vld [vmem:[%s14180_s1 + $0x144] sm:$0xf0]  ;;  %v7749_v50 = vor.u32 %v9706_v42, %v7748_v41 }
  0x18   : > { %v8077_v43 = vor.u32 %v9783_v38, %v8074_v40  ;;  %v9702_v46 = vld [vmem:[%s14180_s1 + $0x124] sm:$0xf]  ;;  %1532 = vperm.xlu0 %10049, %v1522_v29   ;;  %v8038_v49 = vld [vmem:[%s14180_s1 + $0x384] sm:$0xf0]  ;;  %1289 = vmatpush.bf16.msra.mxu0 %v7785_v34  ;;  %v8037_v51 = vor.u32 %v9778_v45, %v8036_v44  ;;  %v7712_v52 = vld [vmem:[%s14180_s1 + $0xd8] sm:$0xf] }
  0x19   : > { %v9774_v48 = vld [vmem:[%s14180_s1 + $0x364] sm:$0xf]  ;;  %1302 = vmatpush.bf16.msra.mxu1 %v8073_v35  ;;  %v7753_v53 = vor.u32 %v9702_v46, %v7750_v47  ;;  %v9697_v54 = vld [vmem:[%s14180_s1 + $0xf8] sm:$0xf0]  ;;  %v8000_v55 = vld [vmem:[%s14180_s1 + $0x318] sm:$0xf] }
  0x1a   : > { %1315 = vmatpush.bf16.msra.mxu2 %v7789_v39  ;;  %v9769_v56 = vld [vmem:[%s14180_s1 + $0x338] sm:$0xf0]  ;;  %v8041_v57 = vor.u32 %v9774_v48, %v8038_v49  ;;  %v7714_v59 = vld [vmem:[%s14180_s1 + $0xfc] sm:$0xf0]  ;;  %v8187_v60 = vld [vmem:[%s14181_s2 + $0x68] sm:$0xff]  ;;  %v7713_v0 = vor.u32 %v9697_v54, %v7712_v52  ;;  %vm1826_vm0 = vcmask 523264  }
  0x1b   : > { %1328 = vmatpush.bf16.msra.mxu3 %v8077_v43  ;;  %v9693_v58 = vld [vmem:[%s14180_s1 + $0xdc] sm:$0xf]  ;;  %v8002_v62 = vld [vmem:[%s14180_s1 + $0x33c] sm:$0xf0]  ;;  %v8001_v1 = vor.u32 %v9769_v56, %v8000_v55  ;;  %v7676_v2 = vld [vmem:[%s14180_s1 + $0x90] sm:$0xf] }
  0x1c   : > { %v9765_v61 = vld [vmem:[%s14180_s1 + $0x31c] sm:$0xf]  ;;  %1290 = vmatpush.bf16.msra.mxu0 %v7749_v50  ;;  %v8186_v63 = vld [vmem:[%s14181_s2 + $0x60] sm:$0xff]  ;;  %v7717_v3 = vor.u32 %v9693_v58, %v7714_v59  ;;  %v9688_v4 = vld [vmem:[%s14180_s1 + $0xb0] sm:$0xf0]  ;;  %vm2386_vm14 = vcmask 261120  }
  0x1d   : > { %1303 = vmatpush.bf16.msra.mxu1 %v8037_v51  ;;  %v7964_v5 = vld [vmem:[%s14180_s1 + $0x2d0] sm:$0xf]  ;;  %v9760_v6 = vld [vmem:[%s14180_s1 + $0x2f0] sm:$0xf0]  ;;  %v8005_v7 = vor.u32 %v9765_v61, %v8002_v62  ;;  %v7678_v9 = vld [vmem:[%s14180_s1 + $0xb4] sm:$0xf0]  ;;  %v7677_v13 = vor.u32 %v9688_v4, %v7676_v2 }
  0x1e   : > { %1316 = vmatpush.bf16.msra.mxu2 %v7753_v53  ;;  %v9684_v8 = vld [vmem:[%s14180_s1 + $0x94] sm:$0xf]  ;;  %v8182_v10 = vld [vmem:[%s14181_s2 + $0x40] sm:$0xff]  ;;  %v7966_v12 = vld [vmem:[%s14180_s1 + $0x2f4] sm:$0xf0]  ;;  %v7965_v14 = vor.u32 %v9760_v6, %v7964_v5  ;;  %vm3049_vm15 = vcmask 130048  }
  0x1f   : > { %1329 = vmatpush.bf16.msra.mxu3 %v8041_v57  ;;  %1634 = vperm.xlu1 %10050, %v8187_v60   ;;  %v9756_v11 = vld [vmem:[%s14180_s1 + $0x2d4] sm:$0xf]  ;;  %v7640_v15 = vld [vmem:[%s14180_s1 + $0x48] sm:$0xf]  ;;  %v7681_v16 = vor.u32 %v9684_v8, %v7678_v9  ;;  %v8194_v17 = vld [vmem:[%s14181_s2 + $0xa0] sm:$0xff] }
  0x20   : > { %1629 = vperm.xlu0 %10049, %v8186_v63   ;;  %1595 = vperm.xlu2 %10051, %v8182_v10   ;;  %v9679_v18 = vld [vmem:[%s14180_s1 + $0x68] sm:$0xf0]  ;;  %v7928_v19 = vld [vmem:[%s14180_s1 + $0x288] sm:$0xf]  ;;  %v7969_v21 = vor.u32 %v9756_v11, %v7966_v12  ;;  %v7642_v24 = vld [vmem:[%s14180_s1 + $0x6c] sm:$0xf0] }
  0x21   : > { %1291 = vmatpush.bf16.msra.mxu0 %v7713_v0  ;;  %1304 = vmatpush.bf16.msra.mxu1 %v8001_v1  ;;  %v9751_v20 = vld [vmem:[%s14180_s1 + $0x2a8] sm:$0xf0]  ;;  %v7930_v26 = vld [vmem:[%s14180_s1 + $0x2ac] sm:$0xf0]  ;;  %v7604_v27 = vld [vmem:[%s14180_s1] sm:$0xf]  ;;  %v7641_v29 = vor.u32 %v9679_v18, %v7640_v15 }
  0x22   : > { %1317 = vmatpush.bf16.msra.mxu2 %v7717_v3  ;;  %v8191_v22 = vld [vmem:[%s14181_s2 + $0x88] sm:$0xff]  ;;  %v9670_v28 = vld [vmem:[%s14180_s1 + $0x20] sm:$0xf0]  ;;  %v7929_v30 = vor.u32 %v9751_v20, %v7928_v19  ;;  %v7892_v31 = vld [vmem:[%s14180_s1 + $0x240] sm:$0xf] }
  0x23   : > { %1330 = vmatpush.bf16.msra.mxu3 %v8005_v7  ;;  %v9675_v23 = vld [vmem:[%s14180_s1 + $0x4c] sm:$0xf]  ;;  %v9742_v32 = vld [vmem:[%s14180_s1 + $0x260] sm:$0xf0]  ;;  %v7606_v35 = vld [vmem:[%s14180_s1 + $0x24] sm:$0xf0]  ;;  %v7605_v45 = vor.u32 %v9670_v28, %v7604_v27 }
  0x24   : > { %v9747_v25 = vld [vmem:[%s14180_s1 + $0x28c] sm:$0xf]  ;;  %v9666_v33 = vld [vmem:[%s14180_s1 + $0x4] sm:$0xf]  ;;  %v7645_v34 = vor.u32 %v9675_v23, %v7642_v24  ;;  %v7894_v37 = vld [vmem:[%s14180_s1 + $0x264] sm:$0xf0]  ;;  %v7893_v46 = vor.u32 %v9742_v32, %v7892_v31 }
  0x25   : > { %1292 = vmatpush.bf16.msra.mxu0 %v7677_v13  ;;  %1305 = vmatpush.bf16.msra.mxu1 %v7965_v14  ;;  %v9738_v36 = vld [vmem:[%s14180_s1 + $0x244] sm:$0xf]  ;;  %v7933_v38 = vor.u32 %v9747_v25, %v7930_v26  ;;  %v7864_v39 = vld [vmem:[%s14180_s1 + $0x200] sm:$0xf]  ;;  %v8183_v44 = vld [vmem:[%s14181_s2 + $0x48] sm:$0xff]  ;;  %v7609_v50 = vor.u32 %v9666_v33, %v7606_v35 }
  0x26   : > { %1318 = vmatpush.bf16.msra.mxu2 %v7681_v16  ;;  %v9734_v40 = vld [vmem:[%s14180_s1 + $0x220] sm:$0xf0]  ;;  %v8152_v41 = vld [vmem:[%s14180_s1 + $0x440] sm:$0xf]  ;;  %v7866_v47 = vld [vmem:[%s14180_s1 + $0x224] sm:$0xf0]  ;;  %v7897_v52 = vor.u32 %v9738_v36, %v7894_v37 }
  0x27   : > { %1331 = vmatpush.bf16.msra.mxu3 %v7969_v21  ;;  %1697 = vperm.xlu1 %10050, %v8194_v17   ;;  %v9806_v42 = vld [vmem:[%s14180_s1 + $0x460] sm:$0xf0]  ;;  %v8154_v49 = vld [vmem:[%s14180_s1 + $0x464] sm:$0xf0]  ;;  %v7865_v51 = vor.u32 %v9734_v40, %v7864_v39  ;;  %v7828_v54 = vld [vmem:[%s14180_s1 + $0x1b8] sm:$0xf] }
  0x28   : > { %1668 = vperm.xlu0 %10049, %v8191_v22   ;;  %v9730_v43 = vld [vmem:[%s14180_s1 + $0x204] sm:$0xf]  ;;  %1600 = vperm.xlu2 %10051, %v8183_v44   ;;  %v8153_v53 = vor.u32 %v9806_v42, %v8152_v41  ;;  %v9725_v55 = vld [vmem:[%s14180_s1 + $0x1d8] sm:$0xf0]  ;;  %v8116_v58 = vld [vmem:[%s14180_s1 + $0x3f8] sm:$0xf] }
  0x29   : > { %1293 = vmatpush.bf16.msra.mxu0 %v7641_v29  ;;  %1306 = vmatpush.bf16.msra.mxu1 %v7929_v30  ;;  %v9802_v48 = vld [vmem:[%s14180_s1 + $0x444] sm:$0xf]  ;;  %v7869_v56 = vor.u32 %v9730_v43, %v7866_v47  ;;  %v9797_v59 = vld [vmem:[%s14180_s1 + $0x418] sm:$0xf0]  ;;  %v7830_v61 = vld [vmem:[%s14180_s1 + $0x1dc] sm:$0xf0]  ;;  %v7829_v2 = vor.u32 %v9725_v55, %v7828_v54 }
  0x2a   : > { %1319 = vmatpush.bf16.msra.mxu2 %v7645_v34  ;;  %v8157_v57 = vor.u32 %v9802_v48, %v8154_v49  ;;  %v9721_v60 = vld [vmem:[%s14180_s1 + $0x1bc] sm:$0xf]  ;;  %v8118_v63 = vld [vmem:[%s14180_s1 + $0x41c] sm:$0xf0]  ;;  %v8199_v0 = vld [vmem:[%s14181_s2 + $0xc8] sm:$0xff]  ;;  %v8117_v3 = vor.u32 %v9797_v59, %v8116_v58 }
  0x2b   : > { %1332 = vmatpush.bf16.msra.mxu3 %v7933_v38  ;;  %v9793_v62 = vld [vmem:[%s14180_s1 + $0x3fc] sm:$0xf]  ;;  %v8198_v1 = vld [vmem:[%s14181_s2 + $0xc0] sm:$0xff]  ;;  %v7792_v4 = vld [vmem:[%s14180_s1 + $0x170] sm:$0xf]  ;;  %v7833_v7 = vor.u32 %v9721_v60, %v7830_v61 }
  0x2c   : > { %v9716_v5 = vld [vmem:[%s14180_s1 + $0x190] sm:$0xf0]  ;;  %v8190_v6 = vld [vmem:[%s14181_s2 + $0x80] sm:$0xff]  ;;  %v8121_v8 = vor.u32 %v9793_v62, %v8118_v63  ;;  %v8080_v9 = vld [vmem:[%s14180_s1 + $0x3b0] sm:$0xf] }
  0x2d   : > { %1294 = vmatpush.bf16.msra.mxu0 %v7605_v45  ;;  %1307 = vmatpush.bf16.msra.mxu1 %v7893_v46  ;;  %v9788_v10 = vld [vmem:[%s14180_s1 + $0x3d0] sm:$0xf0]  ;;  %v7794_v12 = vld [vmem:[%s14180_s1 + $0x194] sm:$0xf0]  ;;  %v7793_v15 = vor.u32 %v9716_v5, %v7792_v4  ;;  %v383_v16 = vld [vmem:[%s378_s16] sm:$0x3]  ;;  %s381_s16 = scalar_lea.vmem %s14190_s11, %s14286_s20 }
  0x2e   : > { %1320 = vmatpush.bf16.msra.mxu2 %v7609_v50  ;;  %v9712_v11 = vld [vmem:[%s14180_s1 + $0x174] sm:$0xf]  ;;  %v8082_v14 = vld [vmem:[%s14180_s1 + $0x3d4] sm:$0xf0]  ;;  %v8081_v17 = vor.u32 %v9788_v10, %v8080_v9  ;;  %v7756_v18 = vld [vmem:[%s14180_s1 + $0x128] sm:$0xf] }
  0x2f   : > { %1333 = vmatpush.bf16.msra.mxu3 %v7897_v52  ;;  %1736 = vperm.xlu1 %10050, %v8199_v0   ;;  %v9784_v13 = vld [vmem:[%s14180_s1 + $0x3b4] sm:$0xf]  ;;  %v9707_v19 = vld [vmem:[%s14180_s1 + $0x148] sm:$0xf0]  ;;  %v385_v20 = vperm.slane %v383_v16, 0  ;;  %v386_v21 = vperm.slane %v383_v16, 1  ;;  %v7797_v22 = vor.u32 %v9712_v11, %v7794_v12 }
  0x30   : > { %1731 = vperm.xlu0 %10049, %v8198_v1   ;;  %1663 = vperm.xlu2 %10051, %v8190_v6   ;;  %v8085_v23 = vor.u32 %v9784_v13, %v8082_v14  ;;  %v8044_v24 = vld [vmem:[%s14180_s1 + $0x368] sm:$0xf]  ;;  %v9779_v25 = vld [vmem:[%s14180_s1 + $0x388] sm:$0xf0]  ;;  %v7758_v27 = vld [vmem:[%s14180_s1 + $0x14c] sm:$0xf0]  ;;  %v7757_v33 = vor.u32 %v9707_v19, %v7756_v18 }
  0x31   : > { %1339 = vmatpush.bf16.msrb.mxu0 %v7865_v51  ;;  %1352 = vmatpush.bf16.msrb.mxu1 %v8153_v53  ;;  %v9703_v26 = vld [vmem:[%s14180_s1 + $0x12c] sm:$0xf]  ;;  %v8046_v29 = vld [vmem:[%s14180_s1 + $0x38c] sm:$0xf0]  ;;  %v10662_v30 = vpack.c.bf16 %v385_v20, %v385_v20  ;;  %v8206_v31 = vld [vmem:[%s14181_s2 + $0x100] sm:$0xff]  ;;  %v10670_v34 = vpack.c.bf16 %v386_v21, %v386_v21  ;;  %v8045_v35 = vor.u32 %v9779_v25, %v8044_v24 }
  0x32   : > { %1365 = vmatpush.bf16.msrb.mxu2 %v7869_v56  ;;  %v9775_v28 = vld [vmem:[%s14180_s1 + $0x36c] sm:$0xf]  ;;  %v7720_v36 = vld [vmem:[%s14180_s1 + $0xe0] sm:$0xf]  ;;  %v9698_v37 = vld [vmem:[%s14180_s1 + $0x100] sm:$0xf0]  ;;  %v7761_v38 = vor.u32 %v9703_v26, %v7758_v27 }
  0x33   : > { %1378 = vmatpush.bf16.msrb.mxu3 %v8157_v57  ;;  %v8203_v32 = vld [vmem:[%s14181_s2 + $0xe8] sm:$0xff]  ;;  %1295 = vmatmul.bf16.vlgmr.msra.gmra.mxu0 %v10662_v30  ;;  %v8049_v39 = vor.u32 %v9775_v28, %v8046_v29  ;;  %v8008_v40 = vld [vmem:[%s14180_s1 + $0x320] sm:$0xf]  ;;  %v9770_v41 = vld [vmem:[%s14180_s1 + $0x340] sm:$0xf0]  ;;  %v7721_v46 = vor.u32 %v9698_v37, %v7720_v36 }
  0x34   : > { %v9694_v42 = vld [vmem:[%s14180_s1 + $0xe4] sm:$0xf]  ;;  %v7722_v43 = vld [vmem:[%s14180_s1 + $0x104] sm:$0xf0]  ;;  %1308 = vmatmul.bf16.vlgmr.msra.gmra.mxu1 %v10670_v34  ;;  %1321 = vmatmul.bf16.vlgmr.msra.gmra.mxu2 %v10662_v30  ;;  %v8009_v48 = vor.u32 %v9770_v41, %v8008_v40  ;;  %v7684_v49 = vld [vmem:[%s14180_s1 + $0x98] sm:$0xf] }
  0x35   : > { %1340 = vmatpush.bf16.msrb.mxu0 %v7829_v2  ;;  %1353 = vmatpush.bf16.msrb.mxu1 %v8117_v3  ;;  %v9766_v44 = vld [vmem:[%s14180_s1 + $0x324] sm:$0xf]  ;;  %v8010_v45 = vld [vmem:[%s14180_s1 + $0x344] sm:$0xf0]  ;;  %v9689_v50 = vld [vmem:[%s14180_s1 + $0xb8] sm:$0xf0]  ;;  %v7725_v51 = vor.u32 %v9694_v42, %v7722_v43 }
  0x36   : > { %1366 = vmatpush.bf16.msrb.mxu2 %v7833_v7  ;;  %v8195_v47 = vld [vmem:[%s14181_s2 + $0xa8] sm:$0xff]  ;;  %v8013_v52 = vor.u32 %v9766_v44, %v8010_v45  ;;  %v7972_v53 = vld [vmem:[%s14180_s1 + $0x2d8] sm:$0xf]  ;;  %v9761_v54 = vld [vmem:[%s14180_s1 + $0x2f8] sm:$0xf0]  ;;  %1334 = vmatmul.bf16.vlgmr.msra.gmra.mxu3 %v10670_v34  ;;  %v7685_v61 = vor.u32 %v9689_v50, %v7684_v49 }
  0x37   : > { %1379 = vmatpush.bf16.msrb.mxu3 %v8121_v8  ;;  %1799 = vperm.xlu1 %10050, %v8206_v31   ;;  %v9685_v55 = vld [vmem:[%s14180_s1 + $0x9c] sm:$0xf]  ;;  %v7686_v56 = vld [vmem:[%s14180_s1 + $0xbc] sm:$0xf0]  ;;  %v1523_v60 = vld [vmem:[%s14181_s2 + $0x10] sm:$0xff]  ;;  %v7973_v62 = vor.u32 %v9761_v54, %v7972_v53 }
  0x38   : > { %1770 = vperm.xlu0 %10049, %v8203_v32   ;;  %1702 = vperm.xlu2 %10051, %v8195_v47   ;;  %v9757_v57 = vld [vmem:[%s14180_s1 + $0x2dc] sm:$0xf]  ;;  %v7974_v58 = vld [vmem:[%s14180_s1 + $0x2fc] sm:$0xf0]  ;;  %v7648_v63 = vld [vmem:[%s14180_s1 + $0x50] sm:$0xf]  ;;  %v7689_v1 = vor.u32 %v9685_v55, %v7686_v56 }
  0x39   : > { %1341 = vmatpush.bf16.msrb.mxu0 %v7793_v15  ;;  %1354 = vmatpush.bf16.msrb.mxu1 %v8081_v17  ;;  %v1524_v59 = vld [vmem:[%s14181_s2 + $0x18] sm:$0xff]  ;;  %v9680_v0 = vld [vmem:[%s14180_s1 + $0x70] sm:$0xf0]  ;;  %v7977_v2 = vor.u32 %v9757_v57, %v7974_v58  ;;  %v7936_v3 = vld [vmem:[%s14180_s1 + $0x290] sm:$0xf] }
  0x3a   : > { %1367 = vmatpush.bf16.msrb.mxu2 %v7797_v22  ;;  %v9752_v4 = vld [vmem:[%s14180_s1 + $0x2b0] sm:$0xf0]  ;;  %v7650_v6 = vld [vmem:[%s14180_s1 + $0x74] sm:$0xf0]  ;;  %v7649_v9 = vor.u32 %v9680_v0, %v7648_v63  ;;  %v8202_v10 = vld [vmem:[%s14181_s2 + $0xe0] sm:$0xff] }
  0x3b   : > { %1380 = vmatpush.bf16.msrb.mxu3 %v8085_v23  ;;  %v9676_v5 = vld [vmem:[%s14180_s1 + $0x54] sm:$0xf]  ;;  %v7938_v8 = vld [vmem:[%s14180_s1 + $0x2b4] sm:$0xf0]  ;;  %v7612_v11 = vld [vmem:[%s14180_s1 + $0x8] sm:$0xf]  ;;  %v7937_v13 = vor.u32 %v9752_v4, %v7936_v3 }
  0x3c   : > { %v9748_v7 = vld [vmem:[%s14180_s1 + $0x294] sm:$0xf]  ;;  %v9671_v12 = vld [vmem:[%s14180_s1 + $0x28] sm:$0xf0]  ;;  %v7900_v14 = vld [vmem:[%s14180_s1 + $0x248] sm:$0xf]  ;;  %v7653_v17 = vor.u32 %v9676_v5, %v7650_v6 }
  0x3d   : > { %1342 = vmatpush.bf16.msrb.mxu0 %v7757_v33  ;;  %1355 = vmatpush.bf16.msrb.mxu1 %v8045_v35  ;;  %v9743_v15 = vld [vmem:[%s14180_s1 + $0x268] sm:$0xf0]  ;;  %v7941_v18 = vor.u32 %v9748_v7, %v7938_v8  ;;  %v8184_v19 = vld [vmem:[%s14181_s2 + $0x50] sm:$0xff]  ;;  %v8181_v20 = vld [vmem:[%s14181_s2 + $0x38] sm:$0xff]  ;;  %v7613_v27 = vor.u32 %v9671_v12, %v7612_v11 }
  0x3e   : > { %1368 = vmatpush.bf16.msrb.mxu2 %v7761_v38  ;;  %v9667_v16 = vld [vmem:[%s14180_s1 + $0xc] sm:$0xf]  ;;  %v7614_v21 = vld [vmem:[%s14180_s1 + $0x2c] sm:$0xf0]  ;;  %v7872_v22 = vld [vmem:[%s14180_s1 + $0x208] sm:$0xf]  ;;  %v7901_v32 = vor.u32 %v9743_v15, %v7900_v14 }
  0x3f   : > { %1381 = vmatpush.bf16.msrb.mxu3 %v8049_v39  ;;  %1542 = vperm.xlu1 %10050, %v1524_v59   ;;  %v9735_v23 = vld [vmem:[%s14180_s1 + $0x228] sm:$0xf0]  ;;  %v7902_v25 = vld [vmem:[%s14180_s1 + $0x26c] sm:$0xf0]  ;;  %v8160_v26 = vld [vmem:[%s14180_s1 + $0x448] sm:$0xf]  ;;  %v7617_v37 = vor.u32 %v9667_v16, %v7614_v21 }
  0x40   : > { %1537 = vperm.xlu0 %10049, %v1523_v60   ;;  %1765 = vperm.xlu2 %10051, %v8202_v10   ;;  %v9739_v24 = vld [vmem:[%s14180_s1 + $0x24c] sm:$0xf]  ;;  %v7874_v31 = vld [vmem:[%s14180_s1 + $0x22c] sm:$0xf0]  ;;  %v7873_v33 = vor.u32 %v9735_v23, %v7872_v22  ;;  %v7836_v41 = vld [vmem:[%s14180_s1 + $0x1c0] sm:$0xf] }
  0x41   : > { %1343 = vmatpush.bf16.msrb.mxu0 %v7721_v46  ;;  %1356 = vmatpush.bf16.msrb.mxu1 %v8009_v48  ;;  %v9807_v28 = vld [vmem:[%s14180_s1 + $0x468] sm:$0xf0]  ;;  %v8162_v36 = vld [vmem:[%s14180_s1 + $0x46c] sm:$0xf0]  ;;  %v7905_v38 = vor.u32 %v9739_v24, %v7902_v25  ;;  %v9726_v42 = vld [vmem:[%s14180_s1 + $0x1e0] sm:$0xf0] }
  0x42   : > { %1369 = vmatpush.bf16.msrb.mxu2 %v7725_v51  ;;  %v9731_v29 = vld [vmem:[%s14180_s1 + $0x20c] sm:$0xf]  ;;  %v8161_v39 = vor.u32 %v9807_v28, %v8160_v26  ;;  %v8124_v43 = vld [vmem:[%s14180_s1 + $0x400] sm:$0xf]  ;;  %v9798_v45 = vld [vmem:[%s14180_s1 + $0x420] sm:$0xf0]  ;;  %v7837_v50 = vor.u32 %v9726_v42, %v7836_v41 }
  0x43   : > { %1382 = vmatpush.bf16.msrb.mxu3 %v8013_v52  ;;  %v9803_v35 = vld [vmem:[%s14180_s1 + $0x44c] sm:$0xf]  ;;  %v7877_v40 = vor.u32 %v9731_v29, %v7874_v31  ;;  %v9722_v46 = vld [vmem:[%s14180_s1 + $0x1c4] sm:$0xf]  ;;  %v7838_v47 = vld [vmem:[%s14180_s1 + $0x1e4] sm:$0xf0]  ;;  %v8125_v51 = vor.u32 %v9798_v45, %v8124_v43 }
  0x44   : > { %v8165_v44 = vor.u32 %v9803_v35, %v8162_v36  ;;  %v9794_v48 = vld [vmem:[%s14180_s1 + $0x404] sm:$0xf]  ;;  %v8126_v49 = vld [vmem:[%s14180_s1 + $0x424] sm:$0xf0]  ;;  %v7841_v52 = vor.u32 %v9722_v46, %v7838_v47  ;;  %v7800_v53 = vld [vmem:[%s14180_s1 + $0x178] sm:$0xf] }
  0x45   : > { %1344 = vmatpush.bf16.msrb.mxu0 %v7685_v61  ;;  %1357 = vmatpush.bf16.msrb.mxu1 %v7973_v62  ;;  %v9717_v54 = vld [vmem:[%s14180_s1 + $0x198] sm:$0xf0]  ;;  %v8088_v55 = vld [vmem:[%s14180_s1 + $0x3b8] sm:$0xf]  ;;  %v8129_v56 = vor.u32 %v9794_v48, %v8126_v49  ;;  %v7802_v59 = vld [vmem:[%s14180_s1 + $0x19c] sm:$0xf0] }
  0x46   : > { %1370 = vmatpush.bf16.msrb.mxu2 %v7689_v1  ;;  %v9789_v57 = vld [vmem:[%s14180_s1 + $0x3d8] sm:$0xf0]  ;;  %v8090_v62 = vld [vmem:[%s14180_s1 + $0x3dc] sm:$0xf0]  ;;  %v8188_v63 = vld [vmem:[%s14181_s2 + $0x70] sm:$0xff]  ;;  %v7801_v1 = vor.u32 %v9717_v54, %v7800_v53 }
  0x47   : > { %1383 = vmatpush.bf16.msrb.mxu3 %v7977_v2  ;;  %1605 = vperm.xlu1 %10050, %v8184_v19   ;;  %v9713_v58 = vld [vmem:[%s14180_s1 + $0x17c] sm:$0xf]  ;;  %v8207_v0 = vld [vmem:[%s14181_s2 + $0x108] sm:$0xff]  ;;  %v8089_v2 = vor.u32 %v9789_v57, %v8088_v55  ;;  %v7764_v4 = vld [vmem:[%s14180_s1 + $0x130] sm:$0xf] }
  0x48   : > { %1576 = vperm.xlu0 %10049, %v8181_v20   ;;  %v8189_v60 = vld [vmem:[%s14181_s2 + $0x78] sm:$0xff]  ;;  %v7805_v3 = vor.u32 %v9713_v58, %v7802_v59  ;;  %v9708_v5 = vld [vmem:[%s14180_s1 + $0x150] sm:$0xf0]  ;;  %v8052_v6 = vld [vmem:[%s14180_s1 + $0x370] sm:$0xf]  ;;  %1804 = vperm.xlu2 %10051, %v8207_v0  }
  0x49   : > { %1345 = vmatpush.bf16.msrb.mxu0 %v7649_v9  ;;  %1358 = vmatpush.bf16.msrb.mxu1 %v7937_v13  ;;  %v9785_v61 = vld [vmem:[%s14180_s1 + $0x3bc] sm:$0xf]  ;;  %v9780_v8 = vld [vmem:[%s14180_s1 + $0x390] sm:$0xf0]  ;;  %v7766_v10 = vld [vmem:[%s14180_s1 + $0x154] sm:$0xf0]  ;;  %v7765_v13 = vor.u32 %v9708_v5, %v7764_v4 }
  0x4a   : > { %1371 = vmatpush.bf16.msrb.mxu2 %v7653_v17  ;;  %v8093_v7 = vor.u32 %v9785_v61, %v8090_v62  ;;  %v9704_v9 = vld [vmem:[%s14180_s1 + $0x134] sm:$0xf]  ;;  %v8054_v12 = vld [vmem:[%s14180_s1 + $0x394] sm:$0xf0]  ;;  %v8053_v14 = vor.u32 %v9780_v8, %v8052_v6  ;;  %v7728_v16 = vld [vmem:[%s14180_s1 + $0xe8] sm:$0xf] }
  0x4b   : > { %1384 = vmatpush.bf16.msrb.mxu3 %v7941_v18  ;;  %v9776_v11 = vld [vmem:[%s14180_s1 + $0x374] sm:$0xf]  ;;  %v7769_v15 = vor.u32 %v9704_v9, %v7766_v10  ;;  %v9699_v17 = vld [vmem:[%s14180_s1 + $0x108] sm:$0xf0]  ;;  %v8016_v18 = vld [vmem:[%s14180_s1 + $0x328] sm:$0xf] }
  0x4c   : > { %v8057_v19 = vor.u32 %v9776_v11, %v8054_v12  ;;  %v9771_v20 = vld [vmem:[%s14180_s1 + $0x348] sm:$0xf0]  ;;  %v7730_v22 = vld [vmem:[%s14180_s1 + $0x10c] sm:$0xf0]  ;;  %v8193_v26 = vld [vmem:[%s14181_s2 + $0x98] sm:$0xff]  ;;  %v7729_v28 = vor.u32 %v9699_v17, %v7728_v16 }
  0x4d   : > { %1346 = vmatpush.bf16.msrb.mxu0 %v7613_v27  ;;  %1359 = vmatpush.bf16.msrb.mxu1 %v7901_v32  ;;  %v9695_v21 = vld [vmem:[%s14180_s1 + $0xec] sm:$0xf]  ;;  %v8196_v23 = vld [vmem:[%s14181_s2 + $0xb0] sm:$0xff]  ;;  %v8017_v29 = vor.u32 %v9771_v20, %v8016_v18  ;;  %v7692_v32 = vld [vmem:[%s14180_s1 + $0xa0] sm:$0xf] }
  0x4e   : > { %1372 = vmatpush.bf16.msrb.mxu2 %v7617_v37  ;;  %v9767_v24 = vld [vmem:[%s14180_s1 + $0x32c] sm:$0xf]  ;;  %v8018_v25 = vld [vmem:[%s14180_s1 + $0x34c] sm:$0xf0]  ;;  %v7733_v31 = vor.u32 %v9695_v21, %v7730_v22  ;;  %v7980_v35 = vld [vmem:[%s14180_s1 + $0x2e0] sm:$0xf] }
  0x4f   : > { %1385 = vmatpush.bf16.msrb.mxu3 %v7905_v38  ;;  %1644 = vperm.xlu1 %10050, %v8189_v60   ;;  %v8180_v27 = vld [vmem:[%s14181_s2 + $0x30] sm:$0xff]  ;;  %v8021_v36 = vor.u32 %v9767_v24, %v8018_v25  ;;  %v9762_v37 = vld [vmem:[%s14180_s1 + $0x300] sm:$0xf0]  ;;  %v7982_v41 = vld [vmem:[%s14180_s1 + $0x304] sm:$0xf0] }
  0x50   : > { %1347 = vmatmul.bf16.vlgmr.msrb.gmra.mxu0 %v10662_v30  ;;  %1360 = vmatmul.bf16.vlgmr.msrb.gmra.mxu1 %v10670_v34  ;;  %v9686_v38 = vld [vmem:[%s14180_s1 + $0xa4] sm:$0xf]  ;;  %v7981_v43 = vor.u32 %v9762_v37, %v7980_v35  ;;  %v7656_v45 = vld [vmem:[%s14180_s1 + $0x58] sm:$0xf]  ;;  %v9681_v46 = vld [vmem:[%s14180_s1 + $0x78] sm:$0xf0] }
  0x51   : > { %1391 = vmatpush.bf16.msra.mxu0 %v7873_v33  ;;  %1404 = vmatpush.bf16.msra.mxu1 %v8161_v39  ;;  %v9690_v33 = vld [vmem:[%s14180_s1 + $0xc0] sm:$0xf0]  ;;  %v7694_v39 = vld [vmem:[%s14180_s1 + $0xc4] sm:$0xf0]  ;;  %v7944_v47 = vld [vmem:[%s14180_s1 + $0x298] sm:$0xf]  ;;  %v7657_v57 = vor.u32 %v9681_v46, %v7656_v45 }
  0x52   : > { %1417 = vmatpush.bf16.msra.mxu2 %v7877_v40  ;;  %1386 = vmatmul.bf16.vlgmr.msrb.gmra.mxu3 %v10670_v34  ;;  %v9758_v40 = vld [vmem:[%s14180_s1 + $0x2e4] sm:$0xf]  ;;  %v7693_v42 = vor.u32 %v9690_v33, %v7692_v32  ;;  %v9753_v49 = vld [vmem:[%s14180_s1 + $0x2b8] sm:$0xf0]  ;;  %v7946_v54 = vld [vmem:[%s14180_s1 + $0x2bc] sm:$0xf0] }
  0x53   : > { %1430 = vmatpush.bf16.msra.mxu3 %v8165_v44  ;;  %1373 = vmatmul.bf16.vlgmr.msrb.gmra.mxu2 %v10662_v30  ;;  %v7697_v44 = vor.u32 %v9686_v38, %v7694_v39  ;;  %v7985_v48 = vor.u32 %v9758_v40, %v7982_v41  ;;  %v9749_v53 = vld [vmem:[%s14180_s1 + $0x29c] sm:$0xf]  ;;  %v8200_v55 = vld [vmem:[%s14181_s2 + $0xd0] sm:$0xff]  ;;  %v7945_v58 = vor.u32 %v9753_v49, %v7944_v47  ;;  %v7910_v4 = vld [vmem:[%s14180_s1 + $0x274] sm:$0xf0] }
  0x54   : > { %1639 = vperm.xlu0 %10049, %v8188_v63   ;;  %1571 = vperm.xlu2 %10051, %v8180_v27   ;;  %v7620_v60 = vld [vmem:[%s14180_s1 + $0x10] sm:$0xf]  ;;  %v9672_v61 = vld [vmem:[%s14180_s1 + $0x30] sm:$0xf0]  ;;  %v7949_v63 = vor.u32 %v9749_v53, %v7946_v54  ;;  %v8170_v16 = vld [vmem:[%s14180_s1 + $0x474] sm:$0xf0] }
  0x55   : > { %1392 = vmatpush.bf16.msra.mxu0 %v7837_v50  ;;  %1405 = vmatpush.bf16.msra.mxu1 %v8125_v51  ;;  %v9677_v50 = vld [vmem:[%s14180_s1 + $0x5c] sm:$0xf]  ;;  %v7658_v51 = vld [vmem:[%s14180_s1 + $0x7c] sm:$0xf0]  ;;  %v7908_v62 = vld [vmem:[%s14180_s1 + $0x250] sm:$0xf]  ;;  %v7621_v5 = vor.u32 %v9672_v61, %v7620_v60 }
  0x56   : > { %1418 = vmatpush.bf16.msra.mxu2 %v7841_v52  ;;  %v8201_v52 = vld [vmem:[%s14181_s2 + $0xd8] sm:$0xff]  ;;  %v7661_v59 = vor.u32 %v9677_v50, %v7658_v51  ;;  %v9744_v0 = vld [vmem:[%s14180_s1 + $0x270] sm:$0xf0]  ;;  %v7880_v6 = vld [vmem:[%s14180_s1 + $0x210] sm:$0xf] }
  0x57   : > { %1431 = vmatpush.bf16.msra.mxu3 %v8129_v56  ;;  %1707 = vperm.xlu1 %10050, %v8196_v23   ;;  %v8185_v56 = vld [vmem:[%s14181_s2 + $0x58] sm:$0xff]  ;;  %v8168_v8 = vld [vmem:[%s14180_s1 + $0x450] sm:$0xf]  ;;  %v7909_v9 = vor.u32 %v9744_v0, %v7908_v62  ;;  %v9808_v11 = vld [vmem:[%s14180_s1 + $0x470] sm:$0xf0] }
  0x58   : > { %v9732_v12 = vld [vmem:[%s14180_s1 + $0x214] sm:$0xf]  ;;  %v8205_v18 = vld [vmem:[%s14181_s2 + $0xf8] sm:$0xff]  ;;  %v8169_v20 = vor.u32 %v9808_v11, %v8168_v8  ;;  %v7844_v23 = vld [vmem:[%s14180_s1 + $0x1c8] sm:$0xf] }
  0x59   : > { %1393 = vmatpush.bf16.msra.mxu0 %v7801_v1  ;;  %1406 = vmatpush.bf16.msra.mxu1 %v8089_v2  ;;  %v9668_v1 = vld [vmem:[%s14180_s1 + $0x14] sm:$0xf]  ;;  %v7622_v2 = vld [vmem:[%s14180_s1 + $0x34] sm:$0xf0]  ;;  %v9727_v24 = vld [vmem:[%s14180_s1 + $0x1e8] sm:$0xf0] }
  0x5a   : > { %1419 = vmatpush.bf16.msra.mxu2 %v7805_v3  ;;  %v9740_v3 = vld [vmem:[%s14180_s1 + $0x254] sm:$0xf]  ;;  %v7625_v10 = vor.u32 %v9668_v1, %v7622_v2  ;;  %v9799_v27 = vld [vmem:[%s14180_s1 + $0x428] sm:$0xf0]  ;;  %v8134_v32 = vld [vmem:[%s14180_s1 + $0x42c] sm:$0xf0]  ;;  %v7845_v33 = vor.u32 %v9727_v24, %v7844_v23 }
  0x5b   : > { %1432 = vmatpush.bf16.msra.mxu3 %v8093_v7  ;;  %v9736_v7 = vld [vmem:[%s14180_s1 + $0x230] sm:$0xf0]  ;;  %v9718_v37 = vld [vmem:[%s14180_s1 + $0x1a0] sm:$0xf0]  ;;  %v8096_v40 = vld [vmem:[%s14180_s1 + $0x3c0] sm:$0xf] }
  0x5c   : > { %1678 = vperm.xlu0 %10049, %v8193_v26   ;;  %1610 = vperm.xlu2 %10051, %v8185_v56   ;;  %v8208_v17 = vld [vmem:[%s14181_s2 + $0x110] sm:$0xff]  ;;  %v8132_v26 = vld [vmem:[%s14180_s1 + $0x408] sm:$0xf]  ;;  %v9790_v41 = vld [vmem:[%s14180_s1 + $0x3e0] sm:$0xf0] }
  0x5d   : > { %1394 = vmatpush.bf16.msra.mxu0 %v7765_v13  ;;  %1407 = vmatpush.bf16.msra.mxu1 %v8053_v14  ;;  %v7882_v13 = vld [vmem:[%s14180_s1 + $0x234] sm:$0xf0]  ;;  %v7913_v14 = vor.u32 %v9740_v3, %v7910_v4  ;;  %v8192_v22 = vld [vmem:[%s14181_s2 + $0x90] sm:$0xff]  ;;  %v8133_v35 = vor.u32 %v9799_v27, %v8132_v26  ;;  %v8098_v45 = vld [vmem:[%s14180_s1 + $0x3e4] sm:$0xf0]  ;;  %v8097_v47 = vor.u32 %v9790_v41, %v8096_v40 }
  0x5e   : > { %1420 = vmatpush.bf16.msra.mxu2 %v7769_v15  ;;  %v9804_v15 = vld [vmem:[%s14180_s1 + $0x454] sm:$0xf]  ;;  %v7885_v21 = vor.u32 %v9732_v12, %v7882_v13  ;;  %v9709_v49 = vld [vmem:[%s14180_s1 + $0x158] sm:$0xf0]  ;;  %v7736_v61 = vld [vmem:[%s14180_s1 + $0xf0] sm:$0xf] }
  0x5f   : > { %1433 = vmatpush.bf16.msra.mxu3 %v8057_v19  ;;  %1746 = vperm.xlu1 %10050, %v8201_v52   ;;  %v7881_v19 = vor.u32 %v9736_v7, %v7880_v6  ;;  %v8173_v25 = vor.u32 %v9804_v15, %v8170_v16  ;;  %v8060_v52 = vld [vmem:[%s14180_s1 + $0x378] sm:$0xf]  ;;  %v9781_v53 = vld [vmem:[%s14180_s1 + $0x398] sm:$0xf0]  ;;  %v9700_v62 = vld [vmem:[%s14180_s1 + $0x110] sm:$0xf0] }
  0x60   : > { %v9705_v54 = vld [vmem:[%s14180_s1 + $0x13c] sm:$0xf]  ;;  %v8061_v60 = vor.u32 %v9781_v53, %v8060_v52  ;;  %v8024_v1 = vld [vmem:[%s14180_s1 + $0x330] sm:$0xf]  ;;  %v9772_v2 = vld [vmem:[%s14180_s1 + $0x350] sm:$0xf0]  ;;  %v7737_v7 = vor.u32 %v9700_v62, %v7736_v61 }
  0x61   : > { %1395 = vmatpush.bf16.msra.mxu0 %v7729_v28  ;;  %1408 = vmatpush.bf16.msra.mxu1 %v8017_v29  ;;  %v9723_v28 = vld [vmem:[%s14180_s1 + $0x1cc] sm:$0xf]  ;;  %v7846_v29 = vld [vmem:[%s14180_s1 + $0x1ec] sm:$0xf0]  ;;  %v9777_v56 = vld [vmem:[%s14180_s1 + $0x37c] sm:$0xf]  ;;  %v8025_v8 = vor.u32 %v9772_v2, %v8024_v1 }
  0x62   : > { %1421 = vmatpush.bf16.msra.mxu2 %v7733_v31  ;;  %v9795_v31 = vld [vmem:[%s14180_s1 + $0x40c] sm:$0xf]  ;;  %v7849_v38 = vor.u32 %v9723_v28, %v7846_v29  ;;  %v9696_v3 = vld [vmem:[%s14180_s1 + $0xf4] sm:$0xf]  ;;  %v7738_v4 = vld [vmem:[%s14180_s1 + $0x114] sm:$0xf0] }
  0x63   : > { %1434 = vmatpush.bf16.msra.mxu3 %v8021_v36  ;;  %v7808_v36 = vld [vmem:[%s14180_s1 + $0x180] sm:$0xf]  ;;  %v8137_v39 = vor.u32 %v9795_v31, %v8134_v32  ;;  %v8026_v6 = vld [vmem:[%s14180_s1 + $0x354] sm:$0xf0]  ;;  %v7741_v11 = vor.u32 %v9696_v3, %v7738_v4  ;;  %v7988_v13 = vld [vmem:[%s14180_s1 + $0x2e8] sm:$0xf] }
  0x64   : > { %1741 = vperm.xlu0 %10049, %v8200_v55   ;;  %1673 = vperm.xlu2 %10051, %v8192_v22   ;;  %v7809_v46 = vor.u32 %v9718_v37, %v7808_v36  ;;  %v7774_v55 = vld [vmem:[%s14180_s1 + $0x15c] sm:$0xf0]  ;;  %v9687_v15 = vld [vmem:[%s14180_s1 + $0xac] sm:$0xf]  ;;  %v7702_v16 = vld [vmem:[%s14180_s1 + $0xcc] sm:$0xf0] }
  0x65   : > { %1396 = vmatpush.bf16.msra.mxu0 %v7693_v42  ;;  %1409 = vmatpush.bf16.msra.mxu1 %v7981_v43  ;;  %v9714_v42 = vld [vmem:[%s14180_s1 + $0x184] sm:$0xf]  ;;  %v7810_v43 = vld [vmem:[%s14180_s1 + $0x1a4] sm:$0xf0]  ;;  %v7664_v22 = vld [vmem:[%s14180_s1 + $0x60] sm:$0xf]  ;;  %v7705_v24 = vor.u32 %v9687_v15, %v7702_v16 }
  0x66   : > { %1422 = vmatpush.bf16.msra.mxu2 %v7697_v44  ;;  %v9786_v44 = vld [vmem:[%s14180_s1 + $0x3c4] sm:$0xf]  ;;  %v7813_v50 = vor.u32 %v9714_v42, %v7810_v43  ;;  %v7952_v26 = vld [vmem:[%s14180_s1 + $0x2a0] sm:$0xf]  ;;  %v7666_v29 = vld [vmem:[%s14180_s1 + $0x84] sm:$0xf0] }
  0x67   : > { %1435 = vmatpush.bf16.msra.mxu3 %v7985_v48  ;;  %1809 = vperm.xlu1 %10050, %v8208_v17   ;;  %v7772_v48 = vld [vmem:[%s14180_s1 + $0x138] sm:$0xf]  ;;  %v8101_v51 = vor.u32 %v9786_v44, %v8098_v45  ;;  %v9759_v17 = vld [vmem:[%s14180_s1 + $0x2ec] sm:$0xf]  ;;  %v9682_v23 = vld [vmem:[%s14180_s1 + $0x80] sm:$0xf0] }
  0x68   : > { %v9754_v27 = vld [vmem:[%s14180_s1 + $0x2c0] sm:$0xf0]  ;;  %v7954_v32 = vld [vmem:[%s14180_s1 + $0x2c4] sm:$0xf0]  ;;  %v7628_v36 = vld [vmem:[%s14180_s1 + $0x18] sm:$0xf] }
  0x69   : > { %1397 = vmatpush.bf16.msra.mxu0 %v7657_v57  ;;  %1410 = vmatpush.bf16.msra.mxu1 %v7945_v58  ;;  %v8062_v57 = vld [vmem:[%s14180_s1 + $0x39c] sm:$0xf0]  ;;  %v8197_v58 = vld [vmem:[%s14181_s2 + $0xb8] sm:$0xff]  ;;  %v9678_v28 = vld [vmem:[%s14180_s1 + $0x64] sm:$0xf] }
  0x6a   : > { %1423 = vmatpush.bf16.msra.mxu2 %v7661_v59  ;;  %v7773_v59 = vor.u32 %v9709_v49, %v7772_v48  ;;  %v8065_v0 = vor.u32 %v9777_v56, %v8062_v57  ;;  %v9750_v31 = vld [vmem:[%s14180_s1 + $0x2a4] sm:$0xf]  ;;  %v9673_v37 = vld [vmem:[%s14180_s1 + $0x38] sm:$0xf0]  ;;  %v7630_v45 = vld [vmem:[%s14180_s1 + $0x3c] sm:$0xf0] }
  0x6b   : > { %1436 = vmatpush.bf16.msra.mxu3 %v7949_v63  ;;  %v7777_v63 = vor.u32 %v9705_v54, %v7774_v55  ;;  %v7957_v40 = vor.u32 %v9750_v31, %v7954_v32  ;;  %v8209_v41 = vld [vmem:[%s14181_s2 + $0x118] sm:$0xff]  ;;  %v7629_v52 = vor.u32 %v9673_v37, %v7628_v36  ;;  %v8140_v61 = vld [vmem:[%s14180_s1 + $0x410] sm:$0xf]  ;;  %v9800_v62 = vld [vmem:[%s14180_s1 + $0x430] sm:$0xf0] }
  0x6c   : > { %1780 = vperm.xlu0 %10049, %v8205_v18   ;;  %1712 = vperm.xlu2 %10051, %v8197_v58   ;;  %v7990_v18 = vld [vmem:[%s14180_s1 + $0x30c] sm:$0xf0]  ;;  %v9745_v43 = vld [vmem:[%s14180_s1 + $0x278] sm:$0xf0]  ;;  %v7888_v48 = vld [vmem:[%s14180_s1 + $0x218] sm:$0xf]  ;;  %v8141_v1 = vor.u32 %v9800_v62, %v8140_v61 }
  0x6d   : > { %1398 = vmatpush.bf16.msra.mxu0 %v7621_v5  ;;  %1411 = vmatpush.bf16.msra.mxu1 %v7909_v9  ;;  %v9768_v5 = vld [vmem:[%s14180_s1 + $0x334] sm:$0xf]  ;;  %v7700_v9 = vld [vmem:[%s14180_s1 + $0xa8] sm:$0xf]  ;;  %v9669_v44 = vld [vmem:[%s14180_s1 + $0x1c] sm:$0xf] }
  0x6e   : > { %1424 = vmatpush.bf16.msra.mxu2 %v7625_v10  ;;  %v9691_v10 = vld [vmem:[%s14180_s1 + $0xc8] sm:$0xf0]  ;;  %v8029_v12 = vor.u32 %v9768_v5, %v8026_v6  ;;  %v9737_v49 = vld [vmem:[%s14180_s1 + $0x238] sm:$0xf0]  ;;  %v7633_v54 = vor.u32 %v9669_v44, %v7630_v45  ;;  %v7816_v3 = vld [vmem:[%s14180_s1 + $0x188] sm:$0xf] }
  0x6f   : > { %1437 = vmatpush.bf16.msra.mxu3 %v7913_v14  ;;  %v9763_v14 = vld [vmem:[%s14180_s1 + $0x308] sm:$0xf0]  ;;  %v7889_v57 = vor.u32 %v9737_v49, %v7888_v48  ;;  %v8104_v5 = vld [vmem:[%s14180_s1 + $0x3c8] sm:$0xf]  ;;  %v7924_v44 = vld [vmem:[%s14180_s1 + $0x260] sm:$0xf] }
  0x70   : > { %1399 = vmatmul.bf16.vlgmr.msra.gmra.mxu0 %v10662_v30  ;;  %1412 = vmatmul.bf16.vlgmr.msra.gmra.mxu1 %v10670_v34  ;;  %v9719_v4 = vld [vmem:[%s14180_s1 + $0x1a8] sm:$0xf0]  ;;  %v7672_v32 = vld [vmem:[%s14180_s1 + $0x68] sm:$0xf]  ;;  %v9746_v45 = vld [vmem:[%s14180_s1 + $0x280] sm:$0xf0] }
  0x71   : > { %1443 = vmatpush.bf16.msrb.mxu0 %v7881_v19  ;;  %1456 = vmatpush.bf16.msrb.mxu1 %v8169_v20  ;;  %v8204_v19 = vld [vmem:[%s14181_s2 + $0xf0] sm:$0xff]  ;;  %v7701_v20 = vor.u32 %v9691_v10, %v7700_v9  ;;  %v9791_v6 = vld [vmem:[%s14180_s1 + $0x3e8] sm:$0xf0]  ;;  %v7780_v9 = vld [vmem:[%s14180_s1 + $0x140] sm:$0xf] }
  0x72   : > { %1469 = vmatpush.bf16.msrb.mxu2 %v7885_v21  ;;  %1438 = vmatmul.bf16.vlgmr.msra.gmra.mxu3 %v10670_v34  ;;  %v7989_v21 = vor.u32 %v9763_v14, %v7988_v13  ;;  %v9710_v10 = vld [vmem:[%s14180_s1 + $0x160] sm:$0xf0]  ;;  %v9755_v36 = vld [vmem:[%s14180_s1 + $0x2c8] sm:$0xf0] }
  0x73   : > { %1482 = vmatpush.bf16.msrb.mxu3 %v8173_v25  ;;  %1425 = vmatmul.bf16.vlgmr.msra.gmra.mxu2 %v10662_v30  ;;  %v7993_v25 = vor.u32 %v9759_v17, %v7990_v18  ;;  %v7781_v15 = vor.u32 %v9710_v10, %v7780_v9  ;;  %v7744_v18 = vld [vmem:[%s14180_s1 + $0xf8] sm:$0xf] }
  0x74   : > { %1775 = vperm.xlu2 %10051, %v8204_v19   ;;  %v9701_v19 = vld [vmem:[%s14180_s1 + $0x118] sm:$0xf0] }
  0x75   : > { %1444 = vmatpush.bf16.msrb.mxu0 %v7845_v33  ;;  %1457 = vmatpush.bf16.msrb.mxu1 %v8133_v35  ;;  %v7665_v33 = vor.u32 %v9682_v23, %v7664_v22  ;;  %v7953_v35 = vor.u32 %v9754_v27, %v7952_v26  ;;  %v7745_v22 = vor.u32 %v9701_v19, %v7744_v18  ;;  %v7996_v26 = vld [vmem:[%s14180_s1 + $0x2f0] sm:$0xf]  ;;  %v9764_v27 = vld [vmem:[%s14180_s1 + $0x310] sm:$0xf0] }
  0x76   : > { %1470 = vmatpush.bf16.msrb.mxu2 %v7849_v38  ;;  %v7916_v38 = vld [vmem:[%s14180_s1 + $0x258] sm:$0xf]  ;;  %v7997_v31 = vor.u32 %v9764_v27, %v7996_v26 }
  0x77   : > { %1483 = vmatpush.bf16.msrb.mxu3 %v8137_v39  ;;  %v7669_v39 = vor.u32 %v9678_v28, %v7666_v29  ;;  %v7917_v53 = vor.u32 %v9745_v43, %v7916_v38  ;;  %v9674_v43 = vld [vmem:[%s14180_s1 + $0x40] sm:$0xf0] }
  0x79   : > { %1445 = vmatpush.bf16.msrb.mxu0 %v7809_v46  ;;  %1458 = vmatpush.bf16.msrb.mxu1 %v8097_v47  ;;  %v9741_v46 = vld [vmem:[%s14180_s1 + $0x25c] sm:$0xf]  ;;  %v7918_v47 = vld [vmem:[%s14180_s1 + $0x27c] sm:$0xf0] }
  0x7a   : > { %1471 = vmatpush.bf16.msrb.mxu2 %v7813_v50  ;;  %v8176_v50 = vld [vmem:[%s14180_s1 + $0x458] sm:$0xf]  ;;  %v7921_v55 = vor.u32 %v9741_v46, %v7918_v47  ;;  %v7925_v47 = vor.u32 %v9746_v45, %v7924_v44 }
  0x7b   : > { %1484 = vmatpush.bf16.msrb.mxu3 %v8101_v51  ;;  %v9809_v51 = vld [vmem:[%s14180_s1 + $0x478] sm:$0xf0] }
  0x7c   : > { %1814 = vperm.xlu2 %10051, %v8209_v41   ;;  %v8177_v58 = vor.u32 %v9809_v51, %v8176_v50  ;;  %v7636_v41 = vld [vmem:[%s14180_s1 + $0x20] sm:$0xf] }
  0x7d   : > { %1446 = vmatpush.bf16.msrb.mxu0 %v7773_v59  ;;  %1459 = vmatpush.bf16.msrb.mxu1 %v8061_v60  ;;  %v7852_v59 = vld [vmem:[%s14180_s1 + $0x1d0] sm:$0xf]  ;;  %v9728_v60 = vld [vmem:[%s14180_s1 + $0x1f0] sm:$0xf0]  ;;  %v7637_v46 = vor.u32 %v9674_v43, %v7636_v41 }
  0x7e   : > { %1472 = vmatpush.bf16.msrb.mxu2 %v7777_v63  ;;  %v11255_v63 = vpop.permute.xlu2 %1595 }
  0x7f   : > { %1485 = vmatpush.bf16.msrb.mxu3 %v8065_v0  ;;  %v7853_v0 = vor.u32 %v9728_v60, %v7852_v59 }
  0x81   : > { %1447 = vmatpush.bf16.msrb.mxu0 %v7737_v7  ;;  %1460 = vmatpush.bf16.msrb.mxu1 %v8025_v8  ;;  %v11212_v42 = vpop.permute.xlu0 %1527  ;;  %v11241_v56 = vpop.permute.xlu1 %1561  ;;  %v7817_v7 = vor.u32 %v9719_v4, %v7816_v3  ;;  %v8105_v8 = vor.u32 %v9791_v6, %v8104_v5 }
  0x82   : > { %1473 = vmatpush.bf16.msrb.mxu2 %v7741_v11  ;;  %v8068_v11 = vld [vmem:[%s14180_s1 + $0x380] sm:$0xf] }
  0x83   : > { %1486 = vmatpush.bf16.msrb.mxu3 %v8029_v12  ;;  %v9782_v12 = vld [vmem:[%s14180_s1 + $0x3a0] sm:$0xf0] }
  0x84   : > { %v8069_v16 = vor.u32 %v9782_v12, %v8068_v11 }
  0x85   : > { %1448 = vmatpush.bf16.msrb.mxu0 %v7701_v20  ;;  %1461 = vmatpush.bf16.msrb.mxu1 %v7989_v21  ;;  %v8032_v20 = vld [vmem:[%s14180_s1 + $0x338] sm:$0xf]  ;;  %v9773_v21 = vld [vmem:[%s14180_s1 + $0x358] sm:$0xf0] }
  0x86   : > { %1474 = vmatpush.bf16.msrb.mxu2 %v7705_v24  ;;  %v11289_v14 = vpop.permute.xlu2 %1600  ;;  %v8033_v23 = vor.u32 %v9773_v21, %v8032_v20  ;;  %v7708_v24 = vld [vmem:[%s14180_s1 + $0xb0] sm:$0xf] }
  0x87   : > { %1487 = vmatpush.bf16.msrb.mxu3 %v7993_v25  ;;  %v9692_v25 = vld [vmem:[%s14180_s1 + $0xd0] sm:$0xf0] }
  0x88   : > { %v7709_v29 = vor.u32 %v9692_v25, %v7708_v24 }
  0x89   : > { %1449 = vmatpush.bf16.msrb.mxu0 %v7665_v33  ;;  %1462 = vmatpush.bf16.msrb.mxu1 %v7953_v35  ;;  %v11287_v13 = vpop.permute.xlu1 %1566  ;;  %v9683_v33 = vld [vmem:[%s14180_s1 + $0x88] sm:$0xf0]  ;;  %v7960_v35 = vld [vmem:[%s14180_s1 + $0x2a8] sm:$0xf] }
  0x8a   : > { %1475 = vmatpush.bf16.msrb.mxu2 %v7669_v39  ;;  %v11257_v2 = vpop.permute.xlu0 %1532  ;;  %v7673_v39 = vor.u32 %v9683_v33, %v7672_v32 }
  0x8b   : > { %1488 = vmatpush.bf16.msrb.mxu3 %v7957_v40  ;;  %v7961_v40 = vor.u32 %v9755_v36, %v7960_v35 }
  0x8d   : > { %1450 = vmatpush.bf16.msrb.mxu0 %v7629_v52  ;;  %1463 = vmatpush.bf16.msrb.mxu1 %v7917_v53 }
  0x8e   : > { %1476 = vmatpush.bf16.msrb.mxu2 %v7633_v54  ;;  %v11331_v37 = vpop.permute.xlu2 %1663 }
  0x8f   : > { %1489 = vmatpush.bf16.msrb.mxu3 %v7921_v55 }
  0x90   : > { %1451 = vmatmul.bf16.vlgmr.msrb.gmra.mxu0 %v10662_v30  ;;  %1464 = vmatmul.bf16.vlgmr.msrb.gmra.mxu1 %v10670_v34 }
  0x91   : > { %1495 = vmatpush.bf16.msra.mxu0 %v7889_v57  ;;  %1508 = vmatpush.bf16.msra.mxu1 %v8177_v58  ;;  %v11317_v28 = vpop.permute.xlu1 %1634 }
  0x92   : > { %1477 = vmatmul.bf16.vlgmr.msrb.gmra.mxu2 %v10662_v30  ;;  %1490 = vmatmul.bf16.vlgmr.msrb.gmra.mxu3 %v10670_v34  ;;  %v11291_v17 = vpop.permute.xlu0 %1629 }
  0x95   : > { %1496 = vmatpush.bf16.msra.mxu0 %v7853_v0  ;;  %1509 = vmatpush.bf16.msra.mxu1 %v8141_v1 }
  0x96   : > { %v11349_v49 = vpop.permute.xlu2 %1702 }
  0x99   : > { %1497 = vmatpush.bf16.msra.mxu0 %v7817_v7  ;;  %1510 = vmatpush.bf16.msra.mxu1 %v8105_v8  ;;  %v11347_v48 = vpop.permute.xlu1 %1697 }
  0x9a   : > { %v11333_v38 = vpop.permute.xlu0 %1668 }
  0x9d   : > { %1498 = vmatpush.bf16.msra.mxu0 %v7781_v15  ;;  %1511 = vmatpush.bf16.msra.mxu1 %v8069_v16 }
  0x9e   : > { %v11357_v52 = vpop.permute.xlu2 %1765 }
  0xa1   : > { %1499 = vmatpush.bf16.msra.mxu0 %v7745_v22  ;;  %1512 = vmatpush.bf16.msra.mxu1 %v8033_v23  ;;  %v11355_v51 = vpop.permute.xlu1 %1736 }
  0xa2   : > { %v11351_v50 = vpop.permute.xlu0 %1731 }
  0xa5   : > { %1500 = vmatpush.bf16.msra.mxu0 %v7709_v29  ;;  %1513 = vmatpush.bf16.msra.mxu1 %v7997_v31 }
  0xa6   : > { %v11363_v59 = vpop.permute.xlu2 %1804 }
  0xa9   : > { %1501 = vmatpush.bf16.msra.mxu0 %v7673_v39  ;;  %1514 = vmatpush.bf16.msra.mxu1 %v7961_v40  ;;  %v11361_v57 = vpop.permute.xlu1 %1799 }
  0xaa   : > { %v11359_v53 = vpop.permute.xlu0 %1770 }
  0xad   : > { %1502 = vmatpush.bf16.msra.mxu0 %v7637_v46  ;;  %1515 = vmatpush.bf16.msra.mxu1 %v7925_v47 }
  0xae   : > { %v1572_v9 = vpop.permute.xlu2 %1571 }
  0xb0   : > { %1503 = vmatmul.bf16.vlgmr.msra.gmra.mxu0 %v10662_v30  ;;  %1516 = vmatmul.bf16.vlgmr.msra.gmra.mxu1 %v10670_v34  ;;  %v1296_v54 = vpop.f32.mrf.mxu0 }
  0xb1   : > { %v1309_v55 = vpop.f32.mrf.mxu1  ;;  %v1543_v4 = vpop.permute.xlu1 %1542 }
  0xb2   : > { %v1310_v58 = vadd.f32 %v1309_v55, %v1296_v54  ;;  %v1538_v60 = vpop.permute.xlu0 %1537 }
  0xb4   : > { %v1545_v61 = vperm.slane %v1310_v58, 0 }
  0xb6   : > { %v1546_v62 = vmul.f32 %v1545_v61, %v11212_v42  ;;  %v1547_v5 = vmul.f32 %v1545_v61, %v11257_v2  ;;  %v1548_v6 = vmul.f32 %v1545_v61, %v1538_v60  ;;  %v1549_v7 = vmul.f32 %v1545_v61, %v1543_v4  ;;  %v1611_v27 = vpop.permute.xlu2 %1610 }
  0xb7   : > { %v1322_v0 = vpop.f32.mrf.mxu2 }
  0xb8   : > { %v1298_v30 = vpop.f32.mrf.mxu0 }
  0xb9   : > { %v1311_v34 = vpop.f32.mrf.mxu1  ;;  %v1335_v1 = vpop.f32.mrf.mxu3 }
  0xba   : > { %v1336_v3 = vadd.f32 %v1335_v1, %v1322_v0  ;;  %v1577_v10 = vpop.permute.xlu0 %1576  ;;  %v1606_v2 = vpop.permute.xlu1 %1605 }
  0xbc   : > { %v1579_v8 = vperm.slane %v1336_v3, 0 }
  0xbe   : > { %v1580_v11 = vmul.f32 %v1579_v8, %v11241_v56  ;;  %v1581_v12 = vmul.f32 %v1579_v8, %v11287_v13  ;;  %v1582_v15 = vmul.f32 %v1579_v8, %v1572_v9  ;;  %v1583_v16 = vmul.f32 %v1579_v8, %v1577_v10 }
  0xbf   : > { %v1324_v42 = vpop.f32.mrf.mxu2 }
  0xc0   : > { %v1584_v18 = vadd.f32 %v1580_v11, %v1546_v62  ;;  %v1585_v19 = vadd.f32 %v1581_v12, %v1547_v5  ;;  %v1586_v20 = vadd.f32 %v1582_v15, %v1548_v6  ;;  %v1587_v21 = vadd.f32 %v1583_v16, %v1549_v7 }
  0xc1   : > { %v1337_v22 = vpop.f32.mrf.mxu3 }
  0xc2   : > { %v1645_v46 = vpop.permute.xlu1 %1644 }
  0xc6   : > { %v1640_v47 = vpop.permute.xlu0 %1639 }
  0xca   : > { %v1708_v16 = vpop.permute.xlu1 %1707 }
  0xcd   : > { %v1348_v23 = vpop.f32.mrf.mxu0  ;;  %v1361_v24 = vpop.f32.mrf.mxu1 }
  0xce   : > { %v1362_v25 = vadd.f32 %v1361_v24, %v1348_v23 }
  0xd0   : > { %v1613_v26 = vperm.slane %v1362_v25, 0 }
  0xd2   : > { %v1614_v29 = vmul.f32 %v1613_v26, %v11255_v63  ;;  %v1615_v56 = vmul.f32 %v1613_v26, %v11289_v14  ;;  %v1616_v31 = vmul.f32 %v1613_v26, %v1606_v2  ;;  %v1617_v13 = vmul.f32 %v1613_v26, %v1611_v27  ;;  %v1747_v26 = vpop.permute.xlu1 %1746 }
  0xd4   : > { %v1618_v33 = vadd.f32 %v1614_v29, %v1584_v18  ;;  %v1619_v35 = vadd.f32 %v1615_v56, %v1585_v19  ;;  %v1620_v36 = vadd.f32 %v1616_v31, %v1586_v20  ;;  %v1621_v39 = vadd.f32 %v1617_v13, %v1587_v21  ;;  %v1679_v19 = vpop.permute.xlu0 %1678 }
  0xd5   : > { %v1387_v40 = vpop.f32.mrf.mxu3  ;;  %v1350_v41 = vpop.f32.mrf.mxu0 }
  0xd6   : > { %v1374_v32 = vpop.f32.mrf.mxu2  ;;  %v1363_v44 = vpop.f32.mrf.mxu1 }
  0xd7   : > { %v1388_v43 = vadd.f32 %v1387_v40, %v1374_v32 }
  0xd9   : > { %v1647_v45 = vperm.slane %v1388_v43, 0 }
  0xdb   : > { %v1648_v54 = vmul.f32 %v1647_v45, %v11291_v17  ;;  %v1649_v63 = vmul.f32 %v1647_v45, %v11317_v28  ;;  %v1650_v55 = vmul.f32 %v1647_v45, %v1640_v47  ;;  %v1651_v14 = vmul.f32 %v1647_v45, %v1645_v46  ;;  %v1674_v28 = vpop.permute.xlu2 %1673 }
  0xdc   : > { %v1742_v13 = vpop.permute.xlu0 %1741 }
  0xdd   : > { %v1652_v58 = vadd.f32 %v1648_v54, %v1618_v33  ;;  %v1653_v60 = vadd.f32 %v1649_v63, %v1619_v35  ;;  %v1654_v61 = vadd.f32 %v1650_v55, %v1620_v36  ;;  %v11373_v62 = vadd.f32 %v1651_v14, %v1621_v39  ;;  %v1389_v0 = vpop.f32.mrf.mxu3 }
  0xde   : > { %v1376_v30 = vpop.f32.mrf.mxu2 }
  0xe3   : > { %v1713_v21 = vpop.permute.xlu2 %1712 }
  0xeb   : > { %v1776_v36 = vpop.permute.xlu2 %1775 }
  0xed   : > { %v1400_v34 = vpop.f32.mrf.mxu0  ;;  %v1413_v1 = vpop.f32.mrf.mxu1 }
  0xee   : > { %v1414_v20 = vadd.f32 %v1413_v1, %v1400_v34  ;;  %v1810_v1 = vpop.permute.xlu1 %1809 }
  0xf0   : > { %v1681_v23 = vperm.slane %v1414_v20, 0 }
  0xf2   : > { %v1683_v27 = vmul.f32 %v1681_v23, %v11333_v38  ;;  %v1684_v29 = vmul.f32 %v1681_v23, %v1674_v28  ;;  %v1682_v31 = vmul.f32 %v1681_v23, %v11331_v37  ;;  %v1685_v45 = vmul.f32 %v1681_v23, %v1679_v19 }
  0xf4   : > { %v1688_v40 = vadd.f32 %v1684_v29, %v1654_v61  ;;  %v1687_v43 = vadd.f32 %v1683_v27, %v1653_v60  ;;  %v1686_v46 = vadd.f32 %v1682_v31, %v1652_v58 }
  0xf5   : > { %v1439_v4 = vpop.f32.mrf.mxu3  ;;  %v1402_v5 = vpop.f32.mrf.mxu0 }
  0xf6   : > { %v1426_v3 = vpop.f32.mrf.mxu2  ;;  %v1415_v6 = vpop.f32.mrf.mxu1 }
  0xf7   : > { %v1440_v22 = vadd.f32 %v1439_v4, %v1426_v3 }
  0xf9   : > { %v1715_v2 = vperm.slane %v1440_v22, 0 }
  0xfb   : > { %v1717_v32 = vmul.f32 %v1715_v2, %v11349_v49  ;;  %v1718_v33 = vmul.f32 %v1715_v2, %v1708_v16  ;;  %v1716_v39 = vmul.f32 %v1715_v2, %v11347_v48  ;;  %v1719_v61 = vmul.f32 %v1715_v2, %v1713_v21 }
  0xfc   : > { %v10245_v21 = vmov 64.0  }
  0xfd   : > { %v1441_v8 = vpop.f32.mrf.mxu3  ;;  %v1722_v37 = vadd.f32 %v1718_v33, %v1688_v40  ;;  %v1721_v55 = vadd.f32 %v1717_v32, %v1687_v43  ;;  %v1720_v30 = vadd.f32 %v1716_v39, %v1686_v46  ;;  %10052 = vrcp.f32 %v10245_v21 }
  0xfe   : > { %v1428_v7 = vpop.f32.mrf.mxu2  ;;  %v1781_v8 = vpop.permute.xlu0 %1780 }
 0x103   : > { %v10053_v22 = vpop.eup %10052 }
 0x104   : > { %v1840_v23 = vmul.f32 64.0, %v10053_v22  ;;  %vm1844_vm1 = vweird.f32 %v10053_v22 }
 0x10d   : > { %v1452_v17 = vpop.f32.mrf.mxu0  ;;  %v1465_v9 = vpop.f32.mrf.mxu1 }
 0x10e   : > { %v1466_v24 = vadd.f32 %v1465_v9, %v1452_v17  ;;  %v1815_v17 = vpop.permute.xlu2 %1814 }
 0x110   : > { %v1749_v56 = vperm.slane %v1466_v24, 0  ;;  %v1841_v24 = vsub.f32 1.0, %v1840_v23  ;;  %v8256_v23 = vld [vmem:[%s14182_s3 + $0x50] sm:$0xf] }
 0x112   : > { %v1752_v41 = vmul.f32 %v1749_v56, %v1742_v13  ;;  %v1751_v44 = vmul.f32 %v1749_v56, %v11355_v51  ;;  %v1750_v38 = vmul.f32 %v1749_v56, %v11351_v50  ;;  %v1689_v50 = vadd.f32 %v1685_v45, %v11373_v62 }
 0x113   : > { %v1753_v4 = vmul.f32 %v1749_v56, %v1747_v26  ;;  %v1842_v2 = vmul.f32 %v10053_v22, %v1841_v24  ;;  %v9824_v24 = vld [vmem:[%s14182_s3 + $0x70] sm:$0xf0] }
 0x114   : > { %v1756_v0 = vadd.f32 %v1752_v41, %v1722_v37  ;;  %v1755_v60 = vadd.f32 %v1751_v44, %v1721_v55  ;;  %v1754_v51 = vadd.f32 %v1750_v38, %v1720_v30  ;;  %v9841_v55 = vld [vmem:[%s14182_s3 + $0xf8] sm:$0xf0]  ;;  %v8322_v30 = vld [vmem:[%s14182_s3 + $0xfc] sm:$0xf0] }
 0x115   : > { %v1478_v10 = vpop.f32.mrf.mxu2  ;;  %v1491_v11 = vpop.f32.mrf.mxu3 }
 0x116   : > { %v1454_v12 = vpop.f32.mrf.mxu0  ;;  %v1467_v15 = vpop.f32.mrf.mxu1  ;;  %v1492_v25 = vadd.f32 %v1491_v11, %v1478_v10 }
 0x118   : > { %v1783_v35 = vperm.slane %v1492_v25, 0  ;;  %v1843_v25 = vadd.f32 %v10053_v22, %v1842_v2  ;;  %v8257_v2 = vor.u32 %v9824_v24, %v8256_v23  ;;  %v9840_v23 = vld [vmem:[%s14182_s3 + $0xf4] sm:$0xf]  ;;  %v8346_v24 = vld [vmem:[%s14182_s3 + $0x114] sm:$0xf0] }
 0x11a   : > { %v1786_v63 = vmul.f32 %v1783_v35, %v1776_v36  ;;  %v1785_v49 = vmul.f32 %v1783_v35, %v11359_v53  ;;  %v1784_v48 = vmul.f32 %v1783_v35, %v11357_v52  ;;  %v1723_v52 = vadd.f32 %v1719_v61, %v1689_v50  ;;  %v9842_v61 = vld [vmem:[%s14182_s3 + $0x100] sm:$0xf0]  ;;  %v9828_v50 = vld [vmem:[%s14182_s3 + $0x94] sm:$0xf] }
 0x11b   : > { %v1787_v11 = vmul.f32 %v1783_v35, %v1781_v8  ;;  %v11390_v26 = vsel %vm1844_vm1, %v10053_v22, %v1843_v25  ;;  %v9820_v25 = vld [vmem:[%s14182_s3 + $0x54] sm:$0xf] }
 0x11c   : > { %v1790_v58 = vadd.f32 %v1786_v63, %v1756_v0  ;;  %v1789_v3 = vadd.f32 %v1785_v49, %v1755_v60  ;;  %v1788_v7 = vadd.f32 %v1784_v48, %v1754_v51  ;;  %v1757_v16 = vadd.f32 %v1753_v4, %v1723_v52  ;;  %v8320_v63 = vld [vmem:[%s14182_s3 + $0xd8] sm:$0xf]  ;;  %v9837_v49 = vld [vmem:[%s14182_s3 + $0xdc] sm:$0xf]  ;;  %v8328_v48 = vld [vmem:[%s14182_s3 + $0xe0] sm:$0xf] }
 0x11d   : > { %v1480_v42 = vpop.f32.mrf.mxu2  ;;  %v1493_v18 = vpop.f32.mrf.mxu3  ;;  %v8325_v0 = vor.u32 %v9837_v49, %v8322_v30  ;;  %v8329_v60 = vor.u32 %v9842_v61, %v8328_v48  ;;  %v8330_v51 = vld [vmem:[%s14182_s3 + $0x104] sm:$0xf0] }
 0x11f   : > { %2197 = vmatpush.bf16.msra.mxu3 %v8325_v0  ;;  %2216 = vmatpush.bf16.msrb.mxu0 %v8329_v60 }
 0x12d   : > { %v1504_v47 = vpop.f32.mrf.mxu0  ;;  %v1517_v54 = vpop.f32.mrf.mxu1 }
 0x12e   : > { %v1518_v14 = vadd.f32 %v1517_v54, %v1504_v47 }
 0x130   : > { %v1817_v34 = vperm.slane %v1518_v14, 0  ;;  %v8321_v14 = vor.u32 %v9841_v55, %v8320_v63 }
 0x132   : > { %v1820_v5 = vmul.f32 %v1817_v34, %v1810_v1  ;;  %v1819_v6 = vmul.f32 %v1817_v34, %v11363_v59  ;;  %v1818_v53 = vmul.f32 %v1817_v34, %v11361_v57  ;;  %v1821_v18 = vmul.f32 %v1817_v34, %v1815_v17  ;;  %v9838_v34 = vld [vmem:[%s14182_s3 + $0xe4] sm:$0xf]  ;;  %2178 = vmatpush.bf16.msra.mxu2 %v8321_v14 }
 0x133   : > { %v1791_v57 = vadd.f32 %v1787_v11, %v1757_v16  ;;  %v8333_v1 = vor.u32 %v9838_v34, %v8330_v51 }
 0x134   : > { %v1824_v9 = vadd.f32 %v1820_v5, %v1790_v58  ;;  %v1823_v28 = vadd.f32 %v1819_v6, %v1789_v3  ;;  %v1822_v10 = vadd.f32 %v1818_v53, %v1788_v7  ;;  %v8284_v58 = vld [vmem:[%s14182_s3 + $0x90] sm:$0xf]  ;;  %v9832_v3 = vld [vmem:[%s14182_s3 + $0xb0] sm:$0xf0]  ;;  %v8286_v5 = vld [vmem:[%s14182_s3 + $0xb4] sm:$0xf0] }
 0x135   : > { %v1506_v12 = vpop.f32.mrf.mxu0  ;;  %v1519_v15 = vpop.f32.mrf.mxu1  ;;  %v1825_v19 = vadd.f32 %v1821_v18, %v1791_v57  ;;  %2235 = vmatpush.bf16.msrb.mxu1 %v8333_v1  ;;  %v8285_v4 = vor.u32 %v9832_v3, %v8284_v58  ;;  %v8292_v6 = vld [vmem:[%s14182_s3 + $0x98] sm:$0xf]  ;;  %v9833_v7 = vld [vmem:[%s14182_s3 + $0xb8] sm:$0xf0]  ;;  %v8289_v52 = vor.u32 %v9828_v50, %v8286_v5 }
 0x136   : > { %v1833_v62 = vsel %vm1826_vm0, %v1824_v9, 0.0  ;;  %v1830_v42 = vsel %vm1826_vm0, %v1823_v28, 0.0  ;;  %v1827_v59 = vsel %vm1826_vm0, %v1822_v10, 0.0  ;;  %v8293_v17 = vor.u32 %v9833_v7, %v8292_v6 }
 0x137   : > { %1834 = vadd.xlane.f32.xlu2 %v1833_v62  ;;  %1831 = vadd.xlane.f32.xlu1 %v1830_v42  ;;  %v1836_v20 = vsel %vm1826_vm0, %v1825_v19, 0.0  ;;  %v8248_v62 = vld [vmem:[%s14182_s3 + $0x48] sm:$0xf]  ;;  %v9823_v42 = vld [vmem:[%s14182_s3 + $0x68] sm:$0xf0] }
 0x138   : > { %1828 = vadd.xlane.f32.xlu0 %v1827_v59  ;;  %2179 = vmatpush.bf16.msra.mxu2 %v8285_v4  ;;  %v9819_v59 = vld [vmem:[%s14182_s3 + $0x4c] sm:$0xf] }
 0x139   : > { %2198 = vmatpush.bf16.msra.mxu3 %v8289_v52  ;;  %2217 = vmatpush.bf16.msrb.mxu0 %v8293_v17 }
 0x13d   : > { %2218 = vmatpush.bf16.msrb.mxu0 %v8257_v2 }
 0x13f   : > { %1837 = vadd.xlane.f32.xlu2 %v1836_v20  ;;  %v8250_v20 = vld [vmem:[%s14182_s3 + $0x6c] sm:$0xf0] }
 0x140   : > { %v8253_v22 = vor.u32 %v9819_v59, %v8250_v20 }
 0x142   : > { %2199 = vmatpush.bf16.msra.mxu3 %v8253_v22  ;;  %v9844_v22 = vld [vmem:[%s14182_s3 + $0x110] sm:$0xf0] }
 0x1aa   : > { %v1835_v27 = vpop.xlane.xlu2 %1834  ;;  %v1832_v29 = vpop.xlane.xlu1 %1831 }
 0x1ab   : > { %v1848_v56 = vmul.f32 %v11390_v26, %v1835_v27  ;;  %v1847_v31 = vmul.f32 %v11390_v26, %v1832_v29  ;;  %v1829_v13 = vpop.xlane.xlu0 %1828  ;;  %v8258_v27 = vld [vmem:[%s14182_s3 + $0x74] sm:$0xf0] }
 0x1ac   : > { %v1846_v32 = vmul.f32 %v11390_v26, %v1829_v13  ;;  %v8261_v29 = vor.u32 %v9820_v25, %v8258_v27  ;;  %v9810_v13 = vld [vmem:[%s14182_s3 + $0x4] sm:$0xf]  ;;  %v8349_v25 = vor.u32 %v9840_v23, %v8346_v24  ;;  %v8300_v27 = vld [vmem:[%s14182_s3 + $0xa0] sm:$0xf]  ;;  %v9845_v23 = vld [vmem:[%s14182_s3 + $0x118] sm:$0xf0] }
 0x1ad   : > { %v11395_v33 = vsub.f32 %v1824_v9, %v1848_v56  ;;  %v11397_v35 = vsub.f32 %v1823_v28, %v1847_v31  ;;  %v9829_v9 = vld [vmem:[%s14182_s3 + $0x9c] sm:$0xf]  ;;  %v8294_v28 = vld [vmem:[%s14182_s3 + $0xbc] sm:$0xf0]  ;;  %v9814_v31 = vld [vmem:[%s14182_s3 + $0x20] sm:$0xf0] }
 0x1ae   : > { %v11399_v36 = vsub.f32 %v1822_v10, %v1846_v32  ;;  %v8297_v15 = vor.u32 %v9829_v9, %v8294_v28  ;;  %v8212_v56 = vld [vmem:[%s14182_s3] sm:$0xf] }
 0x1af   : > { %v1856_v39 = vmul.f32 %v11395_v33, %v11395_v33  ;;  %v1855_v40 = vmul.f32 %v11397_v35, %v11397_v35  ;;  %v8213_v32 = vor.u32 %v9814_v31, %v8212_v56  ;;  %v9830_v56 = vld [vmem:[%s14182_s3 + $0xa4] sm:$0xf] }
 0x1b0   : > { %v1854_v41 = vmul.f32 %v11399_v36, %v11399_v36  ;;  %2236 = vmatpush.bf16.msrb.mxu1 %v8297_v15 }
 0x1b1   : > { %v1864_v43 = vsel %vm1826_vm0, %v1856_v39, 0.0  ;;  %v1861_v44 = vsel %vm1826_vm0, %v1855_v40, 0.0  ;;  %v8214_v39 = vld [vmem:[%s14182_s3 + $0x24] sm:$0xf0] }
 0x1b2   : > { %1865 = vadd.xlane.f32.xlu2 %v1864_v43  ;;  %v1838_v45 = vpop.xlane.xlu2 %1837  ;;  %1862 = vadd.xlane.f32.xlu1 %v1861_v44  ;;  %v1858_v46 = vsel %vm1826_vm0, %v1854_v41, 0.0  ;;  %v8220_v40 = vld [vmem:[%s14182_s3 + $0x8] sm:$0xf]  ;;  %v9815_v41 = vld [vmem:[%s14182_s3 + $0x28] sm:$0xf0]  ;;  %v8217_v43 = vor.u32 %v9810_v13, %v8214_v39 }
 0x1b3   : > { %v1849_v38 = vmul.f32 %v11390_v26, %v1838_v45  ;;  %1859 = vadd.xlane.f32.xlu0 %v1858_v46  ;;  %v8221_v44 = vor.u32 %v9815_v41, %v8220_v40  ;;  %v9811_v45 = vld [vmem:[%s14182_s3 + $0xc] sm:$0xf]  ;;  %v8222_v46 = vld [vmem:[%s14182_s3 + $0x2c] sm:$0xf0]  ;;  %v8302_v39 = vld [vmem:[%s14182_s3 + $0xc4] sm:$0xf0] }
 0x1b4   : > { %2237 = vmatpush.bf16.msrb.mxu1 %v8261_v29  ;;  %2200 = vmatpush.bf16.msra.mxu3 %v8217_v43  ;;  %v9834_v29 = vld [vmem:[%s14182_s3 + $0xc0] sm:$0xf0]  ;;  %v8308_v40 = vld [vmem:[%s14182_s3 + $0xa8] sm:$0xf]  ;;  %v9835_v41 = vld [vmem:[%s14182_s3 + $0xc8] sm:$0xf0]  ;;  %v8305_v43 = vor.u32 %v9830_v56, %v8302_v39 }
 0x1b5   : > { %v11411_v47 = vsub.f32 %v1825_v19, %v1849_v38  ;;  %v8249_v19 = vor.u32 %v9823_v42, %v8248_v62  ;;  %2219 = vmatpush.bf16.msrb.mxu0 %v8221_v44  ;;  %v9843_v62 = vld [vmem:[%s14182_s3 + $0x108] sm:$0xf0]  ;;  %v8309_v44 = vor.u32 %v9835_v41, %v8308_v40 }
 0x1b6   : > { %v9827_v56 = vld [vmem:[%s14182_s3 + $0x88] sm:$0xf0] }
 0x1b7   : > { %v1857_v54 = vmul.f32 %v11411_v47, %v11411_v47  ;;  %2180 = vmatpush.bf16.msra.mxu2 %v8249_v19  ;;  %v8344_v19 = vld [vmem:[%s14182_s3 + $0xf0] sm:$0xf] }
 0x1b8   : > { %v8345_v2 = vor.u32 %v9844_v22, %v8344_v19  ;;  %v8352_v22 = vld [vmem:[%s14182_s3 + $0xf8] sm:$0xf] }
 0x1b9   : > { %v1867_v37 = vsel %vm1826_vm0, %v1857_v54, 0.0  ;;  %v8225_v54 = vor.u32 %v9811_v45, %v8222_v46  ;;  %v9831_v45 = vld [vmem:[%s14182_s3 + $0xac] sm:$0xf]  ;;  %v8310_v46 = vld [vmem:[%s14182_s3 + $0xcc] sm:$0xf0]  ;;  %v8353_v24 = vor.u32 %v9845_v23, %v8352_v22 }
 0x1ba   : > { %2292 = vmatpush.bf16.msra.mxu0 %v8345_v2  ;;  %v8316_v2 = vld [vmem:[%s14182_s3 + $0xb0] sm:$0xf]  ;;  %v9855_v22 = vld [vmem:[%s14183_s4 + $0x48] sm:$0xff] }
 0x1bb   : > { %1868 = vadd.xlane.f32.xlu0 %v1867_v37  ;;  %2181 = vmatpush.bf16.msra.mxu2 %v8213_v32  ;;  %v8301_v32 = vor.u32 %v9834_v29, %v8300_v27  ;;  %v8280_v29 = vld [vmem:[%s14182_s3 + $0x68] sm:$0xf] }
 0x1bc   : > { %2238 = vmatpush.bf16.msrb.mxu1 %v8225_v54  ;;  %v8313_v54 = vor.u32 %v9831_v45, %v8310_v46 }
 0x1be   : > { %2293 = vmatpush.bf16.msra.mxu0 %v8309_v44 }
 0x1c0   : > { %2311 = vmatpush.bf16.msra.mxu1 %v8349_v25  ;;  %v9836_v25 = vld [vmem:[%s14182_s3 + $0xd0] sm:$0xf0] }
 0x1c1   : > { %v8317_v27 = vor.u32 %v9836_v25, %v8316_v2  ;;  %v9852_v2 = vld [vmem:[%s14183_s4 + $0x30] sm:$0xff]  ;;  %v9862_v25 = vld [vmem:[%s14183_s4 + $0x80] sm:$0xff] }
 0x1c4   : > { %2312 = vmatpush.bf16.msra.mxu1 %v8313_v54 }
 0x225   : > { %v1866_v53 = vpop.xlane.xlu2 %1865  ;;  %v1863_v8 = vpop.xlane.xlu1 %1862 }
 0x226   : > { %v1872_v10 = vmul.f32 %v1866_v53, %v11390_v26  ;;  %v1871_v11 = vmul.f32 %v1863_v8, %v11390_v26  ;;  %v1860_v12 = vpop.xlane.xlu0 %1859 }
 0x227   : > { %v1870_v16 = vmul.f32 %v1860_v12, %v11390_v26 }
 0x228   : > { %v11476_v18 = vadd.f32 1e-05, %v1872_v10  ;;  %v1875_v57 = vadd.f32 1e-05, %v1871_v11  ;;  %v9817_v11 = vld [vmem:[%s14182_s3 + $0x38] sm:$0xf0] }
 0x229   : > { %v1874_v21 = vadd.f32 1e-05, %v1870_v16 }
 0x22a   : > { %10054 = vrsqrt.f32 %v11476_v18  ;;  %vm1894_vm4 = vweird.f32 %v1875_v57  ;;  %vm1904_vm10 = vweird.f32 %v11476_v18 }
 0x22b   : > { %10056 = vrsqrt.f32 %v1875_v57  ;;  %vm1884_vm6 = vweird.f32 %v1874_v21 }
 0x22c   : > { %10058 = vrsqrt.f32 %v1874_v21 }
 0x22e   : > { %v1869_v38 = vpop.xlane.xlu0 %1868 }
 0x22f   : > { %v1873_v37 = vmul.f32 %v1869_v38, %v11390_v26  ;;  %v8264_v38 = vld [vmem:[%s14182_s3 + $0x58] sm:$0xf] }
 0x230   : > { %v11519_v63 = vpop.eup %10054 }
 0x231   : > { %v10057_v55 = vpop.eup %10056  ;;  %v1899_v49 = vmul.f32 %v11519_v63, %v11476_v18  ;;  %v1877_v14 = vadd.f32 1e-05, %v1873_v37  ;;  %vm1905_vm7 = vweird.f32 %v11519_v63  ;;  %v9839_v18 = vld [vmem:[%s14182_s3 + $0xec] sm:$0xf]  ;;  %v9821_v37 = vld [vmem:[%s14182_s3 + $0x5c] sm:$0xf] }
 0x232   : > { %v10059_v30 = vpop.eup %10058  ;;  %v1889_v48 = vmul.f32 %v10057_v55, %v1875_v57  ;;  %vm1895_vm2 = vweird.f32 %v10057_v55  ;;  %vm11533_vm11 = vmor %vm1904_vm10, %vm1905_vm7  ;;  %v8338_v57 = vld [vmem:[%s14182_s3 + $0x10c] sm:$0xf0] }
 0x233   : > { %v1900_v61 = vmul.f32 %v11519_v63, %v1899_v49  ;;  %v1879_v0 = vmul.f32 %v10059_v30, %v1874_v21  ;;  %10060 = vrsqrt.f32 %v1877_v14  ;;  %vm1885_vm3 = vweird.f32 %v10059_v30  ;;  %vm1896_vm5 = vmor %vm1894_vm4, %vm1895_vm2 }
 0x234   : > { %v1890_v60 = vmul.f32 %v10057_v55, %v1889_v48  ;;  %vm1886_vm8 = vmor %vm1884_vm6, %vm1885_vm3  ;;  %vm1914_vm12 = vweird.f32 %v1877_v14  ;;  %v8341_v21 = vor.u32 %v9839_v18, %v8338_v57  ;;  %v9826_v48 = vld [vmem:[%s14182_s3 + $0x80] sm:$0xf0] }
 0x235   : > { %v1901_v34 = vmul.f32 0.5, %v1900_v61  ;;  %v1880_v51 = vmul.f32 %v10059_v30, %v1879_v0 }
 0x236   : > { %v1891_v26 = vmul.f32 0.5, %v1890_v60  ;;  %2273 = vmatpush.bf16.msrb.mxu3 %v8341_v21 }
 0x237   : > { %v1881_v1 = vmul.f32 0.5, %v1880_v51  ;;  %v1902_v50 = vsub.f32 1.5, %v1901_v34  ;;  %v9822_v51 = vld [vmem:[%s14182_s3 + $0x64] sm:$0xf] }
 0x238   : > { %v1892_v58 = vsub.f32 1.5, %v1891_v26  ;;  %v8274_v26 = vld [vmem:[%s14182_s3 + $0x84] sm:$0xf0] }
 0x239   : > { %v10061_v3 = vpop.eup %10060  ;;  %v1882_v4 = vsub.f32 1.5, %v1881_v1  ;;  %v1903_v52 = vmul.f32 %v11519_v63, %v1902_v50  ;;  %v8228_v50 = vld [vmem:[%s14182_s3 + $0x10] sm:$0xf] }
 0x23a   : > { %v1893_v5 = vmul.f32 %v10057_v55, %v1892_v58  ;;  %v1909_v6 = vmul.f32 %v10061_v3, %v1877_v14  ;;  %vm1915_vm9 = vweird.f32 %v10061_v3  ;;  %2274 = vmatpush.bf16.msrb.mxu3 %v8305_v43 }
 0x23b   : > { %v1883_v7 = vmul.f32 %v10059_v30, %v1882_v4  ;;  %vm11539_vm13 = vmor %vm1914_vm12, %vm1915_vm9  ;;  %v1907_v42 = vsel %vm11533_vm11, %v11519_v63, %v1903_v52  ;;  %v8266_v63 = vld [vmem:[%s14182_s3 + $0x7c] sm:$0xf0]  ;;  %v9816_v4 = vld [vmem:[%s14182_s3 + $0x30] sm:$0xf0] }
 0x23c   : > { %v1897_v53 = vsel %vm1896_vm5, %v10057_v55, %v1893_v5  ;;  %v1910_v8 = vmul.f32 %v10061_v3, %v1909_v6  ;;  %v11580_v31 = vmul.f32 %v1907_v42, %v11395_v33  ;;  %v8269_v34 = vor.u32 %v9821_v37, %v8266_v63  ;;  %v9812_v6 = vld [vmem:[%s14182_s3 + $0x14] sm:$0xf]  ;;  %v8236_v52 = vld [vmem:[%s14182_s3 + $0x18] sm:$0xf] }
 0x23d   : > { %v11527_v17 = vmul.f32 %v1897_v53, %v11397_v35  ;;  %v1887_v9 = vsel %vm1886_vm8, %v10059_v30, %v1883_v7  ;;  %v8272_v30 = vld [vmem:[%s14182_s3 + $0x60] sm:$0xf]  ;;  %v8230_v7 = vld [vmem:[%s14182_s3 + $0x34] sm:$0xf0] }
 0x23e   : > { %v11531_v28 = vmul.f32 %v1887_v9, %v11399_v36  ;;  %v1911_v10 = vmul.f32 0.5, %v1910_v8  ;;  %v8336_v36 = vld [vmem:[%s14182_s3 + $0xe8] sm:$0xf]  ;;  %v1924_v0 = vmul.f32 0.5, %v11580_v31  ;;  %v8273_v58 = vor.u32 %v9826_v48, %v8272_v30  ;;  %2275 = vmatpush.bf16.msrb.mxu3 %v8269_v34 }
 0x23f   : > { %v1923_v12 = vmul.f32 0.5, %v11527_v17  ;;  %v8337_v59 = vor.u32 %v9843_v62, %v8336_v36  ;;  %v8229_v8 = vor.u32 %v9816_v4, %v8228_v50  ;;  %v9853_v50 = vld [vmem:[%s14183_s4 + $0x38] sm:$0xff] }
 0x240   : > { %v1922_v15 = vmul.f32 0.5, %v11531_v28  ;;  %v1912_v16 = vsub.f32 1.5, %v1911_v10  ;;  %v8233_v10 = vor.u32 %v9812_v6, %v8230_v7  ;;  %2294 = vmatpush.bf16.msra.mxu0 %v8273_v58 }
 0x241   : > { %10062 = vtanh.f32 %v1923_v12  ;;  %2254 = vmatpush.bf16.msrb.mxu2 %v8337_v59  ;;  %v9813_v12 = vld [vmem:[%s14182_s3 + $0x1c] sm:$0xf] }
 0x242   : > { %10064 = vtanh.f32 %v1922_v15  ;;  %v1913_v20 = vmul.f32 %v10061_v3, %v1912_v16  ;;  %v8238_v15 = vld [vmem:[%s14182_s3 + $0x3c] sm:$0xf0]  ;;  %2276 = vmatpush.bf16.msrb.mxu3 %v8233_v10 }
 0x243   : > { %v8241_v36 = vor.u32 %v9813_v12, %v8238_v15  ;;  %v9854_v10 = vld [vmem:[%s14183_s4 + $0x40] sm:$0xff]  ;;  %v9851_v15 = vld [vmem:[%s14183_s4 + $0x28] sm:$0xff] }
 0x244   : > { %v1917_v13 = vsel %vm11539_vm13, %v10061_v3, %v1913_v20  ;;  %v8277_v3 = vor.u32 %v9822_v51, %v8274_v26 }
 0x245   : > { %v11594_v33 = vmul.f32 %v1917_v13, %v11411_v47  ;;  %v9825_v47 = vld [vmem:[%s14182_s3 + $0x78] sm:$0xf0]  ;;  %2255 = vmatpush.bf16.msrb.mxu2 %v8301_v32  ;;  %v8244_v13 = vld [vmem:[%s14182_s3 + $0x20] sm:$0xf]  ;;  %v9818_v32 = vld [vmem:[%s14182_s3 + $0x40] sm:$0xf0] }
 0x246   : > { %v8265_v14 = vor.u32 %v9825_v47, %v8264_v38  ;;  %2313 = vmatpush.bf16.msra.mxu1 %v8277_v3  ;;  %v8245_v39 = vor.u32 %v9818_v32, %v8244_v13  ;;  %v9850_v3 = vld [vmem:[%s14183_s4 + $0x20] sm:$0xff]  ;;  %v9863_v32 = vld [vmem:[%s14183_s4 + $0x88] sm:$0xff] }
 0x247   : > { %v10063_v55 = vpop.eup %10062  ;;  %v1925_v49 = vmul.f32 0.5, %v11594_v33  ;;  %v9846_v13 = vld [vmem:[%s14183_s4] sm:$0xff] }
 0x248   : > { %v10065_v61 = vpop.eup %10064  ;;  %v1931_v60 = vadd.f32 1.0, %v10063_v55 }
 0x249   : > { %v1930_v1 = vadd.f32 1.0, %v10065_v61  ;;  %10066 = vtanh.f32 %v1925_v49  ;;  %2256 = vmatpush.bf16.msrb.mxu2 %v8265_v14 }
 0x24a   : > { %v1935_v5 = vmul.f32 0.5, %v1931_v60  ;;  %10068 = vtanh.f32 %v1924_v0  ;;  %2314 = vmatpush.bf16.msra.mxu1 %v8241_v36 }
 0x24b   : > { %v1934_v53 = vmul.f32 0.5, %v1930_v1 }
 0x24c   : > { %v1939_v9 = vmul.f32 %v1935_v5, %v11527_v17  ;;  %v8237_v17 = vor.u32 %v9817_v11, %v8236_v52 }
 0x24d   : > { %v1938_v16 = vmul.f32 %v1934_v53, %v11531_v28  ;;  %2257 = vmatpush.bf16.msrb.mxu2 %v8229_v8  ;;  %v9858_v8 = vld [vmem:[%s14183_s4 + $0x60] sm:$0xff] }
 0x24e   : > { %2295 = vmatpush.bf16.msra.mxu0 %v8237_v17 }
 0x24f   : > { %v1942_v35 = vpack.c.bf16 %v1939_v9, %v1938_v16  ;;  %v10067_v62 = vpop.eup %10066 }
 0x250   : > { %v10069_v42 = vpop.eup %10068  ;;  %v1933_v59 = vadd.f32 1.0, %v10067_v62 }
 0x251   : > { %8354 = vmatmul.msk.bf16.vlgmr.msra.gmra.mxu2 %vm1826_vm0, %v1942_v35  ;;  %8356 = vmatmul.msk.bf16.vlgmr.msra.gmra.mxu3 %vm1826_vm0, %v1942_v35  ;;  %v1932_v28 = vadd.f32 1.0, %v10069_v42 }
 0x252   : > { %8358 = vmatmul.msk.bf16.vlgmr.msrb.gmra.mxu0 %vm1826_vm0, %v1942_v35  ;;  %8360 = vmatmul.msk.bf16.vlgmr.msrb.gmra.mxu1 %vm1826_vm0, %v1942_v35  ;;  %v1937_v18 = vmul.f32 0.5, %v1933_v59  ;;  %v9859_v59 = vld [vmem:[%s14183_s4 + $0x68] sm:$0xff] }
 0x253   : > { %v1936_v57 = vmul.f32 0.5, %v1932_v28  ;;  %2330 = vmatpush.bf16.msra.mxu2 %v8353_v24 }
 0x254   : > { %v1941_v19 = vmul.f32 %v1937_v18, %v11594_v33 }
 0x255   : > { %v1940_v20 = vmul.f32 %v1936_v57, %v11580_v31  ;;  %v8281_v31 = vor.u32 %v9827_v56, %v8280_v29  ;;  %v9860_v29 = vld [vmem:[%s14183_s4 + $0x70] sm:$0xff] }
 0x257   : > { %v1943_v21 = vpack.c.bf16 %v1941_v19, %v1940_v20  ;;  %2331 = vmatpush.bf16.msra.mxu2 %v8317_v27 }
 0x25b   : > { %2332 = vmatpush.bf16.msra.mxu2 %v8281_v31  ;;  %v9856_v31 = vld [vmem:[%s14183_s4 + $0x50] sm:$0xff] }
 0x25f   : > { %2333 = vmatpush.bf16.msra.mxu2 %v8245_v39 }
 0x261   : > { %8355 = vmatmul.msk.bf16.gmra.mxu2 %vm1826_vm0, %v1943_v21  ;;  %8357 = vmatmul.msk.bf16.gmra.mxu3 %vm1826_vm0, %v1943_v21 }
 0x262   : > { %8359 = vmatmul.msk.bf16.gmra.mxu0 %vm1826_vm0, %v1943_v21  ;;  %8361 = vmatmul.msk.bf16.gmra.mxu1 %vm1826_vm0, %v1943_v21 }
 0x271   : > { %8362 = vmatmul.msk.bf16.vlgmr.msrb.gmra.mxu2 %vm1826_vm0, %v1942_v35  ;;  %8364 = vmatmul.msk.bf16.vlgmr.msrb.gmra.mxu3 %vm1826_vm0, %v1942_v35 }
 0x272   : > { %8366 = vmatmul.msk.bf16.vlgmr.msra.gmra.mxu0 %vm1826_vm0, %v1942_v35  ;;  %8368 = vmatmul.msk.bf16.vlgmr.msra.gmra.mxu1 %vm1826_vm0, %v1942_v35 }
 0x281   : > { %8363 = vmatmul.msk.bf16.gmra.mxu2 %vm1826_vm0, %v1943_v21  ;;  %8365 = vmatmul.msk.bf16.gmra.mxu3 %vm1826_vm0, %v1943_v21 }
 0x282   : > { %8367 = vmatmul.msk.bf16.gmra.mxu0 %vm1826_vm0, %v1943_v21  ;;  %8369 = vmatmul.msk.bf16.gmra.mxu1 %vm1826_vm0, %v1943_v21 }
 0x291   : > { %8370 = vmatmul.msk.bf16.vlgmr.msra.gmra.mxu2 %vm1826_vm0, %v1942_v35 }
 0x2a1   : > { %8371 = vmatmul.msk.bf16.gmra.mxu2 %vm1826_vm0, %v1943_v21 }
 0x2cf   : > { %v2221_v40 = vpop.f32.mrf.mxu0  ;;  %v2240_v41 = vpop.f32.mrf.mxu1 }
 0x2d4   : > { %v2183_v33 = vpop.f32.mrf.mxu2  ;;  %v2202_v43 = vpop.f32.mrf.mxu3 }
 0x2d7   : > { %v2223_v44 = vpop.f32.mrf.mxu0  ;;  %v2242_v45 = vpop.f32.mrf.mxu1 }
 0x2d8   : > { %v2498_v48 = vpack.c.bf16 %v2223_v44, %v2221_v40  ;;  %v2578_v61 = vpack.c.bf16 %v2242_v45, %v2240_v41  ;;  %v9861_v40 = vld [vmem:[%s14183_s4 + $0x78] sm:$0xff]  ;;  %v9847_v45 = vld [vmem:[%s14183_s4 + $0x8] sm:$0xff] }
 0x2dc   : > { %v2185_v46 = vpop.f32.mrf.mxu2  ;;  %v2204_v38 = vpop.f32.mrf.mxu3 }
 0x2dd   : > { %v2364_v1 = vpack.c.bf16 %v2204_v38, %v2202_v43  ;;  %v2353_v6 = vpack.c.bf16 %v2185_v46, %v2183_v33  ;;  %v9857_v43 = vld [vmem:[%s14183_s4 + $0x58] sm:$0xff]  ;;  %v9864_v46 = vld [vmem:[%s14183_s4 + $0x90] sm:$0xff]  ;;  %v9874_v38 = vld [vmem:[%s14183_s4 + $0xe0] sm:$0xff] }
 0x2df   : > { %v2226_v54 = vpop.f32.mrf.mxu0  ;;  %v2245_v47 = vpop.f32.mrf.mxu1 }
 0x2e4   : > { %v2188_v37 = vpop.f32.mrf.mxu2  ;;  %v2207_v63 = vpop.f32.mrf.mxu3 }
 0x2e7   : > { %v2228_v55 = vpop.f32.mrf.mxu0  ;;  %v2247_v49 = vpop.f32.mrf.mxu1 }
 0x2e8   : > { %v2499_v14 = vpack.c.bf16 %v2228_v55, %v2226_v54  ;;  %v2579_v30 = vpack.c.bf16 %v2247_v49, %v2245_v47  ;;  %v9870_v54 = vld [vmem:[%s14183_s4 + $0xc0] sm:$0xff]  ;;  %v9848_v47 = vld [vmem:[%s14183_s4 + $0x10] sm:$0xff]  ;;  %v9875_v49 = vld [vmem:[%s14183_s4 + $0xe8] sm:$0xff] }
 0x2e9   : > { %v9878_v55 = vld [vmem:[%s14183_s4 + $0x100] sm:$0xff] }
 0x2ea   : > { %2538 = vmatpush.bf16.msrb.mxu1 %v2499_v14  ;;  %2618 = vmatpush.bf16.msrb.mxu2 %v2579_v30  ;;  %v9871_v14 = vld [vmem:[%s14183_s4 + $0xc8] sm:$0xff]  ;;  %v9866_v30 = vld [vmem:[%s14183_s4 + $0xa0] sm:$0xff] }
 0x2ec   : > { %v2190_v0 = vpop.f32.mrf.mxu2  ;;  %v2209_v60 = vpop.f32.mrf.mxu3 }
 0x2ed   : > { %v2365_v34 = vpack.c.bf16 %v2209_v60, %v2207_v63  ;;  %v2354_v58 = vpack.c.bf16 %v2190_v0, %v2188_v37  ;;  %v9865_v37 = vld [vmem:[%s14183_s4 + $0x98] sm:$0xff]  ;;  %v9872_v0 = vld [vmem:[%s14183_s4 + $0xd0] sm:$0xff]  ;;  %v9867_v60 = vld [vmem:[%s14183_s4 + $0xa8] sm:$0xff] }
 0x2ee   : > { %2539 = vmatpush.bf16.msrb.mxu1 %v2498_v48  ;;  %2619 = vmatpush.bf16.msrb.mxu2 %v2578_v61  ;;  %v9849_v63 = vld [vmem:[%s14183_s4 + $0x18] sm:$0xff]  ;;  %v9879_v48 = vld [vmem:[%s14183_s4 + $0x108] sm:$0xff]  ;;  %v9876_v61 = vld [vmem:[%s14183_s4 + $0xf0] sm:$0xff] }
 0x2ef   : > { %v2297_v51 = vpop.f32.mrf.mxu0  ;;  %v2316_v26 = vpop.f32.mrf.mxu1  ;;  %2405 = vmatpush.bf16.msrb.mxu0 %v2365_v34  ;;  %10035 = vmatpush.bf16.msra.mxu3 %v2365_v34  ;;  %v9880_v34 = vld [vmem:[%s14183_s4 + $0x110] sm:$0xff] }
 0x2f1   : > { %8472 = vmatmul.msk.bf16.vlgmr.msrb.gmra.mxu2 %vm2386_vm14, %v9858_v8  ;;  %8444 = vmatmul.msk.bf16.vlgmr.msrb.gmra.mxu1 %vm2386_vm14, %v9854_v10 }
 0x2f3   : > { %2406 = vmatpush.bf16.msrb.mxu0 %v2364_v1  ;;  %10036 = vmatpush.bf16.msra.mxu3 %v2364_v1  ;;  %v9873_v1 = vld [vmem:[%s14183_s4 + $0xd8] sm:$0xff] }
 0x2f4   : > { %v2259_v4 = vpop.f32.mrf.mxu2  ;;  %v2278_v5 = vpop.f32.mrf.mxu3 }
 0x2f6   : > { %8396 = vmatmul.msk.bf16.vlgmr.msrb.gmra.mxu0 %vm2386_vm14, %v9850_v3  ;;  %8399 = vmatmul.msk.bf16.vlgmr.msra.gmra.mxu3 %vm2386_vm14, %v9853_v50  ;;  %v9868_v3 = vld [vmem:[%s14183_s4 + $0xb0] sm:$0xff]  ;;  %v9881_v50 = vld [vmem:[%s14183_s4 + $0x118] sm:$0xff] }
 0x2f7   : > { %2466 = vmatpush.bf16.msra.mxu0 %v2354_v58  ;;  %v2299_v7 = vpop.f32.mrf.mxu0  ;;  %v2318_v53 = vpop.f32.mrf.mxu1 }
 0x2f8   : > { %v2818_v28 = vpack.c.bf16 %v2299_v7, %v2297_v51  ;;  %v2898_v18 = vpack.c.bf16 %v2318_v53, %v2316_v26  ;;  %v9877_v26 = vld [vmem:[%s14183_s4 + $0xf8] sm:$0xff] }
 0x2fb   : > { %2467 = vmatpush.bf16.msra.mxu0 %v2353_v6 }
 0x2fc   : > { %v2261_v52 = vpop.f32.mrf.mxu2  ;;  %v2280_v9 = vpop.f32.mrf.mxu3 }
 0x2fd   : > { %v2658_v23 = vpack.c.bf16 %v2261_v52, %v2259_v4  ;;  %v2738_v24 = vpack.c.bf16 %v2280_v9, %v2278_v5  ;;  %v9869_v52 = vld [vmem:[%s14183_s4 + $0xb8] sm:$0xff] }
 0x2ff   : > { %v2302_v11 = vpop.f32.mrf.mxu0  ;;  %v2321_v12 = vpop.f32.mrf.mxu1 }
 0x301   : > { %8473 = vmatmul.msk.bf16.gmra.mxu2 %vm2386_vm14, %v9859_v59  ;;  %8445 = vmatmul.msk.bf16.gmra.mxu1 %vm2386_vm14, %v9855_v22 }
 0x304   : > { %v2264_v16 = vpop.f32.mrf.mxu2  ;;  %v2283_v35 = vpop.f32.mrf.mxu3 }
 0x306   : > { %8397 = vmatmul.msk.bf16.gmra.mxu0 %vm2386_vm14, %v9851_v15 }
 0x307   : > { %v2304_v17 = vpop.f32.mrf.mxu0  ;;  %v2323_v36 = vpop.f32.mrf.mxu1 }
 0x308   : > { %v2819_v62 = vpack.c.bf16 %v2304_v17, %v2302_v11  ;;  %v2899_v42 = vpack.c.bf16 %v2323_v36, %v2321_v12 }
 0x30a   : > { %2858 = vmatpush.bf16.msra.mxu1 %v2819_v62  ;;  %2938 = vmatpush.bf16.msra.mxu2 %v2899_v42 }
 0x30c   : > { %v2266_v57 = vpop.f32.mrf.mxu2  ;;  %v2285_v19 = vpop.f32.mrf.mxu3 }
 0x30d   : > { %v2659_v20 = vpack.c.bf16 %v2266_v57, %v2264_v16  ;;  %v2739_v21 = vpack.c.bf16 %v2285_v19, %v2283_v35 }
 0x30e   : > { %2859 = vmatpush.bf16.msra.mxu1 %v2818_v28  ;;  %2939 = vmatpush.bf16.msra.mxu2 %v2898_v18 }
 0x30f   : > { %2698 = vmatpush.bf16.msrb.mxu3 %v2659_v20  ;;  %2778 = vmatpush.bf16.msrb.mxu0 %v2739_v21 }
 0x311   : > { %8474 = vmatmul.msk.bf16.gmra.mxu2 %vm2386_vm14, %v9860_v29  ;;  %8446 = vmatmul.msk.bf16.gmra.mxu1 %vm2386_vm14, %v9856_v31 }
 0x313   : > { %2699 = vmatpush.bf16.msrb.mxu3 %v2658_v23  ;;  %2779 = vmatpush.bf16.msrb.mxu0 %v2738_v24 }
 0x314   : > { %v2335_v27 = vpop.f32.mrf.mxu2 }
 0x316   : > { %8398 = vmatmul.msk.bf16.gmra.mxu0 %vm2386_vm14, %v9852_v2  ;;  %8500 = vmatmul.msk.bf16.vlgmr.msrb.gmra.mxu3 %vm2386_vm14, %v9862_v25 }
 0x31c   : > { %v2337_v56 = vpop.f32.mrf.mxu2 }
 0x31d   : > { %v2978_v44 = vpack.c.bf16 %v2337_v56, %v2335_v27 }
 0x321   : > { %8475 = vmatmul.msk.bf16.gmra.mxu2 %vm2386_vm14, %v9861_v40  ;;  %8447 = vmatmul.msk.bf16.gmra.mxu1 %vm2386_vm14, %v9857_v43 }
 0x324   : > { %v2340_v39 = vpop.f32.mrf.mxu2 }
 0x326   : > { %8416 = vmatmul.msk.bf16.vlgmr.msra.gmra.mxu0 %vm2386_vm14, %v9846_v13  ;;  %8501 = vmatmul.msk.bf16.gmra.mxu3 %vm2386_vm14, %v9863_v32 }
 0x32c   : > { %v2342_v41 = vpop.f32.mrf.mxu2 }
 0x32d   : > { %v2979_v33 = vpack.c.bf16 %v2342_v41, %v2340_v39 }
 0x32f   : > { %3018 = vmatpush.bf16.msra.mxu3 %v2979_v33 }
 0x331   : > { %8584 = vmatmul.msk.bf16.vlgmr.msra.gmra.mxu2 %vm2386_vm14, %v9874_v38  ;;  %8556 = vmatmul.msk.bf16.vlgmr.msra.gmra.mxu1 %vm2386_vm14, %v9870_v54 }
 0x333   : > { %3019 = vmatpush.bf16.msra.mxu3 %v2978_v44 }
 0x336   : > { %8417 = vmatmul.msk.bf16.gmra.mxu0 %vm2386_vm14, %v9847_v45  ;;  %8502 = vmatmul.msk.bf16.gmra.mxu3 %vm2386_vm14, %v9864_v46 }
 0x341   : > { %8585 = vmatmul.msk.bf16.gmra.mxu2 %vm2386_vm14, %v9875_v49  ;;  %8557 = vmatmul.msk.bf16.gmra.mxu1 %vm2386_vm14, %v9871_v14 }
 0x346   : > { %8418 = vmatmul.msk.bf16.gmra.mxu0 %vm2386_vm14, %v9848_v47  ;;  %8503 = vmatmul.msk.bf16.gmra.mxu3 %vm2386_vm14, %v9865_v37 }
 0x351   : > { %8586 = vmatmul.msk.bf16.gmra.mxu2 %vm2386_vm14, %v9876_v61  ;;  %8558 = vmatmul.msk.bf16.gmra.mxu1 %vm2386_vm14, %v9872_v0 }
 0x356   : > { %8419 = vmatmul.msk.bf16.gmra.mxu0 %vm2386_vm14, %v9849_v63  ;;  %8612 = vmatmul.msk.bf16.vlgmr.msra.gmra.mxu3 %vm2386_vm14, %v9878_v55 }
 0x361   : > { %8587 = vmatmul.msk.bf16.gmra.mxu2 %vm2386_vm14, %v9877_v26  ;;  %8559 = vmatmul.msk.bf16.gmra.mxu1 %vm2386_vm14, %v9873_v1 }
 0x366   : > { %8528 = vmatmul.msk.bf16.vlgmr.msrb.gmra.mxu0 %vm2386_vm14, %v9866_v30  ;;  %8613 = vmatmul.msk.bf16.gmra.mxu3 %vm2386_vm14, %v9879_v48 }
 0x36e   : > { %v2541_v6 = vpop.f32.mrf.mxu1 }
 0x373   : > { %v2408_v51 = vpop.f32.mrf.mxu0 }
 0x374   : > { %v2621_v53 = vpop.f32.mrf.mxu2 }
 0x376   : > { %8529 = vmatmul.msk.bf16.gmra.mxu0 %vm2386_vm14, %v9867_v60  ;;  %8614 = vmatmul.msk.bf16.gmra.mxu3 %vm2386_vm14, %v9880_v34  ;;  %v2543_v10 = vpop.f32.mrf.mxu1 }
 0x379   : > { %v11836_v5 = vpop.f32.mrf.mxu3 }
 0x37b   : > { %v2410_v58 = vpop.f32.mrf.mxu0 }
 0x37c   : > { %v2623_v11 = vpop.f32.mrf.mxu2 }
 0x37e   : > { %v2546_v16 = vpop.f32.mrf.mxu1 }
 0x381   : > { %v11842_v8 = vpop.f32.mrf.mxu3 }
 0x383   : > { %v2413_v4 = vpop.f32.mrf.mxu0 }
 0x384   : > { %v2626_v35 = vpop.f32.mrf.mxu2 }
 0x386   : > { %8530 = vmatmul.msk.bf16.gmra.mxu0 %vm2386_vm14, %v9868_v3  ;;  %8615 = vmatmul.msk.bf16.gmra.mxu3 %vm2386_vm14, %v9881_v50  ;;  %v2548_v62 = vpop.f32.mrf.mxu1 }
 0x38b   : > { %v11840_v7 = vpop.f32.mrf.mxu0 }
 0x38c   : > { %v11852_v59 = vpop.f32.mrf.mxu2 }
 0x38e   : > { %v11856_v57 = vpop.f32.mrf.mxu1 }
 0x393   : > { %v11847_v9 = vpop.f32.mrf.mxu0 }
 0x394   : > { %v11858_v20 = vpop.f32.mrf.mxu2 }
 0x396   : > { %8531 = vmatmul.msk.bf16.gmra.mxu0 %vm2386_vm14, %v9869_v52  ;;  %v11862_v23 = vpop.f32.mrf.mxu1 }
 0x399   : > { %v2701_v12 = vpop.f32.mrf.mxu3 }
 0x39b   : > { %v11850_v15 = vpop.f32.mrf.mxu0 }
 0x39c   : > { %v11864_v24 = vpop.f32.mrf.mxu2 }
 0x39e   : > { %v11868_v27 = vpop.f32.mrf.mxu1 }
 0x3a1   : > { %v2703_v17 = vpop.f32.mrf.mxu3 }
 0x3a3   : > { %v2469_v36 = vpop.f32.mrf.mxu0 }
 0x3a4   : > { %v11870_v29 = vpop.f32.mrf.mxu2  ;;  %v2470_v41 = vadd.f32 %v2469_v36, %v2408_v51 }
 0x3a6   : > { %v11874_v13 = vpop.f32.mrf.mxu1  ;;  %v2561_v43 = vadd.f32 %v2541_v6, %v2470_v41 }
 0x3a8   : > { %v2641_v54 = vadd.f32 %v2621_v53, %v2561_v43 }
 0x3a9   : > { %v2706_v42 = vpop.f32.mrf.mxu3 }
 0x3aa   : > { %v2721_v37 = vadd.f32 %v2701_v12, %v2641_v54 }
 0x3ab   : > { %v2471_v28 = vpop.f32.mrf.mxu0 }
 0x3ac   : > { %v11876_v32 = vpop.f32.mrf.mxu2  ;;  %v2472_v38 = vadd.f32 %v2471_v28, %v2410_v58 }
 0x3ae   : > { %v2861_v33 = vpop.f32.mrf.mxu1  ;;  %v2562_v47 = vadd.f32 %v2543_v10, %v2472_v38 }
 0x3b0   : > { %v2642_v61 = vadd.f32 %v2623_v11, %v2562_v47 }
 0x3b1   : > { %v11854_v18 = vpop.f32.mrf.mxu3 }
 0x3b2   : > { %v2722_v51 = vadd.f32 %v2703_v17, %v2642_v61 }
 0x3b3   : > { %v2474_v19 = vpop.f32.mrf.mxu0 }
 0x3b4   : > { %v2941_v45 = vpop.f32.mrf.mxu2  ;;  %v2475_v30 = vadd.f32 %v2474_v19, %v2413_v4 }
 0x3b6   : > { %v2863_v55 = vpop.f32.mrf.mxu1  ;;  %v2563_v34 = vadd.f32 %v2546_v16, %v2475_v30 }
 0x3b8   : > { %v2643_v52 = vadd.f32 %v2626_v35, %v2563_v34 }
 0x3b9   : > { %v11860_v21 = vpop.f32.mrf.mxu3 }
 0x3ba   : > { %v2723_v36 = vadd.f32 %v2706_v42, %v2643_v52 }
 0x3bb   : > { %v2476_v22 = vpop.f32.mrf.mxu0 }
 0x3bc   : > { %v2943_v14 = vpop.f32.mrf.mxu2  ;;  %v2477_v53 = vadd.f32 %v2476_v22, %v11840_v7 }
 0x3be   : > { %v2866_v3 = vpop.f32.mrf.mxu1  ;;  %v2564_v12 = vadd.f32 %v2548_v62, %v2477_v53 }
 0x3c0   : > { %v2644_v7 = vadd.f32 %v11852_v59, %v2564_v12 }
 0x3c1   : > { %v11866_v2 = vpop.f32.mrf.mxu3 }
 0x3c3   : > { %v2479_v25 = vpop.f32.mrf.mxu0 }
 0x3c4   : > { %v2946_v6 = vpop.f32.mrf.mxu2 }
 0x3c6   : > { %v2868_v41 = vpop.f32.mrf.mxu1 }
 0x3c9   : > { %v11872_v56 = vpop.f32.mrf.mxu3 }
 0x3cb   : > { %v2481_v31 = vpop.f32.mrf.mxu0 }
 0x3cc   : > { %v2948_v22 = vpop.f32.mrf.mxu2 }
 0x3d1   : > { %v11880_v40 = vpop.f32.mrf.mxu3 }
 0x3d3   : > { %v11878_v39 = vpop.f32.mrf.mxu0 }
 0x3d9   : > { %v3021_v46 = vpop.f32.mrf.mxu3 }
 0x3db   : > { %v11882_v44 = vpop.f32.mrf.mxu0 }
 0x3e1   : > { %v3023_v0 = vpop.f32.mrf.mxu3 }
 0x3e3   : > { %v2781_v63 = vpop.f32.mrf.mxu0 }
 0x3e4   : > { %v2801_v49 = vadd.f32 %v2781_v63, %v2721_v37  ;;  %v2871_v37 = vpop.f32.mrf.mxu1 }
 0x3e6   : > { %v2881_v48 = vadd.f32 %v2861_v33, %v2801_v49  ;;  %v2480_v33 = vadd.f32 %v2479_v25, %v11847_v9  ;;  %v2482_v9 = vadd.f32 %v2481_v31, %v11850_v15  ;;  %v2485_v15 = vadd.f32 %v11878_v39, %v11836_v5 }
 0x3e8   : > { %v2961_v60 = vadd.f32 %v2941_v45, %v2881_v48  ;;  %v2565_v62 = vadd.f32 %v11856_v57, %v2480_v33  ;;  %v2566_v57 = vadd.f32 %v11862_v23, %v2482_v9  ;;  %v2567_v23 = vadd.f32 %v11868_v27, %v2485_v15 }
 0x3e9   : > { %v3026_v10 = vpop.f32.mrf.mxu3 }
 0x3ea   : > { %v11884_v26 = vadd.f32 %v3021_v46, %v2961_v60  ;;  %v2724_v46 = vadd.f32 %v11854_v18, %v2644_v7  ;;  %v2645_v59 = vadd.f32 %v11858_v20, %v2565_v62  ;;  %v2646_v31 = vadd.f32 %v11864_v24, %v2566_v57 }
 0x3eb   : > { %v2783_v1 = vpop.f32.mrf.mxu0  ;;  %v2647_v39 = vadd.f32 %v11870_v29, %v2567_v23 }
 0x3ec   : > { %v2802_v58 = vadd.f32 %v2783_v1, %v2722_v51  ;;  %v3050_v50 = vsel %vm3049_vm15, %v11884_v26, 0.0  ;;  %v2725_v18 = vadd.f32 %v11860_v21, %v2645_v59  ;;  %v2873_v60 = vpop.f32.mrf.mxu1  ;;  %v2726_v21 = vadd.f32 %v11866_v2, %v2646_v31 }
 0x3ed   : > { %3051 = vadd.xlane.f32.xlu1 %v3050_v50  ;;  %v2727_v27 = vadd.f32 %v11872_v56, %v2647_v39 }
 0x3ee   : > { %v2882_v4 = vadd.f32 %v2863_v55, %v2802_v58  ;;  %v2951_v55 = vpop.f32.mrf.mxu2 }
 0x3f0   : > { %v2962_v11 = vadd.f32 %v2943_v14, %v2882_v4 }
 0x3f1   : > { %v3028_v45 = vpop.f32.mrf.mxu3 }
 0x3f2   : > { %v11889_v16 = vadd.f32 %v3023_v0, %v2962_v11 }
 0x3f3   : > { %v2786_v17 = vpop.f32.mrf.mxu0 }
 0x3f4   : > { %v2803_v28 = vadd.f32 %v2786_v17, %v2723_v36  ;;  %v3053_v19 = vsel %vm3049_vm15, %v11889_v16, 0.0  ;;  %v2876_v4 = vpop.f32.mrf.mxu1 }
 0x3f5   : > { %3054 = vadd.xlane.f32.xlu2 %v3053_v19 }
 0x3f6   : > { %v2883_v43 = vadd.f32 %v2866_v3, %v2803_v28  ;;  %v2953_v1 = vpop.f32.mrf.mxu2  ;;  %v10246_v28 = vmov 16.0  }
 0x3f7   : > { %10070 = vrcp.f32 %v10246_v28 }
 0x3f8   : > { %v2963_v35 = vadd.f32 %v2946_v6, %v2883_v43 }
 0x3f9   : > { %v3031_v30 = vpop.f32.mrf.mxu3 }
 0x3fa   : > { %v11896_v42 = vadd.f32 %v3026_v10, %v2963_v35 }
 0x3fb   : > { %v2788_v38 = vpop.f32.mrf.mxu0 }
 0x3fc   : > { %v2804_v54 = vadd.f32 %v2788_v38, %v2724_v46  ;;  %v3056_v47 = vsel %vm3049_vm15, %v11896_v42, 0.0 }
 0x3fd   : > { %3057 = vadd.xlane.f32.xlu0 %v3056_v47  ;;  %v10071_v56 = vpop.eup %10070 }
 0x3fe   : > { %v2884_v25 = vadd.f32 %v2868_v41, %v2804_v54  ;;  %v2956_v10 = vpop.f32.mrf.mxu2  ;;  %v3075_v19 = vmul.f32 16.0, %v10071_v56  ;;  %v2487_v41 = vadd.f32 %v11882_v44, %v11842_v8  ;;  %vm3079_vm1 = vweird.f32 %v10071_v56  ;;  %v2878_v54 = vpop.f32.mrf.mxu1 }
 0x400   : > { %v2964_v63 = vadd.f32 %v2948_v22, %v2884_v25  ;;  %v3076_v33 = vsub.f32 1.0, %v3075_v19  ;;  %v2568_v43 = vadd.f32 %v11874_v13, %v2487_v41  ;;  %v8618_v41 = vld [vmem:[%s14184_s5] sm:$0xf] }
 0x401   : > { %v3033_v50 = vpop.f32.mrf.mxu3 }
 0x402   : > { %v11904_v49 = vadd.f32 %v3028_v45, %v2964_v63  ;;  %v3077_v7 = vmul.f32 %v10071_v56, %v3076_v33  ;;  %v2648_v22 = vadd.f32 %v11876_v32, %v2568_v43  ;;  %v9886_v33 = vld [vmem:[%s14184_s5 + $0x20] sm:$0xf0] }
 0x403   : > { %v2791_v14 = vpop.f32.mrf.mxu0 }
 0x404   : > { %v2805_v48 = vadd.f32 %v2791_v14, %v2725_v18  ;;  %v3059_v61 = vsel %vm3049_vm15, %v11904_v49, 0.0  ;;  %v3078_v35 = vadd.f32 %v10071_v56, %v3077_v7  ;;  %v2728_v62 = vadd.f32 %v11880_v40, %v2648_v22  ;;  %v9882_v22 = vld [vmem:[%s14184_s5 + $0x4] sm:$0xf] }
 0x405   : > { %3060 = vadd.xlane.f32.xlu1 %v3059_v61  ;;  %v8619_v7 = vor.u32 %v9886_v33, %v8618_v41 }
 0x406   : > { %v2885_v20 = vadd.f32 %v2871_v37, %v2805_v48  ;;  %v11933_v46 = vsel %vm3079_vm1, %v10071_v56, %v3078_v35  ;;  %v2958_v13 = vpop.f32.mrf.mxu2  ;;  %v8620_v35 = vld [vmem:[%s14184_s5 + $0x24] sm:$0xf0] }
 0x407   : > { %3352 = vmatpush.bf16.msra.mxu0 %v8619_v7 }
 0x408   : > { %v2965_v0 = vadd.f32 %v2951_v55, %v2885_v20 }
 0x409   : > { %v3036_v12 = vpop.f32.mrf.mxu3 }
 0x40a   : > { %v11913_v34 = vadd.f32 %v3031_v30, %v2965_v0 }
 0x40b   : > { %v2793_v51 = vpop.f32.mrf.mxu0 }
 0x40c   : > { %v2806_v3 = vadd.f32 %v2793_v51, %v2726_v21  ;;  %v3062_v58 = vsel %vm3049_vm15, %v11913_v34, 0.0 }
 0x40d   : > { %3063 = vadd.xlane.f32.xlu2 %v3062_v58 }
 0x40e   : > { %v2886_v5 = vadd.f32 %v2873_v60, %v2806_v3 }
 0x410   : > { %v2966_v24 = vadd.f32 %v2953_v1, %v2886_v5 }
 0x411   : > { %v3038_v37 = vpop.f32.mrf.mxu3 }
 0x412   : > { %v11919_v6 = vadd.f32 %v3033_v50, %v2966_v24 }
 0x413   : > { %v2796_v53 = vpop.f32.mrf.mxu0 }
 0x414   : > { %v2807_v52 = vadd.f32 %v2796_v53, %v2727_v27  ;;  %v3065_v2 = vsel %vm3049_vm15, %v11919_v6, 0.0 }
 0x415   : > { %3066 = vadd.xlane.f32.xlu0 %v3065_v2 }
 0x416   : > { %v2887_v11 = vadd.f32 %v2876_v4, %v2807_v52 }
 0x418   : > { %v2967_v36 = vadd.f32 %v2956_v10, %v2887_v11 }
 0x41a   : > { %v11924_v17 = vadd.f32 %v3036_v12, %v2967_v36 }
 0x41b   : > { %v2798_v45 = vpop.f32.mrf.mxu0 }
 0x41c   : > { %v3068_v29 = vsel %vm3049_vm15, %v11924_v17, 0.0  ;;  %v2808_v38 = vadd.f32 %v2798_v45, %v2728_v62  ;;  %v8626_v45 = vld [vmem:[%s14184_s5 + $0x8] sm:$0xf] }
 0x41d   : > { %3069 = vadd.xlane.f32.xlu0 %v3068_v29 }
 0x41e   : > { %v2888_v25 = vadd.f32 %v2878_v54, %v2808_v38  ;;  %v8623_v38 = vor.u32 %v9882_v22, %v8620_v35  ;;  %v9887_v54 = vld [vmem:[%s14184_s5 + $0x28] sm:$0xf0] }
 0x420   : > { %v2968_v44 = vadd.f32 %v2958_v13, %v2888_v25  ;;  %v8627_v13 = vor.u32 %v9887_v54, %v8626_v45  ;;  %3381 = vmatpush.bf16.msrb.mxu1 %v8623_v38 }
 0x422   : > { %v3048_v55 = vadd.f32 %v3038_v37, %v2968_v44  ;;  %3410 = vmatpush.bf16.msrb.mxu2 %v8627_v13 }
 0x424   : > { %v3071_v14 = vsel %vm3049_vm15, %v3048_v55, 0.0 }
 0x460   : > { %v3052_v47 = vpop.xlane.xlu1 %3051 }
 0x461   : > { %v3081_v9 = vmul.f32 %v11933_v46, %v3052_v47  ;;  %v9883_v47 = vld [vmem:[%s14184_s5 + $0xc] sm:$0xf] }
 0x463   : > { %v11937_v8 = vsub.f32 %v11884_v26, %v3081_v9 }
 0x465   : > { %v3097_v32 = vmul.f32 %v11937_v8, %v11937_v8 }
 0x467   : > { %v3105_v59 = vsel %vm3049_vm15, %v3097_v32, 0.0  ;;  %v8628_v32 = vld [vmem:[%s14184_s5 + $0x2c] sm:$0xf0] }
 0x468   : > { %v3055_v40 = vpop.xlane.xlu2 %3054  ;;  %3106 = vadd.xlane.f32.xlu1 %v3105_v59  ;;  %v8631_v59 = vor.u32 %v9883_v47, %v8628_v32 }
 0x469   : > { %v3082_v63 = vmul.f32 %v11933_v46, %v3055_v40 }
 0x46a   : > { %3439 = vmatpush.bf16.msrb.mxu3 %v8631_v59 }
 0x46b   : > { %v11944_v57 = vsub.f32 %v11889_v16, %v3082_v63 }
 0x46d   : > { %v3098_v26 = vmul.f32 %v11944_v57, %v11944_v57 }
 0x46f   : > { %v3108_v18 = vsel %vm3049_vm15, %v3098_v26, 0.0 }
 0x470   : > { %v3058_v30 = vpop.xlane.xlu0 %3057  ;;  %3109 = vadd.xlane.f32.xlu2 %v3108_v18  ;;  %3072 = vadd.xlane.f32.xlu1 %v3071_v14 }
 0x471   : > { %v3083_v48 = vmul.f32 %v11933_v46, %v3058_v30 }
 0x473   : > { %v11952_v61 = vsub.f32 %v11896_v42, %v3083_v48 }
 0x475   : > { %v3099_v15 = vmul.f32 %v11952_v61, %v11952_v61 }
 0x477   : > { %v3111_v16 = vsel %vm3049_vm15, %v3099_v15, 0.0 }
 0x478   : > { %3112 = vadd.xlane.f32.xlu2 %v3111_v16  ;;  %v3061_v20 = vpop.xlane.xlu1 %3060 }
 0x479   : > { %v3084_v31 = vmul.f32 %v11933_v46, %v3061_v20 }
 0x47b   : > { %v11959_v0 = vsub.f32 %v11904_v49, %v3084_v31 }
 0x47d   : > { %v3100_v60 = vmul.f32 %v11959_v0, %v11959_v0 }
 0x47f   : > { %v3114_v23 = vsel %vm3049_vm15, %v3100_v60, 0.0 }
 0x480   : > { %v3064_v21 = vpop.xlane.xlu2 %3063  ;;  %3115 = vadd.xlane.f32.xlu0 %v3114_v23 }
 0x481   : > { %v3085_v42 = vmul.f32 %v11933_v46, %v3064_v21 }
 0x483   : > { %v11966_v51 = vsub.f32 %v11913_v34, %v3085_v42 }
 0x485   : > { %v3101_v1 = vmul.f32 %v11966_v51, %v11966_v51 }
 0x487   : > { %v3117_v3 = vsel %vm3049_vm15, %v3101_v1, 0.0 }
 0x488   : > { %v3067_v58 = vpop.xlane.xlu0 %3066  ;;  %3118 = vadd.xlane.f32.xlu1 %v3117_v3 }
 0x489   : > { %v3086_v49 = vmul.f32 %v11933_v46, %v3067_v58 }
 0x48b   : > { %v11973_v50 = vsub.f32 %v11919_v6, %v3086_v49 }
 0x48d   : > { %v3102_v5 = vmul.f32 %v11973_v50, %v11973_v50 }
 0x48f   : > { %v3120_v39 = vsel %vm3049_vm15, %v3102_v5, 0.0 }
 0x490   : > { %v3070_v24 = vpop.xlane.xlu0 %3069  ;;  %3121 = vadd.xlane.f32.xlu2 %v3120_v39 }
 0x491   : > { %v3087_v34 = vmul.f32 %v11933_v46, %v3070_v24 }
 0x493   : > { %v11980_v27 = vsub.f32 %v11924_v17, %v3087_v34 }
 0x495   : > { %v3103_v53 = vmul.f32 %v11980_v27, %v11980_v27 }
 0x497   : > { %v3123_v4 = vsel %vm3049_vm15, %v3103_v53, 0.0 }
 0x498   : > { %3124 = vadd.xlane.f32.xlu0 %v3123_v4 }
 0x4db   : > { %v3107_v6 = vpop.xlane.xlu1 %3106 }
 0x4dc   : > { %v3129_v52 = vmul.f32 %v3107_v6, %v11933_v46 }
 0x4de   : > { %v3137_v2 = vadd.f32 1e-05, %v3129_v52 }
 0x4e0   : > { %10072 = vrsqrt.f32 %v3137_v2  ;;  %vm3151_vm3 = vweird.f32 %v3137_v2 }
 0x4e3   : > { %v3110_v10 = vpop.xlane.xlu2 %3109  ;;  %v3073_v11 = vpop.xlane.xlu1 %3072 }
 0x4e4   : > { %v3130_v12 = vmul.f32 %v3110_v10, %v11933_v46  ;;  %v3088_v36 = vmul.f32 %v11933_v46, %v3073_v11 }
 0x4e6   : > { %v10073_v29 = vpop.eup %10072  ;;  %v3138_v17 = vadd.f32 1e-05, %v3130_v12  ;;  %v11988_v28 = vsub.f32 %v3048_v55, %v3088_v36 }
 0x4e7   : > { %v3146_v56 = vmul.f32 %v10073_v29, %v3137_v2  ;;  %vm3152_vm2 = vweird.f32 %v10073_v29 }
 0x4e8   : > { %10074 = vrsqrt.f32 %v3138_v17  ;;  %v3104_v19 = vmul.f32 %v11988_v28, %v11988_v28  ;;  %vm3153_vm4 = vmor %vm3151_vm3, %vm3152_vm2  ;;  %vm3161_vm6 = vweird.f32 %v3138_v17 }
 0x4e9   : > { %v3147_v43 = vmul.f32 %v10073_v29, %v3146_v56 }
 0x4ea   : > { %v3126_v62 = vsel %vm3049_vm15, %v3104_v19, 0.0 }
 0x4eb   : > { %v3148_v9 = vmul.f32 0.5, %v3147_v43  ;;  %v3113_v25 = vpop.xlane.xlu2 %3112  ;;  %3127 = vadd.xlane.f32.xlu1 %v3126_v62 }
 0x4ec   : > { %v3131_v44 = vmul.f32 %v3113_v25, %v11933_v46 }
 0x4ed   : > { %v3149_v37 = vsub.f32 1.5, %v3148_v9 }
 0x4ee   : > { %v10075_v40 = vpop.eup %10074  ;;  %v3139_v63 = vadd.f32 1e-05, %v3131_v44 }
 0x4ef   : > { %v3150_v55 = vmul.f32 %v10073_v29, %v3149_v37  ;;  %v3156_v26 = vmul.f32 %v10075_v40, %v3138_v17  ;;  %vm3162_vm5 = vweird.f32 %v10075_v40 }
 0x4f0   : > { %10076 = vrsqrt.f32 %v3139_v63  ;;  %vm3163_vm7 = vmor %vm3161_vm6, %vm3162_vm5  ;;  %vm3171_vm9 = vweird.f32 %v3139_v63 }
 0x4f1   : > { %v3154_v18 = vsel %vm3153_vm4, %v10073_v29, %v3150_v55  ;;  %v3157_v14 = vmul.f32 %v10075_v40, %v3156_v26 }
 0x4f2   : > { %v3225_v30 = vmul.f32 %v3154_v18, %v11937_v8 }
 0x4f3   : > { %v3158_v48 = vmul.f32 0.5, %v3157_v14  ;;  %v3116_v15 = vpop.xlane.xlu0 %3115 }
 0x4f4   : > { %v3233_v16 = vmul.f32 0.5, %v3225_v30  ;;  %v3132_v20 = vmul.f32 %v3116_v15, %v11933_v46 }
 0x4f5   : > { %v3159_v31 = vsub.f32 1.5, %v3158_v48 }
 0x4f6   : > { %v10077_v60 = vpop.eup %10076  ;;  %v3140_v23 = vadd.f32 1e-05, %v3132_v20  ;;  %10078 = vtanh.f32 %v3233_v16 }
 0x4f7   : > { %v3160_v21 = vmul.f32 %v10075_v40, %v3159_v31  ;;  %v3166_v42 = vmul.f32 %v10077_v60, %v3139_v63  ;;  %vm3172_vm8 = vweird.f32 %v10077_v60 }
 0x4f8   : > { %10080 = vrsqrt.f32 %v3140_v23  ;;  %vm3173_vm10 = vmor %vm3171_vm9, %vm3172_vm8  ;;  %vm3181_vm12 = vweird.f32 %v3140_v23 }
 0x4f9   : > { %v3164_v1 = vsel %vm3163_vm7, %v10075_v40, %v3160_v21  ;;  %v3167_v3 = vmul.f32 %v10077_v60, %v3166_v42 }
 0x4fa   : > { %v3226_v58 = vmul.f32 %v3164_v1, %v11944_v57 }
 0x4fb   : > { %v3168_v8 = vmul.f32 0.5, %v3167_v3  ;;  %v3119_v49 = vpop.xlane.xlu1 %3118 }
 0x4fc   : > { %v3234_v5 = vmul.f32 0.5, %v3226_v58  ;;  %v3133_v39 = vmul.f32 %v3119_v49, %v11933_v46  ;;  %v10079_v24 = vpop.eup %10078 }
 0x4fd   : > { %v3169_v34 = vsub.f32 1.5, %v3168_v8  ;;  %v3249_v2 = vadd.f32 1.0, %v10079_v24 }
 0x4fe   : > { %v10081_v53 = vpop.eup %10080  ;;  %10082 = vtanh.f32 %v3234_v5  ;;  %v3141_v4 = vadd.f32 1e-05, %v3133_v39 }
 0x4ff   : > { %v3170_v6 = vmul.f32 %v10077_v60, %v3169_v34  ;;  %v3176_v52 = vmul.f32 %v10081_v53, %v3140_v23  ;;  %v3257_v19 = vmul.f32 0.5, %v3249_v2  ;;  %vm3182_vm11 = vweird.f32 %v10081_v53 }
 0x500   : > { %10084 = vrsqrt.f32 %v3141_v4  ;;  %vm3183_vm13 = vmor %vm3181_vm12, %vm3182_vm11  ;;  %vm3191_vm1 = vweird.f32 %v3141_v4  ;;  %vm5414_vm12 = vcmask 1041408  }
 0x501   : > { %v3174_v10 = vsel %vm3173_vm10, %v10077_v60, %v3170_v6  ;;  %v3177_v11 = vmul.f32 %v10081_v53, %v3176_v52 }
 0x502   : > { %v3227_v57 = vmul.f32 %v3174_v10, %v11952_v61  ;;  %v3265_v61 = vmul.f32 %v3257_v19, %v3225_v30 }
 0x503   : > { %v3178_v12 = vmul.f32 0.5, %v3177_v11  ;;  %v3122_v36 = vpop.xlane.xlu2 %3121 }
 0x504   : > { %v10083_v29 = vpop.eup %10082  ;;  %v3235_v17 = vmul.f32 0.5, %v3227_v57  ;;  %v3134_v56 = vmul.f32 %v3122_v36, %v11933_v46 }
 0x505   : > { %v3250_v41 = vadd.f32 1.0, %v10083_v29  ;;  %v3179_v33 = vsub.f32 1.5, %v3178_v12 }
 0x506   : > { %v10085_v43 = vpop.eup %10084  ;;  %v3142_v7 = vadd.f32 1e-05, %v3134_v56  ;;  %10086 = vtanh.f32 %v3235_v17 }
 0x507   : > { %v3258_v22 = vmul.f32 0.5, %v3250_v41  ;;  %v3180_v35 = vmul.f32 %v10081_v53, %v3179_v33  ;;  %v3186_v45 = vmul.f32 %v10085_v43, %v3141_v4  ;;  %vm3192_vm14 = vweird.f32 %v10085_v43 }
 0x508   : > { %10088 = vrsqrt.f32 %v3142_v7  ;;  %vm3193_vm2 = vmor %vm3191_vm1, %vm3192_vm14  ;;  %vm3201_vm4 = vweird.f32 %v3142_v7 }
 0x509   : > { %v3266_v62 = vmul.f32 %v3258_v22, %v3226_v58  ;;  %v3184_v38 = vsel %vm3183_vm13, %v10081_v53, %v3180_v35  ;;  %v3187_v54 = vmul.f32 %v10085_v43, %v3186_v45 }
 0x50a   : > { %v3228_v47 = vmul.f32 %v3184_v38, %v11959_v0 }
 0x50b   : > { %v12025_v9 = vpack.c.bf16 %v3266_v62, %v3265_v61  ;;  %v3188_v25 = vmul.f32 0.5, %v3187_v54  ;;  %v3125_v53 = vpop.xlane.xlu0 %3124  ;;  %v9888_v61 = vld [vmem:[%s14184_s5 + $0x30] sm:$0xf0]  ;;  %v8636_v54 = vld [vmem:[%s14184_s5 + $0x34] sm:$0xf0] }
 0x50c   : > { %v3236_v13 = vmul.f32 0.5, %v3228_v47  ;;  %v10087_v32 = vpop.eup %10086  ;;  %v3135_v4 = vmul.f32 %v3125_v53, %v11933_v46 }
 0x50d   : > { %v3189_v44 = vsub.f32 1.5, %v3188_v25  ;;  %8652 = vmatmul.msk.bf16.vlgmr.msra.gmra.mxu0 %vm3049_vm15, %v12025_v9  ;;  %8656 = vmatmul.msk.bf16.vlgmr.msrb.gmra.mxu1 %vm3049_vm15, %v12025_v9  ;;  %v3251_v40 = vadd.f32 1.0, %v10087_v32  ;;  %v9889_v25 = vld [vmem:[%s14184_s5 + $0x38] sm:$0xf0] }
 0x50e   : > { %v10089_v59 = vpop.eup %10088  ;;  %10090 = vtanh.f32 %v3236_v13  ;;  %8660 = vmatmul.msk.bf16.vlgmr.msrb.gmra.mxu2 %vm3049_vm15, %v12025_v9  ;;  %8664 = vmatmul.msk.bf16.vlgmr.msrb.gmra.mxu3 %vm3049_vm15, %v12025_v9  ;;  %v3143_v6 = vadd.f32 1e-05, %v3135_v4 }
 0x50f   : > { %v3190_v0 = vmul.f32 %v10085_v43, %v3189_v44  ;;  %v3196_v37 = vmul.f32 %v10089_v59, %v3142_v7  ;;  %v3259_v48 = vmul.f32 0.5, %v3251_v40  ;;  %vm3202_vm3 = vweird.f32 %v10089_v59 }
 0x510   : > { %vm3203_vm5 = vmor %vm3201_vm4, %vm3202_vm3  ;;  %vm3211_vm7 = vweird.f32 %v3143_v6 }
 0x511   : > { %v3194_v63 = vsel %vm3193_vm2, %v10085_v43, %v3190_v0  ;;  %v3197_v55 = vmul.f32 %v10089_v59, %v3196_v37  ;;  %v3267_v60 = vmul.f32 %v3259_v48, %v3227_v57  ;;  %v8644_v0 = vld [vmem:[%s14184_s5 + $0x3c] sm:$0xf0] }
 0x512   : > { %v3229_v26 = vmul.f32 %v3194_v63, %v11966_v51 }
 0x513   : > { %v3198_v18 = vmul.f32 0.5, %v3197_v55 }
 0x514   : > { %v10091_v14 = vpop.eup %10090  ;;  %v3237_v30 = vmul.f32 0.5, %v3229_v26 }
 0x515   : > { %v3252_v15 = vadd.f32 1.0, %v10091_v14  ;;  %v3199_v16 = vsub.f32 1.5, %v3198_v18 }
 0x516   : > { %10092 = vtanh.f32 %v3237_v30 }
 0x517   : > { %v3260_v20 = vmul.f32 0.5, %v3252_v15  ;;  %v3200_v31 = vmul.f32 %v10089_v59, %v3199_v16  ;;  %v8650_v16 = vld [vmem:[%s14184_s5 + $0x20] sm:$0xf] }
 0x519   : > { %v3268_v23 = vmul.f32 %v3260_v20, %v3228_v47  ;;  %v3204_v21 = vsel %vm3203_vm5, %v10089_v59, %v3200_v31  ;;  %v8642_v47 = vld [vmem:[%s14184_s5 + $0x18] sm:$0xf]  ;;  %v9885_v59 = vld [vmem:[%s14184_s5 + $0x1c] sm:$0xf]  ;;  %v9890_v20 = vld [vmem:[%s14184_s5 + $0x40] sm:$0xf0] }
 0x51a   : > { %v3230_v42 = vmul.f32 %v3204_v21, %v11973_v50  ;;  %v8643_v44 = vor.u32 %v9889_v25, %v8642_v47  ;;  %v8647_v37 = vor.u32 %v9885_v59, %v8644_v0  ;;  %v8651_v31 = vor.u32 %v9890_v20, %v8650_v16  ;;  %v9899_v59 = vld [vmem:[%s14185_s6 + $0x40] sm:$0xff] }
 0x51b   : > { %v12037_v1 = vpack.c.bf16 %v3268_v23, %v3267_v60  ;;  %v9891_v0 = vld [vmem:[%s14185_s6] sm:$0xff] }
 0x51c   : > { %v3238_v51 = vmul.f32 0.5, %v3230_v42  ;;  %v10093_v3 = vpop.eup %10092  ;;  %3526 = vmatpush.bf16.msra.mxu2 %v8643_v44  ;;  %3555 = vmatpush.bf16.msra.mxu3 %v8647_v37 }
 0x51d   : > { %8653 = vmatmul.msk.bf16.gmra.mxu0 %vm3049_vm15, %v12037_v1  ;;  %8657 = vmatmul.msk.bf16.gmra.mxu1 %vm3049_vm15, %v12037_v1  ;;  %v3253_v58 = vadd.f32 1.0, %v10093_v3 }
 0x51e   : > { %10094 = vtanh.f32 %v3238_v51  ;;  %8661 = vmatmul.msk.bf16.gmra.mxu2 %vm3049_vm15, %v12037_v1  ;;  %8665 = vmatmul.msk.bf16.gmra.mxu3 %vm3049_vm15, %v12037_v1 }
 0x51f   : > { %v3261_v50 = vmul.f32 0.5, %v3253_v58  ;;  %10096 = vrsqrt.f32 %v3143_v6 }
 0x521   : > { %v3269_v39 = vmul.f32 %v3261_v50, %v3229_v26 }
 0x524   : > { %v10095_v8 = vpop.eup %10094 }
 0x525   : > { %v3254_v49 = vadd.f32 1.0, %v10095_v8  ;;  %v10097_v52 = vpop.eup %10096 }
 0x526   : > { %v3206_v2 = vmul.f32 %v10097_v52, %v3143_v6  ;;  %vm3212_vm6 = vweird.f32 %v10097_v52 }
 0x527   : > { %v3262_v5 = vmul.f32 0.5, %v3254_v49  ;;  %vm3213_vm8 = vmor %vm3211_vm7, %vm3212_vm6 }
 0x528   : > { %v3207_v10 = vmul.f32 %v10097_v52, %v3206_v2 }
 0x529   : > { %v3270_v24 = vmul.f32 %v3262_v5, %v3230_v42 }
 0x52a   : > { %v3208_v11 = vmul.f32 0.5, %v3207_v10 }
 0x52b   : > { %v12047_v34 = vpack.c.bf16 %v3270_v24, %v3269_v39 }
 0x52c   : > { %v3209_v36 = vsub.f32 1.5, %v3208_v11 }
 0x52d   : > { %8654 = vmatmul.msk.bf16.gmra.mxu0 %vm3049_vm15, %v12047_v34  ;;  %8658 = vmatmul.msk.bf16.gmra.mxu1 %vm3049_vm15, %v12047_v34 }
 0x52e   : > { %8662 = vmatmul.msk.bf16.gmra.mxu2 %vm3049_vm15, %v12047_v34  ;;  %8666 = vmatmul.msk.bf16.gmra.mxu3 %vm3049_vm15, %v12047_v34  ;;  %v3210_v17 = vmul.f32 %v10097_v52, %v3209_v36 }
 0x530   : > { %v3214_v56 = vsel %vm3213_vm8, %v10097_v52, %v3210_v17 }
 0x531   : > { %v3231_v33 = vmul.f32 %v3214_v56, %v11980_v27  ;;  %v9884_v27 = vld [vmem:[%s14184_s5 + $0x14] sm:$0xf] }
 0x532   : > { %v8639_v32 = vor.u32 %v9884_v27, %v8636_v54 }
 0x533   : > { %v3239_v22 = vmul.f32 0.5, %v3231_v33 }
 0x534   : > { %3497 = vmatpush.bf16.msra.mxu1 %v8639_v32 }
 0x55e   : > { %v3128_v57 = vpop.xlane.xlu1 %3127 }
 0x55f   : > { %v3136_v12 = vmul.f32 %v3128_v57, %v11933_v46  ;;  %v8634_v46 = vld [vmem:[%s14184_s5 + $0x10] sm:$0xf] }
 0x560   : > { %v8635_v38 = vor.u32 %v9888_v61, %v8634_v46 }
 0x561   : > { %v3144_v29 = vadd.f32 1e-05, %v3136_v12 }
 0x562   : > { %3468 = vmatpush.bf16.msrb.mxu0 %v8635_v38 }
 0x563   : > { %10098 = vrsqrt.f32 %v3144_v29  ;;  %vm3221_vm10 = vweird.f32 %v3144_v29 }
 0x564   : > { %10100 = vtanh.f32 %v3239_v22 }
 0x566   : > { %3584 = vmatpush.bf16.msra.mxu0 %v8651_v31 }
 0x569   : > { %v10099_v19 = vpop.eup %10098 }
 0x56a   : > { %v3216_v41 = vmul.f32 %v10099_v19, %v3144_v29  ;;  %vm3222_vm9 = vweird.f32 %v10099_v19  ;;  %v10101_v63 = vpop.eup %10100 }
 0x56b   : > { %vm3223_vm11 = vmor %vm3221_vm10, %vm3222_vm9  ;;  %v3255_v55 = vadd.f32 1.0, %v10101_v63 }
 0x56c   : > { %v3217_v43 = vmul.f32 %v10099_v19, %v3216_v41 }
 0x56d   : > { %v3263_v26 = vmul.f32 0.5, %v3255_v55 }
 0x56e   : > { %v3218_v7 = vmul.f32 0.5, %v3217_v43 }
 0x56f   : > { %v3271_v30 = vmul.f32 %v3263_v26, %v3231_v33 }
 0x570   : > { %v3219_v35 = vsub.f32 1.5, %v3218_v7 }
 0x572   : > { %v3220_v45 = vmul.f32 %v10099_v19, %v3219_v35 }
 0x574   : > { %v3224_v62 = vsel %vm3223_vm11, %v10099_v19, %v3220_v45 }
 0x575   : > { %v3232_v13 = vmul.f32 %v3224_v62, %v11988_v28 }
 0x577   : > { %v3240_v40 = vmul.f32 0.5, %v3232_v13 }
 0x579   : > { %10102 = vtanh.f32 %v3240_v40 }
 0x57f   : > { %v10103_v28 = vpop.eup %10102 }
 0x580   : > { %v3256_v18 = vadd.f32 1.0, %v10103_v28 }
 0x582   : > { %v3264_v14 = vmul.f32 0.5, %v3256_v18  ;;  %v9907_v18 = vld [vmem:[%s14185_s6 + $0x80] sm:$0xff] }
 0x584   : > { %v3272_v48 = vmul.f32 %v3264_v14, %v3232_v13  ;;  %v9915_v14 = vld [vmem:[%s14185_s6 + $0xc0] sm:$0xff] }
 0x586   : > { %v3276_v15 = vpack.c.bf16 %v3272_v48, %v3271_v30 }
 0x588   : > { %8655 = vmatmul.msk.bf16.gmra.mxu0 %vm3049_vm15, %v3276_v15  ;;  %8659 = vmatmul.msk.bf16.gmra.mxu1 %vm3049_vm15, %v3276_v15 }
 0x589   : > { %8663 = vmatmul.msk.bf16.gmra.mxu2 %vm3049_vm15, %v3276_v15  ;;  %8667 = vmatmul.msk.bf16.gmra.mxu3 %vm3049_vm15, %v3276_v15 }
 0x58a   : > { %v12123_v60 = vpop.f32.mrf.mxu0  ;;  %v3383_v23 = vpop.f32.mrf.mxu1 }
 0x591   : > { %v12125_v21 = vpop.f32.mrf.mxu2  ;;  %v12127_v42 = vpop.f32.mrf.mxu3 }
 0x592   : > { %v3356_v51 = vpop.f32.mrf.mxu0  ;;  %v3385_v3 = vpop.f32.mrf.mxu1 }
 0x593   : > { %v3622_v25 = vpack.c.bf16 %v3356_v51, %v12123_v60  ;;  %v3643_v13 = vpack.c.bf16 %v3385_v3, %v3383_v23  ;;  %v9900_v60 = vld [vmem:[%s14185_s6 + $0x48] sm:$0xff] }
 0x594   : > { %v9892_v23 = vld [vmem:[%s14185_s6 + $0x8] sm:$0xff] }
 0x595   : > { %v9908_v51 = vld [vmem:[%s14185_s6 + $0x88] sm:$0xff] }
 0x596   : > { %v9916_v3 = vld [vmem:[%s14185_s6 + $0xc8] sm:$0xff] }
 0x598   : > { %8668 = vmatmul.msk.bf16.vlgmr.msrb.gmra.mxu0 %vm3049_vm15, %v12025_v9  ;;  %8672 = vmatmul.msk.bf16.vlgmr.msra.gmra.mxu1 %vm3049_vm15, %v12025_v9 }
 0x599   : > { %8676 = vmatmul.msk.bf16.vlgmr.msra.gmra.mxu2 %vm3049_vm15, %v12025_v9  ;;  %8680 = vmatmul.msk.bf16.vlgmr.msra.gmra.mxu3 %vm3049_vm15, %v12025_v9  ;;  %v12131_v58 = vpop.f32.mrf.mxu2  ;;  %v12133_v8 = vpop.f32.mrf.mxu3 }
 0x59a   : > { %v3359_v50 = vpop.f32.mrf.mxu0  ;;  %v3388_v49 = vpop.f32.mrf.mxu1  ;;  %v3890_v28 = vpack.c.bf16 %v12131_v58, %v12125_v21  ;;  %v4040_v26 = vpack.c.bf16 %v12133_v8, %v12127_v42 }
 0x5a1   : > { %v3417_v5 = vpop.f32.mrf.mxu2  ;;  %v3446_v39 = vpop.f32.mrf.mxu3 }
 0x5a2   : > { %v3361_v24 = vpop.f32.mrf.mxu0  ;;  %v3390_v53 = vpop.f32.mrf.mxu1 }
 0x5a3   : > { %v3623_v62 = vpack.c.bf16 %v3361_v24, %v3359_v50  ;;  %v3644_v38 = vpack.c.bf16 %v3390_v53, %v3388_v49  ;;  %v9901_v24 = vld [vmem:[%s14185_s6 + $0x50] sm:$0xff] }
 0x5a4   : > { %v9893_v53 = vld [vmem:[%s14185_s6 + $0x10] sm:$0xff] }
 0x5a8   : > { %8669 = vmatmul.msk.bf16.gmra.mxu0 %vm3049_vm15, %v12037_v1  ;;  %8673 = vmatmul.msk.bf16.gmra.mxu1 %vm3049_vm15, %v12037_v1 }
 0x5a9   : > { %8677 = vmatmul.msk.bf16.gmra.mxu2 %vm3049_vm15, %v12037_v1  ;;  %8681 = vmatmul.msk.bf16.gmra.mxu3 %vm3049_vm15, %v12037_v1  ;;  %v3419_v4 = vpop.f32.mrf.mxu2  ;;  %v3448_v6 = vpop.f32.mrf.mxu3 }
 0x5aa   : > { %v3364_v52 = vpop.f32.mrf.mxu0  ;;  %v3393_v2 = vpop.f32.mrf.mxu1  ;;  %v3891_v37 = vpack.c.bf16 %v3419_v4, %v3417_v5  ;;  %v4041_v40 = vpack.c.bf16 %v3448_v6, %v3446_v39 }
 0x5b1   : > { %v3451_v10 = vpop.f32.mrf.mxu3 }
 0x5b2   : > { %v3366_v11 = vpop.f32.mrf.mxu0  ;;  %v3395_v57 = vpop.f32.mrf.mxu1 }
 0x5b3   : > { %v3624_v7 = vpack.c.bf16 %v3366_v11, %v3364_v52  ;;  %v9909_v52 = vld [vmem:[%s14185_s6 + $0x90] sm:$0xff] }
 0x5b8   : > { %8670 = vmatmul.msk.bf16.gmra.mxu0 %vm3049_vm15, %v12047_v34  ;;  %8674 = vmatmul.msk.bf16.gmra.mxu1 %vm3049_vm15, %v12047_v34 }
 0x5b9   : > { %8678 = vmatmul.msk.bf16.gmra.mxu2 %vm3049_vm15, %v12047_v34  ;;  %8682 = vmatmul.msk.bf16.gmra.mxu3 %vm3049_vm15, %v12047_v34  ;;  %v3453_v36 = vpop.f32.mrf.mxu3 }
 0x5ba   : > { %v4042_v47 = vpack.c.bf16 %v3453_v36, %v3451_v10 }
 0x5c8   : > { %8671 = vmatmul.msk.bf16.gmra.mxu0 %vm3049_vm15, %v3276_v15  ;;  %8675 = vmatmul.msk.bf16.gmra.mxu1 %vm3049_vm15, %v3276_v15 }
 0x5c9   : > { %8679 = vmatmul.msk.bf16.gmra.mxu2 %vm3049_vm15, %v3276_v15  ;;  %8683 = vmatmul.msk.bf16.gmra.mxu3 %vm3049_vm15, %v3276_v15 }
 0x5d8   : > { %8684 = vmatmul.msk.bf16.vlgmr.msra.gmra.mxu0 %vm3049_vm15, %v12025_v9  ;;  %v3422_v9 = vpop.f32.mrf.mxu2 }
 0x5e0   : > { %v3424_v12 = vpop.f32.mrf.mxu2 }
 0x5e1   : > { %v3892_v54 = vpack.c.bf16 %v3424_v12, %v3422_v9 }
 0x5e8   : > { %8685 = vmatmul.msk.bf16.gmra.mxu0 %vm3049_vm15, %v12037_v1 }
 0x5f8   : > { %8686 = vmatmul.msk.bf16.gmra.mxu0 %vm3049_vm15, %v12047_v34  ;;  %v3645_v34 = vpack.c.bf16 %v3395_v57, %v3393_v2  ;;  %v9917_v2 = vld [vmem:[%s14185_s6 + $0xd0] sm:$0xff] }
 0x605   : > { %v3369_v29 = vpop.f32.mrf.mxu0  ;;  %v3398_v17 = vpop.f32.mrf.mxu1 }
 0x608   : > { %8687 = vmatmul.msk.bf16.gmra.mxu0 %vm3049_vm15, %v3276_v15  ;;  %vm4923_vm15 = vcmask 31744  }
 0x60c   : > { %v3427_v1 = vpop.f32.mrf.mxu2  ;;  %v3456_v56 = vpop.f32.mrf.mxu3 }
 0x60d   : > { %v3371_v19 = vpop.f32.mrf.mxu0  ;;  %v3400_v41 = vpop.f32.mrf.mxu1 }
 0x60e   : > { %v3625_v33 = vpack.c.bf16 %v3371_v19, %v3369_v29  ;;  %v3646_v43 = vpack.c.bf16 %v3400_v41, %v3398_v17  ;;  %v9902_v29 = vld [vmem:[%s14185_s6 + $0x58] sm:$0xff] }
 0x60f   : > { %v9894_v17 = vld [vmem:[%s14185_s6 + $0x18] sm:$0xff] }
 0x610   : > { %3715 = vmatpush.bf16.msrb.mxu1 %v3646_v43  ;;  %3828 = vmatpush.bf16.msrb.mxu2 %v3625_v33  ;;  %v9910_v33 = vld [vmem:[%s14185_s6 + $0x98] sm:$0xff] }
 0x611   : > { %v9918_v43 = vld [vmem:[%s14185_s6 + $0xd8] sm:$0xff] }
 0x614   : > { %v3429_v22 = vpop.f32.mrf.mxu2  ;;  %v3458_v35 = vpop.f32.mrf.mxu3  ;;  %3716 = vmatpush.bf16.msrb.mxu1 %v3645_v34  ;;  %3829 = vmatpush.bf16.msrb.mxu2 %v3624_v7 }
 0x615   : > { %v3893_v45 = vpack.c.bf16 %v3429_v22, %v3427_v1  ;;  %v4043_v46 = vpack.c.bf16 %v3458_v35, %v3456_v56  ;;  %v12140_v61 = vpop.f32.mrf.mxu0  ;;  %v12142_v27 = vpop.f32.mrf.mxu1 }
 0x617   : > { %3962 = vmatpush.bf16.msrb.mxu3 %v3893_v45  ;;  %4112 = vmatpush.bf16.msrb.mxu0 %v4043_v46 }
 0x618   : > { %3717 = vmatpush.bf16.msrb.mxu1 %v3644_v38  ;;  %3830 = vmatpush.bf16.msrb.mxu2 %v3623_v62 }
 0x61b   : > { %3963 = vmatpush.bf16.msrb.mxu3 %v3892_v54  ;;  %4113 = vmatpush.bf16.msrb.mxu0 %v4042_v47 }
 0x61c   : > { %v12145_v32 = vpop.f32.mrf.mxu2  ;;  %v12147_v44 = vpop.f32.mrf.mxu3  ;;  %3718 = vmatpush.bf16.msrb.mxu1 %v3643_v13  ;;  %3831 = vmatpush.bf16.msrb.mxu2 %v3622_v25 }
 0x61d   : > { %v12155_v63 = vpop.f32.mrf.mxu0  ;;  %v12157_v55 = vpop.f32.mrf.mxu1 }
 0x61e   : > { %v4190_v13 = vpack.c.bf16 %v12155_v63, %v12140_v61 }
 0x61f   : > { %3964 = vmatpush.bf16.msrb.mxu3 %v3891_v37  ;;  %4114 = vmatpush.bf16.msrb.mxu0 %v4041_v40  ;;  %v9895_v37 = vld [vmem:[%s14185_s6 + $0x20] sm:$0xff] }
 0x620   : > { %8736 = vmatmul.msk.bf16.vlgmr.msrb.gmra.mxu1 %vm1826_vm0, %v9899_v59  ;;  %8776 = vmatmul.msk.bf16.vlgmr.msrb.gmra.mxu2 %vm1826_vm0, %v9891_v0  ;;  %v4340_v59 = vpack.c.bf16 %v12157_v55, %v12142_v27  ;;  %v9903_v0 = vld [vmem:[%s14185_s6 + $0x60] sm:$0xff] }
 0x621   : > { %v9911_v55 = vld [vmem:[%s14185_s6 + $0xa0] sm:$0xff] }
 0x623   : > { %3965 = vmatpush.bf16.msrb.mxu3 %v3890_v28  ;;  %4115 = vmatpush.bf16.msrb.mxu0 %v4040_v26  ;;  %v9919_v26 = vld [vmem:[%s14185_s6 + $0xe0] sm:$0xff] }
 0x624   : > { %v12171_v30 = vpop.f32.mrf.mxu2  ;;  %v12173_v48 = vpop.f32.mrf.mxu3 }
 0x625   : > { %v12175_v15 = vpop.f32.mrf.mxu0  ;;  %v12177_v16 = vpop.f32.mrf.mxu1  ;;  %v4490_v27 = vpack.c.bf16 %v12171_v30, %v12145_v32  ;;  %v4640_v63 = vpack.c.bf16 %v12173_v48, %v12147_v44  ;;  %v9904_v32 = vld [vmem:[%s14185_s6 + $0x68] sm:$0xff] }
 0x626   : > { %8832 = vmatmul.msk.bf16.vlgmr.msrb.gmra.mxu3 %vm1826_vm0, %v9907_v18  ;;  %8888 = vmatmul.msk.bf16.vlgmr.msrb.gmra.mxu0 %vm1826_vm0, %v9915_v14  ;;  %v9896_v44 = vld [vmem:[%s14185_s6 + $0x28] sm:$0xff] }
 0x627   : > { %v9912_v30 = vld [vmem:[%s14185_s6 + $0xa8] sm:$0xff] }
 0x628   : > { %v9920_v48 = vld [vmem:[%s14185_s6 + $0xe8] sm:$0xff] }
 0x62c   : > { %v12181_v20 = vpop.f32.mrf.mxu2  ;;  %v12183_v31 = vpop.f32.mrf.mxu3 }
 0x62d   : > { %v3477_v21 = vpop.f32.mrf.mxu0  ;;  %v3506_v42 = vpop.f32.mrf.mxu1 }
 0x62e   : > { %v4191_v38 = vpack.c.bf16 %v3477_v21, %v12175_v15  ;;  %v4341_v54 = vpack.c.bf16 %v3506_v42, %v12177_v16  ;;  %v9905_v16 = vld [vmem:[%s14185_s6 + $0x70] sm:$0xff]  ;;  %v9906_v42 = vld [vmem:[%s14185_s6 + $0x78] sm:$0xff] }
 0x630   : > { %8737 = vmatmul.msk.bf16.gmra.mxu1 %vm1826_vm0, %v9900_v60  ;;  %8777 = vmatmul.msk.bf16.gmra.mxu2 %vm1826_vm0, %v9892_v23  ;;  %v9913_v60 = vld [vmem:[%s14185_s6 + $0xb0] sm:$0xff] }
 0x631   : > { %v9921_v23 = vld [vmem:[%s14185_s6 + $0xf0] sm:$0xff] }
 0x634   : > { %v12199_v58 = vpop.f32.mrf.mxu2  ;;  %v12201_v8 = vpop.f32.mrf.mxu3 }
 0x635   : > { %v3480_v50 = vpop.f32.mrf.mxu0  ;;  %v3509_v49 = vpop.f32.mrf.mxu1  ;;  %v4491_v40 = vpack.c.bf16 %v12199_v58, %v12181_v20  ;;  %v4641_v28 = vpack.c.bf16 %v12201_v8, %v12183_v31  ;;  %v9897_v20 = vld [vmem:[%s14185_s6 + $0x30] sm:$0xff]  ;;  %v9914_v8 = vld [vmem:[%s14185_s6 + $0xb8] sm:$0xff] }
 0x636   : > { %8833 = vmatmul.msk.bf16.gmra.mxu3 %vm1826_vm0, %v9908_v51  ;;  %8889 = vmatmul.msk.bf16.gmra.mxu0 %vm1826_vm0, %v9916_v3  ;;  %v9898_v51 = vld [vmem:[%s14185_s6 + $0x38] sm:$0xff] }
 0x63c   : > { %v3538_v5 = vpop.f32.mrf.mxu2  ;;  %v3567_v39 = vpop.f32.mrf.mxu3 }
 0x63d   : > { %v3482_v4 = vpop.f32.mrf.mxu0  ;;  %v3511_v6 = vpop.f32.mrf.mxu1 }
 0x63e   : > { %v4192_v7 = vpack.c.bf16 %v3482_v4, %v3480_v50  ;;  %v4342_v34 = vpack.c.bf16 %v3511_v6, %v3509_v49  ;;  %v9922_v50 = vld [vmem:[%s14185_s6 + $0xf8] sm:$0xff]  ;;  %v9939_v6 = vld [vmem:[%s14185_s6 + $0x180] sm:$0xff] }
 0x640   : > { %8738 = vmatmul.msk.bf16.gmra.mxu1 %vm1826_vm0, %v9901_v24  ;;  %8778 = vmatmul.msk.bf16.gmra.mxu2 %vm1826_vm0, %v9893_v53  ;;  %v9923_v24 = vld [vmem:[%s14185_s6 + $0x100] sm:$0xff] }
 0x641   : > { %v9931_v53 = vld [vmem:[%s14185_s6 + $0x140] sm:$0xff] }
 0x644   : > { %v3540_v9 = vpop.f32.mrf.mxu2  ;;  %v3569_v10 = vpop.f32.mrf.mxu3 }
 0x645   : > { %v3485_v11 = vpop.f32.mrf.mxu0  ;;  %v3514_v57 = vpop.f32.mrf.mxu1  ;;  %v4492_v47 = vpack.c.bf16 %v3540_v9, %v3538_v5  ;;  %v4642_v25 = vpack.c.bf16 %v3569_v10, %v3567_v39 }
 0x646   : > { %8834 = vmatmul.msk.bf16.gmra.mxu3 %vm1826_vm0, %v9909_v52  ;;  %8890 = vmatmul.msk.bf16.gmra.mxu0 %vm1826_vm0, %v9917_v2  ;;  %v9947_v52 = vld [vmem:[%s14185_s6 + $0x1c0] sm:$0xff] }
 0x64c   : > { %v3543_v12 = vpop.f32.mrf.mxu2  ;;  %v3572_v36 = vpop.f32.mrf.mxu3 }
 0x64d   : > { %v3487_v1 = vpop.f32.mrf.mxu0  ;;  %v3516_v56 = vpop.f32.mrf.mxu1 }
 0x64e   : > { %v4193_v19 = vpack.c.bf16 %v3487_v1, %v3485_v11  ;;  %v4343_v41 = vpack.c.bf16 %v3516_v56, %v3514_v57  ;;  %v9924_v56 = vld [vmem:[%s14185_s6 + $0x108] sm:$0xff] }
 0x650   : > { %8739 = vmatmul.msk.bf16.gmra.mxu1 %vm1826_vm0, %v9902_v29  ;;  %8779 = vmatmul.msk.bf16.gmra.mxu2 %vm1826_vm0, %v9894_v17 }
 0x651   : > { %4262 = vmatpush.bf16.msra.mxu1 %v4193_v19  ;;  %4412 = vmatpush.bf16.msra.mxu2 %v4343_v41  ;;  %v9932_v19 = vld [vmem:[%s14185_s6 + $0x148] sm:$0xff] }
 0x654   : > { %v3545_v22 = vpop.f32.mrf.mxu2  ;;  %v3574_v35 = vpop.f32.mrf.mxu3 }
 0x655   : > { %v4493_v45 = vpack.c.bf16 %v3545_v22, %v3543_v12  ;;  %v4643_v46 = vpack.c.bf16 %v3574_v35, %v3572_v36  ;;  %4263 = vmatpush.bf16.msra.mxu1 %v4192_v7  ;;  %4413 = vmatpush.bf16.msra.mxu2 %v4342_v34  ;;  %v12235_v62 = vpop.f32.mrf.mxu0  ;;  %v9940_v7 = vld [vmem:[%s14185_s6 + $0x188] sm:$0xff] }
 0x656   : > { %8835 = vmatmul.msk.bf16.gmra.mxu3 %vm1826_vm0, %v9910_v33  ;;  %8891 = vmatmul.msk.bf16.gmra.mxu0 %vm1826_vm0, %v9918_v43  ;;  %v9948_v34 = vld [vmem:[%s14185_s6 + $0x1c8] sm:$0xff] }
 0x657   : > { %4562 = vmatpush.bf16.msra.mxu3 %v4493_v45  ;;  %4712 = vmatpush.bf16.msra.mxu0 %v4643_v46 }
 0x659   : > { %4264 = vmatpush.bf16.msra.mxu1 %v4191_v38  ;;  %4414 = vmatpush.bf16.msra.mxu2 %v4341_v54 }
 0x65b   : > { %4563 = vmatpush.bf16.msra.mxu3 %v4492_v47  ;;  %4713 = vmatpush.bf16.msra.mxu0 %v4642_v25 }
 0x65d   : > { %4265 = vmatpush.bf16.msra.mxu1 %v4190_v13  ;;  %4415 = vmatpush.bf16.msra.mxu2 %v4340_v59  ;;  %v3588_v61 = vpop.f32.mrf.mxu0 }
 0x65e   : > { %v4790_v39 = vpack.c.bf16 %v3588_v61, %v12235_v62 }
 0x65f   : > { %4564 = vmatpush.bf16.msra.mxu3 %v4491_v40  ;;  %4714 = vmatpush.bf16.msra.mxu0 %v4641_v28 }
 0x660   : > { %8740 = vmatmul.msk.bf16.gmra.mxu1 %vm1826_vm0, %v9903_v0  ;;  %8780 = vmatmul.msk.bf16.gmra.mxu2 %vm1826_vm0, %v9895_v37  ;;  %v9925_v0 = vld [vmem:[%s14185_s6 + $0x110] sm:$0xff] }
 0x661   : > { %v9933_v37 = vld [vmem:[%s14185_s6 + $0x150] sm:$0xff] }
 0x663   : > { %4565 = vmatpush.bf16.msra.mxu3 %v4490_v27  ;;  %4715 = vmatpush.bf16.msra.mxu0 %v4640_v63  ;;  %v9941_v27 = vld [vmem:[%s14185_s6 + $0x190] sm:$0xff] }
 0x664   : > { %v9949_v63 = vld [vmem:[%s14185_s6 + $0x1d0] sm:$0xff] }
 0x665   : > { %v3591_v18 = vpop.f32.mrf.mxu0 }
 0x666   : > { %8836 = vmatmul.msk.bf16.gmra.mxu3 %vm1826_vm0, %v9911_v55  ;;  %8892 = vmatmul.msk.bf16.gmra.mxu0 %vm1826_vm0, %v9919_v26 }
 0x66d   : > { %v3593_v14 = vpop.f32.mrf.mxu0 }
 0x66e   : > { %v4791_v5 = vpack.c.bf16 %v3593_v14, %v3591_v18 }
 0x670   : > { %8741 = vmatmul.msk.bf16.gmra.mxu1 %vm1826_vm0, %v9904_v32  ;;  %8781 = vmatmul.msk.bf16.gmra.mxu2 %vm1826_vm0, %v9896_v44 }
 0x675   : > { %v3596_v15 = vpop.f32.mrf.mxu0 }
 0x676   : > { %8837 = vmatmul.msk.bf16.gmra.mxu3 %vm1826_vm0, %v9912_v30  ;;  %8893 = vmatmul.msk.bf16.gmra.mxu0 %vm1826_vm0, %v9920_v48 }
 0x67d   : > { %v3598_v31 = vpop.f32.mrf.mxu0 }
 0x67e   : > { %v4792_v49 = vpack.c.bf16 %v3598_v31, %v3596_v15  ;;  %v9926_v31 = vld [vmem:[%s14185_s6 + $0x118] sm:$0xff] }
 0x680   : > { %8742 = vmatmul.msk.bf16.gmra.mxu1 %vm1826_vm0, %v9905_v16  ;;  %8782 = vmatmul.msk.bf16.gmra.mxu2 %vm1826_vm0, %v9897_v20 }
 0x685   : > { %v3601_v21 = vpop.f32.mrf.mxu0 }
 0x686   : > { %8838 = vmatmul.msk.bf16.gmra.mxu3 %vm1826_vm0, %v9913_v60  ;;  %8894 = vmatmul.msk.bf16.gmra.mxu0 %vm1826_vm0, %v9921_v23  ;;  %v9934_v60 = vld [vmem:[%s14185_s6 + $0x158] sm:$0xff] }
 0x68d   : > { %v3603_v3 = vpop.f32.mrf.mxu0 }
 0x68e   : > { %v4793_v58 = vpack.c.bf16 %v3603_v3, %v3601_v21  ;;  %v9950_v3 = vld [vmem:[%s14185_s6 + $0x1d8] sm:$0xff] }
 0x690   : > { %8743 = vmatmul.msk.bf16.gmra.mxu1 %vm1826_vm0, %v9906_v42  ;;  %8783 = vmatmul.msk.bf16.gmra.mxu2 %vm1826_vm0, %v9898_v51  ;;  %v9942_v51 = vld [vmem:[%s14185_s6 + $0x198] sm:$0xff] }
 0x691   : > { %4862 = vmatpush.bf16.msrb.mxu1 %v4793_v58 }
 0x695   : > { %4863 = vmatpush.bf16.msrb.mxu1 %v4792_v49 }
 0x696   : > { %8839 = vmatmul.msk.bf16.gmra.mxu3 %vm1826_vm0, %v9914_v8  ;;  %8895 = vmatmul.msk.bf16.gmra.mxu0 %vm1826_vm0, %v9922_v50 }
 0x699   : > { %4864 = vmatpush.bf16.msrb.mxu1 %v4791_v5 }
 0x69d   : > { %v3720_v4 = vpop.f32.mrf.mxu1  ;;  %4865 = vmatpush.bf16.msrb.mxu1 %v4790_v39 }
 0x6a0   : > { %8944 = vmatmul.msk.bf16.vlgmr.msra.gmra.mxu1 %vm1826_vm0, %v9923_v24  ;;  %9000 = vmatmul.msk.bf16.vlgmr.msra.gmra.mxu2 %vm1826_vm0, %v9931_v53 }
 0x6a3   : > { %v3833_v2 = vpop.f32.mrf.mxu2  ;;  %v4117_v9 = vpop.f32.mrf.mxu0 }
 0x6a4   : > { %v3834_v10 = vadd.f32 %v3833_v2, %v3720_v4  ;;  %v9927_v2 = vld [vmem:[%s14185_s6 + $0x120] sm:$0xff] }
 0x6a5   : > { %v3722_v11 = vpop.f32.mrf.mxu1 }
 0x6a6   : > { %9056 = vmatmul.msk.bf16.vlgmr.msra.gmra.mxu3 %vm1826_vm0, %v9939_v6  ;;  %9112 = vmatmul.msk.bf16.vlgmr.msra.gmra.mxu0 %vm1826_vm0, %v9947_v52 }
 0x6a9   : > { %v3967_v57 = vpop.f32.mrf.mxu3 }
 0x6aa   : > { %v4007_v12 = vadd.f32 %v3967_v57, %v3834_v10 }
 0x6ab   : > { %v3835_v36 = vpop.f32.mrf.mxu2  ;;  %v4119_v29 = vpop.f32.mrf.mxu0 }
 0x6ac   : > { %v3836_v17 = vadd.f32 %v3835_v36, %v3722_v11  ;;  %v12334_v1 = vadd.f32 %v4117_v9, %v4007_v12  ;;  %v9935_v9 = vld [vmem:[%s14185_s6 + $0x160] sm:$0xff] }
 0x6ad   : > { %v3725_v41 = vpop.f32.mrf.mxu1  ;;  %v9943_v12 = vld [vmem:[%s14185_s6 + $0x1a0] sm:$0xff] }
 0x6ae   : > { %v9951_v36 = vld [vmem:[%s14185_s6 + $0x1e0] sm:$0xff] }
 0x6b0   : > { %8945 = vmatmul.msk.bf16.gmra.mxu1 %vm1826_vm0, %v9924_v56  ;;  %9001 = vmatmul.msk.bf16.gmra.mxu2 %vm1826_vm0, %v9932_v19 }
 0x6b1   : > { %v3969_v33 = vpop.f32.mrf.mxu3 }
 0x6b2   : > { %v4008_v43 = vadd.f32 %v3969_v33, %v3836_v17 }
 0x6b3   : > { %v3838_v22 = vpop.f32.mrf.mxu2  ;;  %v4122_v35 = vpop.f32.mrf.mxu0 }
 0x6b4   : > { %v3839_v45 = vadd.f32 %v3838_v22, %v3725_v41  ;;  %v12350_v46 = vadd.f32 %v4119_v29, %v4008_v43 }
 0x6b5   : > { %v3727_v62 = vpop.f32.mrf.mxu1 }
 0x6b6   : > { %9057 = vmatmul.msk.bf16.gmra.mxu3 %vm1826_vm0, %v9940_v7  ;;  %9113 = vmatmul.msk.bf16.gmra.mxu0 %vm1826_vm0, %v9948_v34 }
 0x6b9   : > { %v3972_v38 = vpop.f32.mrf.mxu3 }
 0x6ba   : > { %v4009_v54 = vadd.f32 %v3972_v38, %v3839_v45  ;;  %v9936_v45 = vld [vmem:[%s14185_s6 + $0x168] sm:$0xff] }
 0x6bb   : > { %v3840_v47 = vpop.f32.mrf.mxu2  ;;  %v4124_v25 = vpop.f32.mrf.mxu0 }
 0x6bc   : > { %v3841_v13 = vadd.f32 %v3840_v47, %v3727_v62  ;;  %v12354_v59 = vadd.f32 %v4122_v35, %v4009_v54  ;;  %v9928_v35 = vld [vmem:[%s14185_s6 + $0x128] sm:$0xff] }
 0x6bd   : > { %v3730_v40 = vpop.f32.mrf.mxu1  ;;  %v9944_v54 = vld [vmem:[%s14185_s6 + $0x1a8] sm:$0xff] }
 0x6be   : > { %v9952_v47 = vld [vmem:[%s14185_s6 + $0x1e8] sm:$0xff] }
 0x6c0   : > { %8946 = vmatmul.msk.bf16.gmra.mxu1 %vm1826_vm0, %v9925_v0  ;;  %9002 = vmatmul.msk.bf16.gmra.mxu2 %vm1826_vm0, %v9933_v37 }
 0x6c1   : > { %v3974_v28 = vpop.f32.mrf.mxu3 }
 0x6c2   : > { %v4010_v61 = vadd.f32 %v3974_v28, %v3841_v13 }
 0x6c3   : > { %v3843_v55 = vpop.f32.mrf.mxu2  ;;  %v4127_v26 = vpop.f32.mrf.mxu0 }
 0x6c4   : > { %v3844_v18 = vadd.f32 %v3843_v55, %v3730_v40  ;;  %v12370_v32 = vadd.f32 %v4124_v25, %v4010_v61  ;;  %v9929_v55 = vld [vmem:[%s14185_s6 + $0x130] sm:$0xff] }
 0x6c5   : > { %v3732_v44 = vpop.f32.mrf.mxu1 }
 0x6c6   : > { %9058 = vmatmul.msk.bf16.gmra.mxu3 %vm1826_vm0, %v9941_v27  ;;  %9114 = vmatmul.msk.bf16.gmra.mxu0 %vm1826_vm0, %v9949_v63 }
 0x6c9   : > { %v3977_v14 = vpop.f32.mrf.mxu3 }
 0x6ca   : > { %v4011_v30 = vadd.f32 %v3977_v14, %v3844_v18  ;;  %v9945_v14 = vld [vmem:[%s14185_s6 + $0x1b0] sm:$0xff] }
 0x6cb   : > { %v3845_v48 = vpop.f32.mrf.mxu2  ;;  %v4129_v15 = vpop.f32.mrf.mxu0 }
 0x6cc   : > { %v3846_v16 = vadd.f32 %v3845_v48, %v3732_v44  ;;  %v12374_v20 = vadd.f32 %v4127_v26, %v4011_v30  ;;  %v9937_v26 = vld [vmem:[%s14185_s6 + $0x170] sm:$0xff] }
 0x6cd   : > { %v3735_v23 = vpop.f32.mrf.mxu1  ;;  %v9953_v30 = vld [vmem:[%s14185_s6 + $0x1f0] sm:$0xff] }
 0x6d0   : > { %8947 = vmatmul.msk.bf16.gmra.mxu1 %vm1826_vm0, %v9926_v31  ;;  %9003 = vmatmul.msk.bf16.gmra.mxu2 %vm1826_vm0, %v9934_v60 }
 0x6d1   : > { %v3979_v21 = vpop.f32.mrf.mxu3 }
 0x6d2   : > { %v4012_v42 = vadd.f32 %v3979_v21, %v3846_v16 }
 0x6d3   : > { %v3848_v58 = vpop.f32.mrf.mxu2  ;;  %v4132_v8 = vpop.f32.mrf.mxu0 }
 0x6d4   : > { %v3849_v50 = vadd.f32 %v3848_v58, %v3735_v23  ;;  %v12390_v49 = vadd.f32 %v4129_v15, %v4012_v42 }
 0x6d5   : > { %v3737_v5 = vpop.f32.mrf.mxu1 }
 0x6d6   : > { %9059 = vmatmul.msk.bf16.gmra.mxu3 %vm1826_vm0, %v9942_v51  ;;  %9115 = vmatmul.msk.bf16.gmra.mxu0 %vm1826_vm0, %v9950_v3  ;;  %v9930_v51 = vld [vmem:[%s14185_s6 + $0x138] sm:$0xff] }
 0x6d7   : > { %v9938_v3 = vld [vmem:[%s14185_s6 + $0x178] sm:$0xff] }
 0x6d9   : > { %v3982_v39 = vpop.f32.mrf.mxu3 }
 0x6da   : > { %v4013_v24 = vadd.f32 %v3982_v39, %v3849_v50  ;;  %v9954_v39 = vld [vmem:[%s14185_s6 + $0x1f8] sm:$0xff] }
 0x6db   : > { %v3850_v53 = vpop.f32.mrf.mxu2  ;;  %v4134_v4 = vpop.f32.mrf.mxu0 }
 0x6dc   : > { %v3851_v6 = vadd.f32 %v3850_v53, %v3737_v5  ;;  %v12394_v52 = vadd.f32 %v4132_v8, %v4013_v24  ;;  %v9946_v5 = vld [vmem:[%s14185_s6 + $0x1b8] sm:$0xff] }
 0x6dd   : > { %v3740_v10 = vpop.f32.mrf.mxu1 }
 0x6e0   : > { %8948 = vmatmul.msk.bf16.gmra.mxu1 %vm1826_vm0, %v9927_v2  ;;  %9004 = vmatmul.msk.bf16.gmra.mxu2 %vm1826_vm0, %v9935_v9 }
 0x6e1   : > { %v3984_v11 = vpop.f32.mrf.mxu3 }
 0x6e2   : > { %v4014_v57 = vadd.f32 %v3984_v11, %v3851_v6  ;;  %v9955_v11 = vld [vmem:[%s14185_s6 + $0x200] sm:$0xff] }
 0x6e3   : > { %v3853_v29 = vpop.f32.mrf.mxu2  ;;  %v4137_v17 = vpop.f32.mrf.mxu0 }
 0x6e4   : > { %v3854_v56 = vadd.f32 %v3853_v29, %v3740_v10  ;;  %v12410_v19 = vadd.f32 %v4134_v4, %v4014_v57 }
 0x6e5   : > { %v12412_v41 = vpop.f32.mrf.mxu1 }
 0x6e6   : > { %9060 = vmatmul.msk.bf16.gmra.mxu3 %vm1826_vm0, %v9943_v12  ;;  %9116 = vmatmul.msk.bf16.gmra.mxu0 %vm1826_vm0, %v9951_v36 }
 0x6e9   : > { %v3987_v33 = vpop.f32.mrf.mxu3 }
 0x6ea   : > { %v4015_v43 = vadd.f32 %v3987_v33, %v3854_v56 }
 0x6eb   : > { %v12416_v7 = vpop.f32.mrf.mxu2  ;;  %v12418_v34 = vpop.f32.mrf.mxu0 }
 0x6ec   : > { %v12420_v22 = vadd.f32 %v4137_v17, %v4015_v43  ;;  %v9956_v17 = vld [vmem:[%s14185_s6 + $0x208] sm:$0xff] }
 0x6ed   : > { %v3745_v62 = vpop.f32.mrf.mxu1 }
 0x6f0   : > { %8949 = vmatmul.msk.bf16.gmra.mxu1 %vm1826_vm0, %v9928_v35  ;;  %9005 = vmatmul.msk.bf16.gmra.mxu2 %vm1826_vm0, %v9936_v45 }
 0x6f1   : > { %v12430_v38 = vpop.f32.mrf.mxu3 }
 0x6f3   : > { %v3858_v25 = vpop.f32.mrf.mxu2  ;;  %v4142_v13 = vpop.f32.mrf.mxu0 }
 0x6f4   : > { %v3859_v0 = vadd.f32 %v3858_v25, %v3745_v62 }
 0x6f5   : > { %v12438_v37 = vpop.f32.mrf.mxu1 }
 0x6f6   : > { %9061 = vmatmul.msk.bf16.gmra.mxu3 %vm1826_vm0, %v9944_v54  ;;  %9117 = vmatmul.msk.bf16.gmra.mxu0 %vm1826_vm0, %v9952_v47 }
 0x6f9   : > { %v3992_v40 = vpop.f32.mrf.mxu3 }
 0x6fa   : > { %v4017_v28 = vadd.f32 %v3992_v40, %v3859_v0 }
 0x6fb   : > { %v12442_v61 = vpop.f32.mrf.mxu2  ;;  %v12444_v27 = vpop.f32.mrf.mxu0 }
 0x6fc   : > { %v12446_v63 = vadd.f32 %v4142_v13, %v4017_v28  ;;  %v9959_v13 = vld [vmem:[%s14185_s6 + $0x220] sm:$0xff] }
 0x6fd   : > { %v3750_v18 = vpop.f32.mrf.mxu1 }
 0x700   : > { %8950 = vmatmul.msk.bf16.gmra.mxu1 %vm1826_vm0, %v9929_v55  ;;  %9006 = vmatmul.msk.bf16.gmra.mxu2 %vm1826_vm0, %v9937_v26 }
 0x701   : > { %v12456_v44 = vpop.f32.mrf.mxu3 }
 0x703   : > { %v3863_v48 = vpop.f32.mrf.mxu2  ;;  %v4147_v31 = vpop.f32.mrf.mxu0 }
 0x704   : > { %v3864_v15 = vadd.f32 %v3863_v48, %v3750_v18 }
 0x705   : > { %v12464_v16 = vpop.f32.mrf.mxu1 }
 0x706   : > { %9062 = vmatmul.msk.bf16.gmra.mxu3 %vm1826_vm0, %v9945_v14  ;;  %9118 = vmatmul.msk.bf16.gmra.mxu0 %vm1826_vm0, %v9953_v30 }
 0x709   : > { %v3997_v60 = vpop.f32.mrf.mxu3 }
 0x70a   : > { %v4019_v23 = vadd.f32 %v3997_v60, %v3864_v15  ;;  %v9962_v60 = vld [vmem:[%s14185_s6 + $0x238] sm:$0xff] }
 0x70b   : > { %v12468_v21 = vpop.f32.mrf.mxu2  ;;  %v12476_v8 = vpop.f32.mrf.mxu0 }
 0x70c   : > { %v4169_v42 = vadd.f32 %v4147_v31, %v4019_v23 }
 0x70d   : > { %v3755_v58 = vpop.f32.mrf.mxu1 }
 0x710   : > { %8951 = vmatmul.msk.bf16.gmra.mxu1 %vm1826_vm0, %v9930_v51  ;;  %9007 = vmatmul.msk.bf16.gmra.mxu2 %vm1826_vm0, %v9938_v3 }
 0x711   : > { %v12480_v50 = vpop.f32.mrf.mxu3 }
 0x713   : > { %v3868_v24 = vpop.f32.mrf.mxu2  ;;  %v4152_v2 = vpop.f32.mrf.mxu0 }
 0x714   : > { %v3869_v53 = vadd.f32 %v3868_v24, %v3755_v58 }
 0x715   : > { %v12488_v4 = vpop.f32.mrf.mxu1 }
 0x716   : > { %9063 = vmatmul.msk.bf16.gmra.mxu3 %vm1826_vm0, %v9946_v5  ;;  %9119 = vmatmul.msk.bf16.gmra.mxu0 %vm1826_vm0, %v9954_v39 }
 0x719   : > { %v4002_v6 = vpop.f32.mrf.mxu3 }
 0x71a   : > { %v4021_v9 = vadd.f32 %v4002_v6, %v3869_v53 }
 0x71b   : > { %v12547_v26 = vpop.f32.mrf.mxu2  ;;  %v12554_v48 = vpop.f32.mrf.mxu0 }
 0x71c   : > { %v4171_v10 = vadd.f32 %v4152_v2, %v4021_v9 }
 0x71d   : > { %v4267_v57 = vpop.f32.mrf.mxu1 }
 0x71e   : > { %v4307_v12 = vadd.f32 %v4267_v57, %v12334_v1  ;;  %v9957_v1 = vld [vmem:[%s14185_s6 + $0x210] sm:$0xff] }
 0x720   : > { %9168 = vmatmul.msk.bf16.vlgmr.msrb.gmra.mxu1 %vm1826_vm0, %v9955_v11 }
 0x721   : > { %v12551_v30 = vpop.f32.mrf.mxu3 }
 0x723   : > { %v4417_v15 = vpop.f32.mrf.mxu2  ;;  %v4717_v23 = vpop.f32.mrf.mxu0 }
 0x724   : > { %v4457_v39 = vadd.f32 %v4417_v15, %v4307_v12 }
 0x725   : > { %v4269_v36 = vpop.f32.mrf.mxu1 }
 0x726   : > { %v4308_v29 = vadd.f32 %v4269_v36, %v12350_v46 }
 0x729   : > { %v4567_v31 = vpop.f32.mrf.mxu3 }
 0x72a   : > { %v4607_v53 = vadd.f32 %v4567_v31, %v4457_v39 }
 0x72b   : > { %v4719_v24 = vpop.f32.mrf.mxu0 }
 0x72c   : > { %v4757_v2 = vadd.f32 %v4717_v23, %v4607_v53 }
 0x72d   : > { %v4272_v56 = vpop.f32.mrf.mxu1 }
 0x72e   : > { %v4309_v33 = vadd.f32 %v4272_v56, %v12354_v59  ;;  %v9958_v59 = vld [vmem:[%s14185_s6 + $0x218] sm:$0xff] }
 0x730   : > { %9169 = vmatmul.msk.bf16.gmra.mxu1 %vm1826_vm0, %v9956_v17 }
 0x731   : > { %v4569_v58 = vpop.f32.mrf.mxu3 }
 0x733   : > { %v4722_v56 = vpop.f32.mrf.mxu0 }
 0x735   : > { %v4274_v43 = vpop.f32.mrf.mxu1 }
 0x736   : > { %v12504_v35 = vadd.f32 %v4274_v43, %v12370_v32 }
 0x739   : > { %v4572_v9 = vpop.f32.mrf.mxu3 }
 0x73d   : > { %v4277_v45 = vpop.f32.mrf.mxu1 }
 0x73e   : > { %v12510_v46 = vadd.f32 %v4277_v45, %v12374_v20 }
 0x740   : > { %9170 = vmatmul.msk.bf16.gmra.mxu1 %vm1826_vm0, %v9957_v1 }
 0x745   : > { %v4279_v62 = vpop.f32.mrf.mxu1 }
 0x746   : > { %v12514_v54 = vadd.f32 %v4279_v62, %v12390_v49 }
 0x74d   : > { %v4282_v32 = vpop.f32.mrf.mxu1 }
 0x74e   : > { %v12520_v47 = vadd.f32 %v4282_v32, %v12394_v52  ;;  %v9960_v52 = vld [vmem:[%s14185_s6 + $0x228] sm:$0xff] }
 0x750   : > { %9171 = vmatmul.msk.bf16.gmra.mxu1 %vm1826_vm0, %v9958_v59  ;;  %v4574_v59 = vpop.f32.mrf.mxu3 }
 0x755   : > { %v4284_v25 = vpop.f32.mrf.mxu1 }
 0x756   : > { %v12524_v20 = vadd.f32 %v4284_v25, %v12410_v19 }
 0x758   : > { %v4577_v15 = vpop.f32.mrf.mxu3 }
 0x75d   : > { %v4287_v49 = vpop.f32.mrf.mxu1 }
 0x75e   : > { %v12530_v0 = vadd.f32 %v4287_v49, %v12420_v22  ;;  %v9961_v22 = vld [vmem:[%s14185_s6 + $0x230] sm:$0xff] }
 0x760   : > { %9172 = vmatmul.msk.bf16.gmra.mxu1 %vm1826_vm0, %v9959_v13 }
 0x765   : > { %v12533_v40 = vpop.f32.mrf.mxu1 }
 0x76d   : > { %v4292_v28 = vpop.f32.mrf.mxu1 }
 0x76e   : > { %v12539_v19 = vadd.f32 %v4292_v28, %v12446_v63 }
 0x770   : > { %9173 = vmatmul.msk.bf16.gmra.mxu1 %vm1826_vm0, %v9960_v52 }
 0x775   : > { %v12542_v55 = vpop.f32.mrf.mxu1 }
 0x77d   : > { %v4297_v18 = vpop.f32.mrf.mxu1 }
 0x77e   : > { %v12549_v14 = vadd.f32 %v4297_v18, %v4169_v42  ;;  %v4419_v42 = vpop.f32.mrf.mxu2 }
 0x77f   : > { %v4458_v57 = vadd.f32 %v4419_v42, %v4308_v29  ;;  %v4724_v29 = vpop.f32.mrf.mxu0 }
 0x780   : > { %9174 = vmatmul.msk.bf16.gmra.mxu1 %vm1826_vm0, %v9961_v22 }
 0x781   : > { %v4608_v17 = vadd.f32 %v4569_v58, %v4458_v57 }
 0x783   : > { %v4758_v43 = vadd.f32 %v4719_v24, %v4608_v17  ;;  %v4579_v24 = vpop.f32.mrf.mxu3 }
 0x785   : > { %v12556_v63 = vpop.f32.mrf.mxu1 }
 0x786   : > { %v4422_v6 = vpop.f32.mrf.mxu2 }
 0x787   : > { %v4459_v12 = vadd.f32 %v4422_v6, %v4309_v33 }
 0x789   : > { %v4609_v32 = vadd.f32 %v4572_v9, %v4459_v12 }
 0x78b   : > { %v4759_v13 = vadd.f32 %v4722_v56, %v4609_v32  ;;  %v4582_v56 = vpop.f32.mrf.mxu3 }
 0x78d   : > { %v4302_v51 = vpop.f32.mrf.mxu1 }
 0x78e   : > { %v12561_v3 = vadd.f32 %v4302_v51, %v4171_v10  ;;  %v4424_v1 = vpop.f32.mrf.mxu2 }
 0x78f   : > { %v4460_v52 = vadd.f32 %v4424_v1, %v12504_v35 }
 0x790   : > { %9175 = vmatmul.msk.bf16.gmra.mxu1 %vm1826_vm0, %v9962_v60  ;;  %v4727_v60 = vpop.f32.mrf.mxu0 }
 0x791   : > { %v4610_v18 = vadd.f32 %v4574_v59, %v4460_v52 }
 0x793   : > { %v4760_v31 = vadd.f32 %v4724_v29, %v4610_v18 }
 0x795   : > { %v12564_v5 = vpop.f32.mrf.mxu1 }
 0x796   : > { %v4427_v22 = vpop.f32.mrf.mxu2 }
 0x797   : > { %v4461_v51 = vadd.f32 %v4427_v22, %v12510_v46 }
 0x799   : > { %v4611_v58 = vadd.f32 %v4577_v15, %v4461_v51 }
 0x79b   : > { %v4761_v53 = vadd.f32 %v4727_v60, %v4611_v58 }
 0x79d   : > { %v4867_v11 = vpop.f32.mrf.mxu1 }
 0x79e   : > { %v12566_v36 = vadd.f32 %v4867_v11, %v4757_v2  ;;  %v4429_v39 = vpop.f32.mrf.mxu2  ;;  %v4729_v11 = vpop.f32.mrf.mxu0 }
 0x79f   : > { %v4462_v2 = vadd.f32 %v4429_v39, %v12514_v54 }
 0x7a0   : > { %v4924_v10 = vsel %vm4923_vm15, %v12566_v36, 0.0 }
 0x7a1   : > { %4925 = vadd.xlane.f32.xlu2 %v4924_v10  ;;  %v4612_v57 = vadd.f32 %v4579_v24, %v4462_v2 }
 0x7a3   : > { %v4762_v10 = vadd.f32 %v4729_v11, %v4612_v57 }
 0x7a5   : > { %v4869_v45 = vpop.f32.mrf.mxu1 }
 0x7a6   : > { %v12570_v62 = vadd.f32 %v4869_v45, %v4758_v43  ;;  %v4432_v17 = vpop.f32.mrf.mxu2  ;;  %v4732_v59 = vpop.f32.mrf.mxu0 }
 0x7a7   : > { %v4463_v1 = vadd.f32 %v4432_v17, %v12520_v47 }
 0x7a8   : > { %v4927_v25 = vsel %vm4923_vm15, %v12570_v62, 0.0 }
 0x7a9   : > { %4928 = vadd.xlane.f32.xlu0 %v4927_v25  ;;  %v4613_v12 = vadd.f32 %v4582_v56, %v4463_v1  ;;  %v3856_v1 = vadd.f32 %v12416_v7, %v12412_v41 }
 0x7ab   : > { %v4763_v32 = vadd.f32 %v4732_v59, %v4613_v12 }
 0x7ad   : > { %v4872_v49 = vpop.f32.mrf.mxu1 }
 0x7ae   : > { %v12575_v28 = vadd.f32 %v4872_v49, %v4759_v13  ;;  %v10247_v49 = vmov 4.0   ;;  %v4434_v22 = vpop.f32.mrf.mxu2 }
 0x7af   : > { %10104 = vrcp.f32 %v10247_v49 }
 0x7b0   : > { %v4930_v33 = vsel %vm4923_vm15, %v12575_v28, 0.0 }
 0x7b1   : > { %4931 = vadd.xlane.f32.xlu1 %v4930_v33  ;;  %v4584_v33 = vpop.f32.mrf.mxu3 }
 0x7b5   : > { %v4874_v23 = vpop.f32.mrf.mxu1  ;;  %v10105_v52 = vpop.eup %10104 }
 0x7b6   : > { %v12580_v42 = vadd.f32 %v4874_v23, %v4760_v31  ;;  %v4973_v47 = vmul.f32 4.0, %v10105_v52  ;;  %v4734_v31 = vpop.f32.mrf.mxu0  ;;  %vm4977_vm0 = vweird.f32 %v10105_v52  ;;  %v4437_v51 = vpop.f32.mrf.mxu2 }
 0x7b8   : > { %v4933_v35 = vsel %vm4923_vm15, %v12580_v42, 0.0  ;;  %v4974_v18 = vsub.f32 1.0, %v4973_v47 }
 0x7b9   : > { %4934 = vadd.xlane.f32.xlu2 %v4933_v35  ;;  %v4587_v58 = vpop.f32.mrf.mxu3 }
 0x7ba   : > { %v4975_v15 = vmul.f32 %v10105_v52, %v4974_v18 }
 0x7bc   : > { %v4976_v23 = vadd.f32 %v10105_v52, %v4975_v15 }
 0x7bd   : > { %v4877_v6 = vpop.f32.mrf.mxu1 }
 0x7be   : > { %v12585_v9 = vadd.f32 %v4877_v6, %v4761_v53  ;;  %v12598_v35 = vsel %vm4977_vm0, %v10105_v52, %v4976_v23  ;;  %v4737_v53 = vpop.f32.mrf.mxu0  ;;  %v4464_v6 = vadd.f32 %v4434_v22, %v12524_v20  ;;  %v4439_v17 = vpop.f32.mrf.mxu2 }
 0x7bf   : > { %14209 = vst [vmem:[#allocation3_spill] sm:$0xff] %v12598_v35 }
 0x7c0   : > { %v4936_v46 = vsel %vm4923_vm15, %v12585_v9, 0.0  ;;  %v4614_v57 = vadd.f32 %v4584_v33, %v4464_v6 }
 0x7c1   : > { %4937 = vadd.xlane.f32.xlu0 %v4936_v46  ;;  %v4589_v56 = vpop.f32.mrf.mxu3 }
 0x7c2   : > { %v4764_v12 = vadd.f32 %v4734_v31, %v4614_v57 }
 0x7c5   : > { %v4879_v43 = vpop.f32.mrf.mxu1 }
 0x7c6   : > { %v12590_v45 = vadd.f32 %v4879_v43, %v4762_v10  ;;  %v4442_v47 = vpop.f32.mrf.mxu2 }
 0x7c8   : > { %v4939_v54 = vsel %vm4923_vm15, %v12590_v45, 0.0 }
 0x7c9   : > { %4940 = vadd.xlane.f32.xlu1 %v4939_v54  ;;  %v4465_v54 = vadd.f32 %v4437_v51, %v12530_v0  ;;  %v4592_v33 = vpop.f32.mrf.mxu3 }
 0x7cd   : > { %v4882_v25 = vpop.f32.mrf.mxu1 }
 0x7ce   : > { %v12594_v29 = vadd.f32 %v4882_v25, %v4763_v32  ;;  %v4739_v25 = vpop.f32.mrf.mxu0 }
 0x7d0   : > { %v4942_v13 = vsel %vm4923_vm15, %v12594_v29, 0.0 }
 0x7d1   : > { %4943 = vadd.xlane.f32.xlu1 %v4942_v13  ;;  %v4615_v13 = vadd.f32 %v4587_v58, %v4465_v54 }
 0x7d3   : > { %v4765_v22 = vadd.f32 %v4737_v53, %v4615_v13  ;;  %v3861_v53 = vadd.f32 %v12442_v61, %v12438_v37 }
 0x7d5   : > { %v4884_v60 = vpop.f32.mrf.mxu1  ;;  %v4018_v57 = vadd.f32 %v12456_v44, %v3861_v53 }
 0x7d6   : > { %v12613_v59 = vadd.f32 %v4884_v60, %v4764_v12  ;;  %v4742_v51 = vpop.f32.mrf.mxu0 }
 0x7d7   : > { %v4168_v37 = vadd.f32 %v12444_v27, %v4018_v57 }
 0x7dd   : > { %v4887_v11 = vpop.f32.mrf.mxu1 }
 0x7de   : > { %v12626_v31 = vadd.f32 %v4887_v11, %v4765_v22  ;;  %v4444_v11 = vpop.f32.mrf.mxu2  ;;  %v4744_v44 = vpop.f32.mrf.mxu0 }
 0x7e5   : > { %v4889_v52 = vpop.f32.mrf.mxu1 }
 0x7e6   : > { %v4747_v22 = vpop.f32.mrf.mxu0 }
 0x814   : > { %v4926_v39 = vpop.xlane.xlu2 %4925 }
 0x815   : > { %v4979_v24 = vmul.f32 %v12598_v35, %v4926_v39  ;;  %v4892_v39 = vpop.f32.mrf.mxu1 }
 0x817   : > { %v12603_v2 = vsub.f32 %v12566_v36, %v4979_v24  ;;  %v4016_v36 = vadd.f32 %v12430_v38, %v3856_v1  ;;  %v4945_v38 = vsel %vm4923_vm15, %v12613_v59, 0.0 }
 0x819   : > { %v5011_v46 = vmul.f32 %v12603_v2, %v12603_v2  ;;  %v4166_v41 = vadd.f32 %v12418_v34, %v4016_v36 }
 0x81b   : > { %v5027_v10 = vsel %vm4923_vm15, %v5011_v46, 0.0  ;;  %v4467_v46 = vadd.f32 %v4442_v47, %v12539_v19  ;;  %v4318_v19 = vadd.f32 %v12542_v55, %v4168_v37 }
 0x81c   : > { %v4929_v43 = vpop.xlane.xlu0 %4928  ;;  %5028 = vadd.xlane.f32.xlu2 %v5027_v10 }
 0x81d   : > { %v4980_v20 = vmul.f32 %v12598_v35, %v4929_v43  ;;  %v4617_v43 = vadd.f32 %v4592_v33, %v4467_v46  ;;  %v4894_v54 = vpop.f32.mrf.mxu1 }
 0x81f   : > { %v12616_v32 = vsub.f32 %v12570_v62, %v4980_v20  ;;  %v4316_v62 = vadd.f32 %v12533_v40, %v4166_v41  ;;  %v4948_v40 = vsel %vm4923_vm15, %v12626_v31, 0.0 }
 0x821   : > { %v5012_v49 = vmul.f32 %v12616_v32, %v12616_v32  ;;  %v4466_v15 = vadd.f32 %v4439_v17, %v4316_v62 }
 0x823   : > { %v5030_v7 = vsel %vm4923_vm15, %v5012_v49, 0.0  ;;  %v4616_v60 = vadd.f32 %v4589_v56, %v4466_v15  ;;  %v4594_v56 = vpop.f32.mrf.mxu3  ;;  %v4447_v49 = vpop.f32.mrf.mxu2 }
 0x824   : > { %v4932_v0 = vpop.xlane.xlu1 %4931  ;;  %5031 = vadd.xlane.f32.xlu0 %v5030_v7  ;;  %4946 = vadd.xlane.f32.xlu2 %v4945_v38  ;;  %v4469_v33 = vadd.f32 %v4447_v49, %v12549_v14 }
 0x825   : > { %v4981_v18 = vmul.f32 %v12598_v35, %v4932_v0  ;;  %v4766_v6 = vadd.f32 %v4739_v25, %v4616_v60  ;;  %v4468_v25 = vadd.f32 %v4444_v11, %v4318_v19  ;;  %v3866_v0 = vadd.f32 %v12468_v21, %v12464_v16 }
 0x827   : > { %v12629_v34 = vsub.f32 %v12575_v28, %v4981_v18  ;;  %v12641_v17 = vadd.f32 %v4889_v52, %v4766_v6  ;;  %v4618_v52 = vadd.f32 %v4594_v56, %v4468_v25  ;;  %v4020_v18 = vadd.f32 %v12480_v50, %v3866_v0 }
 0x829   : > { %v5013_v23 = vmul.f32 %v12629_v34, %v12629_v34  ;;  %v4951_v12 = vsel %vm4923_vm15, %v12641_v17, 0.0  ;;  %v4768_v62 = vadd.f32 %v4744_v44, %v4618_v52  ;;  %v4170_v16 = vadd.f32 %v12476_v8, %v4020_v18  ;;  %v4749_v8 = vpop.f32.mrf.mxu0 }
 0x82b   : > { %v5033_v58 = vsel %vm4923_vm15, %v5013_v23, 0.0  ;;  %v4597_v7 = vpop.f32.mrf.mxu3  ;;  %v12669_v15 = vadd.f32 %v4894_v54, %v4768_v62  ;;  %v4897_v23 = vpop.f32.mrf.mxu1 }
 0x82c   : > { %v4935_v24 = vpop.xlane.xlu2 %4934  ;;  %5034 = vadd.xlane.f32.xlu0 %v5033_v58  ;;  %4949 = vadd.xlane.f32.xlu2 %v4948_v40  ;;  %v4449_v40 = vpop.f32.mrf.mxu2 }
 0x82d   : > { %v4982_v28 = vmul.f32 %v12598_v35, %v4935_v24  ;;  %v4957_v50 = vsel %vm4923_vm15, %v12669_v15, 0.0 }
 0x82f   : > { %v12644_v10 = vsub.f32 %v12580_v42, %v4982_v28  ;;  %v4767_v42 = vadd.f32 %v4742_v51, %v4617_v43  ;;  %v4619_v51 = vadd.f32 %v4597_v7, %v4469_v33 }
 0x831   : > { %v5014_v1 = vmul.f32 %v12644_v10, %v12644_v10  ;;  %v12654_v13 = vadd.f32 %v4892_v39, %v4767_v42  ;;  %v4769_v24 = vadd.f32 %v4747_v22, %v4619_v51 }
 0x833   : > { %v5036_v61 = vsel %vm4923_vm15, %v5014_v1, 0.0  ;;  %v4954_v55 = vsel %vm4923_vm15, %v12654_v13, 0.0  ;;  %v4599_v39 = vpop.f32.mrf.mxu3  ;;  %v12682_v28 = vadd.f32 %v4897_v23, %v4769_v24  ;;  %v4899_v56 = vpop.f32.mrf.mxu1 }
 0x834   : > { %v4938_v20 = vpop.xlane.xlu0 %4937  ;;  %5037 = vadd.xlane.f32.xlu1 %v5036_v61  ;;  %4952 = vadd.xlane.f32.xlu0 %v4951_v12  ;;  %v4452_v1 = vpop.f32.mrf.mxu2 }
 0x835   : > { %v4983_v36 = vmul.f32 %v12598_v35, %v4938_v20  ;;  %v4471_v12 = vadd.f32 %v4452_v1, %v12561_v3  ;;  %v4752_v20 = vpop.f32.mrf.mxu0 }
 0x837   : > { %v12657_v27 = vsub.f32 %v12585_v9, %v4983_v36 }
 0x839   : > { %v5015_v41 = vmul.f32 %v12657_v27, %v12657_v27 }
 0x83b   : > { %v5039_v38 = vsel %vm4923_vm15, %v5015_v41, 0.0  ;;  %v4602_v61 = vpop.f32.mrf.mxu3  ;;  %v4902_v42 = vpop.f32.mrf.mxu1  ;;  %v5371_v41 = vld [vmem:[%s14186_s7] sm:$0xff] }
 0x83c   : > { %v4941_v47 = vpop.xlane.xlu1 %4940  ;;  %5040 = vadd.xlane.f32.xlu1 %v5039_v38  ;;  %4955 = vadd.xlane.f32.xlu0 %v4954_v55  ;;  %v4621_v44 = vadd.f32 %v4602_v61, %v4471_v12  ;;  %5375 = vst [vmem:[#allocation1] ss:$4 sm:$0xff] %v5371_v41  ;;  %v3871_v55 = vadd.f32 %v12547_v26, %v12488_v4 }
 0x83d   : > { %v4984_v9 = vmul.f32 %v12598_v35, %v4941_v47 }
 0x83e   : > { %v4771_v36 = vadd.f32 %v4752_v20, %v4621_v44  ;;  %v4754_v44 = vpop.f32.mrf.mxu0 }
 0x83f   : > { %v12672_v60 = vsub.f32 %v12590_v45, %v4984_v9  ;;  %v4320_v45 = vadd.f32 %v12556_v63, %v4170_v16  ;;  %v4960_v63 = vsel %vm4923_vm15, %v12682_v28, 0.0  ;;  %v4022_v9 = vadd.f32 %v12551_v30, %v3871_v55  ;;  %v4454_v30 = vpop.f32.mrf.mxu2 }
 0x840   : > { %v12697_v54 = vadd.f32 %v4902_v42, %v4771_v36 }
 0x841   : > { %v5016_v58 = vmul.f32 %v12672_v60, %v12672_v60  ;;  %v4470_v6 = vadd.f32 %v4449_v40, %v4320_v45  ;;  %v4172_v40 = vadd.f32 %v12554_v48, %v4022_v9 }
 0x842   : > { %v4966_v25 = vsel %vm4923_vm15, %v12697_v54, 0.0 }
 0x843   : > { %v5042_v21 = vsel %vm4923_vm15, %v5016_v58, 0.0  ;;  %v4620_v57 = vadd.f32 %v4599_v39, %v4470_v6  ;;  %v5379_v51 = vld.sshfl [vmem:[#allocation1] sm:$0xff pattern:$0x73625140]  ;;  %v4904_v42 = vpop.f32.mrf.mxu1 }
 0x844   : > { %v4944_v14 = vpop.xlane.xlu1 %4943  ;;  %5043 = vadd.xlane.f32.xlu2 %v5042_v21  ;;  %4958 = vadd.xlane.f32.xlu1 %v4957_v50  ;;  %v5415_v26 = vsel %vm5414_vm12, %v5379_v51, 0  ;;  %v5380_v58 = vld.sshfl [vmem:[#allocation1 + $0x8] sm:$0xff pattern:$0x73625140] }
 0x845   : > { %v4985_v53 = vmul.f32 %v12598_v35, %v4944_v14  ;;  %v4770_v37 = vadd.f32 %v4749_v8, %v4620_v57  ;;  %5440 = vmatpush.bf16.msrb.mxu2 %v5415_v26  ;;  %v5381_v21 = vld.sshfl [vmem:[#allocation1 + $0x10] sm:$0xff pattern:$0x73625140]  ;;  %v5382_v24 = vld.sshfl [vmem:[#allocation1 + $0x18] sm:$0xff pattern:$0x73625140]  ;;  %v4604_v57 = vpop.f32.mrf.mxu3 }
 0x846   : > { %v5419_v45 = vsel %vm5414_vm12, %v5381_v21, 0  ;;  %v5421_v8 = vsel %vm5414_vm12, %v5382_v24, 0 }
 0x847   : > { %v12685_v11 = vsub.f32 %v12594_v29, %v4985_v53  ;;  %v12693_v29 = vadd.f32 %v4899_v56, %v4770_v37  ;;  %v4322_v53 = vadd.f32 %v12564_v5, %v4172_v40  ;;  %5538 = vmatpush.bf16.msrb.mxu0 %v5419_v45  ;;  %5587 = vmatpush.bf16.msra.mxu1 %v5421_v8 }
 0x849   : > { %v5017_v46 = vmul.f32 %v12685_v11, %v12685_v11  ;;  %v4963_v19 = vsel %vm4923_vm15, %v12693_v29, 0.0 }
 0x84b   : > { %v5045_v43 = vsel %vm4923_vm15, %v5017_v46, 0.0 }
 0x84c   : > { %5046 = vadd.xlane.f32.xlu2 %v5045_v43  ;;  %4961 = vadd.xlane.f32.xlu1 %v4960_v63  ;;  %v4472_v43 = vadd.f32 %v4454_v30, %v4322_v53 }
 0x84e   : > { %v4622_v61 = vadd.f32 %v4604_v57, %v4472_v43 }
 0x854   : > { %4964 = vadd.xlane.f32.xlu2 %v4963_v19 }
 0x85c   : > { %4967 = vadd.xlane.f32.xlu2 %v4966_v25 }
 0x88f   : > { %v5029_v49 = vpop.xlane.xlu2 %5028 }
 0x890   : > { %v5075_v52 = vmul.f32 %v5029_v49, %v12598_v35 }
 0x892   : > { %v5091_v3 = vadd.f32 1e-05, %v5075_v52 }
 0x894   : > { %10106 = vrsqrt.f32 %v5091_v3  ;;  %vm5113_vm14 = vweird.f32 %v5091_v3 }
 0x897   : > { %v5032_v7 = vpop.xlane.xlu0 %5031  ;;  %v4947_v38 = vpop.xlane.xlu2 %4946 }
 0x898   : > { %v5076_v47 = vmul.f32 %v5032_v7, %v12598_v35  ;;  %v4986_v0 = vmul.f32 %v12598_v35, %v4947_v38 }
 0x89a   : > { %v10107_v62 = vpop.eup %10106  ;;  %v12710_v22 = vadd.f32 1e-05, %v5076_v47  ;;  %v12713_v18 = vsub.f32 %v12613_v59, %v4986_v0  ;;  %v5417_v59 = vsel %vm5414_vm12, %v5380_v58, 0 }
 0x89b   : > { %v5108_v33 = vmul.f32 %v10107_v62, %v5091_v3  ;;  %5489 = vmatpush.bf16.msrb.mxu3 %v5417_v59  ;;  %vm5114_vm13 = vweird.f32 %v10107_v62  ;;  %v4772_v3 = vadd.f32 %v4754_v44, %v4622_v61 }
 0x89c   : > { %10108 = vrsqrt.f32 %v12710_v22  ;;  %v5018_v23 = vmul.f32 %v12713_v18, %v12713_v18  ;;  %vm5115_vm1 = vmor %vm5113_vm14, %vm5114_vm13  ;;  %vm5123_vm3 = vweird.f32 %v12710_v22 }
 0x89d   : > { %v5109_v4 = vmul.f32 %v10107_v62, %v5108_v33  ;;  %v12740_v0 = vadd.f32 %v4904_v42, %v4772_v3 }
 0x89e   : > { %v5048_v16 = vsel %vm4923_vm15, %v5018_v23, 0.0 }
 0x89f   : > { %v5110_v50 = vmul.f32 0.5, %v5109_v4  ;;  %v5035_v39 = vpop.xlane.xlu0 %5034  ;;  %v4950_v14 = vpop.xlane.xlu2 %4949  ;;  %5049 = vadd.xlane.f32.xlu0 %v5048_v16 }
 0x8a0   : > { %v5077_v6 = vmul.f32 %v5035_v39, %v12598_v35  ;;  %v4987_v48 = vmul.f32 %v12598_v35, %v4950_v14 }
 0x8a1   : > { %v5111_v46 = vsub.f32 1.5, %v5110_v50 }
 0x8a2   : > { %v10109_v56 = vpop.eup %10108  ;;  %v5093_v63 = vadd.f32 1e-05, %v5077_v6  ;;  %v12728_v1 = vsub.f32 %v12626_v31, %v4987_v48 }
 0x8a3   : > { %v5112_v37 = vmul.f32 %v10107_v62, %v5111_v46  ;;  %v5118_v5 = vmul.f32 %v10109_v56, %v12710_v22  ;;  %vm5124_vm2 = vweird.f32 %v10109_v56 }
 0x8a4   : > { %10110 = vrsqrt.f32 %v5093_v63  ;;  %v5019_v12 = vmul.f32 %v12728_v1, %v12728_v1  ;;  %vm5125_vm4 = vmor %vm5123_vm3, %vm5124_vm2  ;;  %vm5133_vm6 = vweird.f32 %v5093_v63 }
 0x8a5   : > { %v5116_v20 = vsel %vm5115_vm1, %v10107_v62, %v5112_v37  ;;  %v5119_v19 = vmul.f32 %v10109_v56, %v5118_v5 }
 0x8a6   : > { %v12734_v36 = vmul.f32 %v5116_v20, %v12603_v2  ;;  %v5051_v31 = vsel %vm4923_vm15, %v5019_v12, 0.0 }
 0x8a7   : > { %v5120_v25 = vmul.f32 0.5, %v5119_v19  ;;  %v5038_v49 = vpop.xlane.xlu1 %5037  ;;  %v4953_v52 = vpop.xlane.xlu0 %4952  ;;  %5052 = vadd.xlane.f32.xlu0 %v5051_v31 }
 0x8a8   : > { %v5283_v41 = vmul.f32 0.5, %v12734_v36  ;;  %v5078_v7 = vmul.f32 %v5038_v49, %v12598_v35  ;;  %v4988_v38 = vmul.f32 %v12598_v35, %v4953_v52 }
 0x8a9   : > { %v5121_v55 = vsub.f32 1.5, %v5120_v25 }
 0x8aa   : > { %v10111_v47 = vpop.eup %10110  ;;  %v5094_v2 = vadd.f32 1e-05, %v5078_v7  ;;  %v12743_v62 = vsub.f32 %v12641_v17, %v4988_v38  ;;  %10112 = vtanh.f32 %v5283_v41  ;;  %v4969_v17 = vsel %vm4923_vm15, %v12740_v0, 0.0 }
 0x8ab   : > { %v5122_v9 = vmul.f32 %v10109_v56, %v5121_v55  ;;  %v5128_v33 = vmul.f32 %v10111_v47, %v5093_v63  ;;  %vm5134_vm5 = vweird.f32 %v10111_v47 }
 0x8ac   : > { %10114 = vrsqrt.f32 %v5094_v2  ;;  %v5020_v23 = vmul.f32 %v12743_v62, %v12743_v62  ;;  %vm5135_vm7 = vmor %vm5133_vm6, %vm5134_vm5  ;;  %vm5143_vm9 = vweird.f32 %v5094_v2 }
 0x8ad   : > { %v5126_v51 = vsel %vm5125_vm4, %v10109_v56, %v5122_v9  ;;  %v5129_v4 = vmul.f32 %v10111_v47, %v5128_v33  ;;  %v5373_v33 = vld [vmem:[%s14186_s7 + $0x10] sm:$0x3] }
 0x8ae   : > { %v5268_v26 = vmul.f32 %v5126_v51, %v12616_v32  ;;  %v5054_v58 = vsel %vm4923_vm15, %v5020_v23, 0.0  ;;  %5388 = vst [vmem:[#allocation1] ss:$4 sm:$0xff] %v5373_v33 }
 0x8af   : > { %v5130_v40 = vmul.f32 0.5, %v5129_v4  ;;  %v5041_v30 = vpop.xlane.xlu1 %5040  ;;  %v4956_v16 = vpop.xlane.xlu0 %4955  ;;  %5055 = vadd.xlane.f32.xlu1 %v5054_v58  ;;  %4970 = vadd.xlane.f32.xlu0 %v4969_v17 }
 0x8b0   : > { %v5284_v22 = vmul.f32 0.5, %v5268_v26  ;;  %v5079_v59 = vmul.f32 %v5041_v30, %v12598_v35  ;;  %v4989_v21 = vmul.f32 %v12598_v35, %v4956_v16  ;;  %v10113_v50 = vpop.eup %10112 }
 0x8b1   : > { %v5131_v39 = vsub.f32 1.5, %v5130_v40  ;;  %v5315_v48 = vadd.f32 1.0, %v10113_v50 }
 0x8b2   : > { %v10115_v14 = vpop.eup %10114  ;;  %10116 = vtanh.f32 %v5284_v22  ;;  %v12754_v32 = vadd.f32 1e-05, %v5079_v59  ;;  %v12757_v45 = vsub.f32 %v12654_v13, %v4989_v21 }
 0x8b3   : > { %v5132_v24 = vmul.f32 %v10111_v47, %v5131_v39  ;;  %v5138_v53 = vmul.f32 %v10115_v14, %v5094_v2  ;;  %v5331_v44 = vmul.f32 0.5, %v5315_v48  ;;  %vm5144_vm8 = vweird.f32 %v10115_v14 }
 0x8b4   : > { %10118 = vrsqrt.f32 %v12754_v32  ;;  %v5021_v6 = vmul.f32 %v12757_v45, %v12757_v45  ;;  %vm5145_vm10 = vmor %vm5143_vm9, %vm5144_vm8  ;;  %vm5153_vm0 = vweird.f32 %v12754_v32 }
 0x8b5   : > { %v5136_v8 = vsel %vm5135_vm7, %v10111_v47, %v5132_v24  ;;  %v5139_v57 = vmul.f32 %v10115_v14, %v5138_v53  ;;  %v5347_v41 = vmul.f32 %v5331_v44, %v12734_v36 }
 0x8b6   : > { %v12763_v46 = vmul.f32 %v5136_v8, %v12629_v34  ;;  %v5057_v56 = vsel %vm4923_vm15, %v5021_v6, 0.0 }
 0x8b7   : > { %v5140_v43 = vmul.f32 0.5, %v5139_v57  ;;  %v5044_v13 = vpop.xlane.xlu2 %5043  ;;  %v4959_v37 = vpop.xlane.xlu1 %4958  ;;  %5058 = vadd.xlane.f32.xlu1 %v5057_v56 }
 0x8b8   : > { %v10117_v63 = vpop.eup %10116  ;;  %v5285_v5 = vmul.f32 0.5, %v12763_v46  ;;  %v5080_v61 = vmul.f32 %v5044_v13, %v12598_v35  ;;  %v4990_v12 = vmul.f32 %v12598_v35, %v4959_v37 }
 0x8b9   : > { %v5316_v20 = vadd.f32 1.0, %v10117_v63  ;;  %v5141_v19 = vsub.f32 1.5, %v5140_v43 }
 0x8ba   : > { %v10119_v42 = vpop.eup %10118  ;;  %v5096_v34 = vadd.f32 1e-05, %v5080_v61  ;;  %v12770_v31 = vsub.f32 %v12669_v15, %v4990_v12  ;;  %10120 = vtanh.f32 %v5285_v5 }
 0x8bb   : > { %v5332_v25 = vmul.f32 0.5, %v5316_v20  ;;  %v5142_v49 = vmul.f32 %v10115_v14, %v5141_v19  ;;  %v5148_v52 = vmul.f32 %v10119_v42, %v12754_v32  ;;  %vm5154_vm11 = vweird.f32 %v10119_v42 }
 0x8bc   : > { %10122 = vrsqrt.f32 %v5096_v34  ;;  %v5022_v3 = vmul.f32 %v12770_v31, %v12770_v31  ;;  %vm5155_vm13 = vmor %vm5153_vm0, %vm5154_vm11  ;;  %vm5163_vm1 = vweird.f32 %v5096_v34 }
 0x8bd   : > { %v5348_v7 = vmul.f32 %v5332_v25, %v5268_v26  ;;  %v5146_v38 = vsel %vm5145_vm10, %v10115_v14, %v5142_v49  ;;  %v5149_v55 = vmul.f32 %v10119_v42, %v5148_v52 }
 0x8be   : > { %v5270_v47 = vmul.f32 %v5146_v38, %v12644_v10  ;;  %v5060_v15 = vsel %vm4923_vm15, %v5022_v3, 0.0 }
 0x8bf   : > { %v12778_v2 = vpack.c.bf16 %v5348_v7, %v5347_v41  ;;  %v5150_v9 = vmul.f32 0.5, %v5149_v55  ;;  %v12783_v23 = vpop.xlane.xlu2 %5046  ;;  %v4962_v51 = vpop.xlane.xlu1 %4961  ;;  %5061 = vadd.xlane.f32.xlu2 %v5060_v15 }
 0x8c0   : > { %v5286_v4 = vmul.f32 0.5, %v5270_v47  ;;  %v4991_v36 = vmul.f32 %v12598_v35, %v4962_v51  ;;  %v10121_v26 = vpop.eup %10120  ;;  %v5081_v38 = vmul.f32 %v12783_v23, %v12598_v35 }
 0x8c1   : > { %v5151_v58 = vsub.f32 1.5, %v5150_v9  ;;  %9176 = vmatmul.msk.bf16.vlgmr.msrb.gmra.mxu2 %vm4923_vm15, %v12778_v2  ;;  %9184 = vmatmul.msk.bf16.vlgmr.msrb.gmra.mxu3 %vm4923_vm15, %v12778_v2  ;;  %v5317_v22 = vadd.f32 1.0, %v10121_v26 }
 0x8c2   : > { %v10123_v10 = vpop.eup %10122  ;;  %10124 = vtanh.f32 %v5286_v4  ;;  %v12791_v17 = vsub.f32 %v12682_v28, %v4991_v36  ;;  %9192 = vmatmul.msk.bf16.vlgmr.msrb.gmra.mxu0 %vm4923_vm15, %v12778_v2  ;;  %9200 = vmatmul.msk.bf16.vlgmr.msra.gmra.mxu1 %vm4923_vm15, %v12778_v2  ;;  %v5097_v55 = vadd.f32 1e-05, %v5081_v38 }
 0x8c3   : > { %v5152_v40 = vmul.f32 %v10119_v42, %v5151_v58  ;;  %v5158_v30 = vmul.f32 %v10123_v10, %v5096_v34  ;;  %v5333_v32 = vmul.f32 0.5, %v5317_v22  ;;  %vm5164_vm14 = vweird.f32 %v10123_v10 }
 0x8c4   : > { %v5023_v16 = vmul.f32 %v12791_v17, %v12791_v17  ;;  %vm5165_vm2 = vmor %vm5163_vm1, %vm5164_vm14  ;;  %vm5173_vm4 = vweird.f32 %v5097_v55 }
 0x8c5   : > { %v5156_v59 = vsel %vm5155_vm13, %v10119_v42, %v5152_v40  ;;  %v5159_v21 = vmul.f32 %v10123_v10, %v5158_v30  ;;  %v5349_v13 = vmul.f32 %v5333_v32, %v12763_v46 }
 0x8c6   : > { %v5271_v28 = vmul.f32 %v5156_v59, %v12657_v27  ;;  %v5063_v50 = vsel %vm4923_vm15, %v5023_v16, 0.0 }
 0x8c7   : > { %v5160_v39 = vmul.f32 0.5, %v5159_v21  ;;  %v4965_v14 = vpop.xlane.xlu2 %4964  ;;  %5064 = vadd.xlane.f32.xlu0 %v5063_v50 }
 0x8c8   : > { %v10125_v24 = vpop.eup %10124  ;;  %v5287_v53 = vmul.f32 0.5, %v5271_v28  ;;  %v4992_v6 = vmul.f32 %v12598_v35, %v4965_v14 }
 0x8c9   : > { %v5318_v48 = vadd.f32 1.0, %v10125_v24  ;;  %v5161_v8 = vsub.f32 1.5, %v5160_v39 }
 0x8ca   : > { %v12804_v57 = vsub.f32 %v12693_v29, %v4992_v6  ;;  %10126 = vtanh.f32 %v5287_v53 }
 0x8cb   : > { %v5334_v56 = vmul.f32 0.5, %v5318_v48  ;;  %v5162_v43 = vmul.f32 %v10123_v10, %v5161_v8 }
 0x8cc   : > { %v5024_v27 = vmul.f32 %v12804_v57, %v12804_v57 }
 0x8cd   : > { %v5350_v37 = vmul.f32 %v5334_v56, %v5270_v47  ;;  %v5166_v63 = vsel %vm5165_vm2, %v10123_v10, %v5162_v43 }
 0x8ce   : > { %v5272_v5 = vmul.f32 %v5166_v63, %v12672_v60  ;;  %v5066_v61 = vsel %vm4923_vm15, %v5024_v27, 0.0 }
 0x8cf   : > { %v12811_v12 = vpack.c.bf16 %v5350_v37, %v5349_v13  ;;  %5067 = vadd.xlane.f32.xlu1 %v5066_v61  ;;  %v4968_v29 = vpop.xlane.xlu2 %4967 }
 0x8d0   : > { %v5288_v44 = vmul.f32 0.5, %v5272_v5  ;;  %v4993_v20 = vmul.f32 %v12598_v35, %v4968_v29  ;;  %v10127_v46 = vpop.eup %10126 }
 0x8d1   : > { %9177 = vmatmul.msk.bf16.gmra.mxu2 %vm4923_vm15, %v12811_v12  ;;  %9185 = vmatmul.msk.bf16.gmra.mxu3 %vm4923_vm15, %v12811_v12  ;;  %v5319_v42 = vadd.f32 1.0, %v10127_v46 }
 0x8d2   : > { %10128 = vtanh.f32 %v5288_v44  ;;  %v12819_v19 = vsub.f32 %v12697_v54, %v4993_v20  ;;  %9193 = vmatmul.msk.bf16.gmra.mxu0 %vm4923_vm15, %v12811_v12  ;;  %9201 = vmatmul.msk.bf16.gmra.mxu1 %vm4923_vm15, %v12811_v12 }
 0x8d3   : > { %v5335_v49 = vmul.f32 0.5, %v5319_v42  ;;  %10130 = vrsqrt.f32 %v5097_v55 }
 0x8d4   : > { %v5025_v60 = vmul.f32 %v12819_v19, %v12819_v19 }
 0x8d5   : > { %v5351_v41 = vmul.f32 %v5335_v49, %v5271_v28 }
 0x8d6   : > { %v5069_v34 = vsel %vm4923_vm15, %v5025_v60, 0.0 }
 0x8d7   : > { %5070 = vadd.xlane.f32.xlu2 %v5069_v34 }
 0x8d8   : > { %v10129_v25 = vpop.eup %10128 }
 0x8d9   : > { %v5320_v52 = vadd.f32 1.0, %v10129_v25  ;;  %v10131_v47 = vpop.eup %10130 }
 0x8da   : > { %v5168_v15 = vmul.f32 %v10131_v47, %v5097_v55  ;;  %vm5174_vm3 = vweird.f32 %v10131_v47 }
 0x8db   : > { %v5336_v3 = vmul.f32 0.5, %v5320_v52  ;;  %vm5175_vm5 = vmor %vm5173_vm4, %vm5174_vm3 }
 0x8dc   : > { %v5169_v9 = vmul.f32 %v10131_v47, %v5168_v15 }
 0x8dd   : > { %v5352_v54 = vmul.f32 %v5336_v3, %v5272_v5 }
 0x8de   : > { %v5170_v33 = vmul.f32 0.5, %v5169_v9 }
 0x8df   : > { %v12828_v7 = vpack.c.bf16 %v5352_v54, %v5351_v41 }
 0x8e0   : > { %v5171_v4 = vsub.f32 1.5, %v5170_v33 }
 0x8e1   : > { %14210 = vst [vmem:[#allocation4_spill] sm:$0xff] %v12828_v7  ;;  %9178 = vmatmul.msk.bf16.gmra.mxu2 %vm4923_vm15, %v12828_v7  ;;  %9186 = vmatmul.msk.bf16.gmra.mxu3 %vm4923_vm15, %v12828_v7 }
 0x8e2   : > { %9194 = vmatmul.msk.bf16.gmra.mxu0 %vm4923_vm15, %v12828_v7  ;;  %9202 = vmatmul.msk.bf16.gmra.mxu1 %vm4923_vm15, %v12828_v7  ;;  %v5172_v58 = vmul.f32 %v10131_v47, %v5171_v4 }
 0x8e4   : > { %v5176_v40 = vsel %vm5175_vm5, %v10131_v47, %v5172_v58 }
 0x8e5   : > { %v12843_v22 = vmul.f32 %v5176_v40, %v12685_v11 }
 0x8e7   : > { %v5289_v28 = vmul.f32 0.5, %v12843_v22 }
 0x912   : > { %v5050_v51 = vpop.xlane.xlu0 %5049 }
 0x913   : > { %v5082_v36 = vmul.f32 %v5050_v51, %v12598_v35 }
 0x915   : > { %v5098_v26 = vadd.f32 1e-05, %v5082_v36 }
 0x917   : > { %10132 = vrsqrt.f32 %v5098_v26  ;;  %vm5183_vm7 = vweird.f32 %v5098_v26 }
 0x91a   : > { %v5053_v10 = vpop.xlane.xlu0 %5052 }
 0x91b   : > { %v5083_v23 = vmul.f32 %v5053_v10, %v12598_v35 }
 0x91d   : > { %v10133_v30 = vpop.eup %10132  ;;  %v5099_v16 = vadd.f32 1e-05, %v5083_v23 }
 0x91e   : > { %v5178_v59 = vmul.f32 %v10133_v30, %v5098_v26  ;;  %vm5184_vm6 = vweird.f32 %v10133_v30 }
 0x91f   : > { %10134 = vrsqrt.f32 %v5099_v16  ;;  %vm5185_vm8 = vmor %vm5183_vm7, %vm5184_vm6  ;;  %vm5193_vm10 = vweird.f32 %v5099_v16 }
 0x920   : > { %v5179_v21 = vmul.f32 %v10133_v30, %v5178_v59  ;;  %10136 = vtanh.f32 %v5289_v28 }
 0x922   : > { %v5180_v50 = vmul.f32 0.5, %v5179_v21  ;;  %v5056_v39 = vpop.xlane.xlu1 %5055  ;;  %v4971_v14 = vpop.xlane.xlu0 %4970 }
 0x923   : > { %v5084_v24 = vmul.f32 %v5056_v39, %v12598_v35  ;;  %v4994_v53 = vmul.f32 %v12598_v35, %v4971_v14 }
 0x924   : > { %v5181_v6 = vsub.f32 1.5, %v5180_v50 }
 0x925   : > { %v10135_v32 = vpop.eup %10134  ;;  %v5100_v48 = vadd.f32 1e-05, %v5084_v24  ;;  %v12849_v8 = vsub.f32 %v12740_v0, %v4994_v53 }
 0x926   : > { %v5182_v11 = vmul.f32 %v10133_v30, %v5181_v6  ;;  %v5188_v56 = vmul.f32 %v10135_v32, %v5099_v16  ;;  %v10137_v44 = vpop.eup %10136  ;;  %vm5194_vm9 = vweird.f32 %v10135_v32 }
 0x927   : > { %10138 = vrsqrt.f32 %v5100_v48  ;;  %v5026_v43 = vmul.f32 %v12849_v8, %v12849_v8  ;;  %vm5195_vm11 = vmor %vm5193_vm10, %vm5194_vm9  ;;  %vm5203_vm13 = vweird.f32 %v5100_v48 }
 0x928   : > { %v5186_v27 = vsel %vm5185_vm8, %v10133_v30, %v5182_v11  ;;  %v5189_v13 = vmul.f32 %v10135_v32, %v5188_v56 }
 0x929   : > { %v5274_v37 = vmul.f32 %v5186_v27, %v12713_v18  ;;  %v5072_v63 = vsel %vm4923_vm15, %v5026_v43, 0.0  ;;  %v5321_v18 = vadd.f32 1.0, %v10137_v44 }
 0x92a   : > { %v5190_v5 = vmul.f32 0.5, %v5189_v13  ;;  %v5059_v61 = vpop.xlane.xlu1 %5058  ;;  %5073 = vadd.xlane.f32.xlu0 %v5072_v63 }
 0x92b   : > { %v5290_v0 = vmul.f32 0.5, %v5274_v37  ;;  %v5085_v29 = vmul.f32 %v5059_v61, %v12598_v35  ;;  %v5337_v47 = vmul.f32 0.5, %v5321_v18 }
 0x92c   : > { %v5191_v20 = vsub.f32 1.5, %v5190_v5 }
 0x92d   : > { %v10139_v46 = vpop.eup %10138  ;;  %10140 = vtanh.f32 %v5290_v0  ;;  %v5101_v60 = vadd.f32 1e-05, %v5085_v29 }
 0x92e   : > { %v5192_v42 = vmul.f32 %v10135_v32, %v5191_v20  ;;  %v5198_v34 = vmul.f32 %v10139_v46, %v5100_v48  ;;  %vm5204_vm0 = vweird.f32 %v10139_v46 }
 0x92f   : > { %10142 = vrsqrt.f32 %v5101_v60  ;;  %vm5205_vm14 = vmor %vm5203_vm13, %vm5204_vm0  ;;  %vm5213_vm2 = vweird.f32 %v5101_v60 }
 0x930   : > { %v5196_v25 = vsel %vm5195_vm11, %v10135_v32, %v5192_v42  ;;  %v5199_v49 = vmul.f32 %v10139_v46, %v5198_v34 }
 0x931   : > { %v12857_v52 = vmul.f32 %v5196_v25, %v12728_v1  ;;  %v5353_v1 = vmul.f32 %v5337_v47, %v12843_v22 }
 0x932   : > { %v5200_v3 = vmul.f32 0.5, %v5199_v49  ;;  %v5062_v41 = vpop.xlane.xlu2 %5061 }
 0x933   : > { %v10141_v54 = vpop.eup %10140  ;;  %v5291_v38 = vmul.f32 0.5, %v12857_v52  ;;  %v5086_v55 = vmul.f32 %v5062_v41, %v12598_v35 }
 0x934   : > { %v5322_v15 = vadd.f32 1.0, %v10141_v54  ;;  %v5201_v9 = vsub.f32 1.5, %v5200_v3 }
 0x935   : > { %v10143_v33 = vpop.eup %10142  ;;  %v5102_v51 = vadd.f32 1e-05, %v5086_v55  ;;  %10144 = vtanh.f32 %v5291_v38 }
 0x936   : > { %v5338_v4 = vmul.f32 0.5, %v5322_v15  ;;  %v5202_v36 = vmul.f32 %v10139_v46, %v5201_v9  ;;  %v5208_v26 = vmul.f32 %v10143_v33, %v5101_v60  ;;  %vm5214_vm1 = vweird.f32 %v10143_v33 }
 0x937   : > { %10146 = vrsqrt.f32 %v5102_v51  ;;  %vm5215_vm3 = vmor %vm5213_vm2, %vm5214_vm1  ;;  %vm5223_vm5 = vweird.f32 %v5102_v51 }
 0x938   : > { %v5354_v58 = vmul.f32 %v5338_v4, %v5274_v37  ;;  %v5206_v10 = vsel %vm5205_vm14, %v10139_v46, %v5202_v36  ;;  %v5209_v40 = vmul.f32 %v10143_v33, %v5208_v26 }
 0x939   : > { %v5276_v23 = vmul.f32 %v5206_v10, %v12743_v62 }
 0x93a   : > { %v12863_v30 = vpack.c.bf16 %v5354_v58, %v5353_v1  ;;  %v5210_v16 = vmul.f32 0.5, %v5209_v40  ;;  %v5065_v59 = vpop.xlane.xlu0 %5064 }
 0x93b   : > { %v5292_v21 = vmul.f32 0.5, %v5276_v23  ;;  %v5087_v28 = vmul.f32 %v5065_v59, %v12598_v35  ;;  %v10145_v50 = vpop.eup %10144 }
 0x93c   : > { %14211 = vst [vmem:[#allocation5_spill] sm:$0xff] %v12863_v30  ;;  %v5211_v39 = vsub.f32 1.5, %v5210_v16  ;;  %9179 = vmatmul.msk.bf16.gmra.mxu2 %vm4923_vm15, %v12863_v30  ;;  %9187 = vmatmul.msk.bf16.gmra.mxu3 %vm4923_vm15, %v12863_v30  ;;  %v5323_v53 = vadd.f32 1.0, %v10145_v50 }
 0x93d   : > { %v10147_v22 = vpop.eup %10146  ;;  %10148 = vtanh.f32 %v5292_v21  ;;  %v5103_v14 = vadd.f32 1e-05, %v5087_v28  ;;  %9195 = vmatmul.msk.bf16.gmra.mxu0 %vm4923_vm15, %v12863_v30  ;;  %9203 = vmatmul.msk.bf16.gmra.mxu1 %vm4923_vm15, %v12863_v30 }
 0x93e   : > { %v5212_v62 = vmul.f32 %v10143_v33, %v5211_v39  ;;  %v5218_v24 = vmul.f32 %v10147_v22, %v5102_v51  ;;  %v5339_v37 = vmul.f32 0.5, %v5323_v53  ;;  %vm5224_vm4 = vweird.f32 %v10147_v22 }
 0x93f   : > { %10150 = vrsqrt.f32 %v5103_v14  ;;  %vm5225_vm6 = vmor %vm5223_vm5, %vm5224_vm4  ;;  %vm5233_vm8 = vweird.f32 %v5103_v14 }
 0x940   : > { %v5216_v6 = vsel %vm5215_vm3, %v10143_v33, %v5212_v62  ;;  %v5219_v32 = vmul.f32 %v10147_v22, %v5218_v24 }
 0x941   : > { %v5277_v48 = vmul.f32 %v5216_v6, %v12757_v45  ;;  %v5355_v45 = vmul.f32 %v5339_v37, %v12857_v52 }
 0x942   : > { %v5220_v11 = vmul.f32 0.5, %v5219_v32  ;;  %v5068_v56 = vpop.xlane.xlu1 %5067 }
 0x943   : > { %v10149_v43 = vpop.eup %10148  ;;  %v5293_v27 = vmul.f32 0.5, %v5277_v48  ;;  %v5088_v13 = vmul.f32 %v5068_v56, %v12598_v35 }
 0x944   : > { %v5324_v63 = vadd.f32 1.0, %v10149_v43  ;;  %v5221_v5 = vsub.f32 1.5, %v5220_v11 }
 0x945   : > { %v10151_v61 = vpop.eup %10150  ;;  %v5104_v0 = vadd.f32 1e-05, %v5088_v13  ;;  %10152 = vtanh.f32 %v5293_v27 }
 0x946   : > { %v5340_v29 = vmul.f32 0.5, %v5324_v63  ;;  %v5222_v44 = vmul.f32 %v10147_v22, %v5221_v5  ;;  %v5228_v20 = vmul.f32 %v10151_v61, %v5103_v14  ;;  %vm5234_vm7 = vweird.f32 %v10151_v61 }
 0x947   : > { %10154 = vrsqrt.f32 %v5104_v0  ;;  %vm5235_vm9 = vmor %vm5233_vm8, %vm5234_vm7  ;;  %vm5243_vm11 = vweird.f32 %v5104_v0 }
 0x948   : > { %v5356_v46 = vmul.f32 %v5340_v29, %v5276_v23  ;;  %v5226_v60 = vsel %vm5225_vm6, %v10147_v22, %v5222_v44  ;;  %v5229_v42 = vmul.f32 %v10151_v61, %v5228_v20 }
 0x949   : > { %v5278_v34 = vmul.f32 %v5226_v60, %v12770_v31 }
 0x94a   : > { %v12878_v18 = vpack.c.bf16 %v5356_v46, %v5355_v45  ;;  %v5230_v25 = vmul.f32 0.5, %v5229_v42  ;;  %v5071_v53 = vpop.xlane.xlu2 %5070 }
 0x94b   : > { %v5294_v49 = vmul.f32 0.5, %v5278_v34  ;;  %v10153_v3 = vpop.eup %10152  ;;  %v5089_v6 = vmul.f32 %v5071_v53, %v12598_v35 }
 0x94c   : > { %14212 = vst [vmem:[#allocation6_spill] sm:$0xff] %v12878_v18  ;;  %v5231_v41 = vsub.f32 1.5, %v5230_v25  ;;  %9180 = vmatmul.msk.bf16.gmra.mxu2 %vm4923_vm15, %v12878_v18  ;;  %9188 = vmatmul.msk.bf16.gmra.mxu3 %vm4923_vm15, %v12878_v18  ;;  %v5325_v38 = vadd.f32 1.0, %v10153_v3 }
 0x94d   : > { %v10155_v54 = vpop.eup %10154  ;;  %10156 = vtanh.f32 %v5294_v49  ;;  %9196 = vmatmul.msk.bf16.gmra.mxu0 %vm4923_vm15, %v12878_v18  ;;  %9204 = vmatmul.msk.bf16.gmra.mxu1 %vm4923_vm15, %v12878_v18  ;;  %v5105_v32 = vadd.f32 1e-05, %v5089_v6 }
 0x94e   : > { %v5232_v31 = vmul.f32 %v10151_v61, %v5231_v41  ;;  %v5238_v52 = vmul.f32 %v10155_v54, %v5104_v0  ;;  %v5341_v4 = vmul.f32 0.5, %v5325_v38  ;;  %vm5244_vm10 = vweird.f32 %v10155_v54 }
 0x94f   : > { %vm5245_vm0 = vmor %vm5243_vm11, %vm5244_vm10  ;;  %vm5253_vm14 = vweird.f32 %v5105_v32 }
 0x950   : > { %v5236_v55 = vsel %vm5235_vm9, %v10151_v61, %v5232_v31  ;;  %v5239_v47 = vmul.f32 %v10155_v54, %v5238_v52  ;;  %v5357_v10 = vmul.f32 %v5341_v4, %v5277_v48  ;;  %v5372_v61 = vld [vmem:[%s14186_s7 + $0x8] sm:$0xff] }
 0x951   : > { %v5279_v15 = vmul.f32 %v5236_v55, %v12791_v17  ;;  %5378 = vst [vmem:[#allocation1 + $0x20] ss:$4 sm:$0xff] %v5372_v61 }
 0x952   : > { %v5240_v9 = vmul.f32 0.5, %v5239_v47 }
 0x953   : > { %v10157_v33 = vpop.eup %10156  ;;  %v5295_v51 = vmul.f32 0.5, %v5279_v15 }
 0x954   : > { %v5326_v36 = vadd.f32 1.0, %v10157_v33  ;;  %v5241_v26 = vsub.f32 1.5, %v5240_v9  ;;  %v12921_v33 = vpop.f32.mrf.mxu0 }
 0x955   : > { %10158 = vtanh.f32 %v5295_v51  ;;  %14215 = vst [vmem:[#allocation9_spill] sm:$0xff] %v12921_v33  ;;  %v12923_v51 = vpop.f32.mrf.mxu1 }
 0x956   : > { %v5342_v1 = vmul.f32 0.5, %v5326_v36  ;;  %v5242_v58 = vmul.f32 %v10155_v54, %v5241_v26  ;;  %14216 = vst [vmem:[#allocation10_spill] sm:$0xff] %v12923_v51 }
 0x958   : > { %v5358_v40 = vmul.f32 %v5342_v1, %v5278_v34  ;;  %v5246_v23 = vsel %vm5245_vm0, %v10155_v54, %v5242_v58  ;;  %v5383_v60 = vld.sshfl [vmem:[#allocation1 + $0x20] sm:$0xff pattern:$0x73625140]  ;;  %v5384_v41 = vld.sshfl [vmem:[#allocation1 + $0x28] sm:$0xff pattern:$0x73625140]  ;;  %v12925_v1 = vpop.f32.mrf.mxu2  ;;  %v12927_v58 = vpop.f32.mrf.mxu3 }
 0x959   : > { %v5280_v16 = vmul.f32 %v5246_v23, %v12804_v57  ;;  %v5423_v34 = vsel %vm5414_vm12, %v5383_v60, 0  ;;  %v5385_v54 = vld.sshfl [vmem:[#allocation1 + $0x30] sm:$0xff pattern:$0x73625140]  ;;  %14217 = vst [vmem:[#allocation11_spill] sm:$0xff] %v12925_v1 }
 0x95a   : > { %v12890_v59 = vpack.c.bf16 %v5358_v40, %v5357_v10  ;;  %5636 = vmatpush.bf16.msra.mxu2 %v5423_v34  ;;  %v5427_v52 = vsel %vm5414_vm12, %v5385_v54, 0  ;;  %v5386_v38 = vld.sshfl [vmem:[#allocation1 + $0x38] sm:$0xff pattern:$0x73625140]  ;;  %14218 = vst [vmem:[#allocation12_spill] sm:$0xff] %v12927_v58 }
 0x95b   : > { %v5296_v17 = vmul.f32 0.5, %v5280_v16  ;;  %v10159_v21 = vpop.eup %10158  ;;  %5734 = vmatpush.bf16.msra.mxu0 %v5427_v52  ;;  %v5429_v55 = vsel %vm5414_vm12, %v5386_v38, 0 }
 0x95c   : > { %14213 = vst [vmem:[#allocation7_spill] sm:$0xff] %v12890_v59  ;;  %9181 = vmatmul.msk.bf16.gmra.mxu2 %vm4923_vm15, %v12890_v59  ;;  %9189 = vmatmul.msk.bf16.gmra.mxu3 %vm4923_vm15, %v12890_v59  ;;  %v5327_v28 = vadd.f32 1.0, %v10159_v21 }
 0x95d   : > { %10160 = vtanh.f32 %v5296_v17  ;;  %9197 = vmatmul.msk.bf16.gmra.mxu0 %vm4923_vm15, %v12890_v59  ;;  %9205 = vmatmul.msk.bf16.gmra.mxu1 %vm4923_vm15, %v12890_v59  ;;  %v12933_v17 = vpop.f32.mrf.mxu1 }
 0x95e   : > { %v5343_v57 = vmul.f32 0.5, %v5327_v28  ;;  %10162 = vrsqrt.f32 %v5105_v32  ;;  %5783 = vmatpush.bf16.msrb.mxu1 %v5429_v55  ;;  %14221 = vst [vmem:[#allocation15_spill] sm:$0xff] %v12933_v17 }
 0x960   : > { %v5359_v14 = vmul.f32 %v5343_v57, %v5279_v15  ;;  %v12943_v21 = vpop.f32.mrf.mxu2  ;;  %v12945_v28 = vpop.f32.mrf.mxu3 }
 0x961   : > { %14222 = vst [vmem:[#allocation16_spill] sm:$0xff] %v12943_v21 }
 0x962   : > { %14223 = vst [vmem:[#allocation17_spill] sm:$0xff] %v12945_v28 }
 0x963   : > { %v10161_v50 = vpop.eup %10160 }
 0x964   : > { %v5328_v39 = vadd.f32 1.0, %v10161_v50  ;;  %v10163_v48 = vpop.eup %10162 }
 0x965   : > { %v5248_v11 = vmul.f32 %v10163_v48, %v5105_v32  ;;  %vm5254_vm13 = vweird.f32 %v10163_v48  ;;  %v12949_v57 = vpop.f32.mrf.mxu1 }
 0x966   : > { %v5344_v22 = vmul.f32 0.5, %v5328_v39  ;;  %vm5255_vm1 = vmor %vm5253_vm14, %vm5254_vm13 }
 0x967   : > { %v5249_v56 = vmul.f32 %v10163_v48, %v5248_v11 }
 0x968   : > { %v5360_v62 = vmul.f32 %v5344_v22, %v5280_v16  ;;  %v12931_v16 = vpop.f32.mrf.mxu0  ;;  %v12951_v39 = vpop.f32.mrf.mxu2 }
 0x969   : > { %v5250_v43 = vmul.f32 0.5, %v5249_v56  ;;  %14220 = vst [vmem:[#allocation14_spill] sm:$0xff] %v12931_v16  ;;  %v12953_v22 = vpop.f32.mrf.mxu3 }
 0x96a   : > { %v12900_v24 = vpack.c.bf16 %v5360_v62, %v5359_v14  ;;  %14224 = vst [vmem:[#allocation18_spill] sm:$0xff] %v12951_v39 }
 0x96b   : > { %v5251_v37 = vsub.f32 1.5, %v5250_v43  ;;  %14225 = vst [vmem:[#allocation19_spill] sm:$0xff] %v12953_v22 }
 0x96c   : > { %14214 = vst [vmem:[#allocation8_spill] sm:$0xff] %v12900_v24  ;;  %9182 = vmatmul.msk.bf16.gmra.mxu2 %vm4923_vm15, %v12900_v24  ;;  %9190 = vmatmul.msk.bf16.gmra.mxu3 %vm4923_vm15, %v12900_v24 }
 0x96d   : > { %9198 = vmatmul.msk.bf16.gmra.mxu0 %vm4923_vm15, %v12900_v24  ;;  %9206 = vmatmul.msk.bf16.gmra.mxu1 %vm4923_vm15, %v12900_v24  ;;  %v5252_v5 = vmul.f32 %v10163_v48, %v5251_v37  ;;  %v12965_v62 = vpop.f32.mrf.mxu1 }
 0x96f   : > { %v5256_v0 = vsel %vm5255_vm1, %v10163_v48, %v5252_v5 }
 0x970   : > { %v5281_v20 = vmul.f32 %v5256_v0, %v12819_v19  ;;  %v5425_v19 = vsel %vm5414_vm12, %v5384_v41, 0  ;;  %v12947_v50 = vpop.f32.mrf.mxu0  ;;  %v12967_v53 = vpop.f32.mrf.mxu2 }
 0x971   : > { %5685 = vmatpush.bf16.msra.mxu3 %v5425_v19  ;;  %14226 = vst [vmem:[#allocation20_spill] sm:$0xff] %v12967_v53  ;;  %v12969_v6 = vpop.f32.mrf.mxu3 }
 0x972   : > { %v5297_v42 = vmul.f32 0.5, %v5281_v20  ;;  %14227 = vst [vmem:[#allocation21_spill] sm:$0xff] %v12969_v6 }
 0x975   : > { %v12973_v48 = vpop.f32.mrf.mxu1 }
 0x978   : > { %v12963_v14 = vpop.f32.mrf.mxu0  ;;  %v12983_v11 = vpop.f32.mrf.mxu2 }
 0x979   : > { %v12985_v56 = vpop.f32.mrf.mxu3 }
 0x980   : > { %v12971_v32 = vpop.f32.mrf.mxu0 }
 0x981   : > { %v12993_v37 = vpop.f32.mrf.mxu3 }
 0x988   : > { %v12987_v43 = vpop.f32.mrf.mxu0 }
 0x99d   : > { %v5074_v27 = vpop.xlane.xlu0 %5073 }
 0x99e   : > { %v5090_v13 = vmul.f32 %v5074_v27, %v12598_v35  ;;  %v12989_v27 = vpop.f32.mrf.mxu1 }
 0x9a0   : > { %v5106_v63 = vadd.f32 1e-05, %v5090_v13  ;;  %v12991_v13 = vpop.f32.mrf.mxu2 }
 0x9a2   : > { %10164 = vrsqrt.f32 %v5106_v63  ;;  %vm5263_vm3 = vweird.f32 %v5106_v63 }
 0x9a3   : > { %10166 = vtanh.f32 %v5297_v42 }
 0x9a8   : > { %v10165_v29 = vpop.eup %10164 }
 0x9a9   : > { %v5258_v44 = vmul.f32 %v10165_v29, %v5106_v63  ;;  %vm5264_vm2 = vweird.f32 %v10165_v29  ;;  %v10167_v15 = vpop.eup %10166 }
 0x9aa   : > { %vm5265_vm4 = vmor %vm5263_vm3, %vm5264_vm2  ;;  %v5329_v9 = vadd.f32 1.0, %v10167_v15 }
 0x9ab   : > { %v5259_v45 = vmul.f32 %v10165_v29, %v5258_v44 }
 0x9ad   : > { %v5260_v46 = vmul.f32 0.5, %v5259_v45 }
 0x9af   : > { %v5261_v25 = vsub.f32 1.5, %v5260_v46 }
 0x9b1   : > { %v5262_v49 = vmul.f32 %v10165_v29, %v5261_v25 }
 0x9b3   : > { %v5266_v3 = vsel %vm5265_vm4, %v10165_v29, %v5262_v49 }
 0x9b4   : > { %v5282_v31 = vmul.f32 %v5266_v3, %v12849_v8  ;;  %v5345_v8 = vmul.f32 0.5, %v5329_v9  ;;  %v5389_v3 = vld.sshfl [vmem:[#allocation1] sm:$0xff pattern:$0x73625140] }
 0x9b5   : > { %v5431_v41 = vsel %vm5414_vm12, %v5389_v3, 0 }
 0x9b6   : > { %v5298_v47 = vmul.f32 0.5, %v5282_v31  ;;  %v5361_v10 = vmul.f32 %v5345_v8, %v5281_v20  ;;  %5832 = vmatpush.bf16.msrb.mxu2 %v5431_v41 }
 0x9b8   : > { %10168 = vtanh.f32 %v5298_v47 }
 0x9ba   : > { %v12995_v63 = vpop.f32.mrf.mxu0  ;;  %v12997_v5 = vpop.f32.mrf.mxu1 }
 0x9be   : > { %v10169_v4 = vpop.eup %10168 }
 0x9bf   : > { %v5330_v36 = vadd.f32 1.0, %v10169_v4  ;;  %v13007_v61 = vpop.f32.mrf.mxu2  ;;  %v13009_v0 = vpop.f32.mrf.mxu3 }
 0x9c1   : > { %v5346_v26 = vmul.f32 0.5, %v5330_v36 }
 0x9c2   : > { %v13011_v29 = vpop.f32.mrf.mxu0  ;;  %v13013_v44 = vpop.f32.mrf.mxu1 }
 0x9c3   : > { %v5362_v40 = vmul.f32 %v5346_v26, %v5282_v31 }
 0x9c5   : > { %v12929_v23 = vpack.c.bf16 %v5362_v40, %v5361_v10 }
 0x9c7   : > { %14219 = vst [vmem:[#allocation13_spill] sm:$0xff] %v12929_v23  ;;  %9183 = vmatmul.msk.bf16.gmra.mxu2 %vm4923_vm15, %v12929_v23  ;;  %9191 = vmatmul.msk.bf16.gmra.mxu3 %vm4923_vm15, %v12929_v23  ;;  %v13015_v20 = vpop.f32.mrf.mxu2  ;;  %v13017_v45 = vpop.f32.mrf.mxu3 }
 0x9c8   : > { %9199 = vmatmul.msk.bf16.gmra.mxu0 %vm4923_vm15, %v12929_v23  ;;  %9207 = vmatmul.msk.bf16.gmra.mxu1 %vm4923_vm15, %v12929_v23 }
 0x9ca   : > { %v13027_v46 = vpop.f32.mrf.mxu0  ;;  %v13029_v60 = vpop.f32.mrf.mxu1 }
 0x9cf   : > { %v13031_v42 = vpop.f32.mrf.mxu2  ;;  %v13033_v34 = vpop.f32.mrf.mxu3 }
 0x9d2   : > { %v13035_v25 = vpop.f32.mrf.mxu0  ;;  %v13037_v49 = vpop.f32.mrf.mxu1 }
 0x9d7   : > { %9208 = vmatmul.msk.bf16.vlgmr.msra.gmra.mxu2 %vm4923_vm15, %v12778_v2  ;;  %9216 = vmatmul.msk.bf16.vlgmr.msra.gmra.mxu3 %vm4923_vm15, %v12778_v2  ;;  %v13048_v54 = vpop.f32.mrf.mxu2  ;;  %v13050_v31 = vpop.f32.mrf.mxu3 }
 0x9d8   : > { %9224 = vmatmul.msk.bf16.vlgmr.msra.gmra.mxu0 %vm4923_vm15, %v12778_v2  ;;  %9232 = vmatmul.msk.bf16.vlgmr.msrb.gmra.mxu1 %vm4923_vm15, %v12778_v2 }
 0x9da   : > { %v5565_v19 = vpop.f32.mrf.mxu0  ;;  %v5614_v52 = vpop.f32.mrf.mxu1 }
 0x9df   : > { %v13052_v38 = vpop.f32.mrf.mxu2  ;;  %v13054_v55 = vpop.f32.mrf.mxu3 }
 0x9e2   : > { %v5567_v47 = vpop.f32.mrf.mxu0  ;;  %v5616_v15 = vpop.f32.mrf.mxu1 }
 0x9e3   : > { %v6277_v33 = vpack.c.bf16 %v5616_v15, %v5614_v52  ;;  %v14245_v52 = vld [vmem:[#allocation17_spill] sm:$0xff] }
 0x9e7   : > { %9209 = vmatmul.msk.bf16.gmra.mxu2 %vm4923_vm15, %v12811_v12  ;;  %9217 = vmatmul.msk.bf16.gmra.mxu3 %vm4923_vm15, %v12811_v12  ;;  %v5469_v9 = vpop.f32.mrf.mxu2  ;;  %v5518_v4 = vpop.f32.mrf.mxu3 }
 0x9e8   : > { %9225 = vmatmul.msk.bf16.gmra.mxu0 %vm4923_vm15, %v12811_v12  ;;  %9233 = vmatmul.msk.bf16.gmra.mxu1 %vm4923_vm15, %v12811_v12 }
 0x9ea   : > { %v5570_v8 = vpop.f32.mrf.mxu0  ;;  %v5619_v36 = vpop.f32.mrf.mxu1 }
 0x9ef   : > { %v5472_v26 = vpop.f32.mrf.mxu2  ;;  %v5521_v10 = vpop.f32.mrf.mxu3 }
 0x9f2   : > { %v5572_v40 = vpop.f32.mrf.mxu0  ;;  %v5621_v3 = vpop.f32.mrf.mxu1 }
 0x9f3   : > { %v6140_v1 = vpack.c.bf16 %v5572_v40, %v5570_v8  ;;  %v6278_v6 = vpack.c.bf16 %v5621_v3, %v5619_v36  ;;  %v9980_v3 = vld [vmem:[%s14187_s8 + $0x88] sm:$0xff] }
 0x9f7   : > { %9210 = vmatmul.msk.bf16.gmra.mxu2 %vm4923_vm15, %v12828_v7  ;;  %9218 = vmatmul.msk.bf16.gmra.mxu3 %vm4923_vm15, %v12828_v7  ;;  %v5474_v41 = vpop.f32.mrf.mxu2  ;;  %v5523_v35 = vpop.f32.mrf.mxu3 }
 0x9f8   : > { %9226 = vmatmul.msk.bf16.gmra.mxu0 %vm4923_vm15, %v12828_v7  ;;  %9234 = vmatmul.msk.bf16.gmra.mxu1 %vm4923_vm15, %v12828_v7 }
 0xa07   : > { %9211 = vmatmul.msk.bf16.gmra.mxu2 %vm4923_vm15, %v12863_v30  ;;  %9219 = vmatmul.msk.bf16.gmra.mxu3 %vm4923_vm15, %v12863_v30 }
 0xa08   : > { %9227 = vmatmul.msk.bf16.gmra.mxu0 %vm4923_vm15, %v12863_v30  ;;  %9235 = vmatmul.msk.bf16.gmra.mxu1 %vm4923_vm15, %v12863_v30 }
 0xa17   : > { %9212 = vmatmul.msk.bf16.gmra.mxu2 %vm4923_vm15, %v12878_v18  ;;  %9220 = vmatmul.msk.bf16.gmra.mxu3 %vm4923_vm15, %v12878_v18 }
 0xa18   : > { %9228 = vmatmul.msk.bf16.gmra.mxu0 %vm4923_vm15, %v12878_v18  ;;  %9236 = vmatmul.msk.bf16.gmra.mxu1 %vm4923_vm15, %v12878_v18 }
 0xa27   : > { %9213 = vmatmul.msk.bf16.gmra.mxu2 %vm4923_vm15, %v12890_v59  ;;  %9221 = vmatmul.msk.bf16.gmra.mxu3 %vm4923_vm15, %v12890_v59 }
 0xa28   : > { %9229 = vmatmul.msk.bf16.gmra.mxu0 %vm4923_vm15, %v12890_v59  ;;  %9237 = vmatmul.msk.bf16.gmra.mxu1 %vm4923_vm15, %v12890_v59 }
 0xa37   : > { %9214 = vmatmul.msk.bf16.gmra.mxu2 %vm4923_vm15, %v12900_v24  ;;  %9222 = vmatmul.msk.bf16.gmra.mxu3 %vm4923_vm15, %v12900_v24 }
 0xa38   : > { %9230 = vmatmul.msk.bf16.gmra.mxu0 %vm4923_vm15, %v12900_v24  ;;  %9238 = vmatmul.msk.bf16.gmra.mxu1 %vm4923_vm15, %v12900_v24 }
 0xa45   : > { %v5575_v59 = vpop.f32.mrf.mxu0  ;;  %v5624_v18 = vpop.f32.mrf.mxu1 }
 0xa47   : > { %9215 = vmatmul.msk.bf16.gmra.mxu2 %vm4923_vm15, %v12929_v23  ;;  %9223 = vmatmul.msk.bf16.gmra.mxu3 %vm4923_vm15, %v12929_v23 }
 0xa48   : > { %9231 = vmatmul.msk.bf16.gmra.mxu0 %vm4923_vm15, %v12929_v23  ;;  %9239 = vmatmul.msk.bf16.gmra.mxu1 %vm4923_vm15, %v12929_v23  ;;  %v6139_v23 = vpack.c.bf16 %v5567_v47, %v5565_v19  ;;  %v14244_v19 = vld [vmem:[#allocation12_spill] sm:$0xff]  ;;  %v9963_v47 = vld [vmem:[%s14187_s8] sm:$0xff] }
 0xa4a   : > { %v5477_v30 = vpop.f32.mrf.mxu2  ;;  %v5526_v24 = vpop.f32.mrf.mxu3 }
 0xa4d   : > { %v5577_v7 = vpop.f32.mrf.mxu0  ;;  %v5626_v28 = vpop.f32.mrf.mxu1 }
 0xa4e   : > { %v6141_v58 = vpack.c.bf16 %v5577_v7, %v5575_v59  ;;  %v6279_v21 = vpack.c.bf16 %v5626_v28, %v5624_v18  ;;  %v5896_v7 = vpack.c.bf16 %v5474_v41, %v5472_v26  ;;  %v5921_v18 = vpack.c.bf16 %v5523_v35, %v5521_v10  ;;  %v14248_v26 = vld [vmem:[#allocation4_spill] sm:$0xff] }
 0xa4f   : > { %v6276_v59 = vpack.c.bf16 %v13037_v49, %v13029_v60  ;;  %v5920_v35 = vpack.c.bf16 %v5518_v4, %v13054_v55  ;;  %v5919_v28 = vpack.c.bf16 %v13050_v31, %v13033_v34  ;;  %v14241_v60 = vld [vmem:[#allocation21_spill] sm:$0xff]  ;;  %v14242_v49 = vld [vmem:[#allocation11_spill] sm:$0xff] }
 0xa50   : > { %6190 = vmatpush.bf16.msra.mxu1 %v6141_v58  ;;  %6328 = vmatpush.bf16.msra.mxu2 %v6279_v21  ;;  %v5895_v58 = vpack.c.bf16 %v5469_v9, %v13052_v38  ;;  %v5894_v21 = vpack.c.bf16 %v13048_v54, %v13031_v42  ;;  %v9979_v42 = vld [vmem:[%s14187_s8 + $0x80] sm:$0xff]  ;;  %v14243_v54 = vld [vmem:[#allocation16_spill] sm:$0xff]  ;;  %v5915_v38 = vpack.c.bf16 %v14245_v52, %v14244_v19 }
 0xa51   : > { %v5890_v31 = vpack.c.bf16 %v14243_v54, %v14242_v49  ;;  %v9971_v55 = vld [vmem:[%s14187_s8 + $0x40] sm:$0xff] }
 0xa52   : > { %v5479_v22 = vpop.f32.mrf.mxu2  ;;  %v5528_v53 = vpop.f32.mrf.mxu3  ;;  %v14254_v4 = vld [vmem:[#allocation13_spill] sm:$0xff] }
 0xa53   : > { %v5897_v39 = vpack.c.bf16 %v5479_v22, %v5477_v30  ;;  %v5922_v17 = vpack.c.bf16 %v5528_v53, %v5526_v24  ;;  %v6138_v30 = vpack.c.bf16 %v13035_v25, %v13027_v46  ;;  %v6274_v22 = vpack.c.bf16 %v12989_v27, %v12973_v48 }
 0xa54   : > { %6191 = vmatpush.bf16.msra.mxu1 %v6140_v1  ;;  %6329 = vmatpush.bf16.msra.mxu2 %v6278_v6  ;;  %v6135_v48 = vpack.c.bf16 %v12963_v14, %v12947_v50  ;;  %v5892_v27 = vpack.c.bf16 %v12991_v13, %v12983_v11  ;;  %v14234_v50 = vld [vmem:[#allocation10_spill] sm:$0xff]  ;;  %v14235_v14 = vld [vmem:[#allocation15_spill] sm:$0xff]  ;;  %v14239_v13 = vld [vmem:[#allocation20_spill] sm:$0xff] }
 0xa55   : > { %v13080_v51 = vpop.f32.mrf.mxu0  ;;  %v13082_v16 = vpop.f32.mrf.mxu1  ;;  %5971 = vmatpush.bf16.msrb.mxu3 %v5922_v17  ;;  %6068 = vmatpush.bf16.msrb.mxu0 %v5897_v39  ;;  %v6275_v17 = vpack.c.bf16 %v13013_v44, %v12997_v5  ;;  %v6136_v39 = vpack.c.bf16 %v12987_v43, %v12971_v32  ;;  %v5918_v5 = vpack.c.bf16 %v13017_v45, %v13009_v0  ;;  %v14232_v0 = vld [vmem:[#allocation9_spill] sm:$0xff]  ;;  %v14238_v11 = vld [vmem:[#allocation18_spill] sm:$0xff] }
 0xa56   : > { %v6273_v43 = vpack.c.bf16 %v12965_v62, %v12949_v57  ;;  %v6272_v46 = vpack.c.bf16 %v14235_v14, %v14234_v50  ;;  %v14251_v50 = vld [vmem:[#allocation6_spill] sm:$0xff] }
 0xa57   : > { %9240 = vmatmul.msk.bf16.vlgmr.msrb.gmra.mxu2 %vm4923_vm15, %v12778_v2 }
 0xa58   : > { %6192 = vmatpush.bf16.msra.mxu1 %v6139_v23  ;;  %6330 = vmatpush.bf16.msra.mxu2 %v6277_v33  ;;  %v6137_v23 = vpack.c.bf16 %v13011_v29, %v12995_v63  ;;  %v5893_v63 = vpack.c.bf16 %v13015_v20, %v13007_v61  ;;  %v5917_v61 = vpack.c.bf16 %v12993_v37, %v12985_v56  ;;  %v14233_v20 = vld [vmem:[#allocation14_spill] sm:$0xff]  ;;  %v14240_v37 = vld [vmem:[#allocation19_spill] sm:$0xff] }
 0xa59   : > { %5972 = vmatpush.bf16.msrb.mxu3 %v5921_v18  ;;  %6069 = vmatpush.bf16.msrb.mxu0 %v5896_v7  ;;  %v6134_v45 = vpack.c.bf16 %v14233_v20, %v14232_v0  ;;  %v5891_v56 = vpack.c.bf16 %v14239_v13, %v14238_v11  ;;  %v9972_v18 = vld [vmem:[%s14187_s8 + $0x48] sm:$0xff]  ;;  %v9982_v11 = vld [vmem:[%s14187_s8 + $0x98] sm:$0xff] }
 0xa5a   : > { %v13090_v24 = vpop.f32.mrf.mxu2  ;;  %v13092_v1 = vpop.f32.mrf.mxu3 }
 0xa5b   : > { %14228 = vst [vmem:[#allocation22_spill] sm:$0xff] %v13090_v24 }
 0xa5c   : > { %14229 = vst [vmem:[#allocation23_spill] sm:$0xff] %v13092_v1  ;;  %6193 = vmatpush.bf16.msra.mxu1 %v6138_v30  ;;  %6331 = vmatpush.bf16.msra.mxu2 %v6276_v59  ;;  %v9964_v30 = vld [vmem:[%s14187_s8 + $0x8] sm:$0xff] }
 0xa5d   : > { %v13096_v2 = vpop.f32.mrf.mxu0  ;;  %v13098_v33 = vpop.f32.mrf.mxu1  ;;  %5973 = vmatpush.bf16.msrb.mxu3 %v5920_v35  ;;  %6070 = vmatpush.bf16.msrb.mxu0 %v5895_v58 }
 0xa60   : > { %6194 = vmatpush.bf16.msra.mxu1 %v6137_v23  ;;  %6332 = vmatpush.bf16.msra.mxu2 %v6275_v17 }
 0xa61   : > { %5974 = vmatpush.bf16.msrb.mxu3 %v5919_v28  ;;  %6071 = vmatpush.bf16.msrb.mxu0 %v5894_v21  ;;  %v14250_v21 = vld [vmem:[#allocation5_spill] sm:$0xff] }
 0xa62   : > { %v13112_v53 = vpop.f32.mrf.mxu2  ;;  %v13114_v6 = vpop.f32.mrf.mxu3 }
 0xa63   : > { %14230 = vst [vmem:[#allocation24_spill] sm:$0xff] %v13112_v53 }
 0xa64   : > { %14231 = vst [vmem:[#allocation25_spill] sm:$0xff] %v13114_v6  ;;  %6195 = vmatpush.bf16.msra.mxu1 %v6136_v39  ;;  %6333 = vmatpush.bf16.msra.mxu2 %v6274_v22  ;;  %v9981_v22 = vld [vmem:[%s14187_s8 + $0x90] sm:$0xff] }
 0xa65   : > { %v13122_v44 = vpop.f32.mrf.mxu0  ;;  %v13124_v32 = vpop.f32.mrf.mxu1  ;;  %5975 = vmatpush.bf16.msrb.mxu3 %v5918_v5  ;;  %6072 = vmatpush.bf16.msrb.mxu0 %v5893_v63 }
 0xa67   : > { %9241 = vmatmul.msk.bf16.gmra.mxu2 %vm4923_vm15, %v12811_v12  ;;  %v5916_v12 = vpack.c.bf16 %v14241_v60, %v14240_v37  ;;  %v9974_v37 = vld [vmem:[%s14187_s8 + $0x58] sm:$0xff] }
 0xa68   : > { %6196 = vmatpush.bf16.msra.mxu1 %v6135_v48  ;;  %6334 = vmatpush.bf16.msra.mxu2 %v6273_v43  ;;  %v9973_v48 = vld [vmem:[%s14187_s8 + $0x50] sm:$0xff]  ;;  %v9966_v60 = vld [vmem:[%s14187_s8 + $0x18] sm:$0xff] }
 0xa69   : > { %5976 = vmatpush.bf16.msrb.mxu3 %v5917_v61  ;;  %6073 = vmatpush.bf16.msrb.mxu0 %v5892_v27  ;;  %v9965_v43 = vld [vmem:[%s14187_s8 + $0x10] sm:$0xff] }
 0xa6a   : > { %v13140_v57 = vpop.f32.mrf.mxu2  ;;  %v13142_v62 = vpop.f32.mrf.mxu3 }
 0xa6b   : > { %14236 = vst [vmem:[#allocation9_spill] sm:$0xff] %v13140_v57 }
 0xa6c   : > { %14237 = vst [vmem:[#allocation14_spill] sm:$0xff] %v13142_v62  ;;  %6197 = vmatpush.bf16.msra.mxu1 %v6134_v45  ;;  %6335 = vmatpush.bf16.msra.mxu2 %v6272_v46 }
 0xa6d   : > { %v13151_v34 = vpop.f32.mrf.mxu0  ;;  %v13153_v25 = vpop.f32.mrf.mxu1  ;;  %5977 = vmatpush.bf16.msrb.mxu3 %v5916_v12  ;;  %6074 = vmatpush.bf16.msrb.mxu0 %v5891_v56 }
 0xa6f   : > { %6198 = vmatmul.bf16.vlgmr.msra.gmra.mxu1 %v9979_v42 }
 0xa71   : > { %5978 = vmatpush.bf16.msrb.mxu3 %v5915_v38  ;;  %6075 = vmatpush.bf16.msrb.mxu0 %v5890_v31  ;;  %v14252_v31 = vld [vmem:[#allocation7_spill] sm:$0xff]  ;;  %v9983_v38 = vld [vmem:[%s14187_s8 + $0xa0] sm:$0xff] }
 0xa72   : > { %v13165_v15 = vpop.f32.mrf.mxu2  ;;  %v13167_v9 = vpop.f32.mrf.mxu3 }
 0xa73   : > { %14246 = vst [vmem:[#allocation10_spill] sm:$0xff] %v13165_v15 }
 0xa74   : > { %14247 = vst [vmem:[#allocation15_spill] sm:$0xff] %v13167_v9  ;;  %5979 = vmatmul.bf16.vlgmr.msrb.gmra.mxu3 %v9971_v55  ;;  %6076 = vmatmul.bf16.vlgmr.msrb.gmra.mxu0 %v9963_v47  ;;  %v9969_v9 = vld [vmem:[%s14187_s8 + $0x30] sm:$0xff] }
 0xa75   : > { %v13171_v8 = vpop.f32.mrf.mxu0  ;;  %v13173_v36 = vpop.f32.mrf.mxu1 }
 0xa77   : > { %9242 = vmatmul.msk.bf16.gmra.mxu2 %vm4923_vm15, %v14248_v26  ;;  %v9975_v26 = vld [vmem:[%s14187_s8 + $0x60] sm:$0xff] }
 0xa7a   : > { %v13177_v10 = vpop.f32.mrf.mxu2  ;;  %v13179_v40 = vpop.f32.mrf.mxu3 }
 0xa7b   : > { %14249 = vst [vmem:[#allocation18_spill] sm:$0xff] %v13177_v10 }
 0xa7d   : > { %v13184_v41 = vpop.f32.mrf.mxu0  ;;  %v13186_v7 = vpop.f32.mrf.mxu1 }
 0xa7f   : > { %6203 = vmatmul.bf16.gmra.mxu1 %v9980_v3  ;;  %v9967_v3 = vld [vmem:[%s14187_s8 + $0x20] sm:$0xff] }
 0xa82   : > { %v13194_v59 = vpop.f32.mrf.mxu2  ;;  %v13196_v58 = vpop.f32.mrf.mxu3 }
 0xa84   : > { %5984 = vmatmul.bf16.gmra.mxu3 %v9972_v18  ;;  %6081 = vmatmul.bf16.gmra.mxu0 %v9964_v30 }
 0xa85   : > { %v13200_v23 = vpop.f32.mrf.mxu0  ;;  %v13202_v17 = vpop.f32.mrf.mxu1 }
 0xa87   : > { %9243 = vmatmul.msk.bf16.gmra.mxu2 %vm4923_vm15, %v14250_v21 }
 0xa8a   : > { %v13206_v28 = vpop.f32.mrf.mxu2  ;;  %v13208_v39 = vpop.f32.mrf.mxu3 }
 0xa8d   : > { %v13213_v63 = vpop.f32.mrf.mxu0  ;;  %v13215_v5 = vpop.f32.mrf.mxu1 }
 0xa8f   : > { %6208 = vmatmul.bf16.gmra.mxu1 %v9981_v22 }
 0xa92   : > { %v13223_v27 = vpop.f32.mrf.mxu2  ;;  %v13225_v61 = vpop.f32.mrf.mxu3 }
 0xa94   : > { %5989 = vmatmul.bf16.gmra.mxu3 %v9973_v48  ;;  %6086 = vmatmul.bf16.gmra.mxu0 %v9965_v43  ;;  %v14253_v48 = vld [vmem:[#allocation8_spill] sm:$0xff] }
 0xa95   : > { %v13229_v20 = vpop.f32.mrf.mxu0  ;;  %v13231_v45 = vpop.f32.mrf.mxu1 }
 0xa97   : > { %9244 = vmatmul.msk.bf16.gmra.mxu2 %vm4923_vm15, %v14251_v50 }
 0xa9a   : > { %v13235_v14 = vpop.f32.mrf.mxu2  ;;  %v13237_v46 = vpop.f32.mrf.mxu3 }
 0xa9d   : > { %v13242_v13 = vpop.f32.mrf.mxu0  ;;  %v13244_v56 = vpop.f32.mrf.mxu1 }
 0xa9f   : > { %6213 = vmatmul.bf16.gmra.mxu1 %v9982_v11  ;;  %v9984_v11 = vld [vmem:[%s14187_s8 + $0xa8] sm:$0xff] }
 0xaa2   : > { %v13252_v12 = vpop.f32.mrf.mxu2  ;;  %v13254_v42 = vpop.f32.mrf.mxu3 }
 0xaa4   : > { %5994 = vmatmul.bf16.gmra.mxu3 %v9974_v37  ;;  %6091 = vmatmul.bf16.gmra.mxu0 %v9966_v60 }
 0xaa5   : > { %v13256_v49 = vpop.f32.mrf.mxu0  ;;  %v13258_v54 = vpop.f32.mrf.mxu1 }
 0xaa7   : > { %9245 = vmatmul.msk.bf16.gmra.mxu2 %vm4923_vm15, %v14252_v31  ;;  %v9976_v31 = vld [vmem:[%s14187_s8 + $0x68] sm:$0xff] }
 0xaaa   : > { %v13262_v19 = vpop.f32.mrf.mxu2  ;;  %v13264_v52 = vpop.f32.mrf.mxu3 }
 0xaad   : > { %v5763_v55 = vpop.f32.mrf.mxu0  ;;  %v5812_v47 = vpop.f32.mrf.mxu1 }
 0xaaf   : > { %6218 = vmatmul.bf16.gmra.mxu1 %v9983_v38  ;;  %v9968_v38 = vld [vmem:[%s14187_s8 + $0x28] sm:$0xff] }
 0xab2   : > { %v13275_v18 = vpop.f32.mrf.mxu2  ;;  %v13277_v30 = vpop.f32.mrf.mxu3 }
 0xab4   : > { %5999 = vmatmul.bf16.gmra.mxu3 %v9975_v26  ;;  %6096 = vmatmul.bf16.gmra.mxu0 %v9967_v3 }
 0xab5   : > { %v5766_v21 = vpop.f32.mrf.mxu0  ;;  %v5815_v22 = vpop.f32.mrf.mxu1 }
 0xab7   : > { %9246 = vmatmul.msk.bf16.gmra.mxu2 %vm4923_vm15, %v14253_v48 }
 0xaba   : > { %v5668_v43 = vpop.f32.mrf.mxu2  ;;  %v5717_v50 = vpop.f32.mrf.mxu3 }
 0xabd   : > { %v5768_v37 = vpop.f32.mrf.mxu0  ;;  %v5817_v60 = vpop.f32.mrf.mxu1 }
 0xabe   : > { %v6830_v57 = vpack.c.bf16 %v5817_v60, %v5815_v22 }
 0xabf   : > { %6223 = vmatmul.bf16.gmra.mxu1 %v9984_v11  ;;  %v9985_v11 = vld [vmem:[%s14187_s8 + $0xb0] sm:$0xff] }
 0xac2   : > { %v5670_v26 = vpop.f32.mrf.mxu2  ;;  %v5719_v3 = vpop.f32.mrf.mxu3 }
 0xac4   : > { %6004 = vmatmul.bf16.gmra.mxu3 %v9976_v31  ;;  %6101 = vmatmul.bf16.gmra.mxu0 %v9968_v38  ;;  %v9977_v31 = vld [vmem:[%s14187_s8 + $0x70] sm:$0xff]  ;;  %v6692_v38 = vpack.c.bf16 %v5768_v37, %v5766_v21 }
 0xac5   : > { %v5771_v48 = vpop.f32.mrf.mxu0  ;;  %v5820_v29 = vpop.f32.mrf.mxu1  ;;  %v9989_v21 = vld [vmem:[%s14187_s8 + $0xd0] sm:$0xff] }
 0xac7   : > { %9247 = vmatmul.msk.bf16.gmra.mxu2 %vm4923_vm15, %v14254_v4 }
 0xaca   : > { %v5673_v35 = vpop.f32.mrf.mxu2  ;;  %v5722_v0 = vpop.f32.mrf.mxu3 }
 0xacd   : > { %v5773_v24 = vpop.f32.mrf.mxu0  ;;  %v5822_v53 = vpop.f32.mrf.mxu1 }
 0xace   : > { %v6693_v6 = vpack.c.bf16 %v5773_v24, %v5771_v48  ;;  %v6831_v1 = vpack.c.bf16 %v5822_v53, %v5820_v29  ;;  %v9987_v24 = vld [vmem:[%s14187_s8 + $0xc0] sm:$0xff]  ;;  %v6829_v53 = vpack.c.bf16 %v5812_v47, %v13258_v54  ;;  %v6416_v29 = vpack.c.bf16 %v5670_v26, %v5668_v43 }
 0xacf   : > { %6228 = vmatmul.bf16.gmra.mxu1 %v9985_v11 }
 0xad0   : > { %6742 = vmatpush.bf16.msrb.mxu1 %v6693_v6  ;;  %6880 = vmatpush.bf16.msrb.mxu2 %v6831_v1  ;;  %v6691_v1 = vpack.c.bf16 %v5763_v55, %v13256_v49  ;;  %v6554_v6 = vpack.c.bf16 %v5719_v3, %v5717_v50  ;;  %v9995_v49 = vld [vmem:[%s14187_s8 + $0x100] sm:$0xff]  ;;  %v10012_v3 = vld [vmem:[%s14187_s8 + $0x188] sm:$0xff] }
 0xad2   : > { %v5675_v4 = vpop.f32.mrf.mxu2  ;;  %v5724_v15 = vpop.f32.mrf.mxu3 }
 0xad3   : > { %v6417_v62 = vpack.c.bf16 %v5675_v4, %v5673_v35  ;;  %v6555_v10 = vpack.c.bf16 %v5724_v15, %v5722_v0  ;;  %v6690_v15 = vpack.c.bf16 %v13242_v13, %v13229_v20  ;;  %v6553_v35 = vpack.c.bf16 %v13277_v30, %v13264_v52  ;;  %v14266_v52 = vld [vmem:[#allocation22_spill] sm:$0xff] }
 0xad4   : > { %6743 = vmatpush.bf16.msrb.mxu1 %v6692_v38  ;;  %6881 = vmatpush.bf16.msrb.mxu2 %v6830_v57  ;;  %v6828_v57 = vpack.c.bf16 %v13244_v56, %v13231_v45  ;;  %v6689_v0 = vpack.c.bf16 %v13213_v63, %v13200_v23  ;;  %v6827_v20 = vpack.c.bf16 %v13215_v5, %v13202_v17  ;;  %v9978_v56 = vld [vmem:[%s14187_s8 + $0x78] sm:$0xff]  ;;  %v9996_v38 = vld [vmem:[%s14187_s8 + $0x108] sm:$0xff] }
 0xad5   : > { %6009 = vmatmul.bf16.gmra.mxu3 %v9977_v31  ;;  %6604 = vmatpush.bf16.msra.mxu0 %v6555_v10  ;;  %v6552_v45 = vpack.c.bf16 %v13254_v42, %v13237_v46  ;;  %v6414_v13 = vpack.c.bf16 %v13252_v12, %v13235_v14  ;;  %v6688_v23 = vpack.c.bf16 %v13184_v41, %v13171_v8  ;;  %v9970_v5 = vld [vmem:[%s14187_s8 + $0x38] sm:$0xff]  ;;  %v9988_v8 = vld [vmem:[%s14187_s8 + $0xc8] sm:$0xff] }
 0xad6   : > { %6466 = vmatpush.bf16.msra.mxu3 %v6417_v62  ;;  %6106 = vmatmul.bf16.gmra.mxu0 %v9969_v9  ;;  %v9986_v62 = vld [vmem:[%s14187_s8 + $0xb8] sm:$0xff]  ;;  %v6415_v9 = vpack.c.bf16 %v13275_v18, %v13262_v19  ;;  %v6826_v17 = vpack.c.bf16 %v13186_v7, %v13173_v36  ;;  %v6551_v14 = vpack.c.bf16 %v13225_v61, %v13208_v39  ;;  %v10003_v18 = vld [vmem:[%s14187_s8 + $0x140] sm:$0xff] }
 0xad7   : > { %6336 = vmatmul.bf16.vlgmr.msra.gmra.mxu2 %v9987_v24  ;;  %v6687_v36 = vpack.c.bf16 %v13151_v34, %v13122_v44  ;;  %v6825_v41 = vpack.c.bf16 %v13153_v25, %v13124_v32  ;;  %v14255_v7 = vpack.c.bf16 %v13223_v27, %v13206_v28  ;;  %v6550_v39 = vpack.c.bf16 %v13196_v58, %v13179_v40  ;;  %v14256_v32 = vld [vmem:[#allocation18_spill] sm:$0xff]  ;;  %v14259_v27 = vld [vmem:[#allocation15_spill] sm:$0xff]  ;;  %v14265_v19 = vld [vmem:[#allocation24_spill] sm:$0xff] }
 0xad8   : > { %6744 = vmatpush.bf16.msrb.mxu1 %v6691_v1  ;;  %6882 = vmatpush.bf16.msrb.mxu2 %v6829_v53  ;;  %v6686_v61 = vpack.c.bf16 %v13096_v2, %v13080_v51  ;;  %v6824_v44 = vpack.c.bf16 %v13098_v33, %v13082_v16  ;;  %v14257_v34 = vpack.c.bf16 %v13194_v59, %v14256_v32  ;;  %v14258_v28 = vld [vmem:[#allocation14_spill] sm:$0xff]  ;;  %v14261_v2 = vld [vmem:[#allocation9_spill] sm:$0xff]  ;;  %v14263_v33 = vld [vmem:[#allocation23_spill] sm:$0xff] }
 0xad9   : > { %6605 = vmatpush.bf16.msra.mxu0 %v6554_v6  ;;  %v6549_v12 = vpack.c.bf16 %v14259_v27, %v14258_v28  ;;  %v10011_v40 = vld [vmem:[%s14187_s8 + $0x180] sm:$0xff]  ;;  %v14267_v55 = vpack.c.bf16 %v14265_v19, %v14266_v52  ;;  %v10004_v53 = vld [vmem:[%s14187_s8 + $0x148] sm:$0xff]  ;;  %v10014_v28 = vld [vmem:[%s14187_s8 + $0x198] sm:$0xff] }
 0xada   : > { %6467 = vmatpush.bf16.msra.mxu3 %v6416_v29  ;;  %v13310_v10 = vpop.f32.mrf.mxu2  ;;  %v14260_v51 = vld [vmem:[#allocation10_spill] sm:$0xff]  ;;  %v14264_v59 = vld [vmem:[#allocation25_spill] sm:$0xff] }
 0xadb   : > { %v14262_v16 = vpack.c.bf16 %v14260_v51, %v14261_v2  ;;  %v6548_v42 = vpack.c.bf16 %v14264_v59, %v14263_v33  ;;  %v9990_v29 = vld [vmem:[%s14187_s8 + $0xd8] sm:$0xff]  ;;  %v9992_v59 = vld [vmem:[%s14187_s8 + $0xe8] sm:$0xff] }
 0xadc   : > { %6745 = vmatpush.bf16.msrb.mxu1 %v6690_v15  ;;  %6883 = vmatpush.bf16.msrb.mxu2 %v6828_v57  ;;  %v10006_v33 = vld [vmem:[%s14187_s8 + $0x158] sm:$0xff] }
 0xadd   : > { %6606 = vmatpush.bf16.msra.mxu0 %v6553_v35 }
 0xade   : > { %6468 = vmatpush.bf16.msra.mxu3 %v6415_v9 }
 0xadf   : > { %6233 = vmatmul.bf16.gmra.mxu1 %v9986_v62 }
 0xae0   : > { %6746 = vmatpush.bf16.msrb.mxu1 %v6689_v0  ;;  %6884 = vmatpush.bf16.msrb.mxu2 %v6827_v20  ;;  %v10013_v20 = vld [vmem:[%s14187_s8 + $0x190] sm:$0xff] }
 0xae1   : > { %6607 = vmatpush.bf16.msra.mxu0 %v6552_v45 }
 0xae2   : > { %6469 = vmatpush.bf16.msra.mxu3 %v6414_v13  ;;  %v13334_v63 = vpop.f32.mrf.mxu2 }
 0xae3   : > { %v6962_v46 = vpack.c.bf16 %v13334_v63, %v13310_v10 }
 0xae4   : > { %6747 = vmatpush.bf16.msrb.mxu1 %v6688_v23  ;;  %6885 = vmatpush.bf16.msrb.mxu2 %v6826_v17  ;;  %v9997_v23 = vld [vmem:[%s14187_s8 + $0x110] sm:$0xff] }
 0xae5   : > { %6014 = vmatmul.bf16.gmra.mxu3 %v9978_v56  ;;  %6608 = vmatpush.bf16.msra.mxu0 %v6551_v14 }
 0xae6   : > { %6470 = vmatpush.bf16.msra.mxu3 %v14255_v7  ;;  %6111 = vmatmul.bf16.gmra.mxu0 %v9970_v5 }
 0xae7   : > { %6341 = vmatmul.bf16.gmra.mxu2 %v9988_v8  ;;  %v10005_v8 = vld [vmem:[%s14187_s8 + $0x150] sm:$0xff] }
 0xae8   : > { %6748 = vmatpush.bf16.msrb.mxu1 %v6687_v36  ;;  %6886 = vmatpush.bf16.msrb.mxu2 %v6825_v41  ;;  %v9991_v41 = vld [vmem:[%s14187_s8 + $0xe0] sm:$0xff] }
 0xae9   : > { %6609 = vmatpush.bf16.msra.mxu0 %v6550_v39 }
 0xaea   : > { %6471 = vmatpush.bf16.msra.mxu3 %v14257_v34  ;;  %v13362_v25 = vpop.f32.mrf.mxu2 }
 0xaec   : > { %6749 = vmatpush.bf16.msrb.mxu1 %v6686_v61  ;;  %6887 = vmatpush.bf16.msrb.mxu2 %v6824_v44  ;;  %v6199_v58 = vpop.f32.mrf.mxu1 }
 0xaed   : > { %6610 = vmatpush.bf16.msra.mxu0 %v6549_v12 }
 0xaee   : > { %6472 = vmatpush.bf16.msra.mxu3 %v14262_v16 }
 0xaef   : > { %6750 = vmatmul.bf16.vlgmr.msrb.gmra.mxu1 %v10011_v40 }
 0xaf1   : > { %6611 = vmatpush.bf16.msra.mxu0 %v6548_v42  ;;  %v6077_v54 = vpop.f32.mrf.mxu0 }
 0xaf2   : > { %6473 = vmatpush.bf16.msra.mxu3 %v14267_v55  ;;  %v13380_v47 = vpop.f32.mrf.mxu2 }
 0xaf3   : > { %v6963_v30 = vpack.c.bf16 %v13380_v47, %v13362_v25  ;;  %v10021_v25 = vld [vmem:[%s14187_s8 + $0x1d0] sm:$0xff] }
 0xaf4   : > { %v6201_v22 = vpop.f32.mrf.mxu1 }
 0xaf5   : > { %6474 = vmatmul.bf16.vlgmr.msra.gmra.mxu3 %v9995_v49 }
 0xaf6   : > { %6612 = vmatmul.bf16.vlgmr.msra.gmra.mxu0 %v10003_v18  ;;  %v10015_v18 = vld [vmem:[%s14187_s8 + $0x1a0] sm:$0xff] }
 0xaf7   : > { %v5980_v43 = vpop.f32.mrf.mxu3  ;;  %6346 = vmatmul.bf16.gmra.mxu2 %v9989_v21 }
 0xaf8   : > { %v6078_v50 = vadd.f32 %v6077_v54, %v5980_v43 }
 0xaf9   : > { %v6079_v37 = vpop.f32.mrf.mxu0 }
 0xafa   : > { %v13390_v60 = vadd.f32 %v6199_v58, %v6078_v50  ;;  %v13392_v26 = vpop.f32.mrf.mxu2  ;;  %v9998_v58 = vld [vmem:[%s14187_s8 + $0x118] sm:$0xff]  ;;  %v9999_v50 = vld [vmem:[%s14187_s8 + $0x120] sm:$0xff] }
 0xafc   : > { %v6204_v48 = vpop.f32.mrf.mxu1 }
 0xaff   : > { %v5982_v11 = vpop.f32.mrf.mxu3  ;;  %6755 = vmatmul.bf16.gmra.mxu1 %v10012_v3 }
 0xb00   : > { %v6080_v31 = vadd.f32 %v6079_v37, %v5982_v11  ;;  %v10007_v11 = vld [vmem:[%s14187_s8 + $0x160] sm:$0xff] }
 0xb01   : > { %v6082_v4 = vpop.f32.mrf.mxu0 }
 0xb02   : > { %v13400_v24 = vadd.f32 %v6201_v22, %v6080_v31  ;;  %v13402_v1 = vpop.f32.mrf.mxu2  ;;  %v9993_v31 = vld [vmem:[%s14187_s8 + $0xf0] sm:$0xff] }
 0xb03   : > { %v6964_v6 = vpack.c.bf16 %v13402_v1, %v13392_v26 }
 0xb04   : > { %v6206_v15 = vpop.f32.mrf.mxu1 }
 0xb05   : > { %6479 = vmatmul.bf16.gmra.mxu3 %v9996_v38 }
 0xb06   : > { %6617 = vmatmul.bf16.gmra.mxu0 %v10004_v53 }
 0xb07   : > { %v5985_v57 = vpop.f32.mrf.mxu3  ;;  %6351 = vmatmul.bf16.gmra.mxu2 %v9990_v29 }
 0xb08   : > { %v6083_v35 = vadd.f32 %v6082_v4, %v5985_v57 }
 0xb09   : > { %v6084_v62 = vpop.f32.mrf.mxu0 }
 0xb0a   : > { %v13412_v9 = vadd.f32 %v6204_v48, %v6083_v35  ;;  %v13414_v0 = vpop.f32.mrf.mxu2  ;;  %v10016_v35 = vld [vmem:[%s14187_s8 + $0x1a8] sm:$0xff] }
 0xb0c   : > { %v6209_v45 = vpop.f32.mrf.mxu1 }
 0xb0f   : > { %v5987_v13 = vpop.f32.mrf.mxu3  ;;  %6760 = vmatmul.bf16.gmra.mxu1 %v10013_v20 }
 0xb10   : > { %v6085_v56 = vadd.f32 %v6084_v62, %v5987_v13  ;;  %v10000_v13 = vld [vmem:[%s14187_s8 + $0x128] sm:$0xff] }
 0xb11   : > { %v6087_v17 = vpop.f32.mrf.mxu0 }
 0xb12   : > { %v13422_v5 = vadd.f32 %v6206_v15, %v6085_v56  ;;  %v13424_v14 = vpop.f32.mrf.mxu2 }
 0xb13   : > { %v6965_v36 = vpack.c.bf16 %v13424_v14, %v13414_v0 }
 0xb14   : > { %v6211_v7 = vpop.f32.mrf.mxu1 }
 0xb15   : > { %6484 = vmatmul.bf16.gmra.mxu3 %v9997_v23 }
 0xb16   : > { %6622 = vmatmul.bf16.gmra.mxu0 %v10005_v8  ;;  %v10008_v8 = vld [vmem:[%s14187_s8 + $0x168] sm:$0xff] }
 0xb17   : > { %v5990_v39 = vpop.f32.mrf.mxu3  ;;  %6356 = vmatmul.bf16.gmra.mxu2 %v9991_v41  ;;  %v9994_v41 = vld [vmem:[%s14187_s8 + $0xf8] sm:$0xff] }
 0xb18   : > { %v6088_v61 = vadd.f32 %v6087_v17, %v5990_v39 }
 0xb19   : > { %v6089_v44 = vpop.f32.mrf.mxu0 }
 0xb1a   : > { %v13434_v32 = vadd.f32 %v6209_v45, %v6088_v61  ;;  %v13436_v34 = vpop.f32.mrf.mxu2 }
 0xb1c   : > { %v6214_v27 = vpop.f32.mrf.mxu1 }
 0xb1f   : > { %v5992_v12 = vpop.f32.mrf.mxu3  ;;  %6765 = vmatmul.bf16.gmra.mxu1 %v10014_v28 }
 0xb20   : > { %v6090_v40 = vadd.f32 %v6089_v44, %v5992_v12  ;;  %v10017_v12 = vld [vmem:[%s14187_s8 + $0x1b0] sm:$0xff] }
 0xb21   : > { %v6092_v51 = vpop.f32.mrf.mxu0 }
 0xb22   : > { %v13444_v2 = vadd.f32 %v6211_v7, %v6090_v40  ;;  %v13446_v16 = vpop.f32.mrf.mxu2 }
 0xb24   : > { %v6216_v42 = vpop.f32.mrf.mxu1 }
 0xb25   : > { %6489 = vmatmul.bf16.gmra.mxu3 %v9998_v58 }
 0xb26   : > { %6627 = vmatmul.bf16.gmra.mxu0 %v10006_v33  ;;  %v10001_v33 = vld [vmem:[%s14187_s8 + $0x130] sm:$0xff] }
 0xb27   : > { %v5995_v49 = vpop.f32.mrf.mxu3  ;;  %6361 = vmatmul.bf16.gmra.mxu2 %v9992_v59 }
 0xb28   : > { %v6093_v54 = vadd.f32 %v6092_v51, %v5995_v49  ;;  %v10009_v49 = vld [vmem:[%s14187_s8 + $0x170] sm:$0xff] }
 0xb29   : > { %v6094_v19 = vpop.f32.mrf.mxu0 }
 0xb2a   : > { %v13454_v52 = vadd.f32 %v6214_v27, %v6093_v54  ;;  %v13456_v55 = vpop.f32.mrf.mxu2 }
 0xb2c   : > { %v6219_v21 = vpop.f32.mrf.mxu1 }
 0xb2f   : > { %v5997_v22 = vpop.f32.mrf.mxu3  ;;  %6770 = vmatmul.bf16.gmra.mxu1 %v10015_v18  ;;  %v10019_v18 = vld [vmem:[%s14187_s8 + $0x1c0] sm:$0xff] }
 0xb30   : > { %v6095_v43 = vadd.f32 %v6094_v19, %v5997_v22 }
 0xb31   : > { %v6097_v37 = vpop.f32.mrf.mxu0 }
 0xb32   : > { %v13464_v3 = vadd.f32 %v6216_v42, %v6095_v43  ;;  %v5861_v48 = vpop.f32.mrf.mxu2 }
 0xb34   : > { %v6221_v38 = vpop.f32.mrf.mxu1 }
 0xb35   : > { %6494 = vmatmul.bf16.gmra.mxu3 %v9999_v50 }
 0xb36   : > { %6632 = vmatmul.bf16.gmra.mxu0 %v10007_v11 }
 0xb37   : > { %v6000_v4 = vpop.f32.mrf.mxu3  ;;  %6366 = vmatmul.bf16.gmra.mxu2 %v9993_v31 }
 0xb38   : > { %v6098_v53 = vadd.f32 %v6097_v37, %v6000_v4  ;;  %v10018_v4 = vld [vmem:[%s14187_s8 + $0x1b8] sm:$0xff] }
 0xb39   : > { %v6099_v29 = vpop.f32.mrf.mxu0 }
 0xb3a   : > { %v13472_v15 = vadd.f32 %v6219_v21, %v6098_v53  ;;  %v5864_v57 = vpop.f32.mrf.mxu2  ;;  %v6967_v53 = vpack.c.bf16 %v5861_v48, %v13456_v55 }
 0xb3c   : > { %v6224_v62 = vpop.f32.mrf.mxu1 }
 0xb3f   : > { %v6002_v20 = vpop.f32.mrf.mxu3  ;;  %6775 = vmatmul.bf16.gmra.mxu1 %v10016_v35 }
 0xb40   : > { %v6100_v45 = vadd.f32 %v6099_v29, %v6002_v20  ;;  %v10002_v20 = vld [vmem:[%s14187_s8 + $0x138] sm:$0xff] }
 0xb41   : > { %v6102_v56 = vpop.f32.mrf.mxu0 }
 0xb42   : > { %v13480_v23 = vadd.f32 %v6221_v38, %v6100_v45  ;;  %v5866_v17 = vpop.f32.mrf.mxu2  ;;  %v10010_v45 = vld [vmem:[%s14187_s8 + $0x178] sm:$0xff] }
 0xb43   : > { %v6968_v22 = vpack.c.bf16 %v5866_v17, %v5864_v57  ;;  %v6966_v57 = vpack.c.bf16 %v13446_v16, %v13436_v34  ;;  %v10020_v34 = vld [vmem:[%s14187_s8 + $0x1c8] sm:$0xff] }
 0xb44   : > { %v6226_v7 = vpop.f32.mrf.mxu1 }
 0xb45   : > { %6499 = vmatmul.bf16.gmra.mxu3 %v10000_v13 }
 0xb46   : > { %6637 = vmatmul.bf16.gmra.mxu0 %v10008_v8 }
 0xb47   : > { %v6005_v39 = vpop.f32.mrf.mxu3  ;;  %6371 = vmatmul.bf16.gmra.mxu2 %v9994_v41 }
 0xb48   : > { %v6103_v61 = vadd.f32 %v6102_v56, %v6005_v39  ;;  %v10027_v39 = vld [vmem:[%s14187_s8 + $0x200] sm:$0xff] }
 0xb49   : > { %v6104_v44 = vpop.f32.mrf.mxu0 }
 0xb4a   : > { %v13488_v28 = vadd.f32 %v6224_v62, %v6103_v61  ;;  %v5869_v27 = vpop.f32.mrf.mxu2 }
 0xb4c   : > { %v6229_v40 = vpop.f32.mrf.mxu1 }
 0xb4f   : > { %v6007_v58 = vpop.f32.mrf.mxu3  ;;  %6780 = vmatmul.bf16.gmra.mxu1 %v10017_v12 }
 0xb50   : > { %v6105_v51 = vadd.f32 %v6104_v44, %v6007_v58 }
 0xb52   : > { %v13496_v59 = vadd.f32 %v6226_v7, %v6105_v51  ;;  %v5871_v42 = vpop.f32.mrf.mxu2 }
 0xb53   : > { %v6969_v54 = vpack.c.bf16 %v5871_v42, %v5869_v27  ;;  %v6107_v19 = vpop.f32.mrf.mxu0 }
 0xb54   : > { %v6231_v21 = vpop.f32.mrf.mxu1 }
 0xb55   : > { %6504 = vmatmul.bf16.gmra.mxu3 %v10001_v33 }
 0xb56   : > { %7018 = vmatpush.bf16.msrb.mxu3 %v6969_v54  ;;  %6642 = vmatmul.bf16.gmra.mxu0 %v10009_v49  ;;  %v10022_v49 = vld [vmem:[%s14187_s8 + $0x1d8] sm:$0xff] }
 0xb57   : > { %6888 = vmatmul.bf16.vlgmr.msrb.gmra.mxu2 %v10019_v18 }
 0xb58   : > { %v6010_v43 = vpop.f32.mrf.mxu3 }
 0xb59   : > { %v6108_v50 = vadd.f32 %v6107_v19, %v6010_v43 }
 0xb5a   : > { %7019 = vmatpush.bf16.msrb.mxu3 %v6968_v22  ;;  %v6337_v37 = vpop.f32.mrf.mxu2 }
 0xb5b   : > { %v13504_v11 = vadd.f32 %v6229_v40, %v6108_v50  ;;  %v6377_v31 = vadd.f32 %v6337_v37, %v13390_v60  ;;  %v6109_v38 = vpop.f32.mrf.mxu0 }
 0xb5c   : > { %v6234_v29 = vpop.f32.mrf.mxu1 }
 0xb5e   : > { %7020 = vmatpush.bf16.msrb.mxu3 %v6967_v53 }
 0xb5f   : > { %6785 = vmatmul.bf16.gmra.mxu1 %v10018_v4  ;;  %v10029_v4 = vld [vmem:[%s14187_s8 + $0x210] sm:$0xff] }
 0xb60   : > { %v6012_v35 = vpop.f32.mrf.mxu3 }
 0xb61   : > { %v6110_v62 = vadd.f32 %v6109_v38, %v6012_v35  ;;  %v10023_v35 = vld [vmem:[%s14187_s8 + $0x1e0] sm:$0xff] }
 0xb62   : > { %7021 = vmatpush.bf16.msrb.mxu3 %v6966_v57  ;;  %v6339_v60 = vpop.f32.mrf.mxu2 }
 0xb63   : > { %v13519_v13 = vadd.f32 %v6231_v21, %v6110_v62  ;;  %v6378_v55 = vadd.f32 %v6339_v60, %v13400_v24  ;;  %v6112_v48 = vpop.f32.mrf.mxu0 }
 0xb64   : > { %v6236_v16 = vpop.f32.mrf.mxu1 }
 0xb65   : > { %6509 = vmatmul.bf16.gmra.mxu3 %v10002_v20 }
 0xb66   : > { %7022 = vmatpush.bf16.msrb.mxu3 %v6965_v36  ;;  %6647 = vmatmul.bf16.gmra.mxu0 %v10010_v45 }
 0xb67   : > { %6893 = vmatmul.bf16.gmra.mxu2 %v10020_v34 }
 0xb68   : > { %v6015_v56 = vpop.f32.mrf.mxu3 }
 0xb69   : > { %v6113_v17 = vadd.f32 %v6112_v48, %v6015_v56 }
 0xb6a   : > { %7023 = vmatpush.bf16.msrb.mxu3 %v6964_v6  ;;  %v6342_v24 = vpop.f32.mrf.mxu2 }
 0xb6b   : > { %v13531_v8 = vadd.f32 %v6234_v29, %v6113_v17  ;;  %v6379_v41 = vadd.f32 %v6342_v24, %v13412_v9  ;;  %v6114_v7 = vpop.f32.mrf.mxu0 }
 0xb6c   : > { %v6751_v0 = vpop.f32.mrf.mxu1 }
 0xb6e   : > { %7024 = vmatpush.bf16.msrb.mxu3 %v6963_v30 }
 0xb70   : > { %v6017_v14 = vpop.f32.mrf.mxu3 }
 0xb71   : > { %v6115_v36 = vadd.f32 %v6114_v7, %v6017_v14 }
 0xb72   : > { %7025 = vmatpush.bf16.msrb.mxu3 %v6962_v46  ;;  %v6344_v26 = vpop.f32.mrf.mxu2 }
 0xb73   : > { %v13543_v1 = vadd.f32 %v6236_v16, %v6115_v36  ;;  %v6380_v6 = vadd.f32 %v6344_v26, %v13422_v5  ;;  %v6613_v47 = vpop.f32.mrf.mxu0  ;;  %v10028_v5 = vld [vmem:[%s14187_s8 + $0x208] sm:$0xff] }
 0xb74   : > { %v6753_v9 = vpop.f32.mrf.mxu1  ;;  %v10024_v36 = vld [vmem:[%s14187_s8 + $0x1e8] sm:$0xff] }
 0xb75   : > { %7026 = vmatmul.bf16.vlgmr.msrb.gmra.mxu3 %v10027_v39 }
 0xb77   : > { %6898 = vmatmul.bf16.gmra.mxu2 %v10021_v25 }
 0xb78   : > { %v6475_v30 = vpop.f32.mrf.mxu3 }
 0xb79   : > { %v6515_v61 = vadd.f32 %v6475_v30, %v6377_v31 }
 0xb7a   : > { %v6347_v44 = vpop.f32.mrf.mxu2 }
 0xb7b   : > { %v6653_v27 = vadd.f32 %v6613_v47, %v6515_v61  ;;  %v6381_v10 = vadd.f32 %v6347_v44, %v13434_v32  ;;  %v6615_v63 = vpop.f32.mrf.mxu0 }
 0xb7c   : > { %v6756_v51 = vpop.f32.mrf.mxu1 }
 0xb7d   : > { %v13550_v46 = vadd.f32 %v6751_v0, %v6653_v27 }
 0xb80   : > { %v6477_v12 = vpop.f32.mrf.mxu3 }
 0xb81   : > { %v6516_v40 = vadd.f32 %v6477_v12, %v6378_v55  ;;  %v10025_v12 = vld [vmem:[%s14187_s8 + $0x1f0] sm:$0xff] }
 0xb82   : > { %v6349_v58 = vpop.f32.mrf.mxu2 }
 0xb83   : > { %v6654_v33 = vadd.f32 %v6615_v63, %v6516_v40  ;;  %v6382_v42 = vadd.f32 %v6349_v58, %v13444_v2  ;;  %v6618_v54 = vpop.f32.mrf.mxu0 }
 0xb84   : > { %v6758_v37 = vpop.f32.mrf.mxu1 }
 0xb85   : > { %v13559_v32 = vadd.f32 %v6753_v9, %v6654_v33  ;;  %7031 = vmatmul.bf16.gmra.mxu3 %v10028_v5 }
 0xb87   : > { %6903 = vmatmul.bf16.gmra.mxu2 %v10022_v49 }
 0xb88   : > { %v6480_v19 = vpop.f32.mrf.mxu3 }
 0xb89   : > { %v6517_v18 = vadd.f32 %v6480_v19, %v6379_v41  ;;  %v10030_v41 = vld [vmem:[%s14187_s8 + $0x218] sm:$0xff] }
 0xb8a   : > { %v6352_v21 = vpop.f32.mrf.mxu2 }
 0xb8b   : > { %v6655_v22 = vadd.f32 %v6618_v54, %v6517_v18  ;;  %v6383_v43 = vadd.f32 %v6352_v21, %v13454_v52  ;;  %v6620_v50 = vpop.f32.mrf.mxu0  ;;  %v10026_v54 = vld [vmem:[%s14187_s8 + $0x1f8] sm:$0xff] }
 0xb8c   : > { %v6761_v20 = vpop.f32.mrf.mxu1 }
 0xb8d   : > { %v13562_v31 = vadd.f32 %v6756_v51, %v6655_v22 }
 0xb90   : > { %v6482_v2 = vpop.f32.mrf.mxu3 }
 0xb91   : > { %v6518_v38 = vadd.f32 %v6482_v2, %v6380_v6 }
 0xb92   : > { %v6354_v53 = vpop.f32.mrf.mxu2 }
 0xb93   : > { %v6656_v29 = vadd.f32 %v6620_v50, %v6518_v38  ;;  %v6384_v57 = vadd.f32 %v6354_v53, %v13464_v3  ;;  %v6623_v62 = vpop.f32.mrf.mxu0  ;;  %v10033_v50 = vld [vmem:[%s14187_s8 + $0x230] sm:$0xff] }
 0xb94   : > { %v6763_v17 = vpop.f32.mrf.mxu1 }
 0xb95   : > { %v13571_v52 = vadd.f32 %v6758_v37, %v6656_v29  ;;  %7036 = vmatmul.bf16.gmra.mxu3 %v10029_v4 }
 0xb97   : > { %6908 = vmatmul.bf16.gmra.mxu2 %v10023_v35 }
 0xb98   : > { %v6485_v60 = vpop.f32.mrf.mxu3 }
 0xb99   : > { %v6519_v45 = vadd.f32 %v6485_v60, %v6381_v10 }
 0xb9a   : > { %v6357_v55 = vpop.f32.mrf.mxu2 }
 0xb9b   : > { %v6657_v48 = vadd.f32 %v6623_v62, %v6519_v45  ;;  %v6385_v34 = vadd.f32 %v6357_v55, %v13472_v15  ;;  %v6625_v56 = vpop.f32.mrf.mxu0 }
 0xb9c   : > { %v6766_v47 = vpop.f32.mrf.mxu1 }
 0xb9d   : > { %v13574_v16 = vadd.f32 %v6761_v20, %v6657_v48 }
 0xba0   : > { %v6487_v3 = vpop.f32.mrf.mxu3 }
 0xba1   : > { %v6520_v24 = vadd.f32 %v6487_v3, %v6382_v42  ;;  %v10032_v42 = vld [vmem:[%s14187_s8 + $0x228] sm:$0xff] }
 0xba2   : > { %v6359_v7 = vpop.f32.mrf.mxu2 }
 0xba3   : > { %v6658_v0 = vadd.f32 %v6625_v56, %v6520_v24  ;;  %v6386_v14 = vadd.f32 %v6359_v7, %v13480_v23  ;;  %v6628_v26 = vpop.f32.mrf.mxu0  ;;  %v10031_v23 = vld [vmem:[%s14187_s8 + $0x220] sm:$0xff] }
 0xba5   : > { %v13583_v39 = vadd.f32 %v6763_v17, %v6658_v0  ;;  %7041 = vmatmul.bf16.gmra.mxu3 %v10030_v41 }
 0xba7   : > { %6913 = vmatmul.bf16.gmra.mxu2 %v10024_v36 }
 0xba8   : > { %v6490_v15 = vpop.f32.mrf.mxu3 }
 0xba9   : > { %v6521_v6 = vadd.f32 %v6490_v15, %v6383_v43 }
 0xbaa   : > { %v6362_v25 = vpop.f32.mrf.mxu2 }
 0xbab   : > { %v6659_v30 = vadd.f32 %v6628_v26, %v6521_v6  ;;  %v6387_v9 = vadd.f32 %v6362_v25, %v13488_v28 }
 0xbad   : > { %v6797_v61 = vadd.f32 %v6766_v47, %v6659_v30  ;;  %v6768_v30 = vpop.f32.mrf.mxu1 }
 0xbb0   : > { %v6492_v44 = vpop.f32.mrf.mxu3 }
 0xbb1   : > { %v13586_v27 = vadd.f32 %v6492_v44, %v6384_v57 }
 0xbb2   : > { %v6364_v10 = vpop.f32.mrf.mxu2 }
 0xbb3   : > { %v6388_v63 = vadd.f32 %v6364_v10, %v13496_v59 }
 0xbb5   : > { %7046 = vmatmul.bf16.gmra.mxu3 %v10031_v23  ;;  %v13645_v10 = vpop.f32.mrf.mxu1 }
 0xbb7   : > { %6918 = vmatmul.bf16.gmra.mxu2 %v10025_v12 }
 0xbb8   : > { %v6495_v40 = vpop.f32.mrf.mxu3 }
 0xbb9   : > { %v13595_v5 = vadd.f32 %v6495_v40, %v6385_v34 }
 0xbba   : > { %v6367_v28 = vpop.f32.mrf.mxu2 }
 0xbbb   : > { %v6389_v58 = vadd.f32 %v6367_v28, %v13504_v11 }
 0xbbd   : > { %v13653_v40 = vpop.f32.mrf.mxu1 }
 0xbc0   : > { %v6497_v51 = vpop.f32.mrf.mxu3 }
 0xbc1   : > { %v13598_v33 = vadd.f32 %v6497_v51, %v6386_v14 }
 0xbc2   : > { %v6369_v59 = vpop.f32.mrf.mxu2 }
 0xbc3   : > { %v6390_v49 = vadd.f32 %v6369_v59, %v13519_v13 }
 0xbc5   : > { %7051 = vmatmul.bf16.gmra.mxu3 %v10032_v42  ;;  %v6776_v42 = vpop.f32.mrf.mxu1 }
 0xbc7   : > { %6923 = vmatmul.bf16.gmra.mxu2 %v10026_v54 }
 0xbc8   : > { %v6500_v19 = vpop.f32.mrf.mxu3 }
 0xbc9   : > { %v13607_v18 = vadd.f32 %v6500_v19, %v6387_v9 }
 0xbca   : > { %v6372_v11 = vpop.f32.mrf.mxu2 }
 0xbcb   : > { %v6391_v21 = vadd.f32 %v6372_v11, %v13531_v8  ;;  %v10034_v8 = vld [vmem:[%s14187_s8 + $0x238] sm:$0xff] }
 0xbd0   : > { %v6502_v22 = vpop.f32.mrf.mxu3 }
 0xbd1   : > { %v13610_v43 = vadd.f32 %v6502_v22, %v6388_v63 }
 0xbd2   : > { %v6374_v13 = vpop.f32.mrf.mxu2 }
 0xbd3   : > { %v6392_v37 = vadd.f32 %v6374_v13, %v13543_v1 }
 0xbd5   : > { %7056 = vmatmul.bf16.gmra.mxu3 %v10033_v50 }
 0xbd8   : > { %v6505_v2 = vpop.f32.mrf.mxu3 }
 0xbd9   : > { %v13616_v38 = vadd.f32 %v6505_v2, %v6389_v58 }
 0xbda   : > { %v6889_v4 = vpop.f32.mrf.mxu2 }
 0xbdb   : > { %v6929_v53 = vadd.f32 %v6889_v4, %v13550_v46 }
 0xbe0   : > { %v6507_v29 = vpop.f32.mrf.mxu3 }
 0xbe1   : > { %v13619_v57 = vadd.f32 %v6507_v29, %v6390_v49 }
 0xbe2   : > { %v6891_v35 = vpop.f32.mrf.mxu2 }
 0xbe3   : > { %v6930_v62 = vadd.f32 %v6891_v35, %v13559_v32 }
 0xbe5   : > { %7061 = vmatmul.bf16.gmra.mxu3 %v10034_v8 }
 0xbe8   : > { %v6510_v20 = vpop.f32.mrf.mxu3 }
 0xbe9   : > { %v13625_v1 = vadd.f32 %v6510_v20, %v6391_v21  ;;  %v6778_v21 = vpop.f32.mrf.mxu1 }
 0xbea   : > { %v6894_v60 = vpop.f32.mrf.mxu2 }
 0xbeb   : > { %v6931_v45 = vadd.f32 %v6894_v60, %v13562_v31 }
 0xbf0   : > { %v6512_v55 = vpop.f32.mrf.mxu3 }
 0xbf1   : > { %v13628_v48 = vadd.f32 %v6512_v55, %v6392_v37  ;;  %v6781_v8 = vpop.f32.mrf.mxu1 }
 0xbf2   : > { %v6896_v46 = vpop.f32.mrf.mxu2 }
 0xbf3   : > { %v6932_v34 = vadd.f32 %v6896_v46, %v13571_v52  ;;  %v6630_v52 = vpop.f32.mrf.mxu0 }
 0xbf8   : > { %v7027_v56 = vpop.f32.mrf.mxu3 }
 0xbf9   : > { %v13631_v3 = vadd.f32 %v7027_v56, %v6929_v53 }
 0xbfa   : > { %v6899_v17 = vpop.f32.mrf.mxu2 }
 0xbfb   : > { %v6933_v24 = vadd.f32 %v6899_v17, %v13574_v16  ;;  %v6633_v9 = vpop.f32.mrf.mxu0 }
 0xc00   : > { %v7029_v32 = vpop.f32.mrf.mxu3 }
 0xc01   : > { %v13634_v41 = vadd.f32 %v7029_v32, %v6930_v62 }
 0xc02   : > { %v6901_v7 = vpop.f32.mrf.mxu2 }
 0xc03   : > { %v6934_v0 = vadd.f32 %v6901_v7, %v13583_v39 }
 0xc08   : > { %v7032_v14 = vpop.f32.mrf.mxu3 }
 0xc09   : > { %v13637_v31 = vadd.f32 %v7032_v14, %v6931_v45 }
 0xc0a   : > { %v6904_v36 = vpop.f32.mrf.mxu2 }
 0xc0b   : > { %v6935_v15 = vadd.f32 %v6904_v36, %v6797_v61  ;;  %v13651_v61 = vpop.f32.mrf.mxu0  ;;  %v6660_v36 = vadd.f32 %v6630_v52, %v13586_v27 }
 0xc10   : > { %v7034_v26 = vpop.f32.mrf.mxu3 }
 0xc11   : > { %v13639_v6 = vadd.f32 %v7034_v26, %v6932_v34  ;;  %v6783_v34 = vpop.f32.mrf.mxu1 }
 0xc12   : > { %v6906_v16 = vpop.f32.mrf.mxu2 }
 0xc13   : > { %v6638_v51 = vpop.f32.mrf.mxu0 }
 0xc14   : > { %v6663_v11 = vadd.f32 %v6638_v51, %v13607_v18 }
 0xc16   : > { %v6801_v50 = vadd.f32 %v6776_v42, %v6663_v11  ;;  %v6798_v42 = vadd.f32 %v6768_v30, %v6660_v36 }
 0xc18   : > { %v7037_v25 = vpop.f32.mrf.mxu3 }
 0xc19   : > { %v13641_v47 = vadd.f32 %v7037_v25, %v6933_v24  ;;  %v6786_v26 = vpop.f32.mrf.mxu1 }
 0xc1a   : > { %v13647_v39 = vpop.f32.mrf.mxu2 }
 0xc1b   : > { %v6640_v54 = vpop.f32.mrf.mxu0 }
 0xc1c   : > { %v6664_v4 = vadd.f32 %v6640_v54, %v13610_v43  ;;  %v6936_v54 = vadd.f32 %v6906_v16, %v6798_v42 }
 0xc1e   : > { %v6802_v35 = vadd.f32 %v6778_v21, %v6664_v4  ;;  %v6661_v21 = vadd.f32 %v6633_v9, %v13595_v5  ;;  %v6662_v4 = vadd.f32 %v13651_v61, %v13598_v33  ;;  %v7086_v61 = vsel %vm4923_vm15, %v13634_v41, 0.0 }
 0xc20   : > { %v7039_v44 = vpop.f32.mrf.mxu3  ;;  %v6799_v30 = vadd.f32 %v13645_v10, %v6661_v21 }
 0xc21   : > { %v13643_v23 = vadd.f32 %v7039_v44, %v6934_v0 }
 0xc22   : > { %v13655_v28 = vpop.f32.mrf.mxu2  ;;  %v6937_v9 = vadd.f32 %v13647_v39, %v6799_v30  ;;  %v6800_v39 = vadd.f32 %v13653_v40, %v6662_v4  ;;  %v7089_v40 = vsel %vm4923_vm15, %v13637_v31, 0.0 }
 0xc23   : > { %v6643_v37 = vpop.f32.mrf.mxu0 }
 0xc24   : > { %v6665_v18 = vadd.f32 %v6643_v37, %v13616_v38 }
 0xc26   : > { %v6803_v43 = vadd.f32 %v6781_v8, %v6665_v18  ;;  %v7095_v8 = vsel %vm4923_vm15, %v13641_v47, 0.0  ;;  %v7083_v18 = vsel %vm4923_vm15, %v13631_v3, 0.0 }
 0xc28   : > { %v7042_v63 = vpop.f32.mrf.mxu3 }
 0xc29   : > { %v13649_v12 = vadd.f32 %v7042_v63, %v6935_v15 }
 0xc2a   : > { %v6914_v49 = vpop.f32.mrf.mxu2 }
 0xc2b   : > { %v6939_v13 = vadd.f32 %v6914_v49, %v6801_v50  ;;  %v6645_v55 = vpop.f32.mrf.mxu0 }
 0xc2c   : > { %v6666_v32 = vadd.f32 %v6645_v55, %v13619_v57 }
 0xc2e   : > { %v6804_v14 = vadd.f32 %v6783_v34, %v6666_v32 }
 0xc30   : > { %v7044_v58 = vpop.f32.mrf.mxu3 }
 0xc32   : > { %v6916_v22 = vpop.f32.mrf.mxu2 }
 0xc33   : > { %v6940_v20 = vadd.f32 %v6916_v22, %v6802_v35  ;;  %v6648_v38 = vpop.f32.mrf.mxu0  ;;  %v13684_v22 = vadd.f32 %v7044_v58, %v6936_v54 }
 0xc34   : > { %v6667_v44 = vadd.f32 %v6648_v38, %v13625_v1 }
 0xc35   : > { %v7104_v37 = vsel %vm4923_vm15, %v13684_v22, 0.0 }
 0xc36   : > { %v6805_v49 = vadd.f32 %v6786_v26, %v6667_v44 }
 0xc38   : > { %v13657_v59 = vpop.f32.mrf.mxu3 }
 0xc39   : > { %v13696_v58 = vadd.f32 %v13657_v59, %v6937_v9  ;;  %v6938_v59 = vadd.f32 %v13655_v28, %v6800_v39  ;;  %v7101_v28 = vsel %vm4923_vm15, %v13649_v12, 0.0 }
 0xc3a   : > { %v6919_v62 = vpop.f32.mrf.mxu2 }
 0xc3b   : > { %v6941_v56 = vadd.f32 %v6919_v62, %v6803_v43  ;;  %v6650_v11 = vpop.f32.mrf.mxu0  ;;  %v7107_v35 = vsel %vm4923_vm15, %v13696_v58, 0.0 }
 0xc3c   : > { %v6668_v50 = vadd.f32 %v6650_v11, %v13628_v48 }
 0xc40   : > { %v13659_v19 = vpop.f32.mrf.mxu3 }
 0xc41   : > { %v13711_v33 = vadd.f32 %v13659_v19, %v6938_v59  ;;  %v7092_v19 = vsel %vm4923_vm15, %v13639_v6, 0.0 }
 0xc42   : > { %v6921_v17 = vpop.f32.mrf.mxu2 }
 0xc43   : > { %v6942_v15 = vadd.f32 %v6921_v17, %v6804_v14 }
 0xc48   : > { %v7052_v2 = vpop.f32.mrf.mxu3 }
 0xc49   : > { %v13663_v53 = vadd.f32 %v7052_v2, %v6939_v13  ;;  %v6788_v13 = vpop.f32.mrf.mxu1 }
 0xc4a   : > { %v6924_v51 = vpop.f32.mrf.mxu2  ;;  %v6806_v5 = vadd.f32 %v6788_v13, %v6668_v50 }
 0xc4b   : > { %v7113_v29 = vsel %vm4923_vm15, %v13663_v53, 0.0  ;;  %v6943_v27 = vadd.f32 %v6924_v51, %v6805_v49 }
 0xc4c   : > { %7114 = vadd.xlane.f32.xlu0 %v7113_v29 }
 0xc50   : > { %v7054_v60 = vpop.f32.mrf.mxu3 }
 0xc51   : > { %v13668_v45 = vadd.f32 %v7054_v60, %v6940_v20  ;;  %v7098_v20 = vsel %vm4923_vm15, %v13643_v23, 0.0  ;;  %v7110_v60 = vsel %vm4923_vm15, %v13711_v33, 0.0 }
 0xc52   : > { %v6926_v2 = vpop.f32.mrf.mxu2 }
 0xc53   : > { %v7116_v46 = vsel %vm4923_vm15, %v13668_v45, 0.0  ;;  %v6944_v48 = vadd.f32 %v6926_v2, %v6806_v5 }
 0xc54   : > { %7117 = vadd.xlane.f32.xlu2 %v7116_v46  ;;  %v14268_v46 = vld [vmem:[#allocation3_spill] sm:$0xff] }
 0xc58   : > { %v7057_v24 = vpop.f32.mrf.mxu3 }
 0xc59   : > { %v13673_v7 = vadd.f32 %v7057_v24, %v6941_v56 }
 0xc5b   : > { %v7119_v0 = vsel %vm4923_vm15, %v13673_v7, 0.0 }
 0xc5c   : > { %7120 = vadd.xlane.f32.xlu1 %v7119_v0 }
 0xc60   : > { %v7059_v25 = vpop.f32.mrf.mxu3 }
 0xc61   : > { %v13679_v63 = vadd.f32 %v7059_v25, %v6942_v15 }
 0xc63   : > { %v7122_v57 = vsel %vm4923_vm15, %v13679_v63, 0.0 }
 0xc64   : > { %7123 = vadd.xlane.f32.xlu0 %v7122_v57 }
 0xc68   : > { %v7062_v52 = vpop.f32.mrf.mxu3 }
 0xc69   : > { %v13687_v1 = vadd.f32 %v7062_v52, %v6943_v27 }
 0xc6b   : > { %v7125_v16 = vsel %vm4923_vm15, %v13687_v1, 0.0 }
 0xc6c   : > { %7105 = vadd.xlane.f32.xlu0 %v7104_v37  ;;  %7126 = vadd.xlane.f32.xlu2 %v7125_v16 }
 0xc70   : > { %v7064_v10 = vpop.f32.mrf.mxu3 }
 0xc71   : > { %v13700_v29 = vadd.f32 %v7064_v10, %v6944_v48 }
 0xc73   : > { %v7128_v62 = vsel %vm4923_vm15, %v13700_v29, 0.0 }
 0xc74   : > { %7096 = vadd.xlane.f32.xlu0 %v7095_v8  ;;  %7108 = vadd.xlane.f32.xlu2 %v7107_v35 }
 0xc75   : > { %7129 = vadd.xlane.f32.xlu1 %v7128_v62 }
 0xc7c   : > { %7087 = vadd.xlane.f32.xlu0 %v7086_v61  ;;  %7099 = vadd.xlane.f32.xlu2 %v7098_v20 }
 0xc7d   : > { %7111 = vadd.xlane.f32.xlu1 %v7110_v60 }
 0xc84   : > { %7090 = vadd.xlane.f32.xlu2 %v7089_v40 }
 0xc85   : > { %7102 = vadd.xlane.f32.xlu1 %v7101_v28 }
 0xc8d   : > { %7093 = vadd.xlane.f32.xlu1 %v7092_v19 }
 0xc95   : > { %7084 = vadd.xlane.f32.xlu1 %v7083_v18 }
 0xcbf   : > { %v7115_v55 = vpop.xlane.xlu0 %7114 }
 0xcc0   : > { %v7141_v43 = vmul.f32 %v7115_v55, %v14268_v46 }
 0xcc2   : > { %v13729_v34 = vsub.f32 %v13663_v53, %v7141_v43 }
 0xcc4   : > { %v7173_v56 = vmul.f32 %v13729_v34, %v13729_v34 }
 0xcc6   : > { %v7209_v17 = vsel %vm4923_vm15, %v7173_v56, 0.0 }
 0xcc7   : > { %v7118_v24 = vpop.xlane.xlu2 %7117  ;;  %7210 = vadd.xlane.f32.xlu1 %v7209_v17 }
 0xcc8   : > { %v7142_v32 = vmul.f32 %v7118_v24, %v14268_v46 }
 0xcca   : > { %v13736_v0 = vsub.f32 %v13668_v45, %v7142_v32 }
 0xccc   : > { %v7174_v38 = vmul.f32 %v13736_v0, %v13736_v0 }
 0xcce   : > { %v7212_v14 = vsel %vm4923_vm15, %v7174_v38, 0.0 }
 0xccf   : > { %v7121_v36 = vpop.xlane.xlu1 %7120  ;;  %7213 = vadd.xlane.f32.xlu0 %v7212_v14 }
 0xcd0   : > { %v7143_v53 = vmul.f32 %v7121_v36, %v14268_v46 }
 0xcd2   : > { %v13743_v15 = vsub.f32 %v13673_v7, %v7143_v53 }
 0xcd4   : > { %v7175_v26 = vmul.f32 %v13743_v15, %v13743_v15 }
 0xcd6   : > { %v7215_v25 = vsel %vm4923_vm15, %v7175_v26, 0.0 }
 0xcd7   : > { %v7124_v44 = vpop.xlane.xlu0 %7123  ;;  %7216 = vadd.xlane.f32.xlu2 %v7215_v25 }
 0xcd8   : > { %v7144_v45 = vmul.f32 %v7124_v44, %v14268_v46 }
 0xcda   : > { %v13750_v51 = vsub.f32 %v13679_v63, %v7144_v45 }
 0xcdc   : > { %v7176_v42 = vmul.f32 %v13750_v51, %v13750_v51 }
 0xcde   : > { %v7218_v57 = vsel %vm4923_vm15, %v7176_v42, 0.0 }
 0xcdf   : > { %v7106_v49 = vpop.xlane.xlu0 %7105  ;;  %v7127_v7 = vpop.xlane.xlu2 %7126  ;;  %7219 = vadd.xlane.f32.xlu1 %v7218_v57 }
 0xce0   : > { %v7138_v54 = vmul.f32 %v7106_v49, %v14268_v46  ;;  %v7145_v11 = vmul.f32 %v7127_v7, %v14268_v46 }
 0xce2   : > { %v13758_v21 = vsub.f32 %v13684_v22, %v7138_v54  ;;  %v13761_v27 = vsub.f32 %v13687_v1, %v7145_v11 }
 0xce4   : > { %v7177_v63 = vmul.f32 %v13761_v27, %v13761_v27  ;;  %v7170_v52 = vmul.f32 %v13758_v21, %v13758_v21 }
 0xce6   : > { %v7221_v50 = vsel %vm4923_vm15, %v7177_v63, 0.0  ;;  %v7200_v13 = vsel %vm4923_vm15, %v7170_v52, 0.0 }
 0xce7   : > { %v7097_v30 = vpop.xlane.xlu0 %7096  ;;  %7222 = vadd.xlane.f32.xlu0 %v7221_v50  ;;  %v7109_v37 = vpop.xlane.xlu2 %7108  ;;  %7201 = vadd.xlane.f32.xlu1 %v7200_v13 }
 0xce8   : > { %v7135_v22 = vmul.f32 %v7097_v30, %v14268_v46  ;;  %v7139_v16 = vmul.f32 %v7109_v37, %v14268_v46  ;;  %v7130_v1 = vpop.xlane.xlu1 %7129 }
 0xce9   : > { %v7146_v2 = vmul.f32 %v7130_v1, %v14268_v46 }
 0xcea   : > { %v13773_v5 = vsub.f32 %v13641_v47, %v7135_v22  ;;  %v13776_v9 = vsub.f32 %v13696_v58, %v7139_v16 }
 0xceb   : > { %v13779_v48 = vsub.f32 %v13700_v29, %v7146_v2 }
 0xcec   : > { %v7171_v4 = vmul.f32 %v13776_v9, %v13776_v9  ;;  %v7167_v10 = vmul.f32 %v13773_v5, %v13773_v5 }
 0xced   : > { %v7178_v8 = vmul.f32 %v13779_v48, %v13779_v48 }
 0xcee   : > { %v7203_v35 = vsel %vm4923_vm15, %v7171_v4, 0.0  ;;  %v7191_v47 = vsel %vm4923_vm15, %v7167_v10, 0.0 }
 0xcef   : > { %v7088_v62 = vpop.xlane.xlu0 %7087  ;;  %7204 = vadd.xlane.f32.xlu0 %v7203_v35  ;;  %v7100_v58 = vpop.xlane.xlu2 %7099  ;;  %7192 = vadd.xlane.f32.xlu1 %v7191_v47  ;;  %v7224_v29 = vsel %vm4923_vm15, %v7178_v8, 0.0 }
 0xcf0   : > { %v7132_v39 = vmul.f32 %v7088_v62, %v14268_v46  ;;  %v7136_v59 = vmul.f32 %v7100_v58, %v14268_v46  ;;  %7225 = vadd.xlane.f32.xlu2 %v7224_v29  ;;  %v7112_v61 = vpop.xlane.xlu1 %7111 }
 0xcf1   : > { %v7140_v20 = vmul.f32 %v7112_v61, %v14268_v46 }
 0xcf2   : > { %v13794_v60 = vsub.f32 %v13634_v41, %v7132_v39  ;;  %v13797_v40 = vsub.f32 %v13643_v23, %v7136_v59 }
 0xcf3   : > { %v13800_v28 = vsub.f32 %v13711_v33, %v7140_v20 }
 0xcf4   : > { %v7168_v19 = vmul.f32 %v13797_v40, %v13797_v40  ;;  %v7164_v18 = vmul.f32 %v13794_v60, %v13794_v60 }
 0xcf5   : > { %v7172_v55 = vmul.f32 %v13800_v28, %v13800_v28 }
 0xcf6   : > { %v7194_v43 = vsel %vm4923_vm15, %v7168_v19, 0.0  ;;  %v7182_v41 = vsel %vm4923_vm15, %v7164_v18, 0.0 }
 0xcf7   : > { %7195 = vadd.xlane.f32.xlu0 %v7194_v43  ;;  %v7091_v56 = vpop.xlane.xlu2 %7090  ;;  %7183 = vadd.xlane.f32.xlu1 %v7182_v41  ;;  %v7206_v23 = vsel %vm4923_vm15, %v7172_v55, 0.0 }
 0xcf8   : > { %v7133_v33 = vmul.f32 %v7091_v56, %v14268_v46  ;;  %7207 = vadd.xlane.f32.xlu2 %v7206_v23  ;;  %v7103_v17 = vpop.xlane.xlu1 %7102 }
 0xcf9   : > { %v7137_v24 = vmul.f32 %v7103_v17, %v14268_v46 }
 0xcfa   : > { %v13814_v32 = vsub.f32 %v13637_v31, %v7133_v33 }
 0xcfb   : > { %v13817_v38 = vsub.f32 %v13649_v12, %v7137_v24 }
 0xcfc   : > { %v7165_v14 = vmul.f32 %v13814_v32, %v13814_v32 }
 0xcfd   : > { %v7169_v36 = vmul.f32 %v13817_v38, %v13817_v38 }
 0xcfe   : > { %v7185_v53 = vsel %vm4923_vm15, %v7165_v14, 0.0 }
 0xcff   : > { %7186 = vadd.xlane.f32.xlu0 %v7185_v53  ;;  %v7197_v26 = vsel %vm4923_vm15, %v7169_v36, 0.0 }
 0xd00   : > { %7198 = vadd.xlane.f32.xlu2 %v7197_v26  ;;  %v7094_v25 = vpop.xlane.xlu1 %7093 }
 0xd01   : > { %v7134_v44 = vmul.f32 %v7094_v25, %v14268_v46 }
 0xd03   : > { %v13827_v31 = vsub.f32 %v13639_v6, %v7134_v44  ;;  %v7516_v6 = vld [vmem:[#allocation2] sm:$0x1] }
 0xd05   : > { %v7166_v12 = vmul.f32 %v13827_v31, %v13827_v31 }
 0xd07   : > { %v7188_v45 = vsel %vm4923_vm15, %v7166_v12, 0.0 }
 0xd08   : > { %7189 = vadd.xlane.f32.xlu2 %v7188_v45  ;;  %v7085_v42 = vpop.xlane.xlu1 %7084 }
 0xd09   : > { %v7131_v57 = vmul.f32 %v7085_v42, %v14268_v46 }
 0xd0b   : > { %v13834_v49 = vsub.f32 %v13631_v3, %v7131_v57 }
 0xd0d   : > { %v7163_v7 = vmul.f32 %v13834_v49, %v13834_v49 }
 0xd0f   : > { %v7179_v54 = vsel %vm4923_vm15, %v7163_v7, 0.0 }
 0xd10   : > { %7180 = vadd.xlane.f32.xlu2 %v7179_v54 }
 0xd13   : > { %7519 = vperm.xlu0 %10049, %v7516_v6  }
 0xd3a   : > { %v7211_v11 = vpop.xlane.xlu1 %7210 }
 0xd3b   : > { %v7237_v63 = vmul.f32 %v7211_v11, %v14268_v46 }
 0xd3d   : > { %v7253_v52 = vadd.f32 1e-05, %v7237_v63 }
 0xd3f   : > { %10170 = vrsqrt.f32 %v7253_v52  ;;  %vm7365_vm12 = vweird.f32 %v7253_v52 }
 0xd42   : > { %v7214_v50 = vpop.xlane.xlu0 %7213 }
 0xd43   : > { %v7238_v13 = vmul.f32 %v7214_v50, %v14268_v46 }
 0xd45   : > { %v10171_v30 = vpop.eup %10170  ;;  %v7254_v37 = vadd.f32 1e-05, %v7238_v13 }
 0xd46   : > { %v7360_v3 = vmul.f32 %v10171_v30, %v7253_v52  ;;  %vm7366_vm15 = vweird.f32 %v10171_v30 }
 0xd47   : > { %10172 = vrsqrt.f32 %v7254_v37  ;;  %vm7367_vm6 = vmor %vm7365_vm12, %vm7366_vm15  ;;  %vm7375_vm7 = vweird.f32 %v7254_v37 }
 0xd48   : > { %v7361_v22 = vmul.f32 %v10171_v30, %v7360_v3 }
 0xd4a   : > { %v7217_v16 = vpop.xlane.xlu2 %7216  ;;  %v7362_v4 = vmul.f32 0.5, %v7361_v22 }
 0xd4b   : > { %v7239_v1 = vmul.f32 %v7217_v16, %v14268_v46 }
 0xd4c   : > { %v7363_v47 = vsub.f32 1.5, %v7362_v4 }
 0xd4d   : > { %v10173_v2 = vpop.eup %10172  ;;  %v7255_v10 = vadd.f32 1e-05, %v7239_v1 }
 0xd4e   : > { %v7370_v8 = vmul.f32 %v10173_v2, %v7254_v37  ;;  %v7364_v61 = vmul.f32 %v10171_v30, %v7363_v47  ;;  %vm7376_vm5 = vweird.f32 %v10173_v2 }
 0xd4f   : > { %10174 = vrsqrt.f32 %v7255_v10  ;;  %vm7377_vm8 = vmor %vm7375_vm7, %vm7376_vm5  ;;  %vm7385_vm10 = vweird.f32 %v7255_v10 }
 0xd50   : > { %v7371_v35 = vmul.f32 %v10173_v2, %v7370_v8  ;;  %v7368_v43 = vsel %vm7367_vm6, %v10171_v30, %v7364_v61 }
 0xd51   : > { %v13849_v36 = vmul.f32 %v7368_v43, %v13729_v34 }
 0xd52   : > { %v7372_v62 = vmul.f32 0.5, %v7371_v35  ;;  %v7220_v58 = vpop.xlane.xlu1 %7219 }
 0xd53   : > { %v7240_v29 = vmul.f32 %v7220_v58, %v14268_v46  ;;  %v7445_v42 = vmul.f32 0.5, %v13849_v36 }
 0xd54   : > { %v7373_v39 = vsub.f32 1.5, %v7372_v62 }
 0xd55   : > { %v10175_v59 = vpop.eup %10174  ;;  %v13843_v20 = vadd.f32 1e-05, %v7240_v29 }
 0xd56   : > { %v7380_v19 = vmul.f32 %v10175_v59, %v7255_v10  ;;  %v7374_v18 = vmul.f32 %v10173_v2, %v7373_v39  ;;  %vm7386_vm9 = vweird.f32 %v10175_v59 }
 0xd57   : > { %10176 = vrsqrt.f32 %v13843_v20  ;;  %vm7387_vm11 = vmor %vm7385_vm10, %vm7386_vm9  ;;  %vm7395_vm13 = vweird.f32 %v13843_v20 }
 0xd58   : > { %v7381_v55 = vmul.f32 %v10175_v59, %v7380_v19  ;;  %v7378_v24 = vsel %vm7377_vm8, %v10173_v2, %v7374_v18 }
 0xd59   : > { %v13860_v45 = vmul.f32 %v7378_v24, %v13736_v0 }
 0xd5a   : > { %v7382_v41 = vmul.f32 0.5, %v7381_v55  ;;  %v7223_v56 = vpop.xlane.xlu0 %7222  ;;  %v7202_v23 = vpop.xlane.xlu1 %7201 }
 0xd5b   : > { %v7241_v33 = vmul.f32 %v7223_v56, %v14268_v46  ;;  %v7234_v17 = vmul.f32 %v7202_v23, %v14268_v46  ;;  %v7446_v11 = vmul.f32 0.5, %v13860_v45 }
 0xd5c   : > { %v7383_v14 = vsub.f32 1.5, %v7382_v41 }
 0xd5d   : > { %v13851_v53 = vpop.eup %10176  ;;  %v13853_v26 = vadd.f32 1e-05, %v7241_v33  ;;  %v13855_v25 = vadd.f32 1e-05, %v7234_v17 }
 0xd5e   : > { %v7384_v44 = vmul.f32 %v10175_v59, %v7383_v14  ;;  %v7390_v12 = vmul.f32 %v13851_v53, %v13843_v20  ;;  %vm7396_vm0 = vweird.f32 %v13851_v53 }
 0xd5f   : > { %10178 = vrsqrt.f32 %v13853_v26  ;;  %vm13897_vm14 = vmor %vm7395_vm13, %vm7396_vm0  ;;  %vm7405_vm2 = vweird.f32 %v13853_v26  ;;  %vm7335_vm4 = vweird.f32 %v13855_v25 }
 0xd60   : > { %v7391_v34 = vmul.f32 %v13851_v53, %v7390_v12  ;;  %10180 = vrsqrt.f32 %v13855_v25  ;;  %v7388_v6 = vsel %vm7387_vm11, %v10175_v59, %v7384_v44 }
 0xd61   : > { %10182 = vtanh.f32 %v7445_v42  ;;  %v13877_v22 = vmul.f32 %v7388_v6, %v13743_v15 }
 0xd62   : > { %v7392_v57 = vmul.f32 0.5, %v7391_v34  ;;  %v7205_v7 = vpop.xlane.xlu0 %7204  ;;  %v7193_v54 = vpop.xlane.xlu1 %7192  ;;  %10184 = vtanh.f32 %v7446_v11 }
 0xd63   : > { %v7235_v63 = vmul.f32 %v7205_v7, %v14268_v46  ;;  %v7226_v0 = vpop.xlane.xlu2 %7225  ;;  %v7231_v52 = vmul.f32 %v7193_v54, %v14268_v46  ;;  %v7447_v8 = vmul.f32 0.5, %v13877_v22 }
 0xd64   : > { %v7242_v50 = vmul.f32 %v7226_v0, %v14268_v46  ;;  %v7393_v30 = vsub.f32 1.5, %v7392_v57 }
 0xd65   : > { %v13870_v13 = vpop.eup %10178  ;;  %v13872_v37 = vadd.f32 1e-05, %v7235_v63  ;;  %v13874_v3 = vadd.f32 1e-05, %v7231_v52 }
 0xd66   : > { %v13879_v16 = vpop.eup %10180  ;;  %v7400_v1 = vmul.f32 %v13870_v13, %v13853_v26  ;;  %v13883_v2 = vadd.f32 1e-05, %v7242_v50  ;;  %v7394_v15 = vmul.f32 %v13851_v53, %v7393_v30  ;;  %vm7406_vm1 = vweird.f32 %v13870_v13 }
 0xd67   : > { %10186 = vrsqrt.f32 %v13872_v37  ;;  %v7330_v10 = vmul.f32 %v13879_v16, %v13855_v25  ;;  %v10183_v35 = vpop.eup %10182  ;;  %vm13933_vm3 = vmor %vm7405_vm2, %vm7406_vm1  ;;  %vm7336_vm15 = vweird.f32 %v13879_v16  ;;  %vm7345_vm12 = vweird.f32 %v13872_v37 }
 0xd68   : > { %v7401_v4 = vmul.f32 %v13870_v13, %v7400_v1  ;;  %10188 = vrsqrt.f32 %v13883_v2  ;;  %v10185_v61 = vpop.eup %10184  ;;  %v7398_v56 = vsel %vm13897_vm14, %v13851_v53, %v7394_v15  ;;  %v13925_v53 = vadd.f32 1.0, %v10183_v35  ;;  %vm14003_vm0 = vmor %vm7335_vm4, %vm7336_vm15 }
 0xd69   : > { %10190 = vrsqrt.f32 %v13874_v3  ;;  %v7331_v55 = vmul.f32 %v13879_v16, %v7330_v10  ;;  %v13940_v6 = vmul.f32 %v7398_v56, %v13750_v51  ;;  %v13942_v26 = vadd.f32 1.0, %v10185_v61 }
 0xd6a   : > { %v7402_v47 = vmul.f32 0.5, %v7401_v4  ;;  %v7196_v62 = vpop.xlane.xlu0 %7195  ;;  %v7184_v58 = vpop.xlane.xlu1 %7183  ;;  %10192 = vtanh.f32 %v7447_v8  ;;  %vm7415_vm5 = vweird.f32 %v13883_v2  ;;  %vm7305_vm13 = vweird.f32 %v13874_v3 }
 0xd6b   : > { %v7232_v29 = vmul.f32 %v7196_v62, %v14268_v46  ;;  %v7208_v39 = vpop.xlane.xlu2 %7207  ;;  %v7228_v59 = vmul.f32 %v7184_v58, %v14268_v46  ;;  %v7332_v34 = vmul.f32 0.5, %v7331_v55 }
 0xd6c   : > { %v7403_v18 = vsub.f32 1.5, %v7402_v47  ;;  %v7236_v43 = vmul.f32 %v7208_v39, %v14268_v46  ;;  %v7448_v47 = vmul.f32 0.5, %v13940_v6 }
 0xd6d   : > { %v13903_v41 = vpop.eup %10186  ;;  %v13906_v20 = vadd.f32 1e-05, %v7232_v29  ;;  %v13918_v14 = vadd.f32 1e-05, %v7228_v59  ;;  %v7333_v10 = vsub.f32 1.5, %v7332_v34 }
 0xd6e   : > { %v13911_v23 = vpop.eup %10188  ;;  %v7404_v33 = vmul.f32 %v13870_v13, %v7403_v18  ;;  %v7340_v17 = vmul.f32 %v13903_v41, %v13872_v37  ;;  %v13916_v24 = vadd.f32 1e-05, %v7236_v43  ;;  %vm7346_vm7 = vweird.f32 %v13903_v41 }
 0xd6f   : > { %v13920_v44 = vpop.eup %10190  ;;  %v7410_v12 = vmul.f32 %v13911_v23, %v13883_v2  ;;  %10194 = vrsqrt.f32 %v13906_v20  ;;  %vm7416_vm6 = vweird.f32 %v13911_v23  ;;  %v7334_v55 = vmul.f32 %v13879_v16, %v7333_v10  ;;  %vm14016_vm14 = vmor %vm7345_vm12, %vm7346_vm7 }
 0xd70   : > { %v7341_v42 = vmul.f32 %v13903_v41, %v7340_v17  ;;  %v7300_v57 = vmul.f32 %v13920_v44, %v13874_v3  ;;  %10196 = vrsqrt.f32 %v13916_v24  ;;  %v7408_v52 = vsel %vm13933_vm3, %v13870_v13, %v7404_v33  ;;  %v10193_v50 = vpop.eup %10192  ;;  %vm7417_vm8 = vmor %vm7415_vm5, %vm7416_vm6 }
 0xd71   : > { %v7411_v54 = vmul.f32 %v13911_v23, %v7410_v12  ;;  %10198 = vrsqrt.f32 %v13918_v14  ;;  %v13953_v4 = vmul.f32 %v7408_v52, %v13761_v27  ;;  %v13966_v29 = vadd.f32 1.0, %v10193_v50 }
 0xd72   : > { %v7342_v11 = vmul.f32 0.5, %v7341_v42  ;;  %v7301_v63 = vmul.f32 %v13920_v44, %v7300_v57  ;;  %v7187_v0 = vpop.xlane.xlu0 %7186  ;;  %vm7315_vm9 = vweird.f32 %v13906_v20  ;;  %vm7306_vm10 = vweird.f32 %v13920_v44 }
 0xd73   : > { %v7412_v30 = vmul.f32 0.5, %v7411_v54  ;;  %v7229_v51 = vmul.f32 %v7187_v0, %v14268_v46  ;;  %v7199_v1 = vpop.xlane.xlu2 %7198  ;;  %v7449_v19 = vmul.f32 0.5, %v13953_v4  ;;  %vm7355_vm11 = vweird.f32 %v13916_v24 }
 0xd74   : > { %v7233_v15 = vmul.f32 %v7199_v1, %v14268_v46  ;;  %v7343_v62 = vsub.f32 1.5, %v7342_v11  ;;  %v7302_v58 = vmul.f32 0.5, %v7301_v63  ;;  %v7338_v50 = vsel %vm14003_vm0, %v13879_v16, %v7334_v55 }
 0xd75   : > { %v13958_v13 = vpop.eup %10194  ;;  %v7413_v8 = vsub.f32 1.5, %v7412_v30  ;;  %v13961_v35 = vadd.f32 1e-05, %v7229_v51  ;;  %vm7275_vm6 = vweird.f32 %v13918_v14 }
 0xd76   : > { %v7310_v27 = vmul.f32 %v13958_v13, %v13906_v20  ;;  %v13968_v39 = vpop.eup %10196  ;;  %v13972_v61 = vadd.f32 1e-05, %v7233_v15  ;;  %v7344_v12 = vmul.f32 %v13903_v41, %v7343_v62  ;;  %v7303_v57 = vsub.f32 1.5, %v7302_v58 }
 0xd77   : > { %v7414_v59 = vmul.f32 %v13911_v23, %v7413_v8  ;;  %10200 = vrsqrt.f32 %v13961_v35  ;;  %v13975_v18 = vpop.eup %10198  ;;  %v7350_v56 = vmul.f32 %v13968_v39, %v13916_v24  ;;  %vm7316_vm1 = vweird.f32 %v13958_v13 }
 0xd78   : > { %v7311_v43 = vmul.f32 %v13958_v13, %v7310_v27  ;;  %v7270_v17 = vmul.f32 %v13975_v18, %v13918_v14  ;;  %10202 = vrsqrt.f32 %v13972_v61  ;;  %vm7356_vm2 = vweird.f32 %v13968_v39  ;;  %vm14058_vm5 = vmor %vm7315_vm9, %vm7316_vm1 }
 0xd79   : > { %v7418_v33 = vsel %vm7417_vm8, %v13911_v23, %v7414_v59  ;;  %v7351_v34 = vmul.f32 %v13968_v39, %v7350_v56  ;;  %10204 = vtanh.f32 %v7449_v19  ;;  %v7348_v37 = vsel %vm14016_vm14, %v13903_v41, %v7344_v12  ;;  %vm7357_vm15 = vmor %vm7355_vm11, %vm7356_vm2 }
 0xd7a   : > { %v7312_v2 = vmul.f32 0.5, %v7311_v43  ;;  %v13995_v42 = vmul.f32 %v7418_v33, %v13779_v48  ;;  %v7271_v23 = vmul.f32 %v13975_v18, %v7270_v17  ;;  %10206 = vtanh.f32 %v7448_v47  ;;  %vm14078_vm8 = vmor %vm7305_vm13, %vm7306_vm10 }
 0xd7b   : > { %v7190_v7 = vpop.xlane.xlu2 %7189  ;;  %v7352_v48 = vmul.f32 0.5, %v7351_v34  ;;  %v7304_v15 = vmul.f32 %v13920_v44, %v7303_v57  ;;  %vm7285_vm3 = vweird.f32 %v13961_v35  ;;  %vm7276_vm4 = vweird.f32 %v13975_v18 }
 0xd7c   : > { %v7313_v11 = vsub.f32 1.5, %v7312_v2  ;;  %v7230_v63 = vmul.f32 %v7190_v7, %v14268_v46  ;;  %v7450_v0 = vmul.f32 0.5, %v13995_v42  ;;  %v7272_v51 = vmul.f32 0.5, %v7271_v23  ;;  %vm14124_vm0 = vmor %vm7275_vm6, %vm7276_vm4 }
 0xd7d   : > { %v14010_v52 = vpop.eup %10200  ;;  %v7353_v30 = vsub.f32 1.5, %v7352_v48  ;;  %v14049_v27 = vmul.f32 %v7348_v37, %v13776_v9  ;;  %v14052_v59 = vmul.f32 %v7338_v50, %v13758_v21  ;;  %v7308_v3 = vsel %vm14078_vm8, %v13920_v44, %v7304_v15 }
 0xd7e   : > { %v7280_v1 = vmul.f32 %v14010_v52, %v13961_v35  ;;  %v14030_v10 = vpop.eup %10202  ;;  %v7314_v8 = vmul.f32 %v13958_v13, %v7313_v11  ;;  %v14035_v47 = vadd.f32 1e-05, %v7230_v63  ;;  %10208 = vtanh.f32 %v7450_v0 }
 0xd7f   : > { %v7354_v16 = vmul.f32 %v13968_v39, %v7353_v30  ;;  %v7320_v41 = vmul.f32 %v14030_v10, %v13972_v61  ;;  %v10205_v58 = vpop.eup %10204  ;;  %vm7286_vm12 = vweird.f32 %v14010_v52  ;;  %v7273_v24 = vsub.f32 1.5, %v7272_v51 }
 0xd80   : > { %v7281_v62 = vmul.f32 %v14010_v52, %v7280_v1  ;;  %10210 = vrsqrt.f32 %v14035_v47  ;;  %v10207_v56 = vpop.eup %10206  ;;  %vm7326_vm7 = vweird.f32 %v14030_v10  ;;  %v7443_v20 = vmul.f32 0.5, %v14049_v27  ;;  %vm14101_vm10 = vmor %vm7285_vm3, %vm7286_vm12 }
 0xd81   : > { %v7321_v43 = vmul.f32 %v14030_v10, %v7320_v41  ;;  %v7358_v9 = vsel %vm7357_vm15, %v13968_v39, %v7354_v16  ;;  %v7318_v17 = vsel %vm14058_vm5, %v13958_v13, %v7314_v8  ;;  %v7481_v57 = vadd.f32 1.0, %v10205_v58 }
 0xd82   : > { %v7282_v55 = vmul.f32 0.5, %v7281_v62  ;;  %v14067_v33 = vmul.f32 %v7358_v9, %v13800_v28  ;;  %10212 = vtanh.f32 %v7443_v20  ;;  %v7442_v7 = vmul.f32 0.5, %v14052_v59 }
 0xd83   : > { %v7181_v21 = vpop.xlane.xlu2 %7180  ;;  %v7322_v2 = vmul.f32 0.5, %v7321_v43  ;;  %v14085_v13 = vmul.f32 %v7318_v17, %v13797_v40  ;;  %vm7325_vm9 = vweird.f32 %v13972_v61  ;;  %v7480_v0 = vadd.f32 1.0, %v10207_v56 }
 0xd84   : > { %v7283_v12 = vsub.f32 1.5, %v7282_v55  ;;  %v7227_v34 = vmul.f32 %v7181_v21, %v14268_v46  ;;  %v10209_v23 = vpop.eup %10208  ;;  %v7444_v28 = vmul.f32 0.5, %v14067_v33  ;;  %v7274_v25 = vmul.f32 %v13975_v18, %v7273_v24  ;;  %vm7327_vm11 = vmor %vm7325_vm9, %vm7326_vm7 }
 0xd85   : > { %v7323_v54 = vsub.f32 1.5, %v7322_v2  ;;  %v7482_v63 = vadd.f32 1.0, %v10209_v23  ;;  %v7497_v30 = vmul.f32 0.5, %v7481_v57  ;;  %v7440_v51 = vmul.f32 0.5, %v14085_v13 }
 0xd86   : > { %v7284_v46 = vmul.f32 %v14010_v52, %v7283_v12  ;;  %v14088_v11 = vadd.f32 1e-05, %v7227_v34  ;;  %v14093_v48 = vpop.eup %10210  ;;  %10214 = vtanh.f32 %v7444_v28  ;;  %v14113_v35 = vmul.f32 %v7308_v3, %v13773_v5 }
 0xd87   : > { %v7324_v50 = vmul.f32 %v14030_v10, %v7323_v54  ;;  %v7290_v44 = vmul.f32 %v14093_v48, %v14035_v47  ;;  %v7498_v61 = vmul.f32 0.5, %v7482_v63  ;;  %v7496_v62 = vmul.f32 0.5, %v7480_v0 }
 0xd88   : > { %10216 = vrsqrt.f32 %v14088_v11  ;;  %v7288_v15 = vsel %vm14101_vm10, %v14010_v52, %v7284_v46  ;;  %v10213_v8 = vpop.eup %10212  ;;  %v7493_v41 = vmul.f32 0.5, %v13925_v53  ;;  %v7439_v52 = vmul.f32 0.5, %v14113_v35 }
 0xd89   : > { %v7291_v1 = vmul.f32 %v14093_v48, %v7290_v44  ;;  %10218 = vtanh.f32 %v7442_v7  ;;  %v7328_v37 = vsel %vm7327_vm11, %v14030_v10, %v7324_v50  ;;  %v7514_v5 = vmul.f32 %v7498_v61, %v13995_v42 }
 0xd8a   : > { %v14131_v10 = vmul.f32 %v7328_v37, %v13817_v38  ;;  %v14135_v19 = vmul.f32 %v7288_v15, %v13814_v32  ;;  %v7278_v14 = vsel %vm14124_vm0, %v13975_v18, %v7274_v25  ;;  %v7513_v42 = vmul.f32 %v7497_v30, %v13953_v4 }
 0xd8b   : > { %v7292_v58 = vmul.f32 0.5, %v7291_v1  ;;  %7523 = vmatpush.msrb.mxu0 %v7514_v5  ;;  %v7495_v55 = vmul.f32 0.5, %v13966_v29  ;;  %10220 = vtanh.f32 %v7440_v51  ;;  %vm7296_vm13 = vweird.f32 %v14093_v48 }
 0xd8c   : > { %v10215_v24 = vpop.eup %10214  ;;  %v7441_v53 = vmul.f32 0.5, %v14131_v10  ;;  %v7494_v32 = vmul.f32 0.5, %v13942_v26  ;;  %v14146_v9 = vmul.f32 %v7278_v14, %v13794_v60  ;;  %v7512_v56 = vmul.f32 %v7496_v62, %v13940_v6 }
 0xd8d   : > { %v7293_v43 = vsub.f32 1.5, %v7292_v58  ;;  %7524 = vmatpush.msrb.mxu0 %v7513_v42  ;;  %v7476_v4 = vadd.f32 1.0, %v10215_v24  ;;  %vm7295_vm14 = vweird.f32 %v14035_v47  ;;  %v7437_v20 = vmul.f32 0.5, %v14135_v19 }
 0xd8e   : > { %v10217_v38 = vpop.eup %10216  ;;  %10222 = vtanh.f32 %v7441_v53  ;;  %vm7297_vm1 = vmor %vm7295_vm14, %vm7296_vm13  ;;  %v7511_v60 = vmul.f32 %v7495_v55, %v13877_v22  ;;  %v7475_v17 = vadd.f32 1.0, %v10213_v8  ;;  %v7510_v12 = vmul.f32 %v7494_v32, %v13860_v45  ;;  %v7520_v55 = vpop.permute.xlu0 %7519 }
 0xd8f   : > { %v7260_v18 = vmul.f32 %v10217_v38, %v14088_v11  ;;  %v10219_v29 = vpop.eup %10218  ;;  %v7294_v21 = vmul.f32 %v14093_v48, %v7293_v43  ;;  %10224 = vtanh.f32 %v7439_v52  ;;  %7525 = vmatpush.msrb.mxu0 %v7512_v56  ;;  %v7436_v2 = vmul.f32 0.5, %v14146_v9 }
 0xd90   : > { %v7492_v23 = vmul.f32 0.5, %v7476_v4  ;;  %v7474_v47 = vadd.f32 1.0, %v10219_v29  ;;  %v7509_v28 = vmul.f32 %v7493_v41, %v13849_v36  ;;  %10226 = vtanh.f32 %v7437_v20 }
 0xd91   : > { %v7261_v26 = vmul.f32 %v10217_v38, %v7260_v18  ;;  %v7298_v6 = vsel %vm7297_vm1, %v14093_v48, %v7294_v21  ;;  %v10221_v34 = vpop.eup %10220  ;;  %7526 = vmatpush.msrb.mxu0 %v7511_v60  ;;  %vm7266_vm2 = vweird.f32 %v10217_v38  ;;  %v7491_v22 = vmul.f32 0.5, %v7475_v17 }
 0xd92   : > { %v7422_v39 = vmul.f32 %v7298_v6, %v13827_v31  ;;  %vm7265_vm3 = vweird.f32 %v14088_v11  ;;  %v7472_v48 = vadd.f32 1.0, %v10221_v34  ;;  %10228 = vtanh.f32 %v7436_v2 }
 0xd93   : > { %v7262_v57 = vmul.f32 0.5, %v7261_v26  ;;  %7527 = vmatpush.msrb.mxu0 %v7510_v12  ;;  %v7508_v0 = vmul.f32 %v7492_v23, %v14067_v33  ;;  %v7490_v31 = vmul.f32 0.5, %v7474_v47  ;;  %vm7267_vm4 = vmor %vm7265_vm3, %vm7266_vm2  ;;  %v7507_v36 = vmul.f32 %v7491_v22, %v14049_v27 }
 0xd94   : > { %v10223_v7 = vpop.eup %10222  ;;  %v7438_v45 = vmul.f32 0.5, %v7422_v39  ;;  %v7488_v30 = vmul.f32 0.5, %v7472_v48  ;;  %v7522_v53 = vperm.slane %v7520_v55, 0  ;;  %vm7547_vm15 = vcmask 24576  }
 0xd95   : > { %v7263_v46 = vsub.f32 1.5, %v7262_v57  ;;  %v10225_v54 = vpop.eup %10224  ;;  %v7473_v3 = vadd.f32 1.0, %v10223_v7  ;;  %7528 = vmatpush.msrb.mxu0 %v7509_v28  ;;  %v7506_v11 = vmul.f32 %v7490_v31, %v14052_v59 }
 0xd96   : > { %10230 = vtanh.f32 %v7438_v45  ;;  %v7471_v40 = vadd.f32 1.0, %v10225_v54  ;;  %v10227_v44 = vpop.eup %10226  ;;  %v7504_v27 = vmul.f32 %v7488_v30, %v14085_v13 }
 0xd97   : > { %v7264_v63 = vmul.f32 %v10217_v38, %v7263_v46  ;;  %7529 = vmatpush.msrb.mxu0 %v7508_v0  ;;  %v7489_v25 = vmul.f32 0.5, %v7473_v3  ;;  %v7469_v8 = vadd.f32 1.0, %v10227_v44 }
 0xd98   : > { %v10229_v51 = vpop.eup %10228  ;;  %v7487_v15 = vmul.f32 0.5, %v7471_v40 }
 0xd99   : > { %v7268_v50 = vsel %vm7267_vm4, %v10217_v38, %v7264_v63  ;;  %7530 = vmatpush.msrb.mxu0 %v7507_v36  ;;  %v7505_v33 = vmul.f32 %v7489_v25, %v14131_v10  ;;  %v7468_v5 = vadd.f32 1.0, %v10229_v51  ;;  %v7485_v59 = vmul.f32 0.5, %v7469_v8 }
 0xd9a   : > { %v7419_v61 = vmul.f32 %v7268_v50, %v13834_v49  ;;  %v7503_v49 = vmul.f32 %v7487_v15, %v14113_v35  ;;  %v7515_v35 = vld [vmem:[%s14188_s9] sm:$0x1] }
 0xd9b   : > { %7531 = vmatpush.msrb.mxu0 %v7506_v11  ;;  %v7484_v58 = vmul.f32 0.5, %v7468_v5  ;;  %v7501_v10 = vmul.f32 %v7485_v59, %v14135_v19 }
 0xd9c   : > { %v7435_v1 = vmul.f32 0.5, %v7419_v61  ;;  %v10231_v37 = vpop.eup %10230 }
 0xd9d   : > { %v7470_v16 = vadd.f32 1.0, %v10231_v37  ;;  %7532 = vmatpush.msrb.mxu0 %v7505_v33  ;;  %v7500_v24 = vmul.f32 %v7484_v58, %v14146_v9 }
 0xd9e   : > { %10232 = vtanh.f32 %v7435_v1 }
 0xd9f   : > { %v7486_v62 = vmul.f32 0.5, %v7470_v16  ;;  %7533 = vmatpush.msrb.mxu0 %v7504_v27 }
 0xda1   : > { %v7502_v41 = vmul.f32 %v7486_v62, %v7422_v39  ;;  %7534 = vmatpush.msrb.mxu0 %v7503_v49 }
 0xda3   : > { %7535 = vmatpush.msrb.mxu0 %v7502_v41 }
 0xda4   : > { %v10233_v52 = vpop.eup %10232 }
 0xda5   : > { %v7467_v14 = vadd.f32 1.0, %v10233_v52  ;;  %7536 = vmatpush.msrb.mxu0 %v7501_v10 }
 0xda7   : > { %v7483_v42 = vmul.f32 0.5, %v7467_v14  ;;  %7537 = vmatpush.msrb.mxu0 %v7500_v24 }
 0xda9   : > { %v7499_v13 = vmul.f32 %v7483_v42, %v7419_v61 }
 0xdab   : > { %7538 = vmatpush.msrb.mxu0 %v7499_v13 }
 0xdac   : > { %7539 = vmatmul.f32.vlgmr.msrb.gmra.mxu0 %v7515_v35 }
 0xe29   : > { %v7540_v38 = vpop.f32.mrf.mxu0 }
 0xe2a   : > { %v7541_v43 = vadd.f32 %v7540_v38, %v7522_v53 }
 0xe2c   : > { %v7543_v32 = vmul.f32 0.5, %v7541_v43 }
 0xe2e   : > { %10234 = vtanh.f32 %v7543_v32 }
 0xe34   : > { %v10235_v19 = vpop.eup %10234 }
 0xe35   : > { %v7545_v18 = vadd.f32 1.0, %v10235_v19 }
 0xe37   : > { %v7546_v9 = vmul.f32 0.5, %v7545_v18 }
 0xe39   : > { %7548 = vst.msk [vmem:[%s381_s16] sm:$0x1] %vm7547_vm15, %v7546_v9 }
 0xe3a PF: > { %s23_s19 = sadd.s32 1, %s10242_s19  }
 0xe3b   : > { %p20_p4 = scmp.ge.s32.totalorder %s23_s19, 4  }
 0xe3d   :  { %22 = sbr.rel (!%p20_p4) target bundleno = 3 (0x3), region = 127 }

</bundles_post_ra>
